<compile_context>
chip_gen: v6e
topology: v6e:2x2x1
jax: 0.10.0
libtpu: 0.0.40
codegen_flags: <defaults>
</compile_context>

<pallas_src>
import functools

import jax
import jax.numpy as jnp
from jax.experimental import pallas as pl
from jax.experimental.pallas import tpu as pltpu

# ---------------- synthetic config (small, deterministic) ----------------
N_VIEWS = 2
IN_CHANNELS = 32            # cfg.MODEL.SMPL_HEAD.IN_CHANNELS
NUM_BODY_JOINTS = 23        # cfg.SMPL.NUM_BODY_JOINTS
JOINT_REP_DIM = 6           # '6d' joint representation
NPOSE = JOINT_REP_DIM * NUM_BODY_JOINTS   # 138
HIDDEN = 1024               # hard-coded in the module
BATCH = 2
H = W = 8                   # resnet backbone -> AvgPool2d(8, stride=1) -> 1x1
N_ITER = 3

FEAT_DIM = IN_CHANNELS * N_VIEWS          # 64
GLOB_DIM = 6 * N_VIEWS                    # 12
CAM_DIM = 3 * N_VIEWS                     # 6
FC1_IN = FEAT_DIM + NPOSE + 10 + GLOB_DIM + CAM_DIM   # 230

# packed IEF-state layout: [pose | betas | glob | cam | pooled-feat | zero] -> 256
POSE_OFF = 0
BETAS_OFF = POSE_OFF + NPOSE              # 138
GLOB_OFF = BETAS_OFF + 10                 # 148
CAM_OFF = GLOB_OFF + GLOB_DIM             # 160
STATE_USED = CAM_OFF + CAM_DIM            # 166
FEAT_OFF = STATE_USED                     # 166 (pooled feature packed here)
STATE_DIM = 256                           # padded to 2 x 128 lanes
assert FEAT_OFF + FEAT_DIM <= STATE_DIM

_VMEM = pl.BlockSpec(memory_space=pltpu.MemorySpace.VMEM)
_ANY = pl.BlockSpec(memory_space=pl.ANY)


# ---------------- Pallas kernel: fused avgpool + 3-iteration IEF loop ----------------
def _ief_kernel(feat_ref, state0_ref, bias_ref, w1s_ref, w2_hbm, wdec_ref,
                state_out, w2_vmem, w2_sem):
    f32 = jnp.float32
    bf16 = jnp.bfloat16

    # Overlap the dominant 2 MiB w2 HBM->VMEM transfer with the pooled-feature
    # reduction and the first fc1 matmul.
    w2_cp = pltpu.make_async_copy(w2_hbm, w2_vmem, w2_sem)
    w2_cp.start()

    # fused AvgPool2d(8): features arrive as (b, H*W, n*C); reduce the sublane
    # (spatial) axis so the pooled channels stay lane-resident.
    feat = jnp.mean(feat_ref[...], axis=1)               # (b, FEAT_DIM) f32
    b = feat.shape[0]

    b1 = bias_ref[0:1, :]                                 # (1, 1024) f32
    b2 = bias_ref[1:2, :]                                 # (1, 1024) f32
    bdec = bias_ref[2:3, 0:STATE_DIM]                     # (1, 256)  f32

    # Pack the pooled feature into lanes [FEAT_OFF, FEAT_OFF+FEAT_DIM) of the
    # 256-lane IEF state.  The matching rows of w1s hold the fc1 feature
    # weights; the wdec/bdec columns for these lanes are zero, so the feature
    # lanes persist unchanged across the IEF iterations.
    zeros_lo = jnp.zeros((b, FEAT_OFF), f32)
    zeros_hi = jnp.zeros((b, STATE_DIM - FEAT_OFF - FEAT_DIM), f32)
    state = state0_ref[...] + jnp.concatenate([zeros_lo, feat, zeros_hi], axis=1)

    for it in range(N_ITER):
        # fc1 on cat([features, pose, betas, glob, cam]) as ONE K=256 matmul on
        # the packed state (feature rows are folded into w1s).
        h = jnp.dot(state.astype(bf16), w1s_ref[...],
                    preferred_element_type=f32) + b1
        # TODO(synk): Dropout layers are treated as identity (eval mode).
        if it == 0:
            w2_cp.wait()   # w2 must be resident before its first use only.
        h = jnp.dot(h.astype(bf16), w2_vmem[...],
                    preferred_element_type=f32) + b2
        # fused decpose/decshape/decglobalorientation/deccam + residual update;
        # the pad columns of wdec/bdec are zero so feat lanes stay intact.
        state = state + jnp.dot(h.astype(bf16), wdec_ref[...],
                                preferred_element_type=f32) + bdec

    state_out[...] = state


def ief_loop(feat_hw, init_state, params):
    b = feat_hw.shape[0]
    ins = [feat_hw, init_state, params["bias_pack"],
           params["w1s"], params["w2"], params["wdec"]]
    return pl.pallas_call(
        _ief_kernel,
        out_shape=jax.ShapeDtypeStruct((b, STATE_DIM), jnp.float32),
        in_specs=[_VMEM, _VMEM, _VMEM, _VMEM, _ANY, _VMEM],
        out_specs=_VMEM,
        scratch_shapes=[pltpu.VMEM((HIDDEN, HIDDEN), jnp.bfloat16),
                        pltpu.SemaphoreType.DMA],
    )(*ins)


# ---------------- plain-JAX glue ----------------
def rot6d_to_rotmat(x):
    """x: (..., 6) -> (N, 3, 3); matches the standard HMR/4D-Humans rot6d."""
    x = x.reshape(-1, 6)
    a1 = x[:, 0:3]
    a2 = x[:, 3:6]

    def _normalize(v):
        n = jnp.sqrt(jnp.sum(v * v, axis=-1, keepdims=True))
        return v / jnp.maximum(n, 1e-12)

    b1 = _normalize(a1)
    b2 = _normalize(a2 - jnp.sum(b1 * a2, axis=-1, keepdims=True) * b1)
    b3 = jnp.cross(b1, b2)
    return jnp.stack([b1, b2, b3], axis=-1)   # columns are b1, b2, b3


def smpl_fcn_head_forward(features_nchw, params, mean_params):
    # features_nchw: (N_VIEWS * B, C, H, W)   (same NCHW layout as PyTorch)
    nb, c, h, w = features_nchw.shape
    b = nb // N_VIEWS
    # einops '(n b) c -> b (n c)' commutes with per-channel average pooling;
    # present the features as (b, H*W, n*C) so the in-kernel pool reduces over
    # sublanes and the pooled channels stay lane-resident in (n c) order.
    feat_hw = (features_nchw.reshape(N_VIEWS, b, c, h * w)
                            .transpose(1, 3, 0, 2)            # (b, hw, n, c)
                            .reshape(b, h * w, N_VIEWS * c))

    init_body_pose = jnp.broadcast_to(mean_params["body_pose"], (b, NPOSE))
    init_betas = jnp.broadcast_to(mean_params["betas"], (b, 10))
    # expand(b*n, -1).view(b, -1)  ==  tile the mean row n times per batch row
    init_cam = jnp.tile(mean_params["cam"], (b, N_VIEWS))            # (b, 3n)
    init_glob = jnp.tile(mean_params["global_orient"], (b, N_VIEWS)) # (b, 6n)

    init_state = jnp.concatenate(
        [init_body_pose, init_betas, init_glob, init_cam,
         jnp.zeros((b, STATE_DIM - STATE_USED), jnp.float32)], axis=1)

    state = ief_loop(feat_hw, init_state, params)       # (b, 256)
    pred_pose = state[:, POSE_OFF:BETAS_OFF]
    pred_betas = state[:, BETAS_OFF:GLOB_OFF]
    pred_glob = state[:, GLOB_OFF:CAM_OFF]
    pred_cam = state[:, CAM_OFF:STATE_USED]

    # body pose: (b, npose) -> rotmats (b, J, 3, 3)
    pred_body_pose = rot6d_to_rotmat(pred_pose).reshape(b, NUM_BODY_JOINTS, 3, 3)

    # global orientation: 'b (n c) -> (n b) c', then rot6d -> (n*b, 1, 3, 3)
    glob_nb = (pred_glob.reshape(b, N_VIEWS, 6)
                        .transpose(1, 0, 2)
                        .reshape(b * N_VIEWS, 6))
    pred_global_orientation = rot6d_to_rotmat(glob_nb).reshape(b * N_VIEWS, 1, 3, 3)

    # cam: 'b (n c) -> (n b) c'
    pred_cam_nb = (pred_cam.reshape(b, N_VIEWS, 3)
                           .transpose(1, 0, 2)
                           .reshape(b * N_VIEWS, 3))

    return pred_body_pose, pred_betas, pred_global_orientation, pred_cam_nb


# ---------------- deterministic parameter / mean-param construction ----------------
def _linear(kw, kb, din, dout, scale=0.02):
    w = scale * jax.random.normal(kw, (din, dout), jnp.float32)   # (in, out) == pt W.T
    bias = scale * jax.random.normal(kb, (1, dout), jnp.float32)
    return w, bias


def init_params(key):
    ks = jax.random.split(key, 12)
    w1, b1 = _linear(ks[0], ks[1], FC1_IN, HIDDEN)
    w2, b2 = _linear(ks[2], ks[3], HIDDEN, HIDDEN)
    wp, bp = _linear(ks[4], ks[5], HIDDEN, NPOSE, scale=0.01)
    ws, bs = _linear(ks[6], ks[7], HIDDEN, 10, scale=0.01)
    wg, bg = _linear(ks[8], ks[9], HIDDEN, GLOB_DIM, scale=0.01)
    wc, bc = _linear(ks[10], ks[11], HIDDEN, CAM_DIM, scale=0.01)

    # fc1 weight reordered to the packed-state layout
    # [pose|betas|glob|cam | feat | zero]: the PyTorch concat order is
    # [features, pose, betas, glob, cam], i.e. w1 rows [0:64] are features and
    # rows [64:230] are the IEF state.
    w1s = jnp.concatenate(
        [w1[FEAT_DIM:],                               # state rows -> lanes 0..165
         w1[:FEAT_DIM],                               # feat  rows -> lanes 166..229
         jnp.zeros((STATE_DIM - STATE_USED - FEAT_DIM, HIDDEN), jnp.float32)],
        axis=0)                                       # (256, 1024)

    # fused decoder: columns [pose | betas | glob | cam | zero-pad] -> 256;
    # zero pad columns keep the feat lanes of the state untouched.
    wdec = jnp.concatenate(
        [wp, ws, wg, wc, jnp.zeros((HIDDEN, STATE_DIM - STATE_USED), jnp.float32)],
        axis=1)                                       # (1024, 256)
    bdec = jnp.concatenate(
        [bp, bs, bg, bc, jnp.zeros((1, STATE_DIM - STATE_USED), jnp.float32)],
        axis=1)                                       # (1, 256)

    # all f32 biases packed into one (3, 1024) array -> a single prologue DMA.
    bias_pack = jnp.concatenate(
        [b1, b2,
         jnp.concatenate([bdec, jnp.zeros((1, HIDDEN - STATE_DIM), jnp.float32)],
                         axis=1)],
        axis=0)                                       # (3, 1024) f32

    # bf16 weights (f32 accumulation inside the kernel); biases stay f32.
    # TODO(synk): int8 (v5e/v6e) / fp8 (v7x) quantization of w2 is a further ~2x
    # on the dominant weight stream but is chip-dependent; omitted here.
    bf16 = jnp.bfloat16
    return dict(w1s=w1s.astype(bf16), w2=w2.astype(bf16), wdec=wdec.astype(bf16),
                bias_pack=bias_pack)


def init_mean_params(key):
    # TODO(synk): the real module loads cfg.SMPL.MEAN_PARAMS from an .npz file;
    # here we build deterministic synthetic mean parameters of the same shapes.
    k1, k2, k3 = jax.random.split(key, 3)
    # per-joint 6d ~ identity-ish rotation plus small noise; 24 joints * 6 = 144
    ident6d = jnp.tile(jnp.array([[1.0, 0.0, 0.0, 0.0, 1.0, 0.0]], jnp.float32),
                       (1, NUM_BODY_JOINTS + 1))
    init_pose = ident6d + 0.05 * jax.random.normal(k1, (1, 6 * (NUM_BODY_JOINTS + 1)),
                                                   jnp.float32)
    init_betas = 0.1 * jax.random.normal(k2, (1, 10), jnp.float32)
    init_cam = jnp.array([[0.9, 0.0, 0.0]], jnp.float32) \
        + 0.01 * jax.random.normal(k3, (1, 3), jnp.float32)
    return dict(global_orient=init_pose[:, :6],
                body_pose=init_pose[:, 6:],
                betas=init_betas,
                cam=init_cam)


if __name__ == "__main__":
    key = jax.random.PRNGKey(0)
    k_x, k_p, k_m = jax.random.split(key, 3)

    x = jax.random.normal(k_x, (N_VIEWS * BATCH, IN_CHANNELS, H, W), jnp.float32)
    params = init_params(k_p)
    mean_params = init_mean_params(k_m)

    fwd = jax.jit(functools.partial(smpl_fcn_head_forward,
                                    params=params, mean_params=mean_params))
    pred_body_pose, pred_betas, pred_global_orientation, pred_cam = fwd(x)
    jax.block_until_ready((pred_body_pose, pred_betas,
                           pred_global_orientation, pred_cam))

    assert pred_body_pose.shape == (BATCH, NUM_BODY_JOINTS, 3, 3)
    assert pred_betas.shape == (BATCH, 10)
    assert pred_global_orientation.shape == (BATCH * N_VIEWS, 1, 3, 3)
    assert pred_cam.shape == (BATCH * N_VIEWS, 3)
    assert bool(jnp.all(jnp.isfinite(pred_body_pose)))
    assert bool(jnp.all(jnp.isfinite(pred_betas)))
    assert bool(jnp.all(jnp.isfinite(pred_global_orientation)))
    assert bool(jnp.all(jnp.isfinite(pred_cam)))
    print("KERNEL_OK")
</pallas_src>

<mosaic_0001>
module attributes {stable_mosaic.version = 11 : i64} {
  func.func @_ief_kernel(%arg0: memref<2x64x64xf32, #tpu.memory_space<vmem>>, %arg1: memref<2x256xf32, #tpu.memory_space<vmem>>, %arg2: memref<3x1024xf32, #tpu.memory_space<vmem>>, %arg3: memref<256x1024xbf16, #tpu.memory_space<vmem>>, %arg4: memref<1024x1024xbf16, #tpu.memory_space<any>>, %arg5: memref<1024x256xbf16, #tpu.memory_space<vmem>>, %arg6: memref<2x256xf32, #tpu.memory_space<vmem>>, %arg7: memref<1024x1024xbf16, #tpu.memory_space<vmem>>, %arg8: memref<!tpu.dma_semaphore, #tpu.memory_space<semaphore_mem>>) attributes {dimension_semantics = [], scalar_prefetch = 0 : i64, scratch_operands = 2 : i64, tpu.core_type = #tpu.core_type<tc>} {
    tpu.enqueue_dma source(%arg4 : memref<1024x1024xbf16, #tpu.memory_space<any>>) target(%arg7 : memref<1024x1024xbf16, #tpu.memory_space<vmem>>) target_semaphore(%arg8 : memref<!tpu.dma_semaphore, #tpu.memory_space<semaphore_mem>>)
    %c0 = arith.constant 0 : index
    %c0_0 = arith.constant 0 : index
    %c0_1 = arith.constant 0 : index
    %0 = vector.load %arg0[%c0, %c0_0, %c0_1] : memref<2x64x64xf32, #tpu.memory_space<vmem>>, vector<2x64x64xf32>
    %cst = arith.constant dense<0.000000e+00> : vector<2x64xf32>
    %1 = vector.multi_reduction <add>, %0, %cst [1] : vector<2x64x64xf32> to vector<2x64xf32>
    %cst_2 = arith.constant 6.400000e+01 : f32
    %2 = vector.broadcast %cst_2 : f32 to vector<2x64xf32>
    %3 = arith.divf %1, %2 : vector<2x64xf32>
    %c0_3 = arith.constant 0 : index
    %c0_4 = arith.constant 0 : index
    %4 = vector.load %arg2[%c0_3, %c0_4] : memref<3x1024xf32, #tpu.memory_space<vmem>>, vector<1x1024xf32>
    %c1 = arith.constant 1 : index
    %c0_5 = arith.constant 0 : index
    %5 = vector.load %arg2[%c1, %c0_5] : memref<3x1024xf32, #tpu.memory_space<vmem>>, vector<1x1024xf32>
    %c2 = arith.constant 2 : index
    %c0_6 = arith.constant 0 : index
    %6 = vector.load %arg2[%c2, %c0_6] : memref<3x1024xf32, #tpu.memory_space<vmem>>, vector<1x256xf32>
    %cst_7 = arith.constant 0.000000e+00 : f32
    %7 = vector.broadcast %cst_7 : f32 to vector<2x166xf32>
    %cst_8 = arith.constant 0.000000e+00 : f32
    %8 = vector.broadcast %cst_8 : f32 to vector<2x26xf32>
    %c0_9 = arith.constant 0 : index
    %c0_10 = arith.constant 0 : index
    %9 = vector.load %arg1[%c0_9, %c0_10] : memref<2x256xf32, #tpu.memory_space<vmem>>, vector<2x256xf32>
    %10 = tpu.concatenate %7, %3, %8 in 1 : vector<2x166xf32>, vector<2x64xf32>, vector<2x26xf32> -> vector<2x256xf32>
    %11 = arith.addf %9, %10 : vector<2x256xf32>
    %12 = arith.truncf %11 : vector<2x256xf32> to vector<2x256xbf16>
    %c0_11 = arith.constant 0 : index
    %c0_12 = arith.constant 0 : index
    %13 = vector.load %arg3[%c0_11, %c0_12] : memref<256x1024xbf16, #tpu.memory_space<vmem>>, vector<256x1024xbf16>
    %cst_13 = arith.constant dense<0.000000e+00> : vector<2x1024xf32>
    %14 = tpu.matmul %12, %13, %cst_13 {dimension_numbers = #tpu.dot_dimension_numbers<[1], [0], [0], [1], [0, 0, 1, 1], [], []>} : vector<2x256xbf16>, vector<256x1024xbf16>, vector<2x1024xf32> -> vector<2x1024xf32>
    %15 = vector.broadcast %4 : vector<1x1024xf32> to vector<2x1024xf32>
    %16 = arith.addf %14, %15 : vector<2x1024xf32>
    tpu.wait_dma2 semaphore(%arg8 : memref<!tpu.dma_semaphore, #tpu.memory_space<semaphore_mem>>) src(%arg4 : memref<1024x1024xbf16, #tpu.memory_space<any>>) dst(%arg7 : memref<1024x1024xbf16, #tpu.memory_space<vmem>>)
    %17 = arith.truncf %16 : vector<2x1024xf32> to vector<2x1024xbf16>
    %c0_14 = arith.constant 0 : index
    %c0_15 = arith.constant 0 : index
    %18 = vector.load %arg7[%c0_14, %c0_15] : memref<1024x1024xbf16, #tpu.memory_space<vmem>>, vector<1024x1024xbf16>
    %cst_16 = arith.constant dense<0.000000e+00> : vector<2x1024xf32>
    %19 = tpu.matmul %17, %18, %cst_16 {dimension_numbers = #tpu.dot_dimension_numbers<[1], [0], [0], [1], [0, 0, 1, 1], [], []>} : vector<2x1024xbf16>, vector<1024x1024xbf16>, vector<2x1024xf32> -> vector<2x1024xf32>
    %20 = vector.broadcast %5 : vector<1x1024xf32> to vector<2x1024xf32>
    %21 = arith.addf %19, %20 : vector<2x1024xf32>
    %22 = arith.truncf %21 : vector<2x1024xf32> to vector<2x1024xbf16>
    %c0_17 = arith.constant 0 : index
    %c0_18 = arith.constant 0 : index
    %23 = vector.load %arg5[%c0_17, %c0_18] : memref<1024x256xbf16, #tpu.memory_space<vmem>>, vector<1024x256xbf16>
    %cst_19 = arith.constant dense<0.000000e+00> : vector<2x256xf32>
    %24 = tpu.matmul %22, %23, %cst_19 {dimension_numbers = #tpu.dot_dimension_numbers<[1], [0], [0], [1], [0, 0, 1, 1], [], []>} : vector<2x1024xbf16>, vector<1024x256xbf16>, vector<2x256xf32> -> vector<2x256xf32>
    %25 = arith.addf %11, %24 : vector<2x256xf32>
    %26 = vector.broadcast %6 : vector<1x256xf32> to vector<2x256xf32>
    %27 = arith.addf %25, %26 : vector<2x256xf32>
    %28 = arith.truncf %27 : vector<2x256xf32> to vector<2x256xbf16>
    %c0_20 = arith.constant 0 : index
    %c0_21 = arith.constant 0 : index
    %29 = vector.load %arg3[%c0_20, %c0_21] : memref<256x1024xbf16, #tpu.memory_space<vmem>>, vector<256x1024xbf16>
    %cst_22 = arith.constant dense<0.000000e+00> : vector<2x1024xf32>
    %30 = tpu.matmul %28, %29, %cst_22 {dimension_numbers = #tpu.dot_dimension_numbers<[1], [0], [0], [1], [0, 0, 1, 1], [], []>} : vector<2x256xbf16>, vector<256x1024xbf16>, vector<2x1024xf32> -> vector<2x1024xf32>
    %31 = vector.broadcast %4 : vector<1x1024xf32> to vector<2x1024xf32>
    %32 = arith.addf %30, %31 : vector<2x1024xf32>
    %33 = arith.truncf %32 : vector<2x1024xf32> to vector<2x1024xbf16>
    %c0_23 = arith.constant 0 : index
    %c0_24 = arith.constant 0 : index
    %34 = vector.load %arg7[%c0_23, %c0_24] : memref<1024x1024xbf16, #tpu.memory_space<vmem>>, vector<1024x1024xbf16>
    %cst_25 = arith.constant dense<0.000000e+00> : vector<2x1024xf32>
    %35 = tpu.matmul %33, %34, %cst_25 {dimension_numbers = #tpu.dot_dimension_numbers<[1], [0], [0], [1], [0, 0, 1, 1], [], []>} : vector<2x1024xbf16>, vector<1024x1024xbf16>, vector<2x1024xf32> -> vector<2x1024xf32>
    %36 = vector.broadcast %5 : vector<1x1024xf32> to vector<2x1024xf32>
    %37 = arith.addf %35, %36 : vector<2x1024xf32>
    %38 = arith.truncf %37 : vector<2x1024xf32> to vector<2x1024xbf16>
    %c0_26 = arith.constant 0 : index
    %c0_27 = arith.constant 0 : index
    %39 = vector.load %arg5[%c0_26, %c0_27] : memref<1024x256xbf16, #tpu.memory_space<vmem>>, vector<1024x256xbf16>
    %cst_28 = arith.constant dense<0.000000e+00> : vector<2x256xf32>
    %40 = tpu.matmul %38, %39, %cst_28 {dimension_numbers = #tpu.dot_dimension_numbers<[1], [0], [0], [1], [0, 0, 1, 1], [], []>} : vector<2x1024xbf16>, vector<1024x256xbf16>, vector<2x256xf32> -> vector<2x256xf32>
    %41 = arith.addf %27, %40 : vector<2x256xf32>
    %42 = vector.broadcast %6 : vector<1x256xf32> to vector<2x256xf32>
    %43 = arith.addf %41, %42 : vector<2x256xf32>
    %44 = arith.truncf %43 : vector<2x256xf32> to vector<2x256xbf16>
    %c0_29 = arith.constant 0 : index
    %c0_30 = arith.constant 0 : index
    %45 = vector.load %arg3[%c0_29, %c0_30] : memref<256x1024xbf16, #tpu.memory_space<vmem>>, vector<256x1024xbf16>
    %cst_31 = arith.constant dense<0.000000e+00> : vector<2x1024xf32>
    %46 = tpu.matmul %44, %45, %cst_31 {dimension_numbers = #tpu.dot_dimension_numbers<[1], [0], [0], [1], [0, 0, 1, 1], [], []>} : vector<2x256xbf16>, vector<256x1024xbf16>, vector<2x1024xf32> -> vector<2x1024xf32>
    %47 = vector.broadcast %4 : vector<1x1024xf32> to vector<2x1024xf32>
    %48 = arith.addf %46, %47 : vector<2x1024xf32>
    %49 = arith.truncf %48 : vector<2x1024xf32> to vector<2x1024xbf16>
    %c0_32 = arith.constant 0 : index
    %c0_33 = arith.constant 0 : index
    %50 = vector.load %arg7[%c0_32, %c0_33] : memref<1024x1024xbf16, #tpu.memory_space<vmem>>, vector<1024x1024xbf16>
    %cst_34 = arith.constant dense<0.000000e+00> : vector<2x1024xf32>
    %51 = tpu.matmul %49, %50, %cst_34 {dimension_numbers = #tpu.dot_dimension_numbers<[1], [0], [0], [1], [0, 0, 1, 1], [], []>} : vector<2x1024xbf16>, vector<1024x1024xbf16>, vector<2x1024xf32> -> vector<2x1024xf32>
    %52 = vector.broadcast %5 : vector<1x1024xf32> to vector<2x1024xf32>
    %53 = arith.addf %51, %52 : vector<2x1024xf32>
    %54 = arith.truncf %53 : vector<2x1024xf32> to vector<2x1024xbf16>
    %c0_35 = arith.constant 0 : index
    %c0_36 = arith.constant 0 : index
    %55 = vector.load %arg5[%c0_35, %c0_36] : memref<1024x256xbf16, #tpu.memory_space<vmem>>, vector<1024x256xbf16>
    %cst_37 = arith.constant dense<0.000000e+00> : vector<2x256xf32>
    %56 = tpu.matmul %54, %55, %cst_37 {dimension_numbers = #tpu.dot_dimension_numbers<[1], [0], [0], [1], [0, 0, 1, 1], [], []>} : vector<2x1024xbf16>, vector<1024x256xbf16>, vector<2x256xf32> -> vector<2x256xf32>
    %57 = arith.addf %43, %56 : vector<2x256xf32>
    %58 = vector.broadcast %6 : vector<1x256xf32> to vector<2x256xf32>
    %59 = arith.addf %57, %58 : vector<2x256xf32>
    %c0_38 = arith.constant 0 : index
    %c0_39 = arith.constant 0 : index
    %60 = vector.load %arg6[%c0_38, %c0_39] : memref<2x256xf32, #tpu.memory_space<vmem>>, vector<2x256xf32>
    tpu.vector_store %arg6[%c0_38, %c0_39], %59 {strides = array<i32>} : memref<2x256xf32, #tpu.memory_space<vmem>>, vector<2x256xf32>,
    return
  }
}

</mosaic_0001>

<bundles_post_ra>
// kernel: smpl_fcn_head_forward.1
= control target key start
LH: loop header
LB: loop body
LE: loop exit
PB: predicated region body
PF: predicated region fallthrough
CT: control target
= control target key end

     0   :  { %11 = vsyncpa [#allocation5], 0  ;;  %s13884_s0 = inlined_call_operand.vmem [shape: f32[2,64,64], index: 0, kind: input, shape index: {}]   ;;  %s13885_s1 = inlined_call_operand.vmem [shape: f32[2,256], index: 1, kind: input, shape index: {}]   ;;  %s13886_s2 = inlined_call_operand.hbm [shape: f32[3,1024], index: 2, kind: input, shape index: {}]   ;;  %s13887_s3 = inlined_call_operand.hbm [shape: bf16[256,1024], index: 3, kind: input, shape index: {}]   ;;  %s13888_s4 = inlined_call_operand.hbm [shape: bf16[1024,1024], index: 4, kind: input, shape index: {}]   ;;  %s13889_s5 = inlined_call_operand.hbm [shape: bf16[1024,256], index: 5, kind: input, shape index: {}]   ;;  %s13890_s6 = inlined_call_operand.vmem [shape: f32[2,256], index: 6, kind: output, shape index: {}]  }
   0x1   :  { %12 = vsyncpa [#allocation7], 0  ;;  %s10175_s21 = smov [#allocation6]  }
   0x2   :  { %s32_s22 = sshll.u32 %s10175_s21, 4  ;;  %s33_s22 = int_to_ptr.vmem [resolvable:$true] %s32_s22 }
   0x3   :  { %s10097_s23 = scalar_lea.vmem %s33_s22, 16384  ;;  %p10102_p1 = scmp.lt.s32.totalorder %s33_s22, %s33_s22 }
   0x4   :  { %p10098_p0 = scmp.ne.s32.totalorder %s33_s22, %s10097_s23  ;;  %p10103_p2 = scmp.lt.s32.totalorder %s10097_s23, %s10097_s23 }
   0x6   :  { %p10104_p3 = por %p10103_p2, %p10102_p1 }
   0x8   :  { %p10105_p4 = pnand %p10104_p3, %p10098_p0 }
   0xa   :  { %10108 = shalt.err (!%p10105_p4)
}
   0xb   :  { %s10176_s24 = smov 512   ;;  %s10177_s25 = smov 32  }
   0xc   :  { %38 = dma.hbm_to_vmem [thread:$0]  %s13887_s3, 16384, %s33_s22, [#allocation7], %s10176_s24, %s10176_s24, %s10177_s25  }
   0xd   :  { %s10178_s28 = smov [#allocation4]   ;;  %s10179_s30 = smov [#allocation8]  }
   0xe   :  { %s23_s29 = sshll.u32 %s10178_s28, 4  ;;  %s44_s7 = sshll.u32 %s10179_s30, 4  ;;  %s24_s29 = int_to_ptr.vmem [resolvable:$true] %s23_s29  ;;  %s45_s7 = int_to_ptr.vmem [resolvable:$true] %s44_s7 }
   0xf   :  { %s10117_s8 = scalar_lea.vmem %s24_s29, 512  ;;  %p10122_p6 = scmp.lt.s32.totalorder %s24_s29, %s24_s29 }
  0x10   :  { %p10118_p5 = scmp.ne.s32.totalorder %s24_s29, %s10117_s8  ;;  %p10123_p7 = scmp.lt.s32.totalorder %s10117_s8, %s10117_s8 }
  0x12   :  { %p10124_p8 = por %p10123_p7, %p10122_p6 }
  0x14   :  { %p10125_p9 = pnand %p10124_p8, %p10118_p5 }
  0x16   :  { %10128 = shalt.err (!%p10125_p9)
}
  0x17   :  { %26 = dma.hbm_to_vmem [thread:$0]  %s13886_s2, 512, %s24_s29, [#allocation5]  }
  0x18   :  { %s10137_s11 = scalar_lea.vmem %s45_s7, 16384  ;;  %p10142_p11 = scmp.lt.s32.totalorder %s45_s7, %s45_s7 }
  0x19   :  { %p10138_p10 = scmp.ne.s32.totalorder %s45_s7, %s10137_s11  ;;  %p10143_p12 = scmp.lt.s32.totalorder %s10137_s11, %s10137_s11 }
  0x1b   :  { %p10144_p13 = por %p10143_p12, %p10142_p11 }
  0x1d   :  { %p10145_p0 = pnand %p10144_p13, %p10138_p10 }
  0x1f   :  { %10148 = shalt.err (!%p10145_p0)
}
  0x20   :  { %s10180_s3 = smov 128   ;;  %s10181_s12 = smov 8  }
  0x21   :  { %50 = dma.hbm_to_vmem [thread:$0]  %s13889_s5, 16384, %s45_s7, [#allocation7], %s10180_s3, %s10180_s3, %s10181_s12  }
  0x22   :  { %10169 = dma.done.wait [#allocation5], 512  }
  0x23   :  { %10170 = vsyncadd [#allocation5], 4294966784 }
  0x24   :  { %10171 = dma.done.wait [#allocation7], 32768  }
  0x25   :  { %10172 = vsyncadd [#allocation7], 4294934528  ;;  %vm87_vm0 = vcmask 523264   ;;  %v10230_v0 = vld [vmem:[#allocation4 + $0x1] ss:$4 sm:$0xff]  ;;  %vm141_vm1 = vcmask 1041409  }
  0x26   :  { %v10232_v1 = vld [vmem:[#allocation4 + $0x2] ss:$4 sm:$0x3]  ;;  %v72_v3 = vld [vmem:[%s13884_s0 + $0x8] sm:$0xff]  ;;  %v73_v4 = vld [vmem:[%s13884_s0 + $0x10] sm:$0xff]  ;;  %vm146_vm2 = vcmask 310272  }
  0x27   :  { %v71_v2 = vld [vmem:[%s13884_s0] sm:$0xff]  ;;  %v74_v5 = vld [vmem:[%s13884_s0 + $0x18] sm:$0xff]  ;;  %v89_v7 = vsel %vm87_vm0, %v72_v3, 0.0  ;;  %v91_v8 = vsel %vm87_vm0, %v73_v4, 0.0  ;;  %v80_v11 = vld [vmem:[%s13884_s0 + $0x48] sm:$0xff]  ;;  %vm148_vm3 = vcmask 834560  }
  0x28   :  { %v88_v6 = vsel %vm87_vm0, %v71_v2, 0.0  ;;  %v75_v9 = vld [vmem:[%s13884_s0 + $0x20] sm:$0xff]  ;;  %v81_v13 = vld [vmem:[%s13884_s0 + $0x50] sm:$0xff]  ;;  %v82_v14 = vld [vmem:[%s13884_s0 + $0x58] sm:$0xff]  ;;  %v93_v15 = vsel %vm87_vm0, %v74_v5, 0.0  ;;  %v110_v17 = vsel %vm87_vm0, %v80_v11, 0.0 }
  0x29   :  { %v79_v10 = vld [vmem:[%s13884_s0 + $0x40] sm:$0xff]  ;;  %v90_v12 = vadd.f32 %v89_v7, %v88_v6  ;;  %v76_v18 = vld [vmem:[%s13884_s0 + $0x28] sm:$0xff]  ;;  %v77_v19 = vld [vmem:[%s13884_s0 + $0x30] sm:$0xff]  ;;  %v112_v23 = vsel %vm87_vm0, %v81_v13, 0.0  ;;  %v95_v25 = vsel %vm87_vm0, %v75_v9, 0.0  ;;  %v114_v26 = vsel %vm87_vm0, %v82_v14, 0.0 }
  0x2a   :  { %v109_v16 = vsel %vm87_vm0, %v79_v10, 0.0  ;;  %v83_v20 = vld [vmem:[%s13884_s0 + $0x60] sm:$0xff]  ;;  %v84_v24 = vld [vmem:[%s13884_s0 + $0x68] sm:$0xff]  ;;  %v78_v29 = vld [vmem:[%s13884_s0 + $0x38] sm:$0xff]  ;;  %v97_v38 = vsel %vm87_vm0, %v76_v18, 0.0  ;;  %v99_v52 = vsel %vm87_vm0, %v77_v19, 0.0 }
  0x2b   :  { %v92_v21 = vadd.f32 %v91_v8, %v90_v12  ;;  %v111_v22 = vadd.f32 %v110_v17, %v109_v16  ;;  %v231_v27 = vld [vmem:[#allocation6 + $0x1c0] sm:$0xff]  ;;  %v85_v30 = vld [vmem:[%s13884_s0 + $0x70] sm:$0xff]  ;;  %v232_v34 = vld [vmem:[#allocation6 + $0x1c8] sm:$0xff]  ;;  %v116_v39 = vsel %vm87_vm0, %v83_v20, 0.0  ;;  %v118_v53 = vsel %vm87_vm0, %v84_v24, 0.0 }
  0x2c   :  { %v235_v28 = vld [vmem:[#allocation6 + $0x1e0] sm:$0xff]  ;;  %v236_v35 = vld [vmem:[#allocation6 + $0x1e8] sm:$0xff]  ;;  %v86_v57 = vld [vmem:[%s13884_s0 + $0x78] sm:$0xff]  ;;  %v101_v61 = vsel %vm87_vm0, %v78_v29, 0.0  ;;  %v120_v62 = vsel %vm87_vm0, %v85_v30, 0.0  ;;  %s10182_s0 = smov 38  }
  0x2d   :  { %v94_v31 = vadd.f32 %v93_v15, %v92_v21  ;;  %v113_v32 = vadd.f32 %v112_v23, %v111_v22  ;;  %v8790_v33 = vcombine.high %v231_v27, %v235_v28  ;;  %v8789_v36 = vcombine.low %v231_v27, %v235_v28  ;;  %v223_v37 = vld [vmem:[#allocation6 + $0x180] sm:$0xff]  ;;  %v224_v43 = vld [vmem:[#allocation6 + $0x188] sm:$0xff] }
  0x2e   :  { %v8792_v40 = vcombine.high %v232_v34, %v236_v35  ;;  %v8791_v41 = vcombine.low %v232_v34, %v236_v35  ;;  %v227_v42 = vld [vmem:[#allocation6 + $0x1a0] sm:$0xff]  ;;  %v228_v44 = vld [vmem:[#allocation6 + $0x1a8] sm:$0xff]  ;;  %v122_v8 = vsel %vm87_vm0, %v86_v57, 0.0 }
  0x2f   :  { %v96_v45 = vadd.f32 %v95_v25, %v94_v31  ;;  %v115_v46 = vadd.f32 %v114_v26, %v113_v32  ;;  %984 = vmatprep.subr.bf16.mxu0 %v8790_v33  ;;  %v8782_v47 = vcombine.high %v223_v37, %v227_v42  ;;  %v8784_v48 = vcombine.high %v224_v43, %v228_v44  ;;  %v215_v49 = vld [vmem:[#allocation6 + $0x140] sm:$0xff]  ;;  %v216_v51 = vld [vmem:[#allocation6 + $0x148] sm:$0xff] }
  0x30   :  { %v219_v50 = vld [vmem:[#allocation6 + $0x160] sm:$0xff]  ;;  %1025 = vmatprep.subr.bf16.mxu1 %v8792_v40  ;;  %985 = vmatpush1.bf16.msra.mxu0 %v8789_v36  ;;  %v8781_v54 = vcombine.low %v223_v37, %v227_v42  ;;  %v8783_v55 = vcombine.low %v224_v43, %v228_v44  ;;  %v220_v56 = vld [vmem:[#allocation6 + $0x168] sm:$0xff] }
  0x31   :  { %v98_v58 = vadd.f32 %v97_v38, %v96_v45  ;;  %v117_v59 = vadd.f32 %v116_v39, %v115_v46  ;;  %1026 = vmatpush1.bf16.msra.mxu1 %v8791_v41  ;;  %986 = vmatprep.subr.bf16.mxu0 %v8782_v47  ;;  %v8774_v60 = vcombine.high %v215_v49, %v219_v50  ;;  %v207_v2 = vld [vmem:[#allocation6 + $0x100] sm:$0xff]  ;;  %v208_v6 = vld [vmem:[#allocation6 + $0x108] sm:$0xff] }
  0x32   :  { %1027 = vmatprep.subr.bf16.mxu1 %v8784_v48  ;;  %v8776_v63 = vcombine.high %v216_v51, %v220_v56  ;;  %v211_v3 = vld [vmem:[#allocation6 + $0x120] sm:$0xff]  ;;  %v212_v7 = vld [vmem:[#allocation6 + $0x128] sm:$0xff]  ;;  %v8773_v9 = vcombine.low %v215_v49, %v219_v50  ;;  %v8775_v10 = vcombine.low %v216_v51, %v220_v56 }
  0x33   :  { %v100_v4 = vadd.f32 %v99_v52, %v98_v58  ;;  %v119_v5 = vadd.f32 %v118_v53, %v117_v59  ;;  %v8766_v13 = vcombine.high %v207_v2, %v211_v3  ;;  %v8768_v14 = vcombine.high %v208_v6, %v212_v7  ;;  %v199_v15 = vld [vmem:[#allocation6 + $0xc0] sm:$0xff]  ;;  %v200_v19 = vld [vmem:[#allocation6 + $0xc8] sm:$0xff] }
  0x34   :  { %987 = vmatpush1.bf16.msra.mxu0 %v8781_v54  ;;  %v203_v16 = vld [vmem:[#allocation6 + $0xe0] sm:$0xff]  ;;  %v204_v20 = vld [vmem:[#allocation6 + $0xe8] sm:$0xff]  ;;  %v8765_v21 = vcombine.low %v207_v2, %v211_v3  ;;  %v8767_v24 = vcombine.low %v208_v6, %v212_v7  ;;  %v10298_v2 = vld [vmem:[#allocation6 + $0x1d0] sm:$0xff] }
  0x35   :  { %v102_v11 = vadd.f32 %v101_v61, %v100_v4  ;;  %v121_v12 = vadd.f32 %v120_v62, %v119_v5  ;;  %1028 = vmatpush1.bf16.msra.mxu1 %v8783_v55  ;;  %988 = vmatprep.subr.bf16.mxu0 %v8774_v60  ;;  %v8758_v25 = vcombine.high %v199_v15, %v203_v16  ;;  %v191_v27 = vld [vmem:[#allocation6 + $0x80] sm:$0xff]  ;;  %v192_v31 = vld [vmem:[#allocation6 + $0x88] sm:$0xff]  ;;  %v10300_v3 = vld [vmem:[#allocation6 + $0x1f0] sm:$0xff] }
  0x36   :  { %1029 = vmatprep.subr.bf16.mxu1 %v8776_v63  ;;  %v8760_v26 = vcombine.high %v200_v19, %v204_v20  ;;  %v195_v28 = vld [vmem:[#allocation6 + $0xa0] sm:$0xff]  ;;  %v196_v32 = vld [vmem:[#allocation6 + $0xa8] sm:$0xff]  ;;  %v8757_v33 = vcombine.low %v199_v15, %v203_v16  ;;  %v8759_v36 = vcombine.low %v200_v19, %v204_v20  ;;  %v10302_v4 = vld [vmem:[#allocation6 + $0x1d8] sm:$0xff] }
  0x37   :  { %v103_v17 = vrot.slane %v102_v11, 4  ;;  %v123_v18 = vadd.f32 %v122_v8, %v121_v12  ;;  %v8750_v37 = vcombine.high %v191_v27, %v195_v28  ;;  %v8752_v38 = vcombine.high %v192_v31, %v196_v32  ;;  %v183_v39 = vld [vmem:[#allocation6 + $0x40] sm:$0xff]  ;;  %v184_v43 = vld [vmem:[#allocation6 + $0x48] sm:$0xff]  ;;  %v10304_v8 = vld [vmem:[#allocation6 + $0x1f8] sm:$0xff] }
  0x38   :  { %989 = vmatpush1.bf16.msra.mxu0 %v8773_v9  ;;  %v187_v40 = vld [vmem:[#allocation6 + $0x60] sm:$0xff]  ;;  %v188_v44 = vld [vmem:[#allocation6 + $0x68] sm:$0xff]  ;;  %v8749_v45 = vcombine.low %v191_v27, %v195_v28  ;;  %v8751_v48 = vcombine.low %v192_v31, %v196_v32 }
  0x39   :  { %v104_v22 = vadd.f32 %v103_v17, %v102_v11  ;;  %v124_v23 = vrot.slane %v123_v18, 4  ;;  %1030 = vmatpush1.bf16.msra.mxu1 %v8775_v10  ;;  %990 = vmatprep.subr.bf16.mxu0 %v8766_v13  ;;  %v8742_v49 = vcombine.high %v183_v39, %v187_v40  ;;  %v8744_v50 = vcombine.high %v184_v43, %v188_v44  ;;  %v175_v51 = vld [vmem:[#allocation6] sm:$0xff]  ;;  %v176_v55 = vld [vmem:[#allocation6 + $0x8] sm:$0xff] }
  0x3a   :  { %1031 = vmatprep.subr.bf16.mxu1 %v8768_v14  ;;  %v179_v52 = vld [vmem:[#allocation6 + $0x20] sm:$0xff]  ;;  %v180_v56 = vld [vmem:[#allocation6 + $0x28] sm:$0xff]  ;;  %v8741_v57 = vcombine.low %v183_v39, %v187_v40  ;;  %v8743_v59 = vcombine.low %v184_v43, %v188_v44  ;;  %v8793_v10 = vcombine.low %v10298_v2, %v10300_v3  ;;  %v8795_v11 = vcombine.low %v10302_v4, %v10304_v8 }
  0x3b   :  { %v105_v29 = vrot.slane %v104_v22, 2  ;;  %v125_v30 = vadd.f32 %v124_v23, %v123_v18  ;;  %v8734_v60 = vcombine.high %v175_v51, %v179_v52  ;;  %v295_v61 = vld [vmem:[#allocation6 + $0x3c0] sm:$0xff]  ;;  %v8736_v63 = vcombine.high %v176_v55, %v180_v56  ;;  %v296_v6 = vld [vmem:[#allocation6 + $0x3c8] sm:$0xff] }
  0x3c   :  { %991 = vmatpush1.bf16.msra.mxu0 %v8765_v21  ;;  %v299_v62 = vld [vmem:[#allocation6 + $0x3e0] sm:$0xff]  ;;  %v300_v7 = vld [vmem:[#allocation6 + $0x3e8] sm:$0xff]  ;;  %v8733_v9 = vcombine.low %v175_v51, %v179_v52  ;;  %v8735_v12 = vcombine.low %v176_v55, %v180_v56 }
  0x3d   :  { %v106_v34 = vadd.f32 %v105_v29, %v104_v22  ;;  %v126_v35 = vrot.slane %v125_v30, 2  ;;  %1032 = vmatpush1.bf16.msra.mxu1 %v8767_v24  ;;  %992 = vmatprep.subr.bf16.mxu0 %v8758_v25  ;;  %v8854_v13 = vcombine.high %v295_v61, %v299_v62  ;;  %v8856_v14 = vcombine.high %v296_v6, %v300_v7  ;;  %v287_v15 = vld [vmem:[#allocation6 + $0x380] sm:$0xff]  ;;  %v288_v17 = vld [vmem:[#allocation6 + $0x388] sm:$0xff] }
  0x3e   :  { %1033 = vmatprep.subr.bf16.mxu1 %v8760_v26  ;;  %v291_v16 = vld [vmem:[#allocation6 + $0x3a0] sm:$0xff]  ;;  %v292_v18 = vld [vmem:[#allocation6 + $0x3a8] sm:$0xff]  ;;  %v8853_v19 = vcombine.low %v295_v61, %v299_v62  ;;  %v8855_v20 = vcombine.low %v296_v6, %v300_v7 }
  0x3f   :  { %v107_v41 = vrot.slane %v106_v34, 1  ;;  %v127_v42 = vadd.f32 %v126_v35, %v125_v30  ;;  %v8846_v21 = vcombine.high %v287_v15, %v291_v16  ;;  %v8848_v22 = vcombine.high %v288_v17, %v292_v18  ;;  %v279_v23 = vld [vmem:[#allocation6 + $0x340] sm:$0xff]  ;;  %v280_v25 = vld [vmem:[#allocation6 + $0x348] sm:$0xff] }
  0x40   :  { %993 = vmatpush1.bf16.msra.mxu0 %v8757_v33  ;;  %v283_v24 = vld [vmem:[#allocation6 + $0x360] sm:$0xff]  ;;  %v284_v26 = vld [vmem:[#allocation6 + $0x368] sm:$0xff]  ;;  %v8845_v27 = vcombine.low %v287_v15, %v291_v16  ;;  %v8847_v28 = vcombine.low %v288_v17, %v292_v18  ;;  %v8794_v17 = vcombine.high %v10298_v2, %v10300_v3  ;;  %v8796_v18 = vcombine.high %v10302_v4, %v10304_v8 }
  0x41   :  { %v108_v46 = vadd.f32 %v107_v41, %v106_v34  ;;  %v128_v47 = vrot.slane %v127_v42, 1  ;;  %1034 = vmatpush1.bf16.msra.mxu1 %v8759_v36  ;;  %994 = vmatprep.subr.bf16.mxu0 %v8750_v37  ;;  %v8838_v29 = vcombine.high %v279_v23, %v283_v24  ;;  %v8840_v30 = vcombine.high %v280_v25, %v284_v26  ;;  %v271_v31 = vld [vmem:[#allocation6 + $0x300] sm:$0xff]  ;;  %v272_v33 = vld [vmem:[#allocation6 + $0x308] sm:$0xff] }
  0x42   :  { %1035 = vmatprep.subr.bf16.mxu1 %v8752_v38  ;;  %v275_v32 = vld [vmem:[#allocation6 + $0x320] sm:$0xff]  ;;  %v276_v34 = vld [vmem:[#allocation6 + $0x328] sm:$0xff]  ;;  %v8837_v35 = vcombine.low %v279_v23, %v283_v24  ;;  %v8839_v36 = vcombine.low %v280_v25, %v284_v26 }
  0x43   :  { %v129_v53 = vadd.f32 %v128_v47, %v127_v42  ;;  %v131_v54 = vmul.f32 0.015625, %v108_v46  ;;  %v8830_v37 = vcombine.high %v271_v31, %v275_v32  ;;  %v8832_v38 = vcombine.high %v272_v33, %v276_v34  ;;  %v263_v39 = vld [vmem:[#allocation6 + $0x2c0] sm:$0xff]  ;;  %v264_v41 = vld [vmem:[#allocation6 + $0x2c8] sm:$0xff] }
  0x44   :  { %995 = vmatpush1.bf16.msra.mxu0 %v8749_v45  ;;  %v267_v40 = vld [vmem:[#allocation6 + $0x2e0] sm:$0xff]  ;;  %v268_v42 = vld [vmem:[#allocation6 + $0x2e8] sm:$0xff]  ;;  %v8829_v43 = vcombine.low %v271_v31, %v275_v32  ;;  %v8831_v44 = vcombine.low %v272_v33, %v276_v34 }
  0x45   :  { %v132_v58 = vmul.f32 0.015625, %v129_v53  ;;  %1036 = vmatpush1.bf16.msra.mxu1 %v8751_v48  ;;  %996 = vmatprep.subr.bf16.mxu0 %v8742_v49  ;;  %v8822_v45 = vcombine.high %v263_v39, %v267_v40  ;;  %v8824_v46 = vcombine.high %v264_v41, %v268_v42  ;;  %v255_v47 = vld [vmem:[#allocation6 + $0x280] sm:$0xff]  ;;  %v256_v49 = vld [vmem:[#allocation6 + $0x288] sm:$0xff]  ;;  %v8821_v51 = vcombine.low %v263_v39, %v267_v40 }
  0x46   :  { %1037 = vmatprep.subr.bf16.mxu1 %v8744_v50  ;;  %v259_v48 = vld [vmem:[#allocation6 + $0x2a0] sm:$0xff]  ;;  %v260_v50 = vld [vmem:[#allocation6 + $0x2a8] sm:$0xff]  ;;  %v8823_v52 = vcombine.low %v264_v41, %v268_v42  ;;  %v217_v41 = vld [vmem:[#allocation6 + $0x150] sm:$0xff] }
  0x47   :  { %v142_v5 = vsel %vm141_vm1, %v132_v58, %v131_v54  ;;  %v8814_v53 = vcombine.high %v255_v47, %v259_v48  ;;  %v8816_v54 = vcombine.high %v256_v49, %v260_v50  ;;  %v247_v55 = vld [vmem:[#allocation6 + $0x240] sm:$0xff]  ;;  %v252_v58 = vld [vmem:[#allocation6 + $0x268] sm:$0xff] }
  0x48   :  { %143 = vrot.lane.b32.xlu0 %v142_v5, %s10182_s0  ;;  %997 = vmatpush1.bf16.msra.mxu0 %v8741_v57  ;;  %v251_v56 = vld [vmem:[#allocation6 + $0x260] sm:$0xff]  ;;  %v248_v57 = vld [vmem:[#allocation6 + $0x248] sm:$0xff] }
  0x49   :  { %1038 = vmatpush1.bf16.msra.mxu1 %v8743_v59  ;;  %998 = vmatprep.subr.bf16.mxu0 %v8734_v60  ;;  %v8813_v59 = vcombine.low %v255_v47, %v259_v48  ;;  %v8815_v60 = vcombine.low %v256_v49, %v260_v50  ;;  %v8806_v61 = vcombine.high %v247_v55, %v251_v56  ;;  %v243_v5 = vld [vmem:[#allocation6 + $0x220] sm:$0xff]  ;;  %v240_v6 = vld [vmem:[#allocation6 + $0x208] sm:$0xff] }
  0x4a   :  { %1039 = vmatprep.subr.bf16.mxu1 %v8736_v63  ;;  %v8808_v62 = vcombine.high %v248_v57, %v252_v58  ;;  %v239_v63 = vld [vmem:[#allocation6 + $0x200] sm:$0xff]  ;;  %v244_v7 = vld [vmem:[#allocation6 + $0x228] sm:$0xff] }
  0x4b   :  { %v8797_v15 = vcombine.low %v239_v63, %v243_v5  ;;  %v8799_v16 = vcombine.low %v240_v6, %v244_v7 }
  0x4c   :  { %999 = vmatpush1.bf16.msra.mxu0 %v8733_v9  ;;  %v8805_v9 = vcombine.low %v247_v55, %v251_v56  ;;  %v202_v55 = vld [vmem:[#allocation6 + $0xd8] sm:$0xff] }
  0x4d   :  { %1040 = vmatpush1.bf16.msra.mxu1 %v8735_v12  ;;  %1000 = vmatprep.subr.bf16.mxu0 %v8854_v13  ;;  %v8807_v12 = vcombine.low %v248_v57, %v252_v58  ;;  %v8798_v13 = vcombine.high %v239_v63, %v243_v5  ;;  %v206_v56 = vld [vmem:[#allocation6 + $0xf8] sm:$0xff] }
  0x4e   :  { %1041 = vmatprep.subr.bf16.mxu1 %v8856_v14  ;;  %v8800_v14 = vcombine.high %v240_v6, %v244_v7  ;;  %v194_v63 = vld [vmem:[#allocation6 + $0x98] sm:$0xff]  ;;  %v8763_v7 = vcombine.low %v202_v55, %v206_v56 }
  0x4f   :  { %v198_v5 = vld [vmem:[#allocation6 + $0xb8] sm:$0xff] }
  0x50   :  { %1001 = vmatpush2.bf16.msra.mxu0 %v8853_v19  ;;  %v10183_v19 = vmov 1983009808  }
  0x51   :  { %1042 = vmatpush2.bf16.msra.mxu1 %v8855_v20  ;;  %1002 = vmatprep.subr.bf16.mxu0 %v8846_v21  ;;  %v154_v20 = vunpack.c.l.s4 %v10183_v19  ;;  %v156_v21 = vlaneseq }
  0x52   :  { %1043 = vmatprep.subr.bf16.mxu1 %v8848_v22 }
  0x53   :  { %v155_v22 = vunpack.c.0.s8 %v154_v20  ;;  %v10314_v23 = vshrl.u32 %v156_v21, 7  ;;  %v177_v21 = vld [vmem:[#allocation6 + $0x10] sm:$0xff] }
  0x54   :  { %1003 = vmatpush2.bf16.msra.mxu0 %v8845_v27 }
  0x55   :  { %1044 = vmatpush2.bf16.msra.mxu1 %v8847_v28  ;;  %1004 = vmatprep.subr.bf16.mxu0 %v8838_v29  ;;  %v10317_v26 = vsub.s32 %v155_v22, %v10314_v23  ;;  %v10184_v28 = vmov 0.0   ;;  %v181_v22 = vld [vmem:[#allocation6 + $0x30] sm:$0xff] }
  0x56   :  { %1045 = vmatprep.subr.bf16.mxu1 %v8840_v30  ;;  %v138_v30 = vld [vmem:[%s13885_s1] sm:$0xf]  ;;  %s10185_s1 = smov [#allocation2]  }
  0x57   :  { %s67_s20 = sshll.u32 %s10185_s1, 4  ;;  %s68_s20 = int_to_ptr.vmem [resolvable:$true] %s67_s20 }
  0x58   :  { %1005 = vmatpush2.bf16.msra.mxu0 %v8837_v35  ;;  %v225_v35 = vld [vmem:[#allocation6 + $0x190] sm:$0xff]  ;;  %s10157_s21 = scalar_lea.vmem %s68_s20, 65536  ;;  %p10162_p2 = scmp.lt.s32.totalorder %s68_s20, %s68_s20 }
  0x59   :  { %1046 = vmatpush2.bf16.msra.mxu1 %v8839_v36  ;;  %1006 = vmatprep.subr.bf16.mxu0 %v8830_v37  ;;  %v229_v36 = vld [vmem:[#allocation6 + $0x1b0] sm:$0xff]  ;;  %v226_v37 = vld [vmem:[#allocation6 + $0x198] sm:$0xff]  ;;  %p10158_p1 = scmp.ne.s32.totalorder %s68_s20, %s10157_s21  ;;  %p10163_p3 = scmp.lt.s32.totalorder %s10157_s21, %s10157_s21 }
  0x5a   :  { %1047 = vmatprep.subr.bf16.mxu1 %v8832_v38  ;;  %v230_v38 = vld [vmem:[#allocation6 + $0x1b8] sm:$0xff]  ;;  %v8786_v42 = vcombine.high %v225_v35, %v229_v36  ;;  %v8785_v47 = vcombine.low %v225_v35, %v229_v36  ;;  %v8737_v36 = vcombine.low %v177_v21, %v181_v22 }
  0x5b   :  { %v8787_v48 = vcombine.low %v226_v37, %v230_v38  ;;  %v302_v35 = vld [vmem:[#allocation6 + $0x3f8] sm:$0xff]  ;;  %p10164_p4 = por %p10163_p3, %p10162_p2 }
  0x5c   :  { %1007 = vmatpush2.bf16.msra.mxu0 %v8829_v43  ;;  %v8788_v43 = vcombine.high %v226_v37, %v230_v38 }
  0x5d   :  { %1048 = vmatpush2.bf16.msra.mxu1 %v8831_v44  ;;  %1008 = vmatprep.subr.bf16.mxu0 %v8822_v45  ;;  %v221_v44 = vld [vmem:[#allocation6 + $0x170] sm:$0xff]  ;;  %v218_v45 = vld [vmem:[#allocation6 + $0x158] sm:$0xff]  ;;  %p10165_p5 = pnand %p10164_p4, %p10158_p1 }
  0x5e   :  { %1049 = vmatprep.subr.bf16.mxu1 %v8824_v46  ;;  %v222_v46 = vld [vmem:[#allocation6 + $0x178] sm:$0xff]  ;;  %v8778_v49 = vcombine.high %v217_v41, %v221_v44  ;;  %v8777_v2 = vcombine.low %v217_v41, %v221_v44  ;;  %v289_v41 = vld [vmem:[#allocation6 + $0x390] sm:$0xff] }
  0x5f   :  { %v8780_v50 = vcombine.high %v218_v45, %v222_v46  ;;  %v8779_v3 = vcombine.low %v218_v45, %v222_v46  ;;  %v294_v44 = vld [vmem:[#allocation6 + $0x3b8] sm:$0xff] }
  0x60   :  { %1009 = vmatpush2.bf16.msra.mxu0 %v8821_v51  ;;  %v209_v51 = vld [vmem:[#allocation6 + $0x110] sm:$0xff] }
  0x61   :  { %1050 = vmatpush2.bf16.msra.mxu1 %v8823_v52  ;;  %1010 = vmatprep.subr.bf16.mxu0 %v8814_v53  ;;  %v213_v52 = vld [vmem:[#allocation6 + $0x130] sm:$0xff]  ;;  %v210_v53 = vld [vmem:[#allocation6 + $0x118] sm:$0xff] }
  0x62   :  { %1051 = vmatprep.subr.bf16.mxu1 %v8816_v54  ;;  %v214_v54 = vld [vmem:[#allocation6 + $0x138] sm:$0xff]  ;;  %v8770_v4 = vcombine.high %v209_v51, %v213_v52  ;;  %v8769_v57 = vcombine.low %v209_v51, %v213_v52 }
  0x63   :  { %v8772_v8 = vcombine.high %v210_v53, %v214_v54  ;;  %v8771_v58 = vcombine.low %v210_v53, %v214_v54  ;;  %v282_v51 = vld [vmem:[#allocation6 + $0x358] sm:$0xff] }
  0x64   :  { %1011 = vmatpush2.bf16.msra.mxu0 %v8813_v59  ;;  %v286_v52 = vld [vmem:[#allocation6 + $0x378] sm:$0xff] }
  0x65   :  { %1052 = vmatpush2.bf16.msra.mxu1 %v8815_v60  ;;  %1012 = vmatprep.subr.bf16.mxu0 %v8806_v61  ;;  %v8764_v60 = vcombine.high %v202_v55, %v206_v56  ;;  %v193_v61 = vld [vmem:[#allocation6 + $0x90] sm:$0xff]  ;;  %v8843_v56 = vcombine.low %v282_v51, %v286_v52 }
  0x66   :  { %1053 = vmatprep.subr.bf16.mxu1 %v8808_v62  ;;  %v197_v62 = vld [vmem:[#allocation6 + $0xb0] sm:$0xff] }
  0x68   :  { %1013 = vmatpush2.bf16.msra.mxu0 %v8805_v9  ;;  %v8754_v9 = vcombine.high %v193_v61, %v197_v62 }
  0x69   :  { %1054 = vmatpush2.bf16.msra.mxu1 %v8807_v12  ;;  %1014 = vmatprep.subr.bf16.mxu0 %v8798_v13  ;;  %v8756_v12 = vcombine.high %v194_v63, %v198_v5  ;;  %v185_v13 = vld [vmem:[#allocation6 + $0x50] sm:$0xff] }
  0x6a   :  { %1055 = vmatprep.subr.bf16.mxu1 %v8800_v14  ;;  %v189_v14 = vld [vmem:[#allocation6 + $0x70] sm:$0xff] }
  0x6b   :  { %v8746_v19 = vcombine.high %v185_v13, %v189_v14 }
  0x6c   :  { %1015 = vmatpush2.bf16.msra.mxu0 %v8797_v15  ;;  %v186_v15 = vld [vmem:[#allocation6 + $0x58] sm:$0xff] }
  0x6d   :  { %1056 = vmatpush2.bf16.msra.mxu1 %v8799_v16  ;;  %1066 = vmatprep.subr.bf16.mxu0 %v8794_v17  ;;  %v190_v16 = vld [vmem:[#allocation6 + $0x78] sm:$0xff]  ;;  %v8753_v17 = vcombine.low %v193_v61, %v197_v62 }
  0x6e   :  { %1107 = vmatprep.subr.bf16.mxu1 %v8796_v18  ;;  %v8755_v18 = vcombine.low %v194_v63, %v198_v5  ;;  %v8748_v20 = vcombine.high %v186_v15, %v190_v16  ;;  %v266_v61 = vld [vmem:[#allocation6 + $0x2d8] sm:$0xff] }
  0x6f   :  { %v270_v62 = vld [vmem:[#allocation6 + $0x2f8] sm:$0xff] }
  0xba   :  { %v144_v24 = vpop.permute.xlu0 %143 }
  0xbb   :  { %v147_v25 = vsel %vm146_vm2, 0.0, %v144_v24  ;;  %v178_v24 = vld [vmem:[#allocation6 + $0x18] sm:$0xff] }
  0xbc   :  { %v149_v27 = vsel %vm148_vm3, %v147_v25, 0.0  ;;  %v182_v25 = vld [vmem:[#allocation6 + $0x38] sm:$0xff] }
  0xbd   :  { %v152_v29 = vcombine.low %v10184_v28, %v149_v27  ;;  %v8745_v27 = vcombine.low %v185_v13, %v189_v14  ;;  %v8747_v28 = vcombine.low %v186_v15, %v190_v16  ;;  %v8739_v37 = vcombine.low %v178_v24, %v182_v25  ;;  %v258_v13 = vld [vmem:[#allocation6 + $0x298] sm:$0xff] }
  0xbe   :  { %v262_v14 = vld [vmem:[#allocation6 + $0x2b8] sm:$0xff]  ;;  %v8827_v16 = vcombine.low %v266_v61, %v270_v62 }
  0xbf   :  { %v159_v31 = vrot.slane %v152_v29, %v10317_v26  ;;  %v8738_v29 = vcombine.high %v177_v21, %v181_v22  ;;  %v250_v21 = vld [vmem:[#allocation6 + $0x258] sm:$0xff] }
  0xc0   :  { %v254_v22 = vld [vmem:[#allocation6 + $0x278] sm:$0xff] }
  0xc1   :  { %v10323_v32 = vadd.f32 %v159_v31, %v138_v30  ;;  %v8740_v30 = vcombine.high %v178_v24, %v182_v25  ;;  %v297_v31 = vld [vmem:[#allocation6 + $0x3d0] sm:$0xff]  ;;  %v8819_v25 = vcombine.low %v258_v13, %v262_v14 }
  0xc3   :  { %v169_v33 = vrot.slane %v10323_v32, %v10317_v26 }
  0xc5   :  { %v170_v34 = vcombine.high %v169_v33, %v169_v33  ;;  %v10327_v40 = vpack.c.bf16 %v169_v33, %v169_v33  ;;  %v301_v33 = vld [vmem:[#allocation6 + $0x3f0] sm:$0xff] }
  0xc6   :  { %v8858_v38 = vcombine.high %v297_v31, %v301_v33  ;;  %v8857_v45 = vcombine.low %v297_v31, %v301_v33  ;;  %v242_v31 = vld [vmem:[#allocation6 + $0x218] sm:$0xff] }
  0xc7   :  { %v174_v39 = vpack.c.bf16 %v170_v34, %v170_v34  ;;  %v298_v34 = vld [vmem:[#allocation6 + $0x3d8] sm:$0xff] }
  0xc8   :  { %v8859_v46 = vcombine.low %v298_v34, %v302_v35  ;;  %v246_v33 = vld [vmem:[#allocation6 + $0x238] sm:$0xff] }
  0xc9   :  { %1016 = vmatprep.mubr.bf16.mxu0 %v174_v39  ;;  %1057 = vmatprep.mubr.bf16.mxu1 %v174_v39 }
  0xca   :  { %1017 = vmatmul.mubr.bf16.vlgmr.msra.gmra.mxu0 %v10327_v40  ;;  %1058 = vmatmul.mubr.bf16.vlgmr.msra.gmra.mxu1 %v10327_v40 }
  0xcb   :  { %1067 = vmatpush1.bf16.msra.mxu0 %v8793_v10  ;;  %1108 = vmatpush1.bf16.msra.mxu1 %v8795_v11  ;;  %v201_v10 = vld [vmem:[#allocation6 + $0xd0] sm:$0xff] }
  0xcc   :  { %1098 = vmatprep.mubr.bf16.mxu0 %v174_v39  ;;  %1139 = vmatprep.mubr.bf16.mxu1 %v174_v39  ;;  %v205_v11 = vld [vmem:[#allocation6 + $0xf0] sm:$0xff]  ;;  %v8860_v39 = vcombine.high %v298_v34, %v302_v35  ;;  %v8811_v35 = vcombine.low %v250_v21, %v254_v22 }
  0xcd   :  { %1068 = vmatprep.subr.bf16.mxu0 %v8786_v42  ;;  %1109 = vmatprep.subr.bf16.mxu1 %v8788_v43  ;;  %v8762_v59 = vcombine.high %v201_v10, %v205_v11  ;;  %v8761_v6 = vcombine.low %v201_v10, %v205_v11  ;;  %v293_v42 = vld [vmem:[#allocation6 + $0x3b0] sm:$0xff]  ;;  %v290_v43 = vld [vmem:[#allocation6 + $0x398] sm:$0xff] }
  0xce   :  { %v8849_v53 = vcombine.low %v289_v41, %v293_v42  ;;  %v8851_v54 = vcombine.low %v290_v43, %v294_v44  ;;  %v274_v10 = vld [vmem:[#allocation6 + $0x318] sm:$0xff] }
  0xcf   :  { %1069 = vmatpush1.bf16.msra.mxu0 %v8785_v47  ;;  %1110 = vmatpush1.bf16.msra.mxu1 %v8787_v48  ;;  %v8850_v47 = vcombine.high %v289_v41, %v293_v42  ;;  %v8852_v48 = vcombine.high %v290_v43, %v294_v44  ;;  %v278_v11 = vld [vmem:[#allocation6 + $0x338] sm:$0xff] }
  0xd0   :  { %1070 = vmatprep.subr.bf16.mxu0 %v8778_v49  ;;  %1111 = vmatprep.subr.bf16.mxu1 %v8780_v50  ;;  %v281_v49 = vld [vmem:[#allocation6 + $0x350] sm:$0xff]  ;;  %v8835_v5 = vcombine.low %v274_v10, %v278_v11 }
  0xd1   :  { %v285_v50 = vld [vmem:[#allocation6 + $0x370] sm:$0xff] }
  0xd2   :  { %v8841_v55 = vcombine.low %v281_v49, %v285_v50 }
  0xd3   :  { %1071 = vmatpush1.bf16.msra.mxu0 %v8777_v2  ;;  %1112 = vmatpush1.bf16.msra.mxu1 %v8779_v3  ;;  %v8842_v2 = vcombine.high %v281_v49, %v285_v50  ;;  %v8844_v3 = vcombine.high %v282_v51, %v286_v52 }
  0xd4   :  { %1072 = vmatprep.subr.bf16.mxu0 %v8770_v4  ;;  %1113 = vmatprep.subr.bf16.mxu1 %v8772_v8  ;;  %v273_v4 = vld [vmem:[#allocation6 + $0x310] sm:$0xff] }
  0xd5   :  { %v277_v8 = vld [vmem:[#allocation6 + $0x330] sm:$0xff] }
  0xd6   :  { %v8833_v63 = vcombine.low %v273_v4, %v277_v8 }
  0xd7   :  { %1073 = vmatpush1.bf16.msra.mxu0 %v8769_v57  ;;  %1114 = vmatpush1.bf16.msra.mxu1 %v8771_v58  ;;  %v8834_v57 = vcombine.high %v273_v4, %v277_v8  ;;  %v8836_v58 = vcombine.high %v274_v10, %v278_v11 }
  0xd8   :  { %1074 = vmatprep.subr.bf16.mxu0 %v8762_v59  ;;  %1115 = vmatprep.subr.bf16.mxu1 %v8764_v60  ;;  %v265_v59 = vld [vmem:[#allocation6 + $0x2d0] sm:$0xff] }
  0xd9   :  { %v269_v60 = vld [vmem:[#allocation6 + $0x2f0] sm:$0xff] }
  0xda   :  { %v8825_v15 = vcombine.low %v265_v59, %v269_v60 }
  0xdb   :  { %1075 = vmatpush1.bf16.msra.mxu0 %v8761_v6  ;;  %1116 = vmatpush1.bf16.msra.mxu1 %v8763_v7  ;;  %v8826_v6 = vcombine.high %v265_v59, %v269_v60  ;;  %v8828_v7 = vcombine.high %v266_v61, %v270_v62 }
  0xdc   :  { %1076 = vmatprep.subr.bf16.mxu0 %v8754_v9  ;;  %1117 = vmatprep.subr.bf16.mxu1 %v8756_v12  ;;  %v257_v9 = vld [vmem:[#allocation6 + $0x290] sm:$0xff] }
  0xdd   :  { %v261_v12 = vld [vmem:[#allocation6 + $0x2b0] sm:$0xff] }
  0xde   :  { %v8817_v24 = vcombine.low %v257_v9, %v261_v12 }
  0xdf   :  { %1077 = vmatpush1.bf16.msra.mxu0 %v8753_v17  ;;  %1118 = vmatpush1.bf16.msra.mxu1 %v8755_v18  ;;  %v8818_v17 = vcombine.high %v257_v9, %v261_v12  ;;  %v8820_v18 = vcombine.high %v258_v13, %v262_v14 }
  0xe0   :  { %1078 = vmatprep.subr.bf16.mxu0 %v8746_v19  ;;  %1119 = vmatprep.subr.bf16.mxu1 %v8748_v20  ;;  %v249_v19 = vld [vmem:[#allocation6 + $0x250] sm:$0xff] }
  0xe1   :  { %v253_v20 = vld [vmem:[#allocation6 + $0x270] sm:$0xff] }
  0xe2   :  { %v8809_v34 = vcombine.low %v249_v19, %v253_v20 }
  0xe3   :  { %1079 = vmatpush1.bf16.msra.mxu0 %v8745_v27  ;;  %1120 = vmatpush1.bf16.msra.mxu1 %v8747_v28  ;;  %v8810_v27 = vcombine.high %v249_v19, %v253_v20  ;;  %v8812_v28 = vcombine.high %v250_v21, %v254_v22 }
  0xe4   :  { %1080 = vmatprep.subr.bf16.mxu0 %v8738_v29  ;;  %1121 = vmatprep.subr.bf16.mxu1 %v8740_v30  ;;  %v241_v29 = vld [vmem:[#allocation6 + $0x210] sm:$0xff] }
  0xe5   :  { %v245_v30 = vld [vmem:[#allocation6 + $0x230] sm:$0xff] }
  0xe7   :  { %1081 = vmatpush1.bf16.msra.mxu0 %v8737_v36  ;;  %1122 = vmatpush1.bf16.msra.mxu1 %v8739_v37  ;;  %v8802_v36 = vcombine.high %v241_v29, %v245_v30  ;;  %v8804_v37 = vcombine.high %v242_v31, %v246_v33 }
  0xe8   :  { %1082 = vmatprep.subr.bf16.mxu0 %v8858_v38  ;;  %1123 = vmatprep.subr.bf16.mxu1 %v8860_v39  ;;  %v8801_v38 = vcombine.low %v241_v29, %v245_v30  ;;  %v8803_v39 = vcombine.low %v242_v31, %v246_v33 }
  0xeb   :  { %1083 = vmatpush2.bf16.msra.mxu0 %v8857_v45  ;;  %1124 = vmatpush2.bf16.msra.mxu1 %v8859_v46 }
  0xec   :  { %1084 = vmatprep.subr.bf16.mxu0 %v8850_v47  ;;  %1125 = vmatprep.subr.bf16.mxu1 %v8852_v48 }
  0xef   :  { %1085 = vmatpush2.bf16.msra.mxu0 %v8849_v53  ;;  %1126 = vmatpush2.bf16.msra.mxu1 %v8851_v54 }
  0xf0   :  { %1086 = vmatprep.subr.bf16.mxu0 %v8842_v2  ;;  %1127 = vmatprep.subr.bf16.mxu1 %v8844_v3 }
  0xf3   :  { %1087 = vmatpush2.bf16.msra.mxu0 %v8841_v55  ;;  %1128 = vmatpush2.bf16.msra.mxu1 %v8843_v56 }
  0xf4   :  { %1088 = vmatprep.subr.bf16.mxu0 %v8834_v57  ;;  %1129 = vmatprep.subr.bf16.mxu1 %v8836_v58 }
  0xf7   :  { %1089 = vmatpush2.bf16.msra.mxu0 %v8833_v63  ;;  %1130 = vmatpush2.bf16.msra.mxu1 %v8835_v5 }
  0xf8   :  { %1090 = vmatprep.subr.bf16.mxu0 %v8826_v6  ;;  %1131 = vmatprep.subr.bf16.mxu1 %v8828_v7 }
  0xfb   :  { %1091 = vmatpush2.bf16.msra.mxu0 %v8825_v15  ;;  %1132 = vmatpush2.bf16.msra.mxu1 %v8827_v16 }
  0xfc   :  { %1092 = vmatprep.subr.bf16.mxu0 %v8818_v17  ;;  %1133 = vmatprep.subr.bf16.mxu1 %v8820_v18 }
  0xff   :  { %1093 = vmatpush2.bf16.msra.mxu0 %v8817_v24  ;;  %1134 = vmatpush2.bf16.msra.mxu1 %v8819_v25 }
 0x100   :  { %1094 = vmatprep.subr.bf16.mxu0 %v8810_v27  ;;  %1135 = vmatprep.subr.bf16.mxu1 %v8812_v28 }
 0x103   :  { %1095 = vmatpush2.bf16.msra.mxu0 %v8809_v34  ;;  %1136 = vmatpush2.bf16.msra.mxu1 %v8811_v35 }
 0x104   :  { %1096 = vmatprep.subr.bf16.mxu0 %v8802_v36  ;;  %1137 = vmatprep.subr.bf16.mxu1 %v8804_v37 }
 0x107   :  { %1097 = vmatpush2.bf16.msra.mxu0 %v8801_v38  ;;  %1138 = vmatpush2.bf16.msra.mxu1 %v8803_v39 }
 0x10a   :  { %1099 = vmatmul.mubr.bf16.vlgmr.msra.gmra.mxu0 %v10327_v40  ;;  %1140 = vmatmul.mubr.bf16.vlgmr.msra.gmra.mxu1 %v10327_v40 }
 0x10b   :  { %10168 = shalt.err (!%p10165_p5)  }
 0x10c   :  { %70 = dma.hbm_to_vmem [thread:$0]  %s13888_s4, 65536, %s68_s20, [#allocation3]  ;;  %v10343_v41 = vsub.s32 0, %v10314_v23  ;;  %v13896_v42 = vsub.s32 2, %v10314_v23  ;;  %v133_v40 = vld [vmem:[#allocation4] ss:$4 sm:$0xff] }
 0x10d   :  { %v10347_v43 = vsub.s32 1, %v10314_v23  ;;  %v13895_v44 = vsub.s32 3, %v10314_v23  ;;  %v13894_v55 = vsub.s32 4, %v10314_v23  ;;  %v13892_v56 = vsub.s32 6, %v10314_v23 }
 0x10e   :  { %v10351_v45 = vrot.slane %v133_v40, %v10343_v41  ;;  %v10355_v46 = vrot.slane %v133_v40, %v13896_v42  ;;  %v13893_v57 = vsub.s32 5, %v10314_v23  ;;  %v13891_v58 = vsub.s32 7, %v10314_v23 }
 0x10f   :  { %v10358_v47 = vrot.slane %v133_v40, %v10347_v43  ;;  %v10362_v48 = vrot.slane %v133_v40, %v13895_v44  ;;  %v10378_v59 = vrot.slane %v133_v40, %v13894_v55  ;;  %v10382_v60 = vrot.slane %v133_v40, %v13892_v56 }
 0x110   :  { %15019 = vst [vmem:[#allocation16_spill] sm:$0xff] %v10351_v45  ;;  %15020 = vst [vmem:[#allocation17_spill] sm:$0xff] %v10355_v46  ;;  %v10386_v61 = vrot.slane %v133_v40, %v13893_v57  ;;  %v10390_v62 = vrot.slane %v133_v40, %v13891_v58 }
 0x111   :  { %15021 = vst [vmem:[#allocation18_spill] sm:$0xff] %v10358_v47  ;;  %15022 = vst [vmem:[#allocation19_spill] sm:$0xff] %v10362_v48 }
 0x112   :  { %15023 = vst [vmem:[#allocation20_spill] sm:$0xff] %v10378_v59  ;;  %15024 = vst [vmem:[#allocation21_spill] sm:$0xff] %v10382_v60 }
 0x113   :  { %15025 = vst [vmem:[#allocation22_spill] sm:$0xff] %v10386_v61  ;;  %15026 = vst [vmem:[#allocation23_spill] sm:$0xff] %v10390_v62 }
 0x18a   :  { %v1018_v49 = vpop.f32.mrf.mxu0  ;;  %v1059_v50 = vpop.f32.mrf.mxu1 }
 0x18b   :  { %v10365_v51 = vadd.f32 %v1018_v49, %v10351_v45  ;;  %v10368_v52 = vadd.f32 %v1059_v50, %v10355_v46 }
 0x18c   :  { %v1020_v53 = vpop.f32.mrf.mxu0  ;;  %v1061_v54 = vpop.f32.mrf.mxu1 }
 0x18d   :  { %v1021_v2 = vadd.f32 %v1020_v53, %v10358_v47  ;;  %v1062_v3 = vadd.f32 %v1061_v54, %v10362_v48 }
 0x18e   :  { %v1022_v4 = vpop.f32.mrf.mxu0  ;;  %v1063_v8 = vpop.f32.mrf.mxu1 }
 0x190   :  { %v1023_v10 = vpop.f32.mrf.mxu0  ;;  %v1064_v11 = vpop.f32.mrf.mxu1 }
 0x1ca   :  { %v1100_v63 = vpop.f32.mrf.mxu0  ;;  %v1141_v5 = vpop.f32.mrf.mxu1 }
 0x1cb   :  { %v10393_v6 = vadd.f32 %v1100_v63, %v10378_v59  ;;  %v10396_v7 = vadd.f32 %v1141_v5, %v10382_v60 }
 0x1cc   :  { %v1102_v9 = vpop.f32.mrf.mxu0  ;;  %v1143_v12 = vpop.f32.mrf.mxu1 }
 0x1cd   :  { %v10399_v13 = vadd.f32 %v1102_v9, %v10386_v61  ;;  %v10402_v14 = vadd.f32 %v1143_v12, %v10390_v62 }
 0x1ce   :  { %v1104_v15 = vpop.f32.mrf.mxu0  ;;  %v1145_v16 = vpop.f32.mrf.mxu1 }
 0x1d0   :  { %v1105_v17 = vpop.f32.mrf.mxu0  ;;  %v1146_v18 = vpop.f32.mrf.mxu1 }
 0x1d1   :  { %10173 = dma.done.wait [#allocation3], 65536 }
 0x1d2   :  { %10174 = vsyncadd [#allocation3], 4294901760  ;;  %v10404_v19 = vpack.c.bf16 %v1021_v2, %v1021_v2  ;;  %v10406_v20 = vpack.c.bf16 %v1062_v3, %v1062_v3  ;;  %v1216_v21 = vld [vmem:[#allocation2 + $0x1c0] sm:$0xff] }
 0x1d3   :  { %v1220_v22 = vld [vmem:[#allocation2 + $0x1e0] sm:$0xff] }
 0x1d4   :  { %4305 = vmatprep.mubr.bf16.mxu0 %v10404_v19  ;;  %4346 = vmatprep.mubr.bf16.mxu1 %v10406_v20  ;;  %v1344_v24 = vld [vmem:[#allocation2 + $0x5c0] sm:$0xff]  ;;  %v10410_v25 = vcombine.high %v1216_v21, %v1220_v22  ;;  %v10412_v28 = vcombine.low %v1216_v21, %v1220_v22 }
 0x1d5   :  { %v1348_v27 = vld [vmem:[#allocation2 + $0x5e0] sm:$0xff] }
 0x1d6   :  { %v1208_v29 = vld [vmem:[#allocation2 + $0x180] sm:$0xff]  ;;  %v10414_v31 = vcombine.high %v1344_v24, %v1348_v27  ;;  %v10416_v33 = vcombine.low %v1344_v24, %v1348_v27  ;;  %4273 = vmatprep.subr.bf16.mxu0 %v10410_v25 }
 0x1d7   :  { %v1212_v30 = vld [vmem:[#allocation2 + $0x1a0] sm:$0xff]  ;;  %4274 = vmatpush1.bf16.msra.mxu0 %v10412_v28 }
 0x1d8   :  { %v10418_v34 = vcombine.high %v1208_v29, %v1212_v30  ;;  %v1336_v35 = vld [vmem:[#allocation2 + $0x580] sm:$0xff]  ;;  %4314 = vmatprep.subr.bf16.mxu1 %v10414_v31  ;;  %v10425_v50 = vcombine.low %v1208_v29, %v1212_v30 }
 0x1d9   :  { %v1340_v36 = vld [vmem:[#allocation2 + $0x5a0] sm:$0xff]  ;;  %4315 = vmatpush1.bf16.msra.mxu1 %v10416_v33 }
 0x1da   :  { %v1200_v37 = vld [vmem:[#allocation2 + $0x140] sm:$0xff]  ;;  %v10421_v38 = vcombine.high %v1336_v35, %v1340_v36  ;;  %4275 = vmatprep.subr.bf16.mxu0 %v10418_v34  ;;  %v10429_v53 = vcombine.low %v1336_v35, %v1340_v36 }
 0x1db   :  { %v1204_v39 = vld [vmem:[#allocation2 + $0x160] sm:$0xff]  ;;  %4276 = vmatpush1.bf16.msra.mxu0 %v10425_v50 }
 0x1dc   :  { %v1328_v40 = vld [vmem:[#allocation2 + $0x540] sm:$0xff]  ;;  %v10431_v54 = vcombine.high %v1200_v37, %v1204_v39  ;;  %4316 = vmatprep.subr.bf16.mxu1 %v10421_v38  ;;  %v10437_v11 = vcombine.low %v1200_v37, %v1204_v39 }
 0x1dd   :  { %v1332_v49 = vld [vmem:[#allocation2 + $0x560] sm:$0xff]  ;;  %4317 = vmatpush1.bf16.msra.mxu1 %v10429_v53 }
 0x1de   :  { %15027 = vst [vmem:[#allocation24_spill] sm:$0xff] %v10431_v54  ;;  %v10434_v2 = vcombine.high %v1328_v40, %v1332_v49  ;;  %v1192_v3 = vld [vmem:[#allocation2 + $0x100] sm:$0xff]  ;;  %15029 = vst [vmem:[#allocation26_spill] sm:$0xff] %v10437_v11  ;;  %4277 = vmatprep.subr.bf16.mxu0 %v10431_v54  ;;  %v10441_v63 = vcombine.low %v1328_v40, %v1332_v49 }
 0x1df   :  { %v1196_v4 = vld [vmem:[#allocation2 + $0x120] sm:$0xff]  ;;  %4278 = vmatpush1.bf16.msra.mxu0 %v10437_v11 }
 0x1e0   :  { %15028 = vst [vmem:[#allocation25_spill] sm:$0xff] %v10434_v2  ;;  %v1320_v8 = vld [vmem:[#allocation2 + $0x500] sm:$0xff]  ;;  %15030 = vst [vmem:[#allocation27_spill] sm:$0xff] %v10441_v63  ;;  %v10443_v5 = vcombine.high %v1192_v3, %v1196_v4  ;;  %4318 = vmatprep.subr.bf16.mxu1 %v10434_v2  ;;  %v10449_v18 = vcombine.low %v1192_v3, %v1196_v4 }
 0x1e1   :  { %v1324_v10 = vld [vmem:[#allocation2 + $0x520] sm:$0xff]  ;;  %4319 = vmatpush1.bf16.msra.mxu1 %v10441_v63 }
 0x1e2   :  { %15031 = vst [vmem:[#allocation28_spill] sm:$0xff] %v10443_v5  ;;  %v10446_v9 = vcombine.high %v1320_v8, %v1324_v10  ;;  %v1184_v12 = vld [vmem:[#allocation2 + $0xc0] sm:$0xff]  ;;  %15033 = vst [vmem:[#allocation30_spill] sm:$0xff] %v10449_v18  ;;  %4279 = vmatprep.subr.bf16.mxu0 %v10443_v5  ;;  %v10453_v21 = vcombine.low %v1320_v8, %v1324_v10 }
 0x1e3   :  { %v1188_v15 = vld [vmem:[#allocation2 + $0xe0] sm:$0xff]  ;;  %4280 = vmatpush1.bf16.msra.mxu0 %v10449_v18 }
 0x1e4   :  { %15032 = vst [vmem:[#allocation29_spill] sm:$0xff] %v10446_v9  ;;  %v1312_v16 = vld [vmem:[#allocation2 + $0x4c0] sm:$0xff]  ;;  %15034 = vst [vmem:[#allocation31_spill] sm:$0xff] %v10453_v21  ;;  %v10455_v22 = vcombine.high %v1184_v12, %v1188_v15  ;;  %4320 = vmatprep.subr.bf16.mxu1 %v10446_v9  ;;  %v10461_v36 = vcombine.low %v1184_v12, %v1188_v15 }
 0x1e5   :  { %v1316_v17 = vld [vmem:[#allocation2 + $0x4e0] sm:$0xff]  ;;  %4321 = vmatpush1.bf16.msra.mxu1 %v10453_v21 }
 0x1e6   :  { %15035 = vst [vmem:[#allocation32_spill] sm:$0xff] %v10455_v22  ;;  %v10458_v24 = vcombine.high %v1312_v16, %v1316_v17  ;;  %v1176_v27 = vld [vmem:[#allocation2 + $0x80] sm:$0xff]  ;;  %15037 = vst [vmem:[#allocation34_spill] sm:$0xff] %v10461_v36  ;;  %4281 = vmatprep.subr.bf16.mxu0 %v10455_v22  ;;  %v10465_v37 = vcombine.low %v1312_v16, %v1316_v17 }
 0x1e7   :  { %v1180_v29 = vld [vmem:[#allocation2 + $0xa0] sm:$0xff]  ;;  %4282 = vmatpush1.bf16.msra.mxu0 %v10461_v36 }
 0x1e8   :  { %15036 = vst [vmem:[#allocation33_spill] sm:$0xff] %v10458_v24  ;;  %v1304_v30 = vld [vmem:[#allocation2 + $0x480] sm:$0xff]  ;;  %15038 = vst [vmem:[#allocation35_spill] sm:$0xff] %v10465_v37  ;;  %v10467_v39 = vcombine.high %v1176_v27, %v1180_v29  ;;  %4322 = vmatprep.subr.bf16.mxu1 %v10458_v24  ;;  %v10473_v10 = vcombine.low %v1176_v27, %v1180_v29 }
 0x1e9   :  { %v1308_v35 = vld [vmem:[#allocation2 + $0x4a0] sm:$0xff]  ;;  %4323 = vmatpush1.bf16.msra.mxu1 %v10465_v37 }
 0x1ea   :  { %15039 = vst [vmem:[#allocation36_spill] sm:$0xff] %v10467_v39  ;;  %v10470_v40 = vcombine.high %v1304_v30, %v1308_v35  ;;  %v1168_v49 = vld [vmem:[#allocation2 + $0x40] sm:$0xff]  ;;  %15041 = vst [vmem:[#allocation38_spill] sm:$0xff] %v10473_v10  ;;  %4283 = vmatprep.subr.bf16.mxu0 %v10467_v39  ;;  %v10477_v12 = vcombine.low %v1304_v30, %v1308_v35 }
 0x1eb   :  { %v1172_v3 = vld [vmem:[#allocation2 + $0x60] sm:$0xff]  ;;  %4284 = vmatpush1.bf16.msra.mxu0 %v10473_v10 }
 0x1ec   :  { %15040 = vst [vmem:[#allocation37_spill] sm:$0xff] %v10470_v40  ;;  %v1296_v4 = vld [vmem:[#allocation2 + $0x440] sm:$0xff]  ;;  %15042 = vst [vmem:[#allocation39_spill] sm:$0xff] %v10477_v12  ;;  %v10479_v15 = vcombine.high %v1168_v49, %v1172_v3  ;;  %4324 = vmatprep.subr.bf16.mxu1 %v10470_v40  ;;  %v10485_v27 = vcombine.low %v1168_v49, %v1172_v3 }
 0x1ed   :  { %v1300_v8 = vld [vmem:[#allocation2 + $0x460] sm:$0xff]  ;;  %4325 = vmatpush1.bf16.msra.mxu1 %v10477_v12 }
 0x1ee   :  { %15043 = vst [vmem:[#allocation40_spill] sm:$0xff] %v10479_v15  ;;  %v10482_v16 = vcombine.high %v1296_v4, %v1300_v8  ;;  %v1160_v17 = vld [vmem:[#allocation2] sm:$0xff]  ;;  %15045 = vst [vmem:[#allocation42_spill] sm:$0xff] %v10485_v27  ;;  %4285 = vmatprep.subr.bf16.mxu0 %v10479_v15  ;;  %v10489_v29 = vcombine.low %v1296_v4, %v1300_v8 }
 0x1ef   :  { %v1164_v58 = vld [vmem:[#allocation2 + $0x20] sm:$0xff]  ;;  %4286 = vmatpush1.bf16.msra.mxu0 %v10485_v27 }
 0x1f0   :  { %15044 = vst [vmem:[#allocation41_spill] sm:$0xff] %v10482_v16  ;;  %v1288_v56 = vld [vmem:[#allocation2 + $0x400] sm:$0xff]  ;;  %15046 = vst [vmem:[#allocation43_spill] sm:$0xff] %v10489_v29  ;;  %v10491_v30 = vcombine.high %v1160_v17, %v1164_v58  ;;  %4326 = vmatprep.subr.bf16.mxu1 %v10482_v16  ;;  %v10497_v49 = vcombine.low %v1160_v17, %v1164_v58 }
 0x1f1   :  { %v1292_v57 = vld [vmem:[#allocation2 + $0x420] sm:$0xff]  ;;  %4327 = vmatpush1.bf16.msra.mxu1 %v10489_v29 }
 0x1f2   :  { %15047 = vst [vmem:[#allocation44_spill] sm:$0xff] %v10491_v30  ;;  %v10494_v35 = vcombine.high %v1288_v56, %v1292_v57  ;;  %v1280_v55 = vld [vmem:[#allocation2 + $0x3c0] sm:$0xff]  ;;  %15049 = vst [vmem:[#allocation46_spill] sm:$0xff] %v10497_v49  ;;  %4287 = vmatprep.subr.bf16.mxu0 %v10491_v30  ;;  %v10501_v3 = vcombine.low %v1288_v56, %v1292_v57 }
 0x1f3   :  { %v1284_v44 = vld [vmem:[#allocation2 + $0x3e0] sm:$0xff]  ;;  %4288 = vmatpush1.bf16.msra.mxu0 %v10497_v49 }
 0x1f4   :  { %15048 = vst [vmem:[#allocation45_spill] sm:$0xff] %v10494_v35  ;;  %v1408_v42 = vld [vmem:[#allocation2 + $0x7c0] sm:$0xff]  ;;  %15050 = vst [vmem:[#allocation47_spill] sm:$0xff] %v10501_v3  ;;  %v10503_v4 = vcombine.high %v1280_v55, %v1284_v44  ;;  %4328 = vmatprep.subr.bf16.mxu1 %v10494_v35  ;;  %v10509_v58 = vcombine.low %v1280_v55, %v1284_v44 }
 0x1f5   :  { %v1412_v62 = vld [vmem:[#allocation2 + $0x7e0] sm:$0xff]  ;;  %4329 = vmatpush1.bf16.msra.mxu1 %v10501_v3 }
 0x1f6   :  { %15051 = vst [vmem:[#allocation48_spill] sm:$0xff] %v10503_v4  ;;  %v10506_v8 = vcombine.high %v1408_v42, %v1412_v62  ;;  %v1272_v61 = vld [vmem:[#allocation2 + $0x380] sm:$0xff]  ;;  %15053 = vst [vmem:[#allocation50_spill] sm:$0xff] %v10509_v58  ;;  %4289 = vmatprep.subr.bf16.mxu0 %v10503_v4  ;;  %v10513_v56 = vcombine.low %v1408_v42, %v1412_v62 }
 0x1f7   :  { %v1276_v60 = vld [vmem:[#allocation2 + $0x3a0] sm:$0xff]  ;;  %4290 = vmatpush2.bf16.msra.mxu0 %v10509_v58 }
 0x1f8   :  { %15052 = vst [vmem:[#allocation49_spill] sm:$0xff] %v10506_v8  ;;  %v1400_v59 = vld [vmem:[#allocation2 + $0x780] sm:$0xff]  ;;  %15054 = vst [vmem:[#allocation51_spill] sm:$0xff] %v10513_v56  ;;  %v10515_v57 = vcombine.high %v1272_v61, %v1276_v60  ;;  %4330 = vmatprep.subr.bf16.mxu1 %v10506_v8  ;;  %v10521_v44 = vcombine.low %v1272_v61, %v1276_v60 }
 0x1f9   :  { %v1404_v48 = vld [vmem:[#allocation2 + $0x7a0] sm:$0xff]  ;;  %4331 = vmatpush2.bf16.msra.mxu1 %v10513_v56 }
 0x1fa   :  { %15055 = vst [vmem:[#allocation52_spill] sm:$0xff] %v10515_v57  ;;  %v10518_v17 = vcombine.high %v1400_v59, %v1404_v48  ;;  %v1264_v47 = vld [vmem:[#allocation2 + $0x340] sm:$0xff]  ;;  %15057 = vst [vmem:[#allocation54_spill] sm:$0xff] %v10521_v44  ;;  %4291 = vmatprep.subr.bf16.mxu0 %v10515_v57  ;;  %v10525_v42 = vcombine.low %v1400_v59, %v1404_v48 }
 0x1fb   :  { %v1268_v46 = vld [vmem:[#allocation2 + $0x360] sm:$0xff]  ;;  %4292 = vmatpush2.bf16.msra.mxu0 %v10521_v44 }
 0x1fc   :  { %15056 = vst [vmem:[#allocation53_spill] sm:$0xff] %v10518_v17  ;;  %v1392_v45 = vld [vmem:[#allocation2 + $0x740] sm:$0xff]  ;;  %15058 = vst [vmem:[#allocation55_spill] sm:$0xff] %v10525_v42  ;;  %v10527_v55 = vcombine.high %v1264_v47, %v1268_v46  ;;  %4332 = vmatprep.subr.bf16.mxu1 %v10518_v17  ;;  %v10533_v60 = vcombine.low %v1264_v47, %v1268_v46 }
 0x1fd   :  { %v1396_v35 = vld [vmem:[#allocation2 + $0x760] sm:$0xff]  ;;  %4333 = vmatpush2.bf16.msra.mxu1 %v10525_v42 }
 0x1fe   :  { %15059 = vst [vmem:[#allocation56_spill] sm:$0xff] %v10527_v55  ;;  %v10530_v62 = vcombine.high %v1392_v45, %v1396_v35  ;;  %v1256_v8 = vld [vmem:[#allocation2 + $0x300] sm:$0xff]  ;;  %15061 = vst [vmem:[#allocation58_spill] sm:$0xff] %v10533_v60  ;;  %4293 = vmatprep.subr.bf16.mxu0 %v10527_v55  ;;  %v10537_v48 = vcombine.low %v1392_v45, %v1396_v35 }
 0x1ff   :  { %v1260_v4 = vld [vmem:[#allocation2 + $0x320] sm:$0xff]  ;;  %4294 = vmatpush2.bf16.msra.mxu0 %v10533_v60 }
 0x200   :  { %15060 = vst [vmem:[#allocation57_spill] sm:$0xff] %v10530_v62  ;;  %v1384_v3 = vld [vmem:[#allocation2 + $0x700] sm:$0xff]  ;;  %15062 = vst [vmem:[#allocation59_spill] sm:$0xff] %v10537_v48  ;;  %v10539_v59 = vcombine.high %v1256_v8, %v1260_v4  ;;  %4334 = vmatprep.subr.bf16.mxu1 %v10530_v62  ;;  %v10545_v46 = vcombine.low %v1256_v8, %v1260_v4 }
 0x201   :  { %v1388_v49 = vld [vmem:[#allocation2 + $0x720] sm:$0xff]  ;;  %4335 = vmatpush2.bf16.msra.mxu1 %v10537_v48 }
 0x202   :  { %15063 = vst [vmem:[#allocation60_spill] sm:$0xff] %v10539_v59  ;;  %v10542_v61 = vcombine.high %v1384_v3, %v1388_v49  ;;  %v1248_v17 = vld [vmem:[#allocation2 + $0x2c0] sm:$0xff]  ;;  %15065 = vst [vmem:[#allocation62_spill] sm:$0xff] %v10545_v46  ;;  %4295 = vmatprep.subr.bf16.mxu0 %v10539_v59  ;;  %v10549_v45 = vcombine.low %v1384_v3, %v1388_v49 }
 0x203   :  { %v1252_v57 = vld [vmem:[#allocation2 + $0x2e0] sm:$0xff]  ;;  %4296 = vmatpush2.bf16.msra.mxu0 %v10545_v46 }
 0x204   :  { %15064 = vst [vmem:[#allocation61_spill] sm:$0xff] %v10542_v61  ;;  %v1376_v56 = vld [vmem:[#allocation2 + $0x6c0] sm:$0xff]  ;;  %15066 = vst [vmem:[#allocation63_spill] sm:$0xff] %v10549_v45  ;;  %v10551_v47 = vcombine.high %v1248_v17, %v1252_v57  ;;  %4336 = vmatprep.subr.bf16.mxu1 %v10542_v61  ;;  %v10557_v4 = vcombine.low %v1248_v17, %v1252_v57 }
 0x205   :  { %v1380_v58 = vld [vmem:[#allocation2 + $0x6e0] sm:$0xff]  ;;  %4337 = vmatpush2.bf16.msra.mxu1 %v10549_v45 }
 0x206   :  { %15067 = vst [vmem:[#allocation64_spill] sm:$0xff] %v10551_v47  ;;  %v10554_v35 = vcombine.high %v1376_v56, %v1380_v58  ;;  %v1240_v62 = vld [vmem:[#allocation2 + $0x280] sm:$0xff]  ;;  %15069 = vst [vmem:[#allocation66_spill] sm:$0xff] %v10557_v4  ;;  %4297 = vmatprep.subr.bf16.mxu0 %v10551_v47  ;;  %v10561_v49 = vcombine.low %v1376_v56, %v1380_v58 }
 0x207   :  { %v1244_v55 = vld [vmem:[#allocation2 + $0x2a0] sm:$0xff]  ;;  %4298 = vmatpush2.bf16.msra.mxu0 %v10557_v4 }
 0x208   :  { %15068 = vst [vmem:[#allocation65_spill] sm:$0xff] %v10554_v35  ;;  %v1368_v42 = vld [vmem:[#allocation2 + $0x680] sm:$0xff]  ;;  %15070 = vst [vmem:[#allocation67_spill] sm:$0xff] %v10561_v49  ;;  %v10563_v3 = vcombine.high %v1240_v62, %v1244_v55  ;;  %4338 = vmatprep.subr.bf16.mxu1 %v10554_v35  ;;  %v10569_v57 = vcombine.low %v1240_v62, %v1244_v55 }
 0x209   :  { %v1372_v44 = vld [vmem:[#allocation2 + $0x6a0] sm:$0xff]  ;;  %4339 = vmatpush2.bf16.msra.mxu1 %v10561_v49 }
 0x20a   :  { %15071 = vst [vmem:[#allocation68_spill] sm:$0xff] %v10563_v3  ;;  %v10566_v8 = vcombine.high %v1368_v42, %v1372_v44  ;;  %v1232_v61 = vld [vmem:[#allocation2 + $0x240] sm:$0xff]  ;;  %15073 = vst [vmem:[#allocation70_spill] sm:$0xff] %v10569_v57  ;;  %4299 = vmatprep.subr.bf16.mxu0 %v10563_v3  ;;  %v10573_v58 = vcombine.low %v1368_v42, %v1372_v44 }
 0x20b   :  { %v1236_v59 = vld [vmem:[#allocation2 + $0x260] sm:$0xff]  ;;  %4300 = vmatpush2.bf16.msra.mxu0 %v10569_v57 }
 0x20c   :  { %15072 = vst [vmem:[#allocation69_spill] sm:$0xff] %v10566_v8  ;;  %v1360_v48 = vld [vmem:[#allocation2 + $0x640] sm:$0xff]  ;;  %15074 = vst [vmem:[#allocation71_spill] sm:$0xff] %v10573_v58  ;;  %v10575_v56 = vcombine.high %v1232_v61, %v1236_v59  ;;  %4340 = vmatprep.subr.bf16.mxu1 %v10566_v8  ;;  %v10581_v55 = vcombine.low %v1232_v61, %v1236_v59 }
 0x20d   :  { %v1364_v60 = vld [vmem:[#allocation2 + $0x660] sm:$0xff]  ;;  %4341 = vmatpush2.bf16.msra.mxu1 %v10573_v58  ;;  %v10606_v58 = vpack.c.bf16 %v10365_v51, %v10365_v51 }
 0x20e   :  { %15075 = vst [vmem:[#allocation72_spill] sm:$0xff] %v10575_v56  ;;  %v10578_v17 = vcombine.high %v1360_v48, %v1364_v60  ;;  %v1224_v35 = vld [vmem:[#allocation2 + $0x200] sm:$0xff]  ;;  %15077 = vst [vmem:[#allocation74_spill] sm:$0xff] %v10581_v55  ;;  %4301 = vmatprep.subr.bf16.mxu0 %v10575_v56  ;;  %v10585_v44 = vcombine.low %v1360_v48, %v1364_v60 }
 0x20f   :  { %v1228_v47 = vld [vmem:[#allocation2 + $0x220] sm:$0xff]  ;;  %4302 = vmatpush2.bf16.msra.mxu0 %v10581_v55 }
 0x210   :  { %15076 = vst [vmem:[#allocation73_spill] sm:$0xff] %v10578_v17  ;;  %v1352_v45 = vld [vmem:[#allocation2 + $0x600] sm:$0xff]  ;;  %15078 = vst [vmem:[#allocation75_spill] sm:$0xff] %v10585_v44  ;;  %v10587_v42 = vcombine.high %v1224_v35, %v1228_v47  ;;  %4342 = vmatprep.subr.bf16.mxu1 %v10578_v17  ;;  %v10593_v59 = vcombine.low %v1224_v35, %v1228_v47 }
 0x211   :  { %v1356_v46 = vld [vmem:[#allocation2 + $0x620] sm:$0xff]  ;;  %4343 = vmatpush2.bf16.msra.mxu1 %v10585_v44 }
 0x212   :  { %15079 = vst [vmem:[#allocation76_spill] sm:$0xff] %v10587_v42  ;;  %v10590_v62 = vcombine.high %v1352_v45, %v1356_v46  ;;  %v1472_v8 = vld [vmem:[#allocation2 + $0x9c0] sm:$0xff]  ;;  %15081 = vst [vmem:[#allocation78_spill] sm:$0xff] %v10593_v59  ;;  %4303 = vmatprep.subr.bf16.mxu0 %v10587_v42  ;;  %v10597_v60 = vcombine.low %v1352_v45, %v1356_v46  ;;  %v10611_v46 = vpack.c.bf16 %v10368_v52, %v10368_v52 }
 0x213   :  { %v1476_v3 = vld [vmem:[#allocation2 + $0x9e0] sm:$0xff]  ;;  %4304 = vmatpush2.bf16.msra.mxu0 %v10593_v59  ;;  %v10626_v52 = vpack.c.bf16 %v10399_v13, %v10399_v13 }
 0x214   :  { %15080 = vst [vmem:[#allocation77_spill] sm:$0xff] %v10590_v62  ;;  %v1600_v49 = vld [vmem:[#allocation2 + $0xdc0] sm:$0xff]  ;;  %15082 = vst [vmem:[#allocation79_spill] sm:$0xff] %v10597_v60  ;;  %v10599_v48 = vcombine.high %v1472_v8, %v1476_v3  ;;  %4344 = vmatprep.subr.bf16.mxu1 %v10590_v62  ;;  %v10613_v45 = vcombine.low %v1472_v8, %v1476_v3 }
 0x215   :  { %v1604_v4 = vld [vmem:[#allocation2 + $0xde0] sm:$0xff]  ;;  %4345 = vmatpush2.bf16.msra.mxu1 %v10597_v60 }
 0x216   :  { %15083 = vst [vmem:[#allocation80_spill] sm:$0xff] %v10599_v48  ;;  %v10602_v61 = vcombine.high %v1600_v49, %v1604_v4  ;;  %v1464_v17 = vld [vmem:[#allocation2 + $0x980] sm:$0xff]  ;;  %15085 = vst [vmem:[#allocation82_spill] sm:$0xff] %v10613_v45  ;;  %4355 = vmatprep.subr.bf16.mxu0 %v10599_v48  ;;  %v10617_v62 = vcombine.low %v1600_v49, %v1604_v4  ;;  %4306 = vmatmul.mubr.bf16.vlgmr.msra.gmra.mxu0 %v10606_v58 }
 0x217   :  { %v1468_v56 = vld [vmem:[#allocation2 + $0x9a0] sm:$0xff]  ;;  %v10631_v4 = vpack.c.bf16 %v10402_v14, %v10402_v14  ;;  %4356 = vmatpush1.bf16.msra.mxu0 %v10613_v45  ;;  %4387 = vmatprep.mubr.bf16.mxu0 %v10626_v52 }
 0x218   :  { %15084 = vst [vmem:[#allocation81_spill] sm:$0xff] %v10602_v61  ;;  %v1592_v47 = vld [vmem:[#allocation2 + $0xd80] sm:$0xff]  ;;  %15086 = vst [vmem:[#allocation83_spill] sm:$0xff] %v10617_v62  ;;  %v10619_v42 = vcombine.high %v1464_v17, %v1468_v56  ;;  %4396 = vmatprep.subr.bf16.mxu1 %v10602_v61  ;;  %4347 = vmatmul.mubr.bf16.vlgmr.msra.gmra.mxu1 %v10611_v46  ;;  %v10635_v49 = vcombine.low %v1464_v17, %v1468_v56 }
 0x219   :  { %v1596_v35 = vld [vmem:[#allocation2 + $0xda0] sm:$0xff]  ;;  %4397 = vmatpush1.bf16.msra.mxu1 %v10617_v62  ;;  %4428 = vmatprep.mubr.bf16.mxu1 %v10631_v4 }
 0x21a   :  { %15087 = vst [vmem:[#allocation84_spill] sm:$0xff] %v10619_v42  ;;  %v1456_v51 = vld [vmem:[#allocation2 + $0x940] sm:$0xff]  ;;  %v10622_v59 = vcombine.high %v1592_v47, %v1596_v35  ;;  %15089 = vst [vmem:[#allocation86_spill] sm:$0xff] %v10635_v49  ;;  %4357 = vmatprep.subr.bf16.mxu0 %v10619_v42  ;;  %v10639_v3 = vcombine.low %v1592_v47, %v1596_v35 }
 0x21b   :  { %v1460_v44 = vld [vmem:[#allocation2 + $0x960] sm:$0xff]  ;;  %4358 = vmatpush1.bf16.msra.mxu0 %v10635_v49 }
 0x21c   :  { %v1584_v55 = vld [vmem:[#allocation2 + $0xd40] sm:$0xff]  ;;  %15088 = vst [vmem:[#allocation85_spill] sm:$0xff] %v10622_v59  ;;  %15090 = vst [vmem:[#allocation87_spill] sm:$0xff] %v10639_v3  ;;  %v10641_v13 = vcombine.high %v1456_v51, %v1460_v44  ;;  %4398 = vmatprep.subr.bf16.mxu1 %v10622_v59  ;;  %v10649_v56 = vcombine.low %v1456_v51, %v1460_v44 }
 0x21d   :  { %v1588_v57 = vld [vmem:[#allocation2 + $0xd60] sm:$0xff]  ;;  %4399 = vmatpush1.bf16.msra.mxu1 %v10639_v3 }
 0x21e   :  { %15091 = vst [vmem:[#allocation88_spill] sm:$0xff] %v10641_v13  ;;  %v1448_v8 = vld [vmem:[#allocation2 + $0x900] sm:$0xff]  ;;  %v10644_v14 = vcombine.high %v1584_v55, %v1588_v57  ;;  %15093 = vst [vmem:[#allocation90_spill] sm:$0xff] %v10649_v56  ;;  %4359 = vmatprep.subr.bf16.mxu0 %v10641_v13  ;;  %v10653_v17 = vcombine.low %v1584_v55, %v1588_v57 }
 0x21f   :  { %v1452_v61 = vld [vmem:[#allocation2 + $0x920] sm:$0xff]  ;;  %4360 = vmatpush1.bf16.msra.mxu0 %v10649_v56 }
 0x220   :  { %v1576_v48 = vld [vmem:[#allocation2 + $0xd00] sm:$0xff]  ;;  %15092 = vst [vmem:[#allocation89_spill] sm:$0xff] %v10644_v14  ;;  %15094 = vst [vmem:[#allocation91_spill] sm:$0xff] %v10653_v17  ;;  %v10655_v47 = vcombine.high %v1448_v8, %v1452_v61  ;;  %4400 = vmatprep.subr.bf16.mxu1 %v10644_v14  ;;  %v10661_v44 = vcombine.low %v1448_v8, %v1452_v61 }
 0x221   :  { %v1580_v60 = vld [vmem:[#allocation2 + $0xd20] sm:$0xff]  ;;  %4401 = vmatpush1.bf16.msra.mxu1 %v10653_v17 }
 0x222   :  { %15095 = vst [vmem:[#allocation92_spill] sm:$0xff] %v10655_v47  ;;  %v1440_v35 = vld [vmem:[#allocation2 + $0x8c0] sm:$0xff]  ;;  %v10658_v62 = vcombine.high %v1576_v48, %v1580_v60  ;;  %15097 = vst [vmem:[#allocation94_spill] sm:$0xff] %v10661_v44  ;;  %4361 = vmatprep.subr.bf16.mxu0 %v10655_v47  ;;  %v10665_v57 = vcombine.low %v1576_v48, %v1580_v60 }
 0x223   :  { %v1444_v59 = vld [vmem:[#allocation2 + $0x8e0] sm:$0xff]  ;;  %4362 = vmatpush1.bf16.msra.mxu0 %v10661_v44 }
 0x224   :  { %v1568_v42 = vld [vmem:[#allocation2 + $0xcc0] sm:$0xff]  ;;  %15096 = vst [vmem:[#allocation93_spill] sm:$0xff] %v10658_v62  ;;  %15098 = vst [vmem:[#allocation95_spill] sm:$0xff] %v10665_v57  ;;  %v10667_v55 = vcombine.high %v1440_v35, %v1444_v59  ;;  %4402 = vmatprep.subr.bf16.mxu1 %v10658_v62  ;;  %v10673_v61 = vcombine.low %v1440_v35, %v1444_v59 }
 0x225   :  { %v1572_v45 = vld [vmem:[#allocation2 + $0xce0] sm:$0xff]  ;;  %4403 = vmatpush1.bf16.msra.mxu1 %v10665_v57 }
 0x226   :  { %15099 = vst [vmem:[#allocation96_spill] sm:$0xff] %v10667_v55  ;;  %v1432_v51 = vld [vmem:[#allocation2 + $0x880] sm:$0xff]  ;;  %v10670_v14 = vcombine.high %v1568_v42, %v1572_v45  ;;  %15101 = vst [vmem:[#allocation98_spill] sm:$0xff] %v10673_v61  ;;  %4363 = vmatprep.subr.bf16.mxu0 %v10667_v55  ;;  %v10677_v60 = vcombine.low %v1568_v42, %v1572_v45 }
 0x227   :  { %v1436_v13 = vld [vmem:[#allocation2 + $0x8a0] sm:$0xff]  ;;  %4364 = vmatpush1.bf16.msra.mxu0 %v10673_v61 }
 0x228   :  { %v1560_v3 = vld [vmem:[#allocation2 + $0xc80] sm:$0xff]  ;;  %15100 = vst [vmem:[#allocation97_spill] sm:$0xff] %v10670_v14  ;;  %15102 = vst [vmem:[#allocation99_spill] sm:$0xff] %v10677_v60  ;;  %v10679_v48 = vcombine.high %v1432_v51, %v1436_v13  ;;  %4404 = vmatprep.subr.bf16.mxu1 %v10670_v14  ;;  %v10685_v59 = vcombine.low %v1432_v51, %v1436_v13 }
 0x229   :  { %v1564_v49 = vld [vmem:[#allocation2 + $0xca0] sm:$0xff]  ;;  %4405 = vmatpush1.bf16.msra.mxu1 %v10677_v60 }
 0x22a   :  { %15103 = vst [vmem:[#allocation100_spill] sm:$0xff] %v10679_v48  ;;  %v1424_v8 = vld [vmem:[#allocation2 + $0x840] sm:$0xff]  ;;  %v10682_v62 = vcombine.high %v1560_v3, %v1564_v49  ;;  %15105 = vst [vmem:[#allocation102_spill] sm:$0xff] %v10685_v59  ;;  %4365 = vmatprep.subr.bf16.mxu0 %v10679_v48  ;;  %v10689_v42 = vcombine.low %v1560_v3, %v1564_v49 }
 0x22b   :  { %v1428_v47 = vld [vmem:[#allocation2 + $0x860] sm:$0xff]  ;;  %4366 = vmatpush1.bf16.msra.mxu0 %v10685_v59 }
 0x22c   :  { %v1552_v17 = vld [vmem:[#allocation2 + $0xc40] sm:$0xff]  ;;  %15104 = vst [vmem:[#allocation101_spill] sm:$0xff] %v10682_v62  ;;  %15106 = vst [vmem:[#allocation103_spill] sm:$0xff] %v10689_v42  ;;  %v10691_v45 = vcombine.high %v1424_v8, %v1428_v47  ;;  %4406 = vmatprep.subr.bf16.mxu1 %v10682_v62  ;;  %v10697_v13 = vcombine.low %v1424_v8, %v1428_v47 }
 0x22d   :  { %v1556_v56 = vld [vmem:[#allocation2 + $0xc60] sm:$0xff]  ;;  %4407 = vmatpush1.bf16.msra.mxu1 %v10689_v42 }
 0x22e   :  { %15107 = vst [vmem:[#allocation104_spill] sm:$0xff] %v10691_v45  ;;  %v1416_v35 = vld [vmem:[#allocation2 + $0x800] sm:$0xff]  ;;  %v10694_v14 = vcombine.high %v1552_v17, %v1556_v56  ;;  %15109 = vst [vmem:[#allocation106_spill] sm:$0xff] %v10697_v13  ;;  %4367 = vmatprep.subr.bf16.mxu0 %v10691_v45  ;;  %v10701_v49 = vcombine.low %v1552_v17, %v1556_v56 }
 0x22f   :  { %v1420_v55 = vld [vmem:[#allocation2 + $0x820] sm:$0xff]  ;;  %4368 = vmatpush1.bf16.msra.mxu0 %v10697_v13 }
 0x230   :  { %v1544_v57 = vld [vmem:[#allocation2 + $0xc00] sm:$0xff]  ;;  %15108 = vst [vmem:[#allocation105_spill] sm:$0xff] %v10694_v14  ;;  %15110 = vst [vmem:[#allocation107_spill] sm:$0xff] %v10701_v49  ;;  %v10703_v3 = vcombine.high %v1416_v35, %v1420_v55  ;;  %4408 = vmatprep.subr.bf16.mxu1 %v10694_v14  ;;  %v10709_v47 = vcombine.low %v1416_v35, %v1420_v55 }
 0x231   :  { %v1548_v44 = vld [vmem:[#allocation2 + $0xc20] sm:$0xff]  ;;  %4409 = vmatpush1.bf16.msra.mxu1 %v10701_v49 }
 0x232   :  { %15111 = vst [vmem:[#allocation108_spill] sm:$0xff] %v10703_v3  ;;  %v1536_v51 = vld [vmem:[#allocation2 + $0xbc0] sm:$0xff]  ;;  %v10706_v62 = vcombine.high %v1544_v57, %v1548_v44  ;;  %15113 = vst [vmem:[#allocation110_spill] sm:$0xff] %v10709_v47  ;;  %4369 = vmatprep.subr.bf16.mxu0 %v10703_v3  ;;  %v10713_v56 = vcombine.low %v1544_v57, %v1548_v44 }
 0x233   :  { %v1540_v48 = vld [vmem:[#allocation2 + $0xbe0] sm:$0xff]  ;;  %4370 = vmatpush1.bf16.msra.mxu0 %v10709_v47 }
 0x234   :  { %v1664_v60 = vld [vmem:[#allocation2 + $0xfc0] sm:$0xff]  ;;  %15112 = vst [vmem:[#allocation109_spill] sm:$0xff] %v10706_v62  ;;  %15114 = vst [vmem:[#allocation111_spill] sm:$0xff] %v10713_v56  ;;  %v10715_v17 = vcombine.high %v1536_v51, %v1540_v48  ;;  %4410 = vmatprep.subr.bf16.mxu1 %v10706_v62  ;;  %v10721_v55 = vcombine.low %v1536_v51, %v1540_v48 }
 0x235   :  { %v1668_v61 = vld [vmem:[#allocation2 + $0xfe0] sm:$0xff]  ;;  %4411 = vmatpush1.bf16.msra.mxu1 %v10713_v56 }
 0x236   :  { %15115 = vst [vmem:[#allocation112_spill] sm:$0xff] %v10715_v17  ;;  %v1528_v8 = vld [vmem:[#allocation2 + $0xb80] sm:$0xff]  ;;  %v10718_v14 = vcombine.high %v1664_v60, %v1668_v61  ;;  %15117 = vst [vmem:[#allocation114_spill] sm:$0xff] %v10721_v55  ;;  %4371 = vmatprep.subr.bf16.mxu0 %v10715_v17  ;;  %v10725_v44 = vcombine.low %v1664_v60, %v1668_v61 }
 0x237   :  { %v1532_v45 = vld [vmem:[#allocation2 + $0xba0] sm:$0xff]  ;;  %4372 = vmatpush2.bf16.msra.mxu0 %v10721_v55 }
 0x238   :  { %v1656_v42 = vld [vmem:[#allocation2 + $0xf80] sm:$0xff]  ;;  %15116 = vst [vmem:[#allocation113_spill] sm:$0xff] %v10718_v14  ;;  %15118 = vst [vmem:[#allocation115_spill] sm:$0xff] %v10725_v44  ;;  %v10727_v57 = vcombine.high %v1528_v8, %v1532_v45  ;;  %4412 = vmatprep.subr.bf16.mxu1 %v10718_v14  ;;  %v10733_v48 = vcombine.low %v1528_v8, %v1532_v45 }
 0x239   :  { %v1660_v59 = vld [vmem:[#allocation2 + $0xfa0] sm:$0xff]  ;;  %4413 = vmatpush2.bf16.msra.mxu1 %v10725_v44 }
 0x23a   :  { %15119 = vst [vmem:[#allocation116_spill] sm:$0xff] %v10727_v57  ;;  %v1520_v35 = vld [vmem:[#allocation2 + $0xb40] sm:$0xff]  ;;  %v10730_v62 = vcombine.high %v1656_v42, %v1660_v59  ;;  %15121 = vst [vmem:[#allocation118_spill] sm:$0xff] %v10733_v48  ;;  %4373 = vmatprep.subr.bf16.mxu0 %v10727_v57  ;;  %v10737_v61 = vcombine.low %v1656_v42, %v1660_v59 }
 0x23b   :  { %v1524_v3 = vld [vmem:[#allocation2 + $0xb60] sm:$0xff]  ;;  %4374 = vmatpush2.bf16.msra.mxu0 %v10733_v48 }
 0x23c   :  { %v1648_v49 = vld [vmem:[#allocation2 + $0xf40] sm:$0xff]  ;;  %15120 = vst [vmem:[#allocation117_spill] sm:$0xff] %v10730_v62  ;;  %15122 = vst [vmem:[#allocation119_spill] sm:$0xff] %v10737_v61  ;;  %v10739_v60 = vcombine.high %v1520_v35, %v1524_v3  ;;  %4414 = vmatprep.subr.bf16.mxu1 %v10730_v62  ;;  %v10745_v45 = vcombine.low %v1520_v35, %v1524_v3 }
 0x23d   :  { %v1652_v13 = vld [vmem:[#allocation2 + $0xf60] sm:$0xff]  ;;  %4415 = vmatpush2.bf16.msra.mxu1 %v10737_v61 }
 0x23e   :  { %15123 = vst [vmem:[#allocation120_spill] sm:$0xff] %v10739_v60  ;;  %v1512_v51 = vld [vmem:[#allocation2 + $0xb00] sm:$0xff]  ;;  %v10742_v14 = vcombine.high %v1648_v49, %v1652_v13  ;;  %15125 = vst [vmem:[#allocation122_spill] sm:$0xff] %v10745_v45  ;;  %4375 = vmatprep.subr.bf16.mxu0 %v10739_v60  ;;  %v10749_v59 = vcombine.low %v1648_v49, %v1652_v13 }
 0x23f   :  { %v1516_v17 = vld [vmem:[#allocation2 + $0xb20] sm:$0xff]  ;;  %4376 = vmatpush2.bf16.msra.mxu0 %v10745_v45 }
 0x240   :  { %v1640_v56 = vld [vmem:[#allocation2 + $0xf00] sm:$0xff]  ;;  %15124 = vst [vmem:[#allocation121_spill] sm:$0xff] %v10742_v14  ;;  %15126 = vst [vmem:[#allocation123_spill] sm:$0xff] %v10749_v59  ;;  %v10751_v42 = vcombine.high %v1512_v51, %v1516_v17  ;;  %4416 = vmatprep.subr.bf16.mxu1 %v10742_v14  ;;  %v10757_v3 = vcombine.low %v1512_v51, %v1516_v17 }
 0x241   :  { %v1644_v47 = vld [vmem:[#allocation2 + $0xf20] sm:$0xff]  ;;  %4417 = vmatpush2.bf16.msra.mxu1 %v10749_v59 }
 0x242   :  { %15127 = vst [vmem:[#allocation124_spill] sm:$0xff] %v10751_v42  ;;  %v1504_v8 = vld [vmem:[#allocation2 + $0xac0] sm:$0xff]  ;;  %v10754_v62 = vcombine.high %v1640_v56, %v1644_v47  ;;  %15129 = vst [vmem:[#allocation126_spill] sm:$0xff] %v10757_v3  ;;  %4377 = vmatprep.subr.bf16.mxu0 %v10751_v42  ;;  %v10761_v13 = vcombine.low %v1640_v56, %v1644_v47 }
 0x243   :  { %v1508_v57 = vld [vmem:[#allocation2 + $0xae0] sm:$0xff]  ;;  %4378 = vmatpush2.bf16.msra.mxu0 %v10757_v3 }
 0x244   :  { %v1632_v44 = vld [vmem:[#allocation2 + $0xec0] sm:$0xff]  ;;  %15128 = vst [vmem:[#allocation125_spill] sm:$0xff] %v10754_v62  ;;  %15130 = vst [vmem:[#allocation127_spill] sm:$0xff] %v10761_v13  ;;  %v10763_v49 = vcombine.high %v1504_v8, %v1508_v57  ;;  %4418 = vmatprep.subr.bf16.mxu1 %v10754_v62  ;;  %v10769_v17 = vcombine.low %v1504_v8, %v1508_v57 }
 0x245   :  { %v1636_v55 = vld [vmem:[#allocation2 + $0xee0] sm:$0xff]  ;;  %4419 = vmatpush2.bf16.msra.mxu1 %v10761_v13 }
 0x246   :  { %15131 = vst [vmem:[#allocation128_spill] sm:$0xff] %v10763_v49  ;;  %v1496_v35 = vld [vmem:[#allocation2 + $0xa80] sm:$0xff]  ;;  %v10766_v14 = vcombine.high %v1632_v44, %v1636_v55  ;;  %15133 = vst [vmem:[#allocation130_spill] sm:$0xff] %v10769_v17  ;;  %4379 = vmatprep.subr.bf16.mxu0 %v10763_v49  ;;  %v10773_v47 = vcombine.low %v1632_v44, %v1636_v55 }
 0x247   :  { %v1500_v60 = vld [vmem:[#allocation2 + $0xaa0] sm:$0xff]  ;;  %4380 = vmatpush2.bf16.msra.mxu0 %v10769_v17  ;;  %v1349_v17 = vld [vmem:[#allocation2 + $0x5e8] sm:$0xff] }
 0x248   :  { %v1624_v61 = vld [vmem:[#allocation2 + $0xe80] sm:$0xff]  ;;  %15132 = vst [vmem:[#allocation129_spill] sm:$0xff] %v10766_v14  ;;  %15134 = vst [vmem:[#allocation131_spill] sm:$0xff] %v10773_v47  ;;  %v10775_v56 = vcombine.high %v1496_v35, %v1500_v60  ;;  %4420 = vmatprep.subr.bf16.mxu1 %v10766_v14  ;;  %v10781_v57 = vcombine.low %v1496_v35, %v1500_v60  ;;  %v1217_v35 = vld [vmem:[#allocation2 + $0x1c8] sm:$0xff] }
 0x249   :  { %v1628_v48 = vld [vmem:[#allocation2 + $0xea0] sm:$0xff]  ;;  %4421 = vmatpush2.bf16.msra.mxu1 %v10773_v47  ;;  %v1345_v47 = vld [vmem:[#allocation2 + $0x5c8] sm:$0xff] }
 0x24a   :  { %15135 = vst [vmem:[#allocation132_spill] sm:$0xff] %v10775_v56  ;;  %v1488_v51 = vld [vmem:[#allocation2 + $0xa40] sm:$0xff]  ;;  %v10778_v62 = vcombine.high %v1624_v61, %v1628_v48  ;;  %15137 = vst [vmem:[#allocation134_spill] sm:$0xff] %v10781_v57  ;;  %4381 = vmatprep.subr.bf16.mxu0 %v10775_v56  ;;  %v10785_v55 = vcombine.low %v1624_v61, %v1628_v48  ;;  %v1221_v56 = vld [vmem:[#allocation2 + $0x1e8] sm:$0xff] }
 0x24b   :  { %v1492_v42 = vld [vmem:[#allocation2 + $0xa60] sm:$0xff]  ;;  %4382 = vmatpush2.bf16.msra.mxu0 %v10781_v57  ;;  %v1341_v57 = vld [vmem:[#allocation2 + $0x5a8] sm:$0xff] }
 0x24c   :  { %v1616_v59 = vld [vmem:[#allocation2 + $0xe40] sm:$0xff]  ;;  %15136 = vst [vmem:[#allocation133_spill] sm:$0xff] %v10778_v62  ;;  %15138 = vst [vmem:[#allocation135_spill] sm:$0xff] %v10785_v55  ;;  %v10787_v44 = vcombine.high %v1488_v51, %v1492_v42  ;;  %4422 = vmatprep.subr.bf16.mxu1 %v10778_v62  ;;  %v10793_v60 = vcombine.low %v1488_v51, %v1492_v42  ;;  %v1209_v51 = vld [vmem:[#allocation2 + $0x188] sm:$0xff] }
 0x24d   :  { %v1620_v45 = vld [vmem:[#allocation2 + $0xe60] sm:$0xff]  ;;  %4423 = vmatpush2.bf16.msra.mxu1 %v10785_v55  ;;  %v1337_v55 = vld [vmem:[#allocation2 + $0x588] sm:$0xff] }
 0x24e   :  { %15139 = vst [vmem:[#allocation136_spill] sm:$0xff] %v10787_v44  ;;  %v1480_v8 = vld [vmem:[#allocation2 + $0xa00] sm:$0xff]  ;;  %v10790_v14 = vcombine.high %v1616_v59, %v1620_v45  ;;  %15141 = vst [vmem:[#allocation138_spill] sm:$0xff] %v10793_v60  ;;  %4383 = vmatprep.subr.bf16.mxu0 %v10787_v44  ;;  %v10797_v48 = vcombine.low %v1616_v59, %v1620_v45  ;;  %v10811_v59 = vcombine.high %v1217_v35, %v1221_v56  ;;  %v1213_v44 = vld [vmem:[#allocation2 + $0x1a8] sm:$0xff] }
 0x24f   :  { %v1484_v49 = vld [vmem:[#allocation2 + $0xa20] sm:$0xff]  ;;  %4384 = vmatpush2.bf16.msra.mxu0 %v10793_v60  ;;  %v1317_v60 = vld [vmem:[#allocation2 + $0x4e8] sm:$0xff] }
 0x250   :  { %v1608_v13 = vld [vmem:[#allocation2 + $0xe00] sm:$0xff]  ;;  %15140 = vst [vmem:[#allocation137_spill] sm:$0xff] %v10790_v14  ;;  %15142 = vst [vmem:[#allocation139_spill] sm:$0xff] %v10797_v48  ;;  %v10799_v61 = vcombine.high %v1480_v8, %v1484_v49  ;;  %4424 = vmatprep.subr.bf16.mxu1 %v10790_v14  ;;  %v10805_v42 = vcombine.low %v1480_v8, %v1484_v49  ;;  %v10814_v14 = vcombine.high %v1345_v47, %v1349_v17 }
 0x251   :  { %v1612_v3 = vld [vmem:[#allocation2 + $0xe20] sm:$0xff]  ;;  %4425 = vmatpush2.bf16.msra.mxu1 %v10797_v48  ;;  %15147 = vst [vmem:[#allocation144_spill] sm:$0xff] %v10811_v59  ;;  %v10818_v49 = vpack.c.bf16 %v10393_v6, %v10393_v6  ;;  %v10829_v8 = vcombine.low %v1345_v47, %v1349_v17  ;;  %v10834_v6 = vcombine.high %v1337_v55, %v1341_v57  ;;  %v1333_v48 = vld [vmem:[#allocation2 + $0x568] sm:$0xff] }
 0x252   :  { %15143 = vst [vmem:[#allocation140_spill] sm:$0xff] %v10799_v61  ;;  %v10802_v62 = vcombine.high %v1608_v13, %v1612_v3  ;;  %15145 = vst [vmem:[#allocation142_spill] sm:$0xff] %v10805_v42  ;;  %4385 = vmatprep.subr.bf16.mxu0 %v10799_v61  ;;  %v10809_v45 = vcombine.low %v1608_v13, %v1612_v3  ;;  %v10823_v3 = vpack.c.bf16 %v10396_v7, %v10396_v7  ;;  %v1201_v61 = vld [vmem:[#allocation2 + $0x148] sm:$0xff] }
 0x253   :  { %15148 = vst [vmem:[#allocation145_spill] sm:$0xff] %v10814_v14  ;;  %4386 = vmatpush2.bf16.msra.mxu0 %v10805_v42  ;;  %v10825_v13 = vcombine.low %v1217_v35, %v1221_v56  ;;  %15150 = vst [vmem:[#allocation147_spill] sm:$0xff] %v10829_v8  ;;  %v1205_v42 = vld [vmem:[#allocation2 + $0x168] sm:$0xff]  ;;  %v10839_v56 = vcombine.low %v1209_v51, %v1213_v44  ;;  %v10843_v17 = vcombine.low %v1337_v55, %v1341_v57 }
 0x254   :  { %15144 = vst [vmem:[#allocation141_spill] sm:$0xff] %v10802_v62  ;;  %15146 = vst [vmem:[#allocation143_spill] sm:$0xff] %v10809_v45  ;;  %4426 = vmatprep.subr.bf16.mxu1 %v10802_v62  ;;  %4437 = vmatprep.subr.bf16.mxu0 %v10811_v59  ;;  %v10831_v62 = vcombine.high %v1209_v51, %v1213_v44  ;;  %v1329_v7 = vld [vmem:[#allocation2 + $0x548] sm:$0xff]  ;;  %v10845_v47 = vcombine.high %v1201_v61, %v1205_v42 }
 0x255   :  { %15149 = vst [vmem:[#allocation146_spill] sm:$0xff] %v10825_v13  ;;  %4427 = vmatpush2.bf16.msra.mxu1 %v10809_v45  ;;  %15152 = vst [vmem:[#allocation149_spill] sm:$0xff] %v10834_v6  ;;  %v10848_v35 = vcombine.high %v1329_v7, %v1333_v48  ;;  %v1197_v59 = vld [vmem:[#allocation2 + $0x128] sm:$0xff]  ;;  %v10853_v44 = vcombine.low %v1201_v61, %v1205_v42  ;;  %v10857_v57 = vcombine.low %v1329_v7, %v1333_v48 }
 0x256   :  { %15151 = vst [vmem:[#allocation148_spill] sm:$0xff] %v10831_v62  ;;  %4478 = vmatprep.subr.bf16.mxu1 %v10814_v14  ;;  %4388 = vmatmul.mubr.bf16.vlgmr.msra.gmra.mxu0 %v10818_v49  ;;  %15153 = vst [vmem:[#allocation150_spill] sm:$0xff] %v10839_v56  ;;  %v1193_v14 = vld [vmem:[#allocation2 + $0x108] sm:$0xff] }
 0x257   :  { %4438 = vmatpush1.bf16.msra.mxu0 %v10825_v13  ;;  %15154 = vst [vmem:[#allocation151_spill] sm:$0xff] %v10843_v17  ;;  %15155 = vst [vmem:[#allocation152_spill] sm:$0xff] %v10845_v47  ;;  %4469 = vmatprep.mubr.bf16.mxu0 %v10404_v19  ;;  %v1321_v45 = vld [vmem:[#allocation2 + $0x508] sm:$0xff]  ;;  %v10859_v55 = vcombine.high %v1193_v14, %v1197_v59  ;;  %v10865_v61 = vcombine.low %v1193_v14, %v1197_v59 }
 0x258   :  { %4429 = vmatmul.mubr.bf16.vlgmr.msra.gmra.mxu1 %v10823_v3  ;;  %4439 = vmatprep.subr.bf16.mxu0 %v10831_v62  ;;  %15156 = vst [vmem:[#allocation153_spill] sm:$0xff] %v10848_v35  ;;  %v1325_v13 = vld [vmem:[#allocation2 + $0x528] sm:$0xff]  ;;  %15157 = vst [vmem:[#allocation154_spill] sm:$0xff] %v10853_v44 }
 0x259   :  { %4479 = vmatpush1.bf16.msra.mxu1 %v10829_v8  ;;  %4510 = vmatprep.mubr.bf16.mxu1 %v10406_v20  ;;  %15158 = vst [vmem:[#allocation155_spill] sm:$0xff] %v10857_v57  ;;  %15159 = vst [vmem:[#allocation156_spill] sm:$0xff] %v10859_v55  ;;  %v10862_v51 = vcombine.high %v1321_v45, %v1325_v13  ;;  %v1189_v62 = vld [vmem:[#allocation2 + $0xe8] sm:$0xff]  ;;  %v10869_v48 = vcombine.low %v1321_v45, %v1325_v13 }
 0x25a   :  { %4480 = vmatprep.subr.bf16.mxu1 %v10834_v6  ;;  %v1185_v6 = vld [vmem:[#allocation2 + $0xc8] sm:$0xff]  ;;  %15161 = vst [vmem:[#allocation158_spill] sm:$0xff] %v10865_v61 }
 0x25b   :  { %4440 = vmatpush1.bf16.msra.mxu0 %v10839_v56  ;;  %15160 = vst [vmem:[#allocation157_spill] sm:$0xff] %v10862_v51  ;;  %v1313_v8 = vld [vmem:[#allocation2 + $0x4c8] sm:$0xff]  ;;  %15162 = vst [vmem:[#allocation159_spill] sm:$0xff] %v10869_v48  ;;  %v10871_v42 = vcombine.high %v1185_v6, %v1189_v62  ;;  %v10877_v14 = vcombine.low %v1185_v6, %v1189_v62 }
 0x25c   :  { %4441 = vmatprep.subr.bf16.mxu0 %v10845_v47  ;;  %v10874_v7 = vcombine.high %v1313_v8, %v1317_v60  ;;  %v1181_v47 = vld [vmem:[#allocation2 + $0xa8] sm:$0xff]  ;;  %v10881_v45 = vcombine.low %v1313_v8, %v1317_v60 }
 0x25d   :  { %4481 = vmatpush1.bf16.msra.mxu1 %v10843_v17  ;;  %15163 = vst [vmem:[#allocation160_spill] sm:$0xff] %v10871_v42  ;;  %v1305_v17 = vld [vmem:[#allocation2 + $0x488] sm:$0xff]  ;;  %15165 = vst [vmem:[#allocation162_spill] sm:$0xff] %v10877_v14 }
 0x25e   :  { %4482 = vmatprep.subr.bf16.mxu1 %v10848_v35  ;;  %15164 = vst [vmem:[#allocation161_spill] sm:$0xff] %v10874_v7  ;;  %v1177_v35 = vld [vmem:[#allocation2 + $0x88] sm:$0xff]  ;;  %15166 = vst [vmem:[#allocation163_spill] sm:$0xff] %v10881_v45 }
 0x25f   :  { %4442 = vmatpush1.bf16.msra.mxu0 %v10853_v44  ;;  %v1309_v56 = vld [vmem:[#allocation2 + $0x4a8] sm:$0xff]  ;;  %v10883_v59 = vcombine.high %v1177_v35, %v1181_v47  ;;  %v10889_v62 = vcombine.low %v1177_v35, %v1181_v47 }
 0x260   :  { %4443 = vmatprep.subr.bf16.mxu0 %v10859_v55  ;;  %v10886_v13 = vcombine.high %v1305_v17, %v1309_v56  ;;  %v1173_v55 = vld [vmem:[#allocation2 + $0x68] sm:$0xff]  ;;  %v10893_v60 = vcombine.low %v1305_v17, %v1309_v56 }
 0x261   :  { %4483 = vmatpush1.bf16.msra.mxu1 %v10857_v57  ;;  %15167 = vst [vmem:[#allocation164_spill] sm:$0xff] %v10883_v59  ;;  %v1297_v57 = vld [vmem:[#allocation2 + $0x448] sm:$0xff]  ;;  %15169 = vst [vmem:[#allocation166_spill] sm:$0xff] %v10889_v62 }
 0x262   :  { %4484 = vmatprep.subr.bf16.mxu1 %v10862_v51  ;;  %15168 = vst [vmem:[#allocation165_spill] sm:$0xff] %v10886_v13  ;;  %v1169_v51 = vld [vmem:[#allocation2 + $0x48] sm:$0xff]  ;;  %15170 = vst [vmem:[#allocation167_spill] sm:$0xff] %v10893_v60 }
 0x263   :  { %4444 = vmatpush1.bf16.msra.mxu0 %v10865_v61  ;;  %v1301_v44 = vld [vmem:[#allocation2 + $0x468] sm:$0xff]  ;;  %v10895_v8 = vcombine.high %v1169_v51, %v1173_v55  ;;  %v10901_v47 = vcombine.low %v1169_v51, %v1173_v55 }
 0x264   :  { %4445 = vmatprep.subr.bf16.mxu0 %v10871_v42  ;;  %v10898_v6 = vcombine.high %v1297_v57, %v1301_v44  ;;  %v1165_v42 = vld [vmem:[#allocation2 + $0x28] sm:$0xff]  ;;  %v10905_v56 = vcombine.low %v1297_v57, %v1301_v44 }
 0x265   :  { %4485 = vmatpush1.bf16.msra.mxu1 %v10869_v48  ;;  %15171 = vst [vmem:[#allocation168_spill] sm:$0xff] %v10895_v8  ;;  %v1289_v48 = vld [vmem:[#allocation2 + $0x408] sm:$0xff]  ;;  %15173 = vst [vmem:[#allocation170_spill] sm:$0xff] %v10901_v47 }
 0x266   :  { %4486 = vmatprep.subr.bf16.mxu1 %v10874_v7  ;;  %15172 = vst [vmem:[#allocation169_spill] sm:$0xff] %v10898_v6  ;;  %v1161_v7 = vld [vmem:[#allocation2 + $0x8] sm:$0xff]  ;;  %15174 = vst [vmem:[#allocation171_spill] sm:$0xff] %v10905_v56 }
 0x267   :  { %4446 = vmatpush1.bf16.msra.mxu0 %v10877_v14  ;;  %v1293_v61 = vld [vmem:[#allocation2 + $0x428] sm:$0xff]  ;;  %v10907_v17 = vcombine.high %v1161_v7, %v1165_v42  ;;  %v10913_v55 = vcombine.low %v1161_v7, %v1165_v42 }
 0x268   :  { %4447 = vmatprep.subr.bf16.mxu0 %v10883_v59  ;;  %v10910_v35 = vcombine.high %v1289_v48, %v1293_v61  ;;  %v1285_v59 = vld [vmem:[#allocation2 + $0x3e8] sm:$0xff]  ;;  %v10917_v44 = vcombine.low %v1289_v48, %v1293_v61 }
 0x269   :  { %4487 = vmatpush1.bf16.msra.mxu1 %v10881_v45  ;;  %15175 = vst [vmem:[#allocation172_spill] sm:$0xff] %v10907_v17  ;;  %v1409_v45 = vld [vmem:[#allocation2 + $0x7c8] sm:$0xff]  ;;  %15177 = vst [vmem:[#allocation174_spill] sm:$0xff] %v10913_v55 }
 0x26a   :  { %4488 = vmatprep.subr.bf16.mxu1 %v10886_v13  ;;  %15176 = vst [vmem:[#allocation173_spill] sm:$0xff] %v10910_v35  ;;  %v1281_v13 = vld [vmem:[#allocation2 + $0x3c8] sm:$0xff]  ;;  %15178 = vst [vmem:[#allocation175_spill] sm:$0xff] %v10917_v44 }
 0x26b   :  { %4448 = vmatpush1.bf16.msra.mxu0 %v10889_v62  ;;  %v1413_v14 = vld [vmem:[#allocation2 + $0x7e8] sm:$0xff]  ;;  %v10919_v57 = vcombine.high %v1281_v13, %v1285_v59  ;;  %v10925_v42 = vcombine.low %v1281_v13, %v1285_v59 }
 0x26c   :  { %4449 = vmatprep.subr.bf16.mxu0 %v10895_v8  ;;  %v10922_v51 = vcombine.high %v1409_v45, %v1413_v14  ;;  %v1277_v8 = vld [vmem:[#allocation2 + $0x3a8] sm:$0xff]  ;;  %v10929_v61 = vcombine.low %v1409_v45, %v1413_v14 }
 0x26d   :  { %4489 = vmatpush1.bf16.msra.mxu1 %v10893_v60  ;;  %15179 = vst [vmem:[#allocation176_spill] sm:$0xff] %v10919_v57  ;;  %v1401_v60 = vld [vmem:[#allocation2 + $0x788] sm:$0xff]  ;;  %15181 = vst [vmem:[#allocation178_spill] sm:$0xff] %v10925_v42 }
 0x26e   :  { %4490 = vmatprep.subr.bf16.mxu1 %v10898_v6  ;;  %15180 = vst [vmem:[#allocation177_spill] sm:$0xff] %v10922_v51  ;;  %v1273_v6 = vld [vmem:[#allocation2 + $0x388] sm:$0xff]  ;;  %15182 = vst [vmem:[#allocation179_spill] sm:$0xff] %v10929_v61 }
 0x26f   :  { %4450 = vmatpush1.bf16.msra.mxu0 %v10901_v47  ;;  %v1405_v62 = vld [vmem:[#allocation2 + $0x7a8] sm:$0xff]  ;;  %v10931_v48 = vcombine.high %v1273_v6, %v1277_v8  ;;  %v10937_v59 = vcombine.low %v1273_v6, %v1277_v8 }
 0x270   :  { %4451 = vmatprep.subr.bf16.mxu0 %v10907_v17  ;;  %v10934_v7 = vcombine.high %v1401_v60, %v1405_v62  ;;  %v1269_v17 = vld [vmem:[#allocation2 + $0x368] sm:$0xff]  ;;  %v10941_v14 = vcombine.low %v1401_v60, %v1405_v62 }
 0x271   :  { %4491 = vmatpush1.bf16.msra.mxu1 %v10905_v56  ;;  %15183 = vst [vmem:[#allocation180_spill] sm:$0xff] %v10931_v48  ;;  %v1393_v56 = vld [vmem:[#allocation2 + $0x748] sm:$0xff]  ;;  %15185 = vst [vmem:[#allocation182_spill] sm:$0xff] %v10937_v59 }
 0x272   :  { %4492 = vmatprep.subr.bf16.mxu1 %v10910_v35  ;;  %15184 = vst [vmem:[#allocation181_spill] sm:$0xff] %v10934_v7  ;;  %v1265_v35 = vld [vmem:[#allocation2 + $0x348] sm:$0xff]  ;;  %15186 = vst [vmem:[#allocation183_spill] sm:$0xff] %v10941_v14 }
 0x273   :  { %4452 = vmatpush1.bf16.msra.mxu0 %v10913_v55  ;;  %v1397_v47 = vld [vmem:[#allocation2 + $0x768] sm:$0xff]  ;;  %v10943_v45 = vcombine.high %v1265_v35, %v1269_v17  ;;  %v10949_v8 = vcombine.low %v1265_v35, %v1269_v17 }
 0x274   :  { %4453 = vmatprep.subr.bf16.mxu0 %v10919_v57  ;;  %v10946_v13 = vcombine.high %v1393_v56, %v1397_v47  ;;  %v1261_v57 = vld [vmem:[#allocation2 + $0x328] sm:$0xff]  ;;  %v10953_v62 = vcombine.low %v1393_v56, %v1397_v47 }
 0x275   :  { %4493 = vmatpush1.bf16.msra.mxu1 %v10917_v44  ;;  %15187 = vst [vmem:[#allocation184_spill] sm:$0xff] %v10943_v45  ;;  %v1385_v44 = vld [vmem:[#allocation2 + $0x708] sm:$0xff]  ;;  %15189 = vst [vmem:[#allocation186_spill] sm:$0xff] %v10949_v8 }
 0x276   :  { %4494 = vmatprep.subr.bf16.mxu1 %v10922_v51  ;;  %15188 = vst [vmem:[#allocation185_spill] sm:$0xff] %v10946_v13  ;;  %v1257_v51 = vld [vmem:[#allocation2 + $0x308] sm:$0xff]  ;;  %15190 = vst [vmem:[#allocation187_spill] sm:$0xff] %v10953_v62 }
 0x277   :  { %4454 = vmatpush2.bf16.msra.mxu0 %v10925_v42  ;;  %v1389_v55 = vld [vmem:[#allocation2 + $0x728] sm:$0xff]  ;;  %v10955_v60 = vcombine.high %v1257_v51, %v1261_v57  ;;  %v10961_v17 = vcombine.low %v1257_v51, %v1261_v57 }
 0x278   :  { %4455 = vmatprep.subr.bf16.mxu0 %v10931_v48  ;;  %v10958_v6 = vcombine.high %v1385_v44, %v1389_v55  ;;  %v1253_v48 = vld [vmem:[#allocation2 + $0x2e8] sm:$0xff]  ;;  %v10965_v47 = vcombine.low %v1385_v44, %v1389_v55 }
 0x279   :  { %4495 = vmatpush2.bf16.msra.mxu1 %v10929_v61  ;;  %15191 = vst [vmem:[#allocation188_spill] sm:$0xff] %v10955_v60  ;;  %v1377_v61 = vld [vmem:[#allocation2 + $0x6c8] sm:$0xff]  ;;  %15193 = vst [vmem:[#allocation190_spill] sm:$0xff] %v10961_v17 }
 0x27a   :  { %4496 = vmatprep.subr.bf16.mxu1 %v10934_v7  ;;  %15192 = vst [vmem:[#allocation189_spill] sm:$0xff] %v10958_v6  ;;  %v1249_v7 = vld [vmem:[#allocation2 + $0x2c8] sm:$0xff]  ;;  %15194 = vst [vmem:[#allocation191_spill] sm:$0xff] %v10965_v47 }
 0x27b   :  { %4456 = vmatpush2.bf16.msra.mxu0 %v10937_v59  ;;  %v1381_v42 = vld [vmem:[#allocation2 + $0x6e8] sm:$0xff]  ;;  %v10967_v56 = vcombine.high %v1249_v7, %v1253_v48  ;;  %v10973_v57 = vcombine.low %v1249_v7, %v1253_v48 }
 0x27c   :  { %4457 = vmatprep.subr.bf16.mxu0 %v10943_v45  ;;  %v10970_v35 = vcombine.high %v1377_v61, %v1381_v42  ;;  %v1245_v45 = vld [vmem:[#allocation2 + $0x2a8] sm:$0xff]  ;;  %v10977_v55 = vcombine.low %v1377_v61, %v1381_v42 }
 0x27d   :  { %4497 = vmatpush2.bf16.msra.mxu1 %v10941_v14  ;;  %15195 = vst [vmem:[#allocation192_spill] sm:$0xff] %v10967_v56  ;;  %v1369_v14 = vld [vmem:[#allocation2 + $0x688] sm:$0xff]  ;;  %15197 = vst [vmem:[#allocation194_spill] sm:$0xff] %v10973_v57 }
 0x27e   :  { %4498 = vmatprep.subr.bf16.mxu1 %v10946_v13  ;;  %15196 = vst [vmem:[#allocation193_spill] sm:$0xff] %v10970_v35  ;;  %v1241_v13 = vld [vmem:[#allocation2 + $0x288] sm:$0xff]  ;;  %15198 = vst [vmem:[#allocation195_spill] sm:$0xff] %v10977_v55 }
 0x27f   :  { %4458 = vmatpush2.bf16.msra.mxu0 %v10949_v8  ;;  %v1373_v59 = vld [vmem:[#allocation2 + $0x6a8] sm:$0xff]  ;;  %v10979_v44 = vcombine.high %v1241_v13, %v1245_v45  ;;  %v10985_v48 = vcombine.low %v1241_v13, %v1245_v45 }
 0x280   :  { %4459 = vmatprep.subr.bf16.mxu0 %v10955_v60  ;;  %v10982_v51 = vcombine.high %v1369_v14, %v1373_v59  ;;  %v1237_v60 = vld [vmem:[#allocation2 + $0x268] sm:$0xff]  ;;  %v10989_v42 = vcombine.low %v1369_v14, %v1373_v59 }
 0x281   :  { %4499 = vmatpush2.bf16.msra.mxu1 %v10953_v62  ;;  %15199 = vst [vmem:[#allocation196_spill] sm:$0xff] %v10979_v44  ;;  %v1361_v62 = vld [vmem:[#allocation2 + $0x648] sm:$0xff]  ;;  %15201 = vst [vmem:[#allocation198_spill] sm:$0xff] %v10985_v48 }
 0x282   :  { %4500 = vmatprep.subr.bf16.mxu1 %v10958_v6  ;;  %15200 = vst [vmem:[#allocation197_spill] sm:$0xff] %v10982_v51  ;;  %v1233_v6 = vld [vmem:[#allocation2 + $0x248] sm:$0xff]  ;;  %15202 = vst [vmem:[#allocation199_spill] sm:$0xff] %v10989_v42 }
 0x283   :  { %4460 = vmatpush2.bf16.msra.mxu0 %v10961_v17  ;;  %v1365_v8 = vld [vmem:[#allocation2 + $0x668] sm:$0xff]  ;;  %v10991_v61 = vcombine.high %v1233_v6, %v1237_v60  ;;  %v10997_v45 = vcombine.low %v1233_v6, %v1237_v60 }
 0x284   :  { %4461 = vmatprep.subr.bf16.mxu0 %v10967_v56  ;;  %v10994_v7 = vcombine.high %v1361_v62, %v1365_v8  ;;  %v1229_v56 = vld [vmem:[#allocation2 + $0x228] sm:$0xff]  ;;  %v11001_v59 = vcombine.low %v1361_v62, %v1365_v8 }
 0x285   :  { %4501 = vmatpush2.bf16.msra.mxu1 %v10965_v47  ;;  %15203 = vst [vmem:[#allocation200_spill] sm:$0xff] %v10991_v61  ;;  %v1353_v47 = vld [vmem:[#allocation2 + $0x608] sm:$0xff]  ;;  %15205 = vst [vmem:[#allocation202_spill] sm:$0xff] %v10997_v45 }
 0x286   :  { %4502 = vmatprep.subr.bf16.mxu1 %v10970_v35  ;;  %15204 = vst [vmem:[#allocation201_spill] sm:$0xff] %v10994_v7  ;;  %v1225_v35 = vld [vmem:[#allocation2 + $0x208] sm:$0xff]  ;;  %15206 = vst [vmem:[#allocation203_spill] sm:$0xff] %v11001_v59 }
 0x287   :  { %4462 = vmatpush2.bf16.msra.mxu0 %v10973_v57  ;;  %v1357_v17 = vld [vmem:[#allocation2 + $0x628] sm:$0xff]  ;;  %v11003_v14 = vcombine.high %v1225_v35, %v1229_v56  ;;  %v11009_v60 = vcombine.low %v1225_v35, %v1229_v56 }
 0x288   :  { %4463 = vmatprep.subr.bf16.mxu0 %v10979_v44  ;;  %v11006_v13 = vcombine.high %v1353_v47, %v1357_v17  ;;  %v1477_v44 = vld [vmem:[#allocation2 + $0x9e8] sm:$0xff]  ;;  %v11013_v8 = vcombine.low %v1353_v47, %v1357_v17 }
 0x289   :  { %4503 = vmatpush2.bf16.msra.mxu1 %v10977_v55  ;;  %15207 = vst [vmem:[#allocation204_spill] sm:$0xff] %v11003_v14  ;;  %v1601_v55 = vld [vmem:[#allocation2 + $0xdc8] sm:$0xff]  ;;  %15209 = vst [vmem:[#allocation206_spill] sm:$0xff] %v11009_v60 }
 0x28a   :  { %4504 = vmatprep.subr.bf16.mxu1 %v10982_v51  ;;  %15208 = vst [vmem:[#allocation205_spill] sm:$0xff] %v11006_v13  ;;  %v1473_v51 = vld [vmem:[#allocation2 + $0x9c8] sm:$0xff]  ;;  %15210 = vst [vmem:[#allocation207_spill] sm:$0xff] %v11013_v8 }
 0x28b   :  { %4464 = vmatpush2.bf16.msra.mxu0 %v10985_v48  ;;  %v1605_v57 = vld [vmem:[#allocation2 + $0xde8] sm:$0xff]  ;;  %v11015_v62 = vcombine.high %v1473_v51, %v1477_v44  ;;  %v11021_v56 = vcombine.low %v1473_v51, %v1477_v44 }
 0x28c   :  { %4465 = vmatprep.subr.bf16.mxu0 %v10991_v61  ;;  %v11018_v6 = vcombine.high %v1601_v55, %v1605_v57  ;;  %v1469_v61 = vld [vmem:[#allocation2 + $0x9a8] sm:$0xff]  ;;  %v11025_v17 = vcombine.low %v1601_v55, %v1605_v57 }
 0x28d   :  { %4505 = vmatpush2.bf16.msra.mxu1 %v10989_v42  ;;  %15211 = vst [vmem:[#allocation208_spill] sm:$0xff] %v11015_v62  ;;  %v1593_v42 = vld [vmem:[#allocation2 + $0xd88] sm:$0xff]  ;;  %15213 = vst [vmem:[#allocation210_spill] sm:$0xff] %v11021_v56 }
 0x28e   :  { %4506 = vmatprep.subr.bf16.mxu1 %v10994_v7  ;;  %15212 = vst [vmem:[#allocation209_spill] sm:$0xff] %v11018_v6  ;;  %v1465_v7 = vld [vmem:[#allocation2 + $0x988] sm:$0xff]  ;;  %15214 = vst [vmem:[#allocation211_spill] sm:$0xff] %v11025_v17 }
 0x28f   :  { %4466 = vmatpush2.bf16.msra.mxu0 %v10997_v45  ;;  %v1597_v48 = vld [vmem:[#allocation2 + $0xda8] sm:$0xff]  ;;  %v11027_v47 = vcombine.high %v1465_v7, %v1469_v61  ;;  %v11035_v44 = vcombine.low %v1465_v7, %v1469_v61 }
 0x290   :  { %4467 = vmatprep.subr.bf16.mxu0 %v11003_v14  ;;  %v11030_v35 = vcombine.high %v1593_v42, %v1597_v48  ;;  %v1461_v14 = vld [vmem:[#allocation2 + $0x968] sm:$0xff]  ;;  %v11039_v57 = vcombine.low %v1593_v42, %v1597_v48 }
 0x291   :  { %4507 = vmatpush2.bf16.msra.mxu1 %v11001_v59  ;;  %15215 = vst [vmem:[#allocation212_spill] sm:$0xff] %v11027_v47  ;;  %v1585_v59 = vld [vmem:[#allocation2 + $0xd48] sm:$0xff]  ;;  %15217 = vst [vmem:[#allocation214_spill] sm:$0xff] %v11035_v44 }
 0x292   :  { %4508 = vmatprep.subr.bf16.mxu1 %v11006_v13  ;;  %15216 = vst [vmem:[#allocation213_spill] sm:$0xff] %v11030_v35  ;;  %v1457_v13 = vld [vmem:[#allocation2 + $0x948] sm:$0xff]  ;;  %15218 = vst [vmem:[#allocation215_spill] sm:$0xff] %v11039_v57 }
 0x293   :  { %4468 = vmatpush2.bf16.msra.mxu0 %v11009_v60  ;;  %v1589_v60 = vld [vmem:[#allocation2 + $0xd68] sm:$0xff]  ;;  %v11041_v55 = vcombine.high %v1457_v13, %v1461_v14  ;;  %v11049_v61 = vcombine.low %v1457_v13, %v1461_v14 }
 0x294   :  { %4519 = vmatprep.subr.bf16.mxu0 %v11015_v62  ;;  %v11044_v51 = vcombine.high %v1585_v59, %v1589_v60  ;;  %v1453_v62 = vld [vmem:[#allocation2 + $0x928] sm:$0xff]  ;;  %v11053_v48 = vcombine.low %v1585_v59, %v1589_v60 }
 0x295   :  { %4509 = vmatpush2.bf16.msra.mxu1 %v11013_v8  ;;  %15219 = vst [vmem:[#allocation216_spill] sm:$0xff] %v11041_v55  ;;  %v1577_v8 = vld [vmem:[#allocation2 + $0xd08] sm:$0xff]  ;;  %15221 = vst [vmem:[#allocation218_spill] sm:$0xff] %v11049_v61 }
 0x296   :  { %4560 = vmatprep.subr.bf16.mxu1 %v11018_v6  ;;  %4470 = vmatmul.mubr.bf16.vlgmr.msra.gmra.mxu0 %v10606_v58  ;;  %15220 = vst [vmem:[#allocation217_spill] sm:$0xff] %v11044_v51  ;;  %v1449_v6 = vld [vmem:[#allocation2 + $0x908] sm:$0xff]  ;;  %15222 = vst [vmem:[#allocation219_spill] sm:$0xff] %v11053_v48 }
 0x297   :  { %4520 = vmatpush1.bf16.msra.mxu0 %v11021_v56  ;;  %4551 = vmatprep.mubr.bf16.mxu0 %v10626_v52  ;;  %v1581_v56 = vld [vmem:[#allocation2 + $0xd28] sm:$0xff]  ;;  %v11055_v42 = vcombine.high %v1449_v6, %v1453_v62  ;;  %v11061_v14 = vcombine.low %v1449_v6, %v1453_v62 }
 0x298   :  { %4511 = vmatmul.mubr.bf16.vlgmr.msra.gmra.mxu1 %v10611_v46  ;;  %4521 = vmatprep.subr.bf16.mxu0 %v11027_v47  ;;  %v11058_v7 = vcombine.high %v1577_v8, %v1581_v56  ;;  %v1445_v47 = vld [vmem:[#allocation2 + $0x8e8] sm:$0xff]  ;;  %v11065_v59 = vcombine.low %v1577_v8, %v1581_v56 }
 0x299   :  { %4561 = vmatpush1.bf16.msra.mxu1 %v11025_v17  ;;  %4592 = vmatprep.mubr.bf16.mxu1 %v10631_v4  ;;  %15223 = vst [vmem:[#allocation220_spill] sm:$0xff] %v11055_v42  ;;  %v1569_v17 = vld [vmem:[#allocation2 + $0xcc8] sm:$0xff]  ;;  %15225 = vst [vmem:[#allocation222_spill] sm:$0xff] %v11061_v14 }
 0x29a   :  { %4562 = vmatprep.subr.bf16.mxu1 %v11030_v35  ;;  %15224 = vst [vmem:[#allocation221_spill] sm:$0xff] %v11058_v7  ;;  %v1441_v35 = vld [vmem:[#allocation2 + $0x8c8] sm:$0xff]  ;;  %15226 = vst [vmem:[#allocation223_spill] sm:$0xff] %v11065_v59 }
 0x29b   :  { %4522 = vmatpush1.bf16.msra.mxu0 %v11035_v44  ;;  %v1573_v45 = vld [vmem:[#allocation2 + $0xce8] sm:$0xff]  ;;  %v11067_v13 = vcombine.high %v1441_v35, %v1445_v47  ;;  %v11073_v62 = vcombine.low %v1441_v35, %v1445_v47 }
 0x29c   :  { %4523 = vmatprep.subr.bf16.mxu0 %v11041_v55  ;;  %v11070_v60 = vcombine.high %v1569_v17, %v1573_v45  ;;  %v1437_v55 = vld [vmem:[#allocation2 + $0x8a8] sm:$0xff]  ;;  %v11077_v8 = vcombine.low %v1569_v17, %v1573_v45 }
 0x29d   :  { %4563 = vmatpush1.bf16.msra.mxu1 %v11039_v57  ;;  %15227 = vst [vmem:[#allocation224_spill] sm:$0xff] %v11067_v13  ;;  %v1561_v57 = vld [vmem:[#allocation2 + $0xc88] sm:$0xff]  ;;  %15229 = vst [vmem:[#allocation226_spill] sm:$0xff] %v11073_v62 }
 0x29e   :  { %4564 = vmatprep.subr.bf16.mxu1 %v11044_v51  ;;  %15228 = vst [vmem:[#allocation225_spill] sm:$0xff] %v11070_v60  ;;  %v1433_v51 = vld [vmem:[#allocation2 + $0x888] sm:$0xff]  ;;  %15230 = vst [vmem:[#allocation227_spill] sm:$0xff] %v11077_v8 }
 0x29f   :  { %4524 = vmatpush1.bf16.msra.mxu0 %v11049_v61  ;;  %v1565_v44 = vld [vmem:[#allocation2 + $0xca8] sm:$0xff]  ;;  %v11079_v6 = vcombine.high %v1433_v51, %v1437_v55  ;;  %v11085_v47 = vcombine.low %v1433_v51, %v1437_v55 }
 0x2a0   :  { %4525 = vmatprep.subr.bf16.mxu0 %v11055_v42  ;;  %v11082_v56 = vcombine.high %v1561_v57, %v1565_v44  ;;  %v1429_v42 = vld [vmem:[#allocation2 + $0x868] sm:$0xff]  ;;  %v11089_v45 = vcombine.low %v1561_v57, %v1565_v44 }
 0x2a1   :  { %4565 = vmatpush1.bf16.msra.mxu1 %v11053_v48  ;;  %15231 = vst [vmem:[#allocation228_spill] sm:$0xff] %v11079_v6  ;;  %v1553_v48 = vld [vmem:[#allocation2 + $0xc48] sm:$0xff]  ;;  %15233 = vst [vmem:[#allocation230_spill] sm:$0xff] %v11085_v47 }
 0x2a2   :  { %4566 = vmatprep.subr.bf16.mxu1 %v11058_v7  ;;  %15232 = vst [vmem:[#allocation229_spill] sm:$0xff] %v11082_v56  ;;  %v1425_v7 = vld [vmem:[#allocation2 + $0x848] sm:$0xff]  ;;  %15234 = vst [vmem:[#allocation231_spill] sm:$0xff] %v11089_v45 }
 0x2a3   :  { %4526 = vmatpush1.bf16.msra.mxu0 %v11061_v14  ;;  %v1557_v61 = vld [vmem:[#allocation2 + $0xc68] sm:$0xff]  ;;  %v11091_v17 = vcombine.high %v1425_v7, %v1429_v42  ;;  %v11097_v55 = vcombine.low %v1425_v7, %v1429_v42 }
 0x2a4   :  { %4527 = vmatprep.subr.bf16.mxu0 %v11067_v13  ;;  %v11094_v35 = vcombine.high %v1553_v48, %v1557_v61  ;;  %v1421_v13 = vld [vmem:[#allocation2 + $0x828] sm:$0xff]  ;;  %v11101_v44 = vcombine.low %v1553_v48, %v1557_v61 }
 0x2a5   :  { %4567 = vmatpush1.bf16.msra.mxu1 %v11065_v59  ;;  %15235 = vst [vmem:[#allocation232_spill] sm:$0xff] %v11091_v17  ;;  %v1545_v59 = vld [vmem:[#allocation2 + $0xc08] sm:$0xff]  ;;  %15237 = vst [vmem:[#allocation234_spill] sm:$0xff] %v11097_v55 }
 0x2a6   :  { %4568 = vmatprep.subr.bf16.mxu1 %v11070_v60  ;;  %15236 = vst [vmem:[#allocation233_spill] sm:$0xff] %v11094_v35  ;;  %v1417_v60 = vld [vmem:[#allocation2 + $0x808] sm:$0xff]  ;;  %15238 = vst [vmem:[#allocation235_spill] sm:$0xff] %v11101_v44 }
 0x2a7   :  { %4528 = vmatpush1.bf16.msra.mxu0 %v11073_v62  ;;  %v1549_v14 = vld [vmem:[#allocation2 + $0xc28] sm:$0xff]  ;;  %v11103_v57 = vcombine.high %v1417_v60, %v1421_v13  ;;  %v11109_v42 = vcombine.low %v1417_v60, %v1421_v13 }
 0x2a8   :  { %4529 = vmatprep.subr.bf16.mxu0 %v11079_v6  ;;  %v11106_v51 = vcombine.high %v1545_v59, %v1549_v14  ;;  %v1541_v6 = vld [vmem:[#allocation2 + $0xbe8] sm:$0xff]  ;;  %v11113_v61 = vcombine.low %v1545_v59, %v1549_v14 }
 0x2a9   :  { %4569 = vmatpush1.bf16.msra.mxu1 %v11077_v8  ;;  %15239 = vst [vmem:[#allocation236_spill] sm:$0xff] %v11103_v57  ;;  %v1665_v8 = vld [vmem:[#allocation2 + $0xfc8] sm:$0xff]  ;;  %15241 = vst [vmem:[#allocation238_spill] sm:$0xff] %v11109_v42 }
 0x2aa   :  { %4570 = vmatprep.subr.bf16.mxu1 %v11082_v56  ;;  %15240 = vst [vmem:[#allocation237_spill] sm:$0xff] %v11106_v51  ;;  %v1537_v56 = vld [vmem:[#allocation2 + $0xbc8] sm:$0xff]  ;;  %15242 = vst [vmem:[#allocation239_spill] sm:$0xff] %v11113_v61 }
 0x2ab   :  { %4530 = vmatpush1.bf16.msra.mxu0 %v11085_v47  ;;  %v1669_v62 = vld [vmem:[#allocation2 + $0xfe8] sm:$0xff]  ;;  %v11115_v48 = vcombine.high %v1537_v56, %v1541_v6  ;;  %v11121_v13 = vcombine.low %v1537_v56, %v1541_v6 }
 0x2ac   :  { %4531 = vmatprep.subr.bf16.mxu0 %v11091_v17  ;;  %v11118_v7 = vcombine.high %v1665_v8, %v1669_v62  ;;  %v1533_v17 = vld [vmem:[#allocation2 + $0xba8] sm:$0xff]  ;;  %v11125_v14 = vcombine.low %v1665_v8, %v1669_v62 }
 0x2ad   :  { %4571 = vmatpush1.bf16.msra.mxu1 %v11089_v45  ;;  %15243 = vst [vmem:[#allocation240_spill] sm:$0xff] %v11115_v48  ;;  %v1657_v45 = vld [vmem:[#allocation2 + $0xf88] sm:$0xff]  ;;  %15245 = vst [vmem:[#allocation242_spill] sm:$0xff] %v11121_v13 }
 0x2ae   :  { %4572 = vmatprep.subr.bf16.mxu1 %v11094_v35  ;;  %15244 = vst [vmem:[#allocation241_spill] sm:$0xff] %v11118_v7  ;;  %v1529_v35 = vld [vmem:[#allocation2 + $0xb88] sm:$0xff]  ;;  %15246 = vst [vmem:[#allocation243_spill] sm:$0xff] %v11125_v14 }
 0x2af   :  { %4532 = vmatpush1.bf16.msra.mxu0 %v11097_v55  ;;  %v1661_v47 = vld [vmem:[#allocation2 + $0xfa8] sm:$0xff]  ;;  %v11127_v59 = vcombine.high %v1529_v35, %v1533_v17  ;;  %v11133_v6 = vcombine.low %v1529_v35, %v1533_v17 }
 0x2b0   :  { %4533 = vmatprep.subr.bf16.mxu0 %v11103_v57  ;;  %v11130_v60 = vcombine.high %v1657_v45, %v1661_v47  ;;  %v1525_v57 = vld [vmem:[#allocation2 + $0xb68] sm:$0xff]  ;;  %v11137_v62 = vcombine.low %v1657_v45, %v1661_v47 }
 0x2b1   :  { %4573 = vmatpush1.bf16.msra.mxu1 %v11101_v44  ;;  %15247 = vst [vmem:[#allocation244_spill] sm:$0xff] %v11127_v59  ;;  %v1649_v44 = vld [vmem:[#allocation2 + $0xf48] sm:$0xff]  ;;  %15249 = vst [vmem:[#allocation246_spill] sm:$0xff] %v11133_v6 }
 0x2b2   :  { %4574 = vmatprep.subr.bf16.mxu1 %v11106_v51  ;;  %15248 = vst [vmem:[#allocation245_spill] sm:$0xff] %v11130_v60  ;;  %v1521_v51 = vld [vmem:[#allocation2 + $0xb48] sm:$0xff]  ;;  %15250 = vst [vmem:[#allocation247_spill] sm:$0xff] %v11137_v62 }
 0x2b3   :  { %4534 = vmatpush1.bf16.msra.mxu0 %v11109_v42  ;;  %v1653_v55 = vld [vmem:[#allocation2 + $0xf68] sm:$0xff]  ;;  %v11139_v8 = vcombine.high %v1521_v51, %v1525_v57  ;;  %v11145_v17 = vcombine.low %v1521_v51, %v1525_v57 }
 0x2b4   :  { %4535 = vmatprep.subr.bf16.mxu0 %v11115_v48  ;;  %v11142_v56 = vcombine.high %v1649_v44, %v1653_v55  ;;  %v1517_v48 = vld [vmem:[#allocation2 + $0xb28] sm:$0xff]  ;;  %v11149_v47 = vcombine.low %v1649_v44, %v1653_v55 }
 0x2b5   :  { %4575 = vmatpush1.bf16.msra.mxu1 %v11113_v61  ;;  %15251 = vst [vmem:[#allocation248_spill] sm:$0xff] %v11139_v8  ;;  %v1641_v61 = vld [vmem:[#allocation2 + $0xf08] sm:$0xff]  ;;  %15253 = vst [vmem:[#allocation250_spill] sm:$0xff] %v11145_v17 }
 0x2b6   :  { %4576 = vmatprep.subr.bf16.mxu1 %v11118_v7  ;;  %15252 = vst [vmem:[#allocation249_spill] sm:$0xff] %v11142_v56  ;;  %v1513_v7 = vld [vmem:[#allocation2 + $0xb08] sm:$0xff]  ;;  %15254 = vst [vmem:[#allocation251_spill] sm:$0xff] %v11149_v47 }
 0x2b7   :  { %4536 = vmatpush2.bf16.msra.mxu0 %v11121_v13  ;;  %v1645_v42 = vld [vmem:[#allocation2 + $0xf28] sm:$0xff]  ;;  %v11151_v45 = vcombine.high %v1513_v7, %v1517_v48  ;;  %v11157_v57 = vcombine.low %v1513_v7, %v1517_v48 }
 0x2b8   :  { %4537 = vmatprep.subr.bf16.mxu0 %v11127_v59  ;;  %v11154_v35 = vcombine.high %v1641_v61, %v1645_v42  ;;  %v1509_v59 = vld [vmem:[#allocation2 + $0xae8] sm:$0xff]  ;;  %v11161_v55 = vcombine.low %v1641_v61, %v1645_v42 }
 0x2b9   :  { %4577 = vmatpush2.bf16.msra.mxu1 %v11125_v14  ;;  %15255 = vst [vmem:[#allocation252_spill] sm:$0xff] %v11151_v45  ;;  %v1633_v14 = vld [vmem:[#allocation2 + $0xec8] sm:$0xff]  ;;  %15257 = vst [vmem:[#allocation254_spill] sm:$0xff] %v11157_v57 }
 0x2ba   :  { %4578 = vmatprep.subr.bf16.mxu1 %v11130_v60  ;;  %15256 = vst [vmem:[#allocation253_spill] sm:$0xff] %v11154_v35  ;;  %v1505_v60 = vld [vmem:[#allocation2 + $0xac8] sm:$0xff]  ;;  %15258 = vst [vmem:[#allocation255_spill] sm:$0xff] %v11161_v55 }
 0x2bb   :  { %4538 = vmatpush2.bf16.msra.mxu0 %v11133_v6  ;;  %v1637_v13 = vld [vmem:[#allocation2 + $0xee8] sm:$0xff]  ;;  %v11163_v44 = vcombine.high %v1505_v60, %v1509_v59  ;;  %v11169_v48 = vcombine.low %v1505_v60, %v1509_v59 }
 0x2bc   :  { %4539 = vmatprep.subr.bf16.mxu0 %v11139_v8  ;;  %v11166_v51 = vcombine.high %v1633_v14, %v1637_v13  ;;  %v1501_v8 = vld [vmem:[#allocation2 + $0xaa8] sm:$0xff]  ;;  %v11173_v42 = vcombine.low %v1633_v14, %v1637_v13 }
 0x2bd   :  { %4579 = vmatpush2.bf16.msra.mxu1 %v11137_v62  ;;  %15259 = vst [vmem:[#allocation256_spill] sm:$0xff] %v11163_v44  ;;  %v1625_v62 = vld [vmem:[#allocation2 + $0xe88] sm:$0xff]  ;;  %15261 = vst [vmem:[#allocation258_spill] sm:$0xff] %v11169_v48 }
 0x2be   :  { %4580 = vmatprep.subr.bf16.mxu1 %v11142_v56  ;;  %15260 = vst [vmem:[#allocation257_spill] sm:$0xff] %v11166_v51  ;;  %v1497_v56 = vld [vmem:[#allocation2 + $0xa88] sm:$0xff]  ;;  %15262 = vst [vmem:[#allocation259_spill] sm:$0xff] %v11173_v42 }
 0x2bf   :  { %4540 = vmatpush2.bf16.msra.mxu0 %v11145_v17  ;;  %v1629_v6 = vld [vmem:[#allocation2 + $0xea8] sm:$0xff]  ;;  %v11175_v61 = vcombine.high %v1497_v56, %v1501_v8  ;;  %v11181_v59 = vcombine.low %v1497_v56, %v1501_v8 }
 0x2c0   :  { %4541 = vmatprep.subr.bf16.mxu0 %v11151_v45  ;;  %v11178_v7 = vcombine.high %v1625_v62, %v1629_v6  ;;  %v1493_v45 = vld [vmem:[#allocation2 + $0xa68] sm:$0xff]  ;;  %v11185_v13 = vcombine.low %v1625_v62, %v1629_v6 }
 0x2c1   :  { %4581 = vmatpush2.bf16.msra.mxu1 %v11149_v47  ;;  %15263 = vst [vmem:[#allocation260_spill] sm:$0xff] %v11175_v61  ;;  %v1617_v47 = vld [vmem:[#allocation2 + $0xe48] sm:$0xff]  ;;  %15265 = vst [vmem:[#allocation262_spill] sm:$0xff] %v11181_v59 }
 0x2c2   :  { %4582 = vmatprep.subr.bf16.mxu1 %v11154_v35  ;;  %15264 = vst [vmem:[#allocation261_spill] sm:$0xff] %v11178_v7  ;;  %v1489_v35 = vld [vmem:[#allocation2 + $0xa48] sm:$0xff]  ;;  %15266 = vst [vmem:[#allocation263_spill] sm:$0xff] %v11185_v13 }
 0x2c3   :  { %4542 = vmatpush2.bf16.msra.mxu0 %v11157_v57  ;;  %v1621_v17 = vld [vmem:[#allocation2 + $0xe68] sm:$0xff]  ;;  %v11187_v14 = vcombine.high %v1489_v35, %v1493_v45  ;;  %v11193_v8 = vcombine.low %v1489_v35, %v1493_v45 }
 0x2c4   :  { %4543 = vmatprep.subr.bf16.mxu0 %v11163_v44  ;;  %v11190_v60 = vcombine.high %v1617_v47, %v1621_v17  ;;  %v1485_v44 = vld [vmem:[#allocation2 + $0xa28] sm:$0xff]  ;;  %v11197_v6 = vcombine.low %v1617_v47, %v1621_v17 }
 0x2c5   :  { %4583 = vmatpush2.bf16.msra.mxu1 %v11161_v55  ;;  %15267 = vst [vmem:[#allocation264_spill] sm:$0xff] %v11187_v14  ;;  %v1609_v55 = vld [vmem:[#allocation2 + $0xe08] sm:$0xff]  ;;  %15269 = vst [vmem:[#allocation266_spill] sm:$0xff] %v11193_v8 }
 0x2c6   :  { %4584 = vmatprep.subr.bf16.mxu1 %v11166_v51  ;;  %15268 = vst [vmem:[#allocation265_spill] sm:$0xff] %v11190_v60  ;;  %v1481_v51 = vld [vmem:[#allocation2 + $0xa08] sm:$0xff]  ;;  %15270 = vst [vmem:[#allocation267_spill] sm:$0xff] %v11197_v6 }
 0x2c7   :  { %4544 = vmatpush2.bf16.msra.mxu0 %v11169_v48  ;;  %v1613_v57 = vld [vmem:[#allocation2 + $0xe28] sm:$0xff]  ;;  %v11199_v62 = vcombine.high %v1481_v51, %v1485_v44  ;;  %v1350_v48 = vld [vmem:[#allocation2 + $0x5f0] sm:$0xff]  ;;  %v11205_v45 = vcombine.low %v1481_v51, %v1485_v44  ;;  %v11219_v44 = vrot.slane %v10230_v0, %v10343_v41 }
 0x2c8   :  { %4545 = vmatprep.subr.bf16.mxu0 %v11175_v61  ;;  %v11202_v56 = vcombine.high %v1609_v55, %v1613_v57  ;;  %v1222_v61 = vld [vmem:[#allocation2 + $0x1f0] sm:$0xff]  ;;  %v11209_v17 = vcombine.low %v1609_v55, %v1613_v57 }
 0x2c9   :  { %4585 = vmatpush2.bf16.msra.mxu1 %v11173_v42  ;;  %15271 = vst [vmem:[#allocation268_spill] sm:$0xff] %v11199_v62  ;;  %v1346_v42 = vld [vmem:[#allocation2 + $0x5d0] sm:$0xff]  ;;  %15273 = vst [vmem:[#allocation270_spill] sm:$0xff] %v11205_v45 }
 0x2ca   :  { %4586 = vmatprep.subr.bf16.mxu1 %v11178_v7  ;;  %15272 = vst [vmem:[#allocation269_spill] sm:$0xff] %v11202_v56  ;;  %v1218_v7 = vld [vmem:[#allocation2 + $0x1d0] sm:$0xff]  ;;  %15274 = vst [vmem:[#allocation271_spill] sm:$0xff] %v11209_v17  ;;  %v11214_v35 = vcombine.high %v1346_v42, %v1350_v48  ;;  %v11225_v57 = vcombine.low %v1346_v42, %v1350_v48 }
 0x2cb   :  { %4546 = vmatpush2.bf16.msra.mxu0 %v11181_v59  ;;  %v11211_v47 = vcombine.high %v1218_v7, %v1222_v61  ;;  %v1342_v59 = vld [vmem:[#allocation2 + $0x5b0] sm:$0xff]  ;;  %15277 = vst [vmem:[#allocation274_spill] sm:$0xff] %v11219_v44  ;;  %v11221_v51 = vcombine.low %v1218_v7, %v1222_v61 }
 0x2cc   :  { %4547 = vmatprep.subr.bf16.mxu0 %v11187_v14  ;;  %15276 = vst [vmem:[#allocation273_spill] sm:$0xff] %v11214_v35  ;;  %v1214_v14 = vld [vmem:[#allocation2 + $0x1b0] sm:$0xff]  ;;  %15279 = vst [vmem:[#allocation276_spill] sm:$0xff] %v11225_v57 }
 0x2cd   :  { %4587 = vmatpush2.bf16.msra.mxu1 %v11185_v13  ;;  %15275 = vst [vmem:[#allocation272_spill] sm:$0xff] %v11211_v47  ;;  %v1338_v13 = vld [vmem:[#allocation2 + $0x590] sm:$0xff]  ;;  %15278 = vst [vmem:[#allocation275_spill] sm:$0xff] %v11221_v51 }
 0x2ce   :  { %4588 = vmatprep.subr.bf16.mxu1 %v11190_v60  ;;  %v1210_v60 = vld [vmem:[#allocation2 + $0x190] sm:$0xff] }
 0x2cf   :  { %4548 = vmatpush2.bf16.msra.mxu0 %v11193_v8  ;;  %v11227_v55 = vcombine.high %v1210_v60, %v1214_v14  ;;  %v1330_v7 = vld [vmem:[#allocation2 + $0x550] sm:$0xff]  ;;  %v11244_v8 = vcombine.low %v1338_v13, %v1342_v59 }
 0x2d0   :  { %4549 = vmatprep.subr.bf16.mxu0 %v11199_v62  ;;  %v1202_v62 = vld [vmem:[#allocation2 + $0x150] sm:$0xff] }
 0x2d1   :  { %4589 = vmatpush2.bf16.msra.mxu1 %v11197_v6  ;;  %15280 = vst [vmem:[#allocation277_spill] sm:$0xff] %v11227_v55  ;;  %v1206_v6 = vld [vmem:[#allocation2 + $0x170] sm:$0xff]  ;;  %15284 = vst [vmem:[#allocation281_spill] sm:$0xff] %v11244_v8 }
 0x2d2   :  { %4590 = vmatprep.subr.bf16.mxu1 %v11202_v56  ;;  %v11232_v56 = vrot.slane %v10230_v0, %v10347_v43  ;;  %v11246_v30 = vcombine.high %v1202_v62, %v1206_v6 }
 0x2d3   :  { %4550 = vmatpush2.bf16.msra.mxu0 %v11205_v45  ;;  %v11234_v45 = vcombine.high %v1338_v13, %v1342_v59 }
 0x2d4   :  { %4601 = vmatprep.subr.bf16.mxu0 %v11211_v47  ;;  %15281 = vst [vmem:[#allocation278_spill] sm:$0xff] %v11232_v56  ;;  %15285 = vst [vmem:[#allocation282_spill] sm:$0xff] %v11246_v30 }
 0x2d5   :  { %4591 = vmatpush2.bf16.msra.mxu1 %v11209_v17  ;;  %15282 = vst [vmem:[#allocation279_spill] sm:$0xff] %v11234_v45  ;;  %v1334_v17 = vld [vmem:[#allocation2 + $0x570] sm:$0xff] }
 0x2d6   :  { %4642 = vmatprep.subr.bf16.mxu1 %v11214_v35  ;;  %v4307_v61 = vpop.f32.mrf.mxu0  ;;  %4552 = vmatmul.mubr.bf16.vlgmr.msra.gmra.mxu0 %v10818_v49  ;;  %v11240_v35 = vcombine.low %v1210_v60, %v1214_v14  ;;  %v11252_v27 = vcombine.high %v1330_v7, %v1334_v17  ;;  %v1194_v14 = vld [vmem:[#allocation2 + $0x110] sm:$0xff] }
 0x2d7   :  { %v4308_v48 = vadd.f32 %v4307_v61, %v11219_v44  ;;  %4602 = vmatpush1.bf16.msra.mxu0 %v11221_v51  ;;  %v1198_v60 = vld [vmem:[#allocation2 + $0x130] sm:$0xff]  ;;  %4633 = vmatprep.mubr.bf16.mxu0 %v10404_v19 }
 0x2d8   :  { %v4348_v42 = vpop.f32.mrf.mxu1  ;;  %4593 = vmatmul.mubr.bf16.vlgmr.msra.gmra.mxu1 %v10823_v3  ;;  %15283 = vst [vmem:[#allocation280_spill] sm:$0xff] %v11240_v35  ;;  %v4309_v47 = vpop.f32.mrf.mxu0  ;;  %4603 = vmatprep.subr.bf16.mxu0 %v11227_v55  ;;  %15286 = vst [vmem:[#allocation283_spill] sm:$0xff] %v11252_v27  ;;  %v1322_v51 = vld [vmem:[#allocation2 + $0x510] sm:$0xff] }
 0x2d9   :  { %4643 = vmatpush1.bf16.msra.mxu1 %v11225_v57  ;;  %v11248_v29 = vadd.f32 %v4348_v42, %v4308_v48  ;;  %v4310_v61 = vadd.f32 %v4309_v47, %v11232_v56  ;;  %v1326_v55 = vld [vmem:[#allocation2 + $0x530] sm:$0xff]  ;;  %4674 = vmatprep.mubr.bf16.mxu1 %v10406_v20  ;;  %v11259_v47 = vcombine.low %v1202_v62, %v1206_v6 }
 0x2da   :  { %v4350_v44 = vpop.f32.mrf.mxu1  ;;  %4644 = vmatprep.subr.bf16.mxu1 %v11234_v45  ;;  %v4311_v57 = vpop.f32.mrf.mxu0  ;;  %v11263_v42 = vcombine.low %v1330_v7, %v1334_v17  ;;  %v11265_v45 = vcombine.high %v1194_v14, %v1198_v60  ;;  %v11268_v56 = vcombine.high %v1322_v51, %v1326_v55  ;;  %v11271_v6 = vcombine.low %v1194_v14, %v1198_v60 }
 0x2db   :  { %v11256_v59 = vadd.f32 %v4350_v44, %v4310_v61  ;;  %4604 = vmatpush1.bf16.msra.mxu0 %v11240_v35  ;;  %15287 = vst [vmem:[#allocation284_spill] sm:$0xff] %v11259_v47  ;;  %v1186_v44 = vld [vmem:[#allocation2 + $0xd0] sm:$0xff]  ;;  %v11275_v62 = vcombine.low %v1322_v51, %v1326_v55 }
 0x2dc   :  { %v4352_v13 = vpop.f32.mrf.mxu1  ;;  %v4312_v48 = vpop.f32.mrf.mxu0  ;;  %4605 = vmatprep.subr.bf16.mxu0 %v11246_v30  ;;  %15288 = vst [vmem:[#allocation285_spill] sm:$0xff] %v11263_v42  ;;  %15289 = vst [vmem:[#allocation286_spill] sm:$0xff] %v11265_v45  ;;  %v1190_v61 = vld [vmem:[#allocation2 + $0xf0] sm:$0xff] }
 0x2dd   :  { %4645 = vmatpush1.bf16.msra.mxu1 %v11244_v8  ;;  %15290 = vst [vmem:[#allocation287_spill] sm:$0xff] %v11268_v56  ;;  %v1314_v13 = vld [vmem:[#allocation2 + $0x4d0] sm:$0xff]  ;;  %15291 = vst [vmem:[#allocation288_spill] sm:$0xff] %v11271_v6  ;;  %v11277_v17 = vcombine.high %v1186_v44, %v1190_v61  ;;  %v11283_v14 = vcombine.low %v1186_v44, %v1190_v61 }
 0x2de   :  { %v4353_v57 = vpop.f32.mrf.mxu1  ;;  %4646 = vmatprep.subr.bf16.mxu1 %v11252_v27  ;;  %v1318_v35 = vld [vmem:[#allocation2 + $0x4f0] sm:$0xff]  ;;  %15292 = vst [vmem:[#allocation289_spill] sm:$0xff] %v11275_v62 }
 0x2df   :  { %4606 = vmatpush1.bf16.msra.mxu0 %v11259_v47  ;;  %15293 = vst [vmem:[#allocation290_spill] sm:$0xff] %v11277_v17  ;;  %v11280_v7 = vcombine.high %v1314_v13, %v1318_v35  ;;  %v1178_v48 = vld [vmem:[#allocation2 + $0x90] sm:$0xff]  ;;  %15295 = vst [vmem:[#allocation292_spill] sm:$0xff] %v11283_v14  ;;  %v11287_v51 = vcombine.low %v1314_v13, %v1318_v35 }
 0x2e0   :  { %4607 = vmatprep.subr.bf16.mxu0 %v11265_v45  ;;  %v1182_v57 = vld [vmem:[#allocation2 + $0xb0] sm:$0xff] }
 0x2e1   :  { %4647 = vmatpush1.bf16.msra.mxu1 %v11263_v42  ;;  %15294 = vst [vmem:[#allocation291_spill] sm:$0xff] %v11280_v7  ;;  %v1306_v27 = vld [vmem:[#allocation2 + $0x490] sm:$0xff]  ;;  %15296 = vst [vmem:[#allocation293_spill] sm:$0xff] %v11287_v51  ;;  %v11289_v55 = vcombine.high %v1178_v48, %v1182_v57  ;;  %v11295_v44 = vcombine.low %v1178_v48, %v1182_v57 }
 0x2e2   :  { %4648 = vmatprep.subr.bf16.mxu1 %v11268_v56  ;;  %v1310_v30 = vld [vmem:[#allocation2 + $0x4b0] sm:$0xff] }
 0x2e3   :  { %4608 = vmatpush1.bf16.msra.mxu0 %v11271_v6  ;;  %15297 = vst [vmem:[#allocation294_spill] sm:$0xff] %v11289_v55  ;;  %v11292_v60 = vcombine.high %v1306_v27, %v1310_v30  ;;  %v1170_v56 = vld [vmem:[#allocation2 + $0x50] sm:$0xff]  ;;  %15299 = vst [vmem:[#allocation296_spill] sm:$0xff] %v11295_v44  ;;  %v11299_v35 = vcombine.low %v1306_v27, %v1310_v30 }
 0x2e4   :  { %4609 = vmatprep.subr.bf16.mxu0 %v11277_v17  ;;  %v1174_v45 = vld [vmem:[#allocation2 + $0x70] sm:$0xff] }
 0x2e5   :  { %4649 = vmatpush1.bf16.msra.mxu1 %v11275_v62  ;;  %15298 = vst [vmem:[#allocation295_spill] sm:$0xff] %v11292_v60  ;;  %v1298_v42 = vld [vmem:[#allocation2 + $0x450] sm:$0xff]  ;;  %15300 = vst [vmem:[#allocation297_spill] sm:$0xff] %v11299_v35  ;;  %v11301_v61 = vcombine.high %v1170_v56, %v1174_v45  ;;  %v11307_v48 = vcombine.low %v1170_v56, %v1174_v45 }
 0x2e6   :  { %4650 = vmatprep.subr.bf16.mxu1 %v11280_v7  ;;  %v1302_v47 = vld [vmem:[#allocation2 + $0x470] sm:$0xff] }
 0x2e7   :  { %4610 = vmatpush1.bf16.msra.mxu0 %v11283_v14  ;;  %15301 = vst [vmem:[#allocation298_spill] sm:$0xff] %v11301_v61  ;;  %v11304_v13 = vcombine.high %v1298_v42, %v1302_v47  ;;  %v1162_v7 = vld [vmem:[#allocation2 + $0x10] sm:$0xff]  ;;  %15303 = vst [vmem:[#allocation300_spill] sm:$0xff] %v11307_v48  ;;  %v11311_v27 = vcombine.low %v1298_v42, %v1302_v47 }
 0x2e8   :  { %4611 = vmatprep.subr.bf16.mxu0 %v11289_v55  ;;  %v1166_v17 = vld [vmem:[#allocation2 + $0x30] sm:$0xff] }
 0x2e9   :  { %4651 = vmatpush1.bf16.msra.mxu1 %v11287_v51  ;;  %15302 = vst [vmem:[#allocation299_spill] sm:$0xff] %v11304_v13  ;;  %v1290_v62 = vld [vmem:[#allocation2 + $0x410] sm:$0xff]  ;;  %15304 = vst [vmem:[#allocation301_spill] sm:$0xff] %v11311_v27  ;;  %v11313_v30 = vcombine.high %v1162_v7, %v1166_v17  ;;  %v11319_v56 = vcombine.low %v1162_v7, %v1166_v17 }
 0x2ea   :  { %4652 = vmatprep.subr.bf16.mxu1 %v11292_v60  ;;  %v1294_v6 = vld [vmem:[#allocation2 + $0x430] sm:$0xff] }
 0x2eb   :  { %4612 = vmatpush1.bf16.msra.mxu0 %v11295_v44  ;;  %15305 = vst [vmem:[#allocation302_spill] sm:$0xff] %v11313_v30  ;;  %v11316_v57 = vcombine.high %v1290_v62, %v1294_v6  ;;  %v1282_v60 = vld [vmem:[#allocation2 + $0x3d0] sm:$0xff]  ;;  %15307 = vst [vmem:[#allocation304_spill] sm:$0xff] %v11319_v56  ;;  %v11323_v45 = vcombine.low %v1290_v62, %v1294_v6 }
 0x2ec   :  { %4613 = vmatprep.subr.bf16.mxu0 %v11301_v61  ;;  %v1286_v55 = vld [vmem:[#allocation2 + $0x3f0] sm:$0xff] }
 0x2ed   :  { %4653 = vmatpush1.bf16.msra.mxu1 %v11299_v35  ;;  %15306 = vst [vmem:[#allocation303_spill] sm:$0xff] %v11316_v57  ;;  %v1410_v51 = vld [vmem:[#allocation2 + $0x7d0] sm:$0xff]  ;;  %15308 = vst [vmem:[#allocation305_spill] sm:$0xff] %v11323_v45  ;;  %v11325_v47 = vcombine.high %v1282_v60, %v1286_v55  ;;  %v11331_v17 = vcombine.low %v1282_v60, %v1286_v55 }
 0x2ee   :  { %4654 = vmatprep.subr.bf16.mxu1 %v11304_v13  ;;  %v1414_v14 = vld [vmem:[#allocation2 + $0x7f0] sm:$0xff] }
 0x2ef   :  { %4614 = vmatpush1.bf16.msra.mxu0 %v11307_v48  ;;  %15309 = vst [vmem:[#allocation306_spill] sm:$0xff] %v11325_v47  ;;  %v11328_v42 = vcombine.high %v1410_v51, %v1414_v14  ;;  %v1274_v13 = vld [vmem:[#allocation2 + $0x390] sm:$0xff]  ;;  %15311 = vst [vmem:[#allocation308_spill] sm:$0xff] %v11331_v17  ;;  %v11335_v6 = vcombine.low %v1410_v51, %v1414_v14 }
 0x2f0   :  { %4615 = vmatprep.subr.bf16.mxu0 %v11313_v30  ;;  %v1278_v61 = vld [vmem:[#allocation2 + $0x3b0] sm:$0xff] }
 0x2f1   :  { %4655 = vmatpush1.bf16.msra.mxu1 %v11311_v27  ;;  %15310 = vst [vmem:[#allocation307_spill] sm:$0xff] %v11328_v42  ;;  %v1402_v35 = vld [vmem:[#allocation2 + $0x790] sm:$0xff]  ;;  %15312 = vst [vmem:[#allocation309_spill] sm:$0xff] %v11335_v6  ;;  %v11337_v62 = vcombine.high %v1274_v13, %v1278_v61  ;;  %v11343_v55 = vcombine.low %v1274_v13, %v1278_v61 }
 0x2f2   :  { %4656 = vmatprep.subr.bf16.mxu1 %v11316_v57  ;;  %v1406_v44 = vld [vmem:[#allocation2 + $0x7b0] sm:$0xff] }
 0x2f3   :  { %4616 = vmatpush1.bf16.msra.mxu0 %v11319_v56  ;;  %15313 = vst [vmem:[#allocation310_spill] sm:$0xff] %v11337_v62  ;;  %v11340_v7 = vcombine.high %v1402_v35, %v1406_v44  ;;  %v1266_v57 = vld [vmem:[#allocation2 + $0x350] sm:$0xff]  ;;  %15315 = vst [vmem:[#allocation312_spill] sm:$0xff] %v11343_v55  ;;  %v11347_v14 = vcombine.low %v1402_v35, %v1406_v44 }
 0x2f4   :  { %4617 = vmatprep.subr.bf16.mxu0 %v11325_v47  ;;  %v1270_v30 = vld [vmem:[#allocation2 + $0x370] sm:$0xff] }
 0x2f5   :  { %4657 = vmatpush1.bf16.msra.mxu1 %v11323_v45  ;;  %15314 = vst [vmem:[#allocation311_spill] sm:$0xff] %v11340_v7  ;;  %v1394_v27 = vld [vmem:[#allocation2 + $0x750] sm:$0xff]  ;;  %15316 = vst [vmem:[#allocation313_spill] sm:$0xff] %v11347_v14  ;;  %v11349_v51 = vcombine.high %v1266_v57, %v1270_v30  ;;  %v11355_v61 = vcombine.low %v1266_v57, %v1270_v30 }
 0x2f6   :  { %4658 = vmatprep.subr.bf16.mxu1 %v11328_v42  ;;  %v1398_v48 = vld [vmem:[#allocation2 + $0x770] sm:$0xff] }
 0x2f7   :  { %4618 = vmatpush2.bf16.msra.mxu0 %v11331_v17  ;;  %15317 = vst [vmem:[#allocation314_spill] sm:$0xff] %v11349_v51  ;;  %v11352_v60 = vcombine.high %v1394_v27, %v1398_v48  ;;  %v1258_v42 = vld [vmem:[#allocation2 + $0x310] sm:$0xff]  ;;  %15319 = vst [vmem:[#allocation316_spill] sm:$0xff] %v11355_v61  ;;  %v11359_v44 = vcombine.low %v1394_v27, %v1398_v48 }
 0x2f8   :  { %4619 = vmatprep.subr.bf16.mxu0 %v11337_v62  ;;  %v1262_v47 = vld [vmem:[#allocation2 + $0x330] sm:$0xff] }
 0x2f9   :  { %4659 = vmatpush2.bf16.msra.mxu1 %v11335_v6  ;;  %15318 = vst [vmem:[#allocation315_spill] sm:$0xff] %v11352_v60  ;;  %v1386_v45 = vld [vmem:[#allocation2 + $0x710] sm:$0xff]  ;;  %15320 = vst [vmem:[#allocation317_spill] sm:$0xff] %v11359_v44  ;;  %v11361_v35 = vcombine.high %v1258_v42, %v1262_v47  ;;  %v11367_v30 = vcombine.low %v1258_v42, %v1262_v47 }
 0x2fa   :  { %4660 = vmatprep.subr.bf16.mxu1 %v11340_v7  ;;  %v1390_v56 = vld [vmem:[#allocation2 + $0x730] sm:$0xff] }
 0x2fb   :  { %4620 = vmatpush2.bf16.msra.mxu0 %v11343_v55  ;;  %15321 = vst [vmem:[#allocation318_spill] sm:$0xff] %v11361_v35  ;;  %v11364_v13 = vcombine.high %v1386_v45, %v1390_v56  ;;  %v1250_v7 = vld [vmem:[#allocation2 + $0x2d0] sm:$0xff]  ;;  %15323 = vst [vmem:[#allocation320_spill] sm:$0xff] %v11367_v30  ;;  %v11371_v48 = vcombine.low %v1386_v45, %v1390_v56 }
 0x2fc   :  { %4621 = vmatprep.subr.bf16.mxu0 %v11349_v51  ;;  %v1254_v62 = vld [vmem:[#allocation2 + $0x2f0] sm:$0xff] }
 0x2fd   :  { %4661 = vmatpush2.bf16.msra.mxu1 %v11347_v14  ;;  %15322 = vst [vmem:[#allocation319_spill] sm:$0xff] %v11364_v13  ;;  %v1378_v6 = vld [vmem:[#allocation2 + $0x6d0] sm:$0xff]  ;;  %15324 = vst [vmem:[#allocation321_spill] sm:$0xff] %v11371_v48  ;;  %v11373_v27 = vcombine.high %v1250_v7, %v1254_v62  ;;  %v11379_v47 = vcombine.low %v1250_v7, %v1254_v62 }
 0x2fe   :  { %4662 = vmatprep.subr.bf16.mxu1 %v11352_v60  ;;  %v1382_v17 = vld [vmem:[#allocation2 + $0x6f0] sm:$0xff] }
 0x2ff   :  { %4622 = vmatpush2.bf16.msra.mxu0 %v11355_v61  ;;  %15325 = vst [vmem:[#allocation322_spill] sm:$0xff] %v11373_v27  ;;  %v11376_v57 = vcombine.high %v1378_v6, %v1382_v17  ;;  %v1242_v60 = vld [vmem:[#allocation2 + $0x290] sm:$0xff]  ;;  %15327 = vst [vmem:[#allocation324_spill] sm:$0xff] %v11379_v47  ;;  %v11383_v56 = vcombine.low %v1378_v6, %v1382_v17 }
 0x300   :  { %4623 = vmatprep.subr.bf16.mxu0 %v11361_v35  ;;  %v1246_v51 = vld [vmem:[#allocation2 + $0x2b0] sm:$0xff] }
 0x301   :  { %4663 = vmatpush2.bf16.msra.mxu1 %v11359_v44  ;;  %15326 = vst [vmem:[#allocation323_spill] sm:$0xff] %v11376_v57  ;;  %v1370_v14 = vld [vmem:[#allocation2 + $0x690] sm:$0xff]  ;;  %15328 = vst [vmem:[#allocation325_spill] sm:$0xff] %v11383_v56  ;;  %v11385_v45 = vcombine.high %v1242_v60, %v1246_v51  ;;  %v11391_v62 = vcombine.low %v1242_v60, %v1246_v51 }
 0x302   :  { %4664 = vmatprep.subr.bf16.mxu1 %v11364_v13  ;;  %v1374_v55 = vld [vmem:[#allocation2 + $0x6b0] sm:$0xff] }
 0x303   :  { %4624 = vmatpush2.bf16.msra.mxu0 %v11367_v30  ;;  %15329 = vst [vmem:[#allocation326_spill] sm:$0xff] %v11385_v45  ;;  %v11388_v42 = vcombine.high %v1370_v14, %v1374_v55  ;;  %v1234_v13 = vld [vmem:[#allocation2 + $0x250] sm:$0xff]  ;;  %15331 = vst [vmem:[#allocation328_spill] sm:$0xff] %v11391_v62  ;;  %v11395_v17 = vcombine.low %v1370_v14, %v1374_v55 }
 0x304   :  { %4625 = vmatprep.subr.bf16.mxu0 %v11373_v27  ;;  %v1238_v35 = vld [vmem:[#allocation2 + $0x270] sm:$0xff] }
 0x305   :  { %4665 = vmatpush2.bf16.msra.mxu1 %v11371_v48  ;;  %15330 = vst [vmem:[#allocation327_spill] sm:$0xff] %v11388_v42  ;;  %v1362_v44 = vld [vmem:[#allocation2 + $0x650] sm:$0xff]  ;;  %15332 = vst [vmem:[#allocation329_spill] sm:$0xff] %v11395_v17  ;;  %v11397_v6 = vcombine.high %v1234_v13, %v1238_v35  ;;  %v11403_v51 = vcombine.low %v1234_v13, %v1238_v35 }
 0x306   :  { %4666 = vmatprep.subr.bf16.mxu1 %v11376_v57  ;;  %v1366_v61 = vld [vmem:[#allocation2 + $0x670] sm:$0xff] }
 0x307   :  { %4626 = vmatpush2.bf16.msra.mxu0 %v11379_v47  ;;  %15333 = vst [vmem:[#allocation330_spill] sm:$0xff] %v11397_v6  ;;  %v11400_v7 = vcombine.high %v1362_v44, %v1366_v61  ;;  %v1226_v57 = vld [vmem:[#allocation2 + $0x210] sm:$0xff]  ;;  %15335 = vst [vmem:[#allocation332_spill] sm:$0xff] %v11403_v51  ;;  %v11407_v55 = vcombine.low %v1362_v44, %v1366_v61 }
 0x308   :  { %4627 = vmatprep.subr.bf16.mxu0 %v11385_v45  ;;  %v1230_v27 = vld [vmem:[#allocation2 + $0x230] sm:$0xff] }
 0x309   :  { %4667 = vmatpush2.bf16.msra.mxu1 %v11383_v56  ;;  %15334 = vst [vmem:[#allocation331_spill] sm:$0xff] %v11400_v7  ;;  %v1354_v48 = vld [vmem:[#allocation2 + $0x610] sm:$0xff]  ;;  %15336 = vst [vmem:[#allocation333_spill] sm:$0xff] %v11407_v55  ;;  %v11409_v14 = vcombine.high %v1226_v57, %v1230_v27  ;;  %v11415_v35 = vcombine.low %v1226_v57, %v1230_v27 }
 0x30a   :  { %4668 = vmatprep.subr.bf16.mxu1 %v11388_v42  ;;  %v1358_v30 = vld [vmem:[#allocation2 + $0x630] sm:$0xff] }
 0x30b   :  { %4628 = vmatpush2.bf16.msra.mxu0 %v11391_v62  ;;  %15337 = vst [vmem:[#allocation334_spill] sm:$0xff] %v11409_v14  ;;  %v11412_v60 = vcombine.high %v1354_v48, %v1358_v30  ;;  %v1474_v42 = vld [vmem:[#allocation2 + $0x9d0] sm:$0xff]  ;;  %15339 = vst [vmem:[#allocation336_spill] sm:$0xff] %v11415_v35  ;;  %v11419_v61 = vcombine.low %v1354_v48, %v1358_v30 }
 0x30c   :  { %4629 = vmatprep.subr.bf16.mxu0 %v11397_v6  ;;  %v1478_v45 = vld [vmem:[#allocation2 + $0x9f0] sm:$0xff] }
 0x30d   :  { %4669 = vmatpush2.bf16.msra.mxu1 %v11395_v17  ;;  %15338 = vst [vmem:[#allocation335_spill] sm:$0xff] %v11412_v60  ;;  %v1602_v56 = vld [vmem:[#allocation2 + $0xdd0] sm:$0xff]  ;;  %15340 = vst [vmem:[#allocation337_spill] sm:$0xff] %v11419_v61  ;;  %v11421_v44 = vcombine.high %v1474_v42, %v1478_v45  ;;  %v11427_v27 = vcombine.low %v1474_v42, %v1478_v45 }
 0x30e   :  { %4670 = vmatprep.subr.bf16.mxu1 %v11400_v7  ;;  %v1606_v47 = vld [vmem:[#allocation2 + $0xdf0] sm:$0xff] }
 0x30f   :  { %4630 = vmatpush2.bf16.msra.mxu0 %v11403_v51  ;;  %15341 = vst [vmem:[#allocation338_spill] sm:$0xff] %v11421_v44  ;;  %v11424_v13 = vcombine.high %v1602_v56, %v1606_v47  ;;  %v1466_v7 = vld [vmem:[#allocation2 + $0x990] sm:$0xff]  ;;  %15343 = vst [vmem:[#allocation340_spill] sm:$0xff] %v11427_v27  ;;  %v11431_v30 = vcombine.low %v1602_v56, %v1606_v47 }
 0x310   :  { %4631 = vmatprep.subr.bf16.mxu0 %v11409_v14  ;;  %v1470_v6 = vld [vmem:[#allocation2 + $0x9b0] sm:$0xff] }
 0x311   :  { %4671 = vmatpush2.bf16.msra.mxu1 %v11407_v55  ;;  %15342 = vst [vmem:[#allocation339_spill] sm:$0xff] %v11424_v13  ;;  %v1594_v17 = vld [vmem:[#allocation2 + $0xd90] sm:$0xff]  ;;  %15344 = vst [vmem:[#allocation341_spill] sm:$0xff] %v11431_v30  ;;  %v11433_v48 = vcombine.high %v1466_v7, %v1470_v6  ;;  %v11442_v47 = vcombine.low %v1466_v7, %v1470_v6 }
 0x312   :  { %4672 = vmatprep.subr.bf16.mxu1 %v11412_v60  ;;  %v1598_v62 = vld [vmem:[#allocation2 + $0xdb0] sm:$0xff] }
 0x313   :  { %4632 = vmatpush2.bf16.msra.mxu0 %v11415_v35  ;;  %15345 = vst [vmem:[#allocation342_spill] sm:$0xff] %v11433_v48  ;;  %v11436_v57 = vcombine.high %v1594_v17, %v1598_v62  ;;  %v1458_v60 = vld [vmem:[#allocation2 + $0x950] sm:$0xff]  ;;  %15347 = vst [vmem:[#allocation344_spill] sm:$0xff] %v11442_v47 }
 0x314   :  { %4683 = vmatprep.subr.bf16.mxu0 %v11421_v44  ;;  %v1462_v14 = vld [vmem:[#allocation2 + $0x970] sm:$0xff] }
 0x315   :  { %4673 = vmatpush2.bf16.msra.mxu1 %v11419_v61  ;;  %15346 = vst [vmem:[#allocation343_spill] sm:$0xff] %v11436_v57  ;;  %v1586_v35 = vld [vmem:[#allocation2 + $0xd50] sm:$0xff]  ;;  %v11448_v44 = vcombine.high %v1458_v60, %v1462_v14 }
 0x316   :  { %4724 = vmatprep.subr.bf16.mxu1 %v11424_v13  ;;  %v4389_v55 = vpop.f32.mrf.mxu0  ;;  %4634 = vmatmul.mubr.bf16.vlgmr.msra.gmra.mxu0 %v10606_v58  ;;  %v1590_v45 = vld [vmem:[#allocation2 + $0xd70] sm:$0xff]  ;;  %v11446_v13 = vcombine.low %v1594_v17, %v1598_v62 }
 0x317   :  { %v4390_v42 = vadd.f32 %v4389_v55, %v11248_v29  ;;  %4684 = vmatpush1.bf16.msra.mxu0 %v11427_v27  ;;  %15349 = vst [vmem:[#allocation346_spill] sm:$0xff] %v11448_v44  ;;  %v11454_v8 = vcombine.high %v1586_v35, %v1590_v45  ;;  %v1450_v6 = vld [vmem:[#allocation2 + $0x910] sm:$0xff]  ;;  %4715 = vmatprep.mubr.bf16.mxu0 %v10626_v52 }
 0x318   :  { %v4430_v61 = vpop.f32.mrf.mxu1  ;;  %4675 = vmatmul.mubr.bf16.vlgmr.msra.gmra.mxu1 %v10611_v46  ;;  %v4391_v56 = vpop.f32.mrf.mxu0  ;;  %4685 = vmatprep.subr.bf16.mxu0 %v11433_v48  ;;  %15348 = vst [vmem:[#allocation345_spill] sm:$0xff] %v11446_v13  ;;  %v1454_v7 = vld [vmem:[#allocation2 + $0x930] sm:$0xff] }
 0x319   :  { %4725 = vmatpush1.bf16.msra.mxu1 %v11431_v30  ;;  %v11450_v51 = vadd.f32 %v4430_v61, %v4390_v42  ;;  %v4392_v29 = vadd.f32 %v4391_v56, %v11256_v59  ;;  %15350 = vst [vmem:[#allocation347_spill] sm:$0xff] %v11454_v8  ;;  %v1578_v27 = vld [vmem:[#allocation2 + $0xd10] sm:$0xff]  ;;  %4756 = vmatprep.mubr.bf16.mxu1 %v10631_v4 }
 0x31a   :  { %v4432_v55 = vpop.f32.mrf.mxu1  ;;  %4726 = vmatprep.subr.bf16.mxu1 %v11436_v57  ;;  %v4393_v30 = vpop.f32.mrf.mxu0  ;;  %v1582_v48 = vld [vmem:[#allocation2 + $0xd30] sm:$0xff]  ;;  %v11461_v59 = vcombine.low %v1458_v60, %v1462_v14  ;;  %v11465_v42 = vcombine.low %v1586_v35, %v1590_v45  ;;  %v11467_v56 = vcombine.high %v1450_v6, %v1454_v7  ;;  %v11473_v14 = vcombine.low %v1450_v6, %v1454_v7 }
 0x31b   :  { %v11458_v62 = vadd.f32 %v4432_v55, %v4392_v29  ;;  %4686 = vmatpush1.bf16.msra.mxu0 %v11442_v47  ;;  %v11470_v57 = vcombine.high %v1578_v27, %v1582_v48  ;;  %v1442_v29 = vld [vmem:[#allocation2 + $0x8d0] sm:$0xff]  ;;  %v11477_v60 = vcombine.low %v1578_v27, %v1582_v48 }
 0x31c   :  { %v4434_v17 = vpop.f32.mrf.mxu1  ;;  %15351 = vst [vmem:[#allocation348_spill] sm:$0xff] %v11461_v59  ;;  %v4394_v61 = vpop.f32.mrf.mxu0  ;;  %4687 = vmatprep.subr.bf16.mxu0 %v11448_v44  ;;  %15352 = vst [vmem:[#allocation349_spill] sm:$0xff] %v11465_v42  ;;  %v1446_v55 = vld [vmem:[#allocation2 + $0x8f0] sm:$0xff] }
 0x31d   :  { %4727 = vmatpush1.bf16.msra.mxu1 %v11446_v13  ;;  %15353 = vst [vmem:[#allocation350_spill] sm:$0xff] %v11467_v56  ;;  %15354 = vst [vmem:[#allocation351_spill] sm:$0xff] %v11470_v57  ;;  %v1570_v17 = vld [vmem:[#allocation2 + $0xcd0] sm:$0xff]  ;;  %v11479_v35 = vcombine.high %v1442_v29, %v1446_v55  ;;  %v11485_v6 = vcombine.low %v1442_v29, %v1446_v55 }
 0x31e   :  { %v4435_v30 = vpop.f32.mrf.mxu1  ;;  %4728 = vmatprep.subr.bf16.mxu1 %v11454_v8  ;;  %v1574_v47 = vld [vmem:[#allocation2 + $0xcf0] sm:$0xff]  ;;  %15355 = vst [vmem:[#allocation352_spill] sm:$0xff] %v11473_v14  ;;  %15356 = vst [vmem:[#allocation353_spill] sm:$0xff] %v11477_v60 }
 0x31f   :  { %4688 = vmatpush1.bf16.msra.mxu0 %v11461_v59  ;;  %15357 = vst [vmem:[#allocation354_spill] sm:$0xff] %v11479_v35  ;;  %v11482_v45 = vcombine.high %v1570_v17, %v1574_v47  ;;  %v1434_v61 = vld [vmem:[#allocation2 + $0x890] sm:$0xff]  ;;  %15359 = vst [vmem:[#allocation356_spill] sm:$0xff] %v11485_v6  ;;  %v11489_v27 = vcombine.low %v1570_v17, %v1574_v47 }
 0x320   :  { %4689 = vmatprep.subr.bf16.mxu0 %v11467_v56  ;;  %v1438_v30 = vld [vmem:[#allocation2 + $0x8b0] sm:$0xff] }
 0x321   :  { %4729 = vmatpush1.bf16.msra.mxu1 %v11465_v42  ;;  %15358 = vst [vmem:[#allocation355_spill] sm:$0xff] %v11482_v45  ;;  %v1562_v8 = vld [vmem:[#allocation2 + $0xc90] sm:$0xff]  ;;  %15360 = vst [vmem:[#allocation357_spill] sm:$0xff] %v11489_v27  ;;  %v11491_v48 = vcombine.high %v1434_v61, %v1438_v30  ;;  %v11497_v29 = vcombine.low %v1434_v61, %v1438_v30 }
 0x322   :  { %4730 = vmatprep.subr.bf16.mxu1 %v11470_v57  ;;  %v1566_v44 = vld [vmem:[#allocation2 + $0xcb0] sm:$0xff] }
 0x323   :  { %4690 = vmatpush1.bf16.msra.mxu0 %v11473_v14  ;;  %15361 = vst [vmem:[#allocation358_spill] sm:$0xff] %v11491_v48  ;;  %v11494_v7 = vcombine.high %v1562_v8, %v1566_v44  ;;  %v1426_v57 = vld [vmem:[#allocation2 + $0x850] sm:$0xff]  ;;  %15363 = vst [vmem:[#allocation360_spill] sm:$0xff] %v11497_v29  ;;  %v11501_v47 = vcombine.low %v1562_v8, %v1566_v44 }
 0x324   :  { %4691 = vmatprep.subr.bf16.mxu0 %v11479_v35  ;;  %v1430_v56 = vld [vmem:[#allocation2 + $0x870] sm:$0xff] }
 0x325   :  { %4731 = vmatpush1.bf16.msra.mxu1 %v11477_v60  ;;  %15362 = vst [vmem:[#allocation359_spill] sm:$0xff] %v11494_v7  ;;  %v1554_v42 = vld [vmem:[#allocation2 + $0xc50] sm:$0xff]  ;;  %15364 = vst [vmem:[#allocation361_spill] sm:$0xff] %v11501_v47  ;;  %v11503_v55 = vcombine.high %v1426_v57, %v1430_v56  ;;  %v11509_v61 = vcombine.low %v1426_v57, %v1430_v56 }
 0x326   :  { %4732 = vmatprep.subr.bf16.mxu1 %v11482_v45  ;;  %v1558_v59 = vld [vmem:[#allocation2 + $0xc70] sm:$0xff] }
 0x327   :  { %4692 = vmatpush1.bf16.msra.mxu0 %v11485_v6  ;;  %15365 = vst [vmem:[#allocation362_spill] sm:$0xff] %v11503_v55  ;;  %v11506_v17 = vcombine.high %v1554_v42, %v1558_v59  ;;  %v1418_v45 = vld [vmem:[#allocation2 + $0x810] sm:$0xff]  ;;  %15367 = vst [vmem:[#allocation364_spill] sm:$0xff] %v11509_v61  ;;  %v11513_v8 = vcombine.low %v1554_v42, %v1558_v59 }
 0x328   :  { %4693 = vmatprep.subr.bf16.mxu0 %v11491_v48  ;;  %v1422_v35 = vld [vmem:[#allocation2 + $0x830] sm:$0xff] }
 0x329   :  { %4733 = vmatpush1.bf16.msra.mxu1 %v11489_v27  ;;  %15366 = vst [vmem:[#allocation363_spill] sm:$0xff] %v11506_v17  ;;  %v1546_v60 = vld [vmem:[#allocation2 + $0xc10] sm:$0xff]  ;;  %15368 = vst [vmem:[#allocation365_spill] sm:$0xff] %v11513_v8  ;;  %v11515_v44 = vcombine.high %v1418_v45, %v1422_v35  ;;  %v11521_v57 = vcombine.low %v1418_v45, %v1422_v35 }
 0x32a   :  { %4734 = vmatprep.subr.bf16.mxu1 %v11494_v7  ;;  %v1550_v14 = vld [vmem:[#allocation2 + $0xc30] sm:$0xff] }
 0x32b   :  { %4694 = vmatpush1.bf16.msra.mxu0 %v11497_v29  ;;  %15369 = vst [vmem:[#allocation366_spill] sm:$0xff] %v11515_v44  ;;  %v11518_v30 = vcombine.high %v1546_v60, %v1550_v14  ;;  %v1538_v7 = vld [vmem:[#allocation2 + $0xbd0] sm:$0xff]  ;;  %15371 = vst [vmem:[#allocation368_spill] sm:$0xff] %v11521_v57  ;;  %v11525_v59 = vcombine.low %v1546_v60, %v1550_v14 }
 0x32c   :  { %4695 = vmatprep.subr.bf16.mxu0 %v11503_v55  ;;  %v1542_v48 = vld [vmem:[#allocation2 + $0xbf0] sm:$0xff] }
 0x32d   :  { %4735 = vmatpush1.bf16.msra.mxu1 %v11501_v47  ;;  %15370 = vst [vmem:[#allocation367_spill] sm:$0xff] %v11518_v30  ;;  %v1666_v27 = vld [vmem:[#allocation2 + $0xfd0] sm:$0xff]  ;;  %15372 = vst [vmem:[#allocation369_spill] sm:$0xff] %v11525_v59  ;;  %v11527_v42 = vcombine.high %v1538_v7, %v1542_v48  ;;  %v11533_v35 = vcombine.low %v1538_v7, %v1542_v48 }
 0x32e   :  { %4736 = vmatprep.subr.bf16.mxu1 %v11506_v17  ;;  %v1670_v6 = vld [vmem:[#allocation2 + $0xff0] sm:$0xff] }
 0x32f   :  { %4696 = vmatpush1.bf16.msra.mxu0 %v11509_v61  ;;  %15373 = vst [vmem:[#allocation370_spill] sm:$0xff] %v11527_v42  ;;  %v11530_v56 = vcombine.high %v1666_v27, %v1670_v6  ;;  %v1530_v17 = vld [vmem:[#allocation2 + $0xb90] sm:$0xff]  ;;  %15375 = vst [vmem:[#allocation372_spill] sm:$0xff] %v11533_v35  ;;  %v11537_v14 = vcombine.low %v1666_v27, %v1670_v6 }
 0x330   :  { %4697 = vmatprep.subr.bf16.mxu0 %v11515_v44  ;;  %v1534_v55 = vld [vmem:[#allocation2 + $0xbb0] sm:$0xff] }
 0x331   :  { %4737 = vmatpush1.bf16.msra.mxu1 %v11513_v8  ;;  %15374 = vst [vmem:[#allocation371_spill] sm:$0xff] %v11530_v56  ;;  %v1658_v47 = vld [vmem:[#allocation2 + $0xf90] sm:$0xff]  ;;  %15376 = vst [vmem:[#allocation373_spill] sm:$0xff] %v11537_v14  ;;  %v11539_v60 = vcombine.high %v1530_v17, %v1534_v55  ;;  %v11545_v48 = vcombine.low %v1530_v17, %v1534_v55 }
 0x332   :  { %4738 = vmatprep.subr.bf16.mxu1 %v11518_v30  ;;  %v1662_v29 = vld [vmem:[#allocation2 + $0xfb0] sm:$0xff] }
 0x333   :  { %4698 = vmatpush1.bf16.msra.mxu0 %v11521_v57  ;;  %15377 = vst [vmem:[#allocation374_spill] sm:$0xff] %v11539_v60  ;;  %v11542_v45 = vcombine.high %v1658_v47, %v1662_v29  ;;  %v1522_v30 = vld [vmem:[#allocation2 + $0xb50] sm:$0xff]  ;;  %15379 = vst [vmem:[#allocation376_spill] sm:$0xff] %v11545_v48  ;;  %v11549_v6 = vcombine.low %v1658_v47, %v1662_v29 }
 0x334   :  { %4699 = vmatprep.subr.bf16.mxu0 %v11527_v42  ;;  %v1526_v44 = vld [vmem:[#allocation2 + $0xb70] sm:$0xff] }
 0x335   :  { %4739 = vmatpush1.bf16.msra.mxu1 %v11525_v59  ;;  %15378 = vst [vmem:[#allocation375_spill] sm:$0xff] %v11542_v45  ;;  %v1650_v8 = vld [vmem:[#allocation2 + $0xf50] sm:$0xff]  ;;  %15380 = vst [vmem:[#allocation377_spill] sm:$0xff] %v11549_v6  ;;  %v11551_v27 = vcombine.high %v1522_v30, %v1526_v44  ;;  %v11557_v55 = vcombine.low %v1522_v30, %v1526_v44 }
 0x336   :  { %4740 = vmatprep.subr.bf16.mxu1 %v11530_v56  ;;  %v1654_v61 = vld [vmem:[#allocation2 + $0xf70] sm:$0xff] }
 0x337   :  { %4700 = vmatpush2.bf16.msra.mxu0 %v11533_v35  ;;  %15381 = vst [vmem:[#allocation378_spill] sm:$0xff] %v11551_v27  ;;  %v11554_v7 = vcombine.high %v1650_v8, %v1654_v61  ;;  %v1514_v56 = vld [vmem:[#allocation2 + $0xb10] sm:$0xff]  ;;  %15383 = vst [vmem:[#allocation380_spill] sm:$0xff] %v11557_v55  ;;  %v11561_v29 = vcombine.low %v1650_v8, %v1654_v61 }
 0x338   :  { %4701 = vmatprep.subr.bf16.mxu0 %v11539_v60  ;;  %v1518_v42 = vld [vmem:[#allocation2 + $0xb30] sm:$0xff] }
 0x339   :  { %4741 = vmatpush2.bf16.msra.mxu1 %v11537_v14  ;;  %15382 = vst [vmem:[#allocation379_spill] sm:$0xff] %v11554_v7  ;;  %v1642_v59 = vld [vmem:[#allocation2 + $0xf10] sm:$0xff]  ;;  %15384 = vst [vmem:[#allocation381_spill] sm:$0xff] %v11561_v29  ;;  %v11563_v47 = vcombine.high %v1514_v56, %v1518_v42  ;;  %v11569_v44 = vcombine.low %v1514_v56, %v1518_v42 }
 0x33a   :  { %4742 = vmatprep.subr.bf16.mxu1 %v11542_v45  ;;  %v1646_v57 = vld [vmem:[#allocation2 + $0xf30] sm:$0xff] }
 0x33b   :  { %4702 = vmatpush2.bf16.msra.mxu0 %v11545_v48  ;;  %15385 = vst [vmem:[#allocation382_spill] sm:$0xff] %v11563_v47  ;;  %v11566_v17 = vcombine.high %v1642_v59, %v1646_v57  ;;  %v1506_v45 = vld [vmem:[#allocation2 + $0xad0] sm:$0xff]  ;;  %15387 = vst [vmem:[#allocation384_spill] sm:$0xff] %v11569_v44  ;;  %v11573_v61 = vcombine.low %v1642_v59, %v1646_v57 }
 0x33c   :  { %4703 = vmatprep.subr.bf16.mxu0 %v11551_v27  ;;  %v1510_v60 = vld [vmem:[#allocation2 + $0xaf0] sm:$0xff] }
 0x33d   :  { %4743 = vmatpush2.bf16.msra.mxu1 %v11549_v6  ;;  %15386 = vst [vmem:[#allocation383_spill] sm:$0xff] %v11566_v17  ;;  %v1634_v14 = vld [vmem:[#allocation2 + $0xed0] sm:$0xff]  ;;  %15388 = vst [vmem:[#allocation385_spill] sm:$0xff] %v11573_v61  ;;  %v11575_v8 = vcombine.high %v1506_v45, %v1510_v60  ;;  %v11581_v42 = vcombine.low %v1506_v45, %v1510_v60 }
 0x33e   :  { %4744 = vmatprep.subr.bf16.mxu1 %v11554_v7  ;;  %v1638_v35 = vld [vmem:[#allocation2 + $0xef0] sm:$0xff] }
 0x33f   :  { %4704 = vmatpush2.bf16.msra.mxu0 %v11557_v55  ;;  %15389 = vst [vmem:[#allocation386_spill] sm:$0xff] %v11575_v8  ;;  %v11578_v30 = vcombine.high %v1634_v14, %v1638_v35  ;;  %v1498_v7 = vld [vmem:[#allocation2 + $0xa90] sm:$0xff]  ;;  %15391 = vst [vmem:[#allocation388_spill] sm:$0xff] %v11581_v42  ;;  %v11585_v57 = vcombine.low %v1634_v14, %v1638_v35 }
 0x340   :  { %4705 = vmatprep.subr.bf16.mxu0 %v11563_v47  ;;  %v1502_v27 = vld [vmem:[#allocation2 + $0xab0] sm:$0xff] }
 0x341   :  { %4745 = vmatpush2.bf16.msra.mxu1 %v11561_v29  ;;  %15390 = vst [vmem:[#allocation387_spill] sm:$0xff] %v11578_v30  ;;  %v1626_v6 = vld [vmem:[#allocation2 + $0xe90] sm:$0xff]  ;;  %15392 = vst [vmem:[#allocation389_spill] sm:$0xff] %v11585_v57  ;;  %v11587_v59 = vcombine.high %v1498_v7, %v1502_v27  ;;  %v11593_v60 = vcombine.low %v1498_v7, %v1502_v27 }
 0x342   :  { %4746 = vmatprep.subr.bf16.mxu1 %v11566_v17  ;;  %v1630_v48 = vld [vmem:[#allocation2 + $0xeb0] sm:$0xff] }
 0x343   :  { %4706 = vmatpush2.bf16.msra.mxu0 %v11569_v44  ;;  %15393 = vst [vmem:[#allocation390_spill] sm:$0xff] %v11587_v59  ;;  %v11590_v56 = vcombine.high %v1626_v6, %v1630_v48  ;;  %v1490_v17 = vld [vmem:[#allocation2 + $0xa50] sm:$0xff]  ;;  %15395 = vst [vmem:[#allocation392_spill] sm:$0xff] %v11593_v60  ;;  %v11597_v35 = vcombine.low %v1626_v6, %v1630_v48 }
 0x344   :  { %4707 = vmatprep.subr.bf16.mxu0 %v11575_v8  ;;  %v1494_v47 = vld [vmem:[#allocation2 + $0xa70] sm:$0xff] }
 0x345   :  { %4747 = vmatpush2.bf16.msra.mxu1 %v11573_v61  ;;  %15394 = vst [vmem:[#allocation391_spill] sm:$0xff] %v11590_v56  ;;  %v1618_v29 = vld [vmem:[#allocation2 + $0xe50] sm:$0xff]  ;;  %15396 = vst [vmem:[#allocation393_spill] sm:$0xff] %v11597_v35  ;;  %v11599_v14 = vcombine.high %v1490_v17, %v1494_v47  ;;  %v11605_v27 = vcombine.low %v1490_v17, %v1494_v47 }
 0x346   :  { %4748 = vmatprep.subr.bf16.mxu1 %v11578_v30  ;;  %v1622_v55 = vld [vmem:[#allocation2 + $0xe70] sm:$0xff] }
 0x347   :  { %4708 = vmatpush2.bf16.msra.mxu0 %v11581_v42  ;;  %15397 = vst [vmem:[#allocation394_spill] sm:$0xff] %v11599_v14  ;;  %v11602_v45 = vcombine.high %v1618_v29, %v1622_v55  ;;  %v1482_v30 = vld [vmem:[#allocation2 + $0xa10] sm:$0xff]  ;;  %15399 = vst [vmem:[#allocation396_spill] sm:$0xff] %v11605_v27  ;;  %v11609_v48 = vcombine.low %v1618_v29, %v1622_v55  ;;  %v1351_v42 = vld [vmem:[#allocation2 + $0x5f8] sm:$0xff] }
 0x348   :  { %4709 = vmatprep.subr.bf16.mxu0 %v11587_v59  ;;  %v1486_v8 = vld [vmem:[#allocation2 + $0xa30] sm:$0xff]  ;;  %v1223_v59 = vld [vmem:[#allocation2 + $0x1f8] sm:$0xff] }
 0x349   :  { %4749 = vmatpush2.bf16.msra.mxu1 %v11585_v57  ;;  %15398 = vst [vmem:[#allocation395_spill] sm:$0xff] %v11602_v45  ;;  %v1610_v61 = vld [vmem:[#allocation2 + $0xe10] sm:$0xff]  ;;  %15400 = vst [vmem:[#allocation397_spill] sm:$0xff] %v11609_v48  ;;  %v11611_v6 = vcombine.high %v1482_v30, %v1486_v8  ;;  %v1347_v57 = vld [vmem:[#allocation2 + $0x5d8] sm:$0xff]  ;;  %v11617_v47 = vcombine.low %v1482_v30, %v1486_v8  ;;  %v15407_v8 = vsub.s32 2, %v10314_v23 }
 0x34a   :  { %4750 = vmatprep.subr.bf16.mxu1 %v11590_v56  ;;  %v1614_v44 = vld [vmem:[#allocation2 + $0xe30] sm:$0xff]  ;;  %v1219_v56 = vld [vmem:[#allocation2 + $0x1d8] sm:$0xff]  ;;  %v11626_v17 = vcombine.high %v1347_v57, %v1351_v42 }
 0x34b   :  { %4710 = vmatpush2.bf16.msra.mxu0 %v11593_v60  ;;  %15401 = vst [vmem:[#allocation398_spill] sm:$0xff] %v11611_v6  ;;  %v11614_v7 = vcombine.high %v1610_v61, %v1614_v44  ;;  %15403 = vst [vmem:[#allocation400_spill] sm:$0xff] %v11617_v47  ;;  %v11621_v55 = vcombine.low %v1610_v61, %v1614_v44  ;;  %v11623_v29 = vcombine.high %v1219_v56, %v1223_v59  ;;  %v1343_v60 = vld [vmem:[#allocation2 + $0x5b8] sm:$0xff] }
 0x34c   :  { %4711 = vmatprep.subr.bf16.mxu0 %v11599_v14  ;;  %15406 = vst [vmem:[#allocation403_spill] sm:$0xff] %v11626_v17  ;;  %v1215_v14 = vld [vmem:[#allocation2 + $0x1b8] sm:$0xff]  ;;  %v11632_v30 = vrot.slane %v10230_v0, %v15407_v8  ;;  %v11638_v44 = vcombine.low %v1347_v57, %v1351_v42 }
 0x34d   :  { %4751 = vmatpush2.bf16.msra.mxu1 %v11597_v35  ;;  %15402 = vst [vmem:[#allocation399_spill] sm:$0xff] %v11614_v7  ;;  %15404 = vst [vmem:[#allocation401_spill] sm:$0xff] %v11621_v55  ;;  %v1339_v35 = vld [vmem:[#allocation2 + $0x598] sm:$0xff] }
 0x34e   :  { %4752 = vmatprep.subr.bf16.mxu1 %v11602_v45  ;;  %15405 = vst [vmem:[#allocation402_spill] sm:$0xff] %v11623_v29  ;;  %v1211_v45 = vld [vmem:[#allocation2 + $0x198] sm:$0xff]  ;;  %15408 = vst [vmem:[#allocation404_spill] sm:$0xff] %v11632_v30 }
 0x34f   :  { %4712 = vmatpush2.bf16.msra.mxu0 %v11605_v27  ;;  %15410 = vst [vmem:[#allocation406_spill] sm:$0xff] %v11638_v44  ;;  %v11640_v61 = vcombine.high %v1211_v45, %v1215_v14  ;;  %v1203_v8 = vld [vmem:[#allocation2 + $0x158] sm:$0xff]  ;;  %v11658_v27 = vcombine.low %v1339_v35, %v1343_v60 }
 0x350   :  { %4713 = vmatprep.subr.bf16.mxu0 %v11611_v6  ;;  %v11634_v6 = vcombine.low %v1219_v56, %v1223_v59  ;;  %v1207_v59 = vld [vmem:[#allocation2 + $0x178] sm:$0xff] }
 0x351   :  { %4753 = vmatpush2.bf16.msra.mxu1 %v11609_v48  ;;  %15411 = vst [vmem:[#allocation407_spill] sm:$0xff] %v11640_v61  ;;  %v11648_v48 = vcombine.high %v1339_v35, %v1343_v60  ;;  %v11660_v13 = vcombine.high %v1203_v8, %v1207_v59 }
 0x352   :  { %4754 = vmatprep.subr.bf16.mxu1 %v11614_v7  ;;  %15409 = vst [vmem:[#allocation405_spill] sm:$0xff] %v11634_v6  ;;  %v15412_v7 = vsub.s32 3, %v10314_v23 }
 0x353   :  { %4714 = vmatpush2.bf16.msra.mxu0 %v11617_v47  ;;  %15414 = vst [vmem:[#allocation409_spill] sm:$0xff] %v11648_v48  ;;  %15416 = vst [vmem:[#allocation411_spill] sm:$0xff] %v11660_v13 }
 0x354   :  { %4765 = vmatprep.subr.bf16.mxu0 %v11623_v29  ;;  %v11646_v47 = vrot.slane %v10230_v0, %v15412_v7  ;;  %v1335_v29 = vld [vmem:[#allocation2 + $0x578] sm:$0xff] }
 0x355   :  { %4755 = vmatpush2.bf16.msra.mxu1 %v11621_v55  ;;  %v1331_v55 = vld [vmem:[#allocation2 + $0x558] sm:$0xff] }
 0x356   :  { %4806 = vmatprep.subr.bf16.mxu1 %v11626_v17  ;;  %15413 = vst [vmem:[#allocation408_spill] sm:$0xff] %v11646_v47  ;;  %v4471_v56 = vpop.f32.mrf.mxu0  ;;  %4716 = vmatmul.mubr.bf16.vlgmr.msra.gmra.mxu0 %v10818_v49  ;;  %v11654_v17 = vcombine.low %v1211_v45, %v1215_v14  ;;  %v11666_v15 = vcombine.high %v1331_v55, %v1335_v29  ;;  %v1195_v14 = vld [vmem:[#allocation2 + $0x118] sm:$0xff] }
 0x357   :  { %v4472_v42 = vadd.f32 %v4471_v56, %v11632_v30  ;;  %4766 = vmatpush1.bf16.msra.mxu0 %v11634_v6  ;;  %v1199_v45 = vld [vmem:[#allocation2 + $0x138] sm:$0xff]  ;;  %4797 = vmatprep.mubr.bf16.mxu0 %v10404_v19 }
 0x358   :  { %v4512_v57 = vpop.f32.mrf.mxu1  ;;  %4757 = vmatmul.mubr.bf16.vlgmr.msra.gmra.mxu1 %v10823_v3  ;;  %15415 = vst [vmem:[#allocation410_spill] sm:$0xff] %v11654_v17  ;;  %v4473_v7 = vpop.f32.mrf.mxu0  ;;  %4767 = vmatprep.subr.bf16.mxu0 %v11640_v61  ;;  %15417 = vst [vmem:[#allocation412_spill] sm:$0xff] %v11666_v15  ;;  %v1323_v6 = vld [vmem:[#allocation2 + $0x518] sm:$0xff]  ;;  %v11679_v19 = vcombine.high %v1195_v14, %v1199_v45 }
 0x359   :  { %4807 = vmatpush1.bf16.msra.mxu1 %v11638_v44  ;;  %v11662_v16 = vadd.f32 %v4512_v57, %v4472_v42  ;;  %v4474_v56 = vadd.f32 %v4473_v7, %v11646_v47  ;;  %v1327_v61 = vld [vmem:[#allocation2 + $0x538] sm:$0xff]  ;;  %4838 = vmatprep.mubr.bf16.mxu1 %v10406_v20  ;;  %v11673_v42 = vcombine.low %v1203_v8, %v1207_v59 }
 0x35a   :  { %v4514_v30 = vpop.f32.mrf.mxu1  ;;  %4808 = vmatprep.subr.bf16.mxu1 %v11648_v48  ;;  %v4475_v44 = vpop.f32.mrf.mxu0  ;;  %v11677_v7 = vcombine.low %v1331_v55, %v1335_v29  ;;  %15420 = vst [vmem:[#allocation415_spill] sm:$0xff] %v11679_v19  ;;  %v11682_v20 = vcombine.high %v1323_v6, %v1327_v61  ;;  %v11685_v8 = vcombine.low %v1195_v14, %v1199_v45 }
 0x35b   :  { %v11670_v60 = vadd.f32 %v4514_v30, %v4474_v56  ;;  %4768 = vmatpush1.bf16.msra.mxu0 %v11654_v17  ;;  %15418 = vst [vmem:[#allocation413_spill] sm:$0xff] %v11673_v42  ;;  %v1187_v30 = vld [vmem:[#allocation2 + $0xd8] sm:$0xff]  ;;  %v11689_v55 = vcombine.low %v1323_v6, %v1327_v61 }
 0x35c   :  { %v4516_v35 = vpop.f32.mrf.mxu1  ;;  %v4476_v57 = vpop.f32.mrf.mxu0  ;;  %4769 = vmatprep.subr.bf16.mxu0 %v11660_v13  ;;  %15419 = vst [vmem:[#allocation414_spill] sm:$0xff] %v11677_v7  ;;  %15421 = vst [vmem:[#allocation416_spill] sm:$0xff] %v11682_v20  ;;  %v1191_v56 = vld [vmem:[#allocation2 + $0xf8] sm:$0xff] }
 0x35d   :  { %4809 = vmatpush1.bf16.msra.mxu1 %v11658_v27  ;;  %v1315_v35 = vld [vmem:[#allocation2 + $0x4d8] sm:$0xff]  ;;  %15422 = vst [vmem:[#allocation417_spill] sm:$0xff] %v11685_v8  ;;  %15423 = vst [vmem:[#allocation418_spill] sm:$0xff] %v11689_v55  ;;  %v11691_v29 = vcombine.high %v1187_v30, %v1191_v56  ;;  %v11697_v14 = vcombine.low %v1187_v30, %v1191_v56 }
 0x35e   :  { %v4517_v44 = vpop.f32.mrf.mxu1  ;;  %4810 = vmatprep.subr.bf16.mxu1 %v11666_v15  ;;  %v1319_v17 = vld [vmem:[#allocation2 + $0x4f8] sm:$0xff] }
 0x35f   :  { %4770 = vmatpush1.bf16.msra.mxu0 %v11673_v42  ;;  %15424 = vst [vmem:[#allocation419_spill] sm:$0xff] %v11691_v29  ;;  %v11694_v59 = vcombine.high %v1315_v35, %v1319_v17  ;;  %v1179_v57 = vld [vmem:[#allocation2 + $0x98] sm:$0xff]  ;;  %15426 = vst [vmem:[#allocation421_spill] sm:$0xff] %v11697_v14  ;;  %v11701_v6 = vcombine.low %v1315_v35, %v1319_v17 }
 0x360   :  { %4771 = vmatprep.subr.bf16.mxu0 %v11679_v19  ;;  %v1183_v44 = vld [vmem:[#allocation2 + $0xb8] sm:$0xff] }
 0x361   :  { %4811 = vmatpush1.bf16.msra.mxu1 %v11677_v7  ;;  %15425 = vst [vmem:[#allocation420_spill] sm:$0xff] %v11694_v59  ;;  %v1307_v15 = vld [vmem:[#allocation2 + $0x498] sm:$0xff]  ;;  %15427 = vst [vmem:[#allocation422_spill] sm:$0xff] %v11701_v6  ;;  %v11703_v61 = vcombine.high %v1179_v57, %v1183_v44  ;;  %v11709_v30 = vcombine.low %v1179_v57, %v1183_v44 }
 0x362   :  { %4812 = vmatprep.subr.bf16.mxu1 %v11682_v20  ;;  %v1311_v13 = vld [vmem:[#allocation2 + $0x4b8] sm:$0xff] }
 0x363   :  { %4772 = vmatpush1.bf16.msra.mxu0 %v11685_v8  ;;  %15428 = vst [vmem:[#allocation423_spill] sm:$0xff] %v11703_v61  ;;  %v11706_v45 = vcombine.high %v1307_v15, %v1311_v13  ;;  %v1171_v20 = vld [vmem:[#allocation2 + $0x58] sm:$0xff]  ;;  %15430 = vst [vmem:[#allocation425_spill] sm:$0xff] %v11709_v30  ;;  %v11713_v17 = vcombine.low %v1307_v15, %v1311_v13 }
 0x364   :  { %4773 = vmatprep.subr.bf16.mxu0 %v11691_v29  ;;  %v1175_v19 = vld [vmem:[#allocation2 + $0x78] sm:$0xff] }
 0x365   :  { %4813 = vmatpush1.bf16.msra.mxu1 %v11689_v55  ;;  %15429 = vst [vmem:[#allocation424_spill] sm:$0xff] %v11706_v45  ;;  %v1299_v7 = vld [vmem:[#allocation2 + $0x458] sm:$0xff]  ;;  %15431 = vst [vmem:[#allocation426_spill] sm:$0xff] %v11713_v17  ;;  %v11715_v56 = vcombine.high %v1171_v20, %v1175_v19  ;;  %v11721_v57 = vcombine.low %v1171_v20, %v1175_v19 }
 0x366   :  { %4814 = vmatprep.subr.bf16.mxu1 %v11694_v59  ;;  %v1303_v42 = vld [vmem:[#allocation2 + $0x478] sm:$0xff] }
 0x367   :  { %4774 = vmatpush1.bf16.msra.mxu0 %v11697_v14  ;;  %15432 = vst [vmem:[#allocation427_spill] sm:$0xff] %v11715_v56  ;;  %v11718_v35 = vcombine.high %v1299_v7, %v1303_v42  ;;  %v1163_v59 = vld [vmem:[#allocation2 + $0x18] sm:$0xff]  ;;  %15434 = vst [vmem:[#allocation429_spill] sm:$0xff] %v11721_v57  ;;  %v11725_v15 = vcombine.low %v1299_v7, %v1303_v42 }
 0x368   :  { %4775 = vmatprep.subr.bf16.mxu0 %v11703_v61  ;;  %v1167_v29 = vld [vmem:[#allocation2 + $0x38] sm:$0xff] }
 0x369   :  { %4815 = vmatpush1.bf16.msra.mxu1 %v11701_v6  ;;  %15433 = vst [vmem:[#allocation428_spill] sm:$0xff] %v11718_v35  ;;  %v1291_v55 = vld [vmem:[#allocation2 + $0x418] sm:$0xff]  ;;  %15435 = vst [vmem:[#allocation430_spill] sm:$0xff] %v11725_v15  ;;  %v11727_v13 = vcombine.high %v1163_v59, %v1167_v29  ;;  %v11733_v19 = vcombine.low %v1163_v59, %v1167_v29 }
 0x36a   :  { %4816 = vmatprep.subr.bf16.mxu1 %v11706_v45  ;;  %v1295_v8 = vld [vmem:[#allocation2 + $0x438] sm:$0xff] }
 0x36b   :  { %4776 = vmatpush1.bf16.msra.mxu0 %v11709_v30  ;;  %15436 = vst [vmem:[#allocation431_spill] sm:$0xff] %v11727_v13  ;;  %v11730_v44 = vcombine.high %v1291_v55, %v1295_v8  ;;  %v1283_v45 = vld [vmem:[#allocation2 + $0x3d8] sm:$0xff]  ;;  %15438 = vst [vmem:[#allocation433_spill] sm:$0xff] %v11733_v19  ;;  %v11737_v42 = vcombine.low %v1291_v55, %v1295_v8 }
 0x36c   :  { %4777 = vmatprep.subr.bf16.mxu0 %v11715_v56  ;;  %v1287_v61 = vld [vmem:[#allocation2 + $0x3f8] sm:$0xff] }
 0x36d   :  { %4817 = vmatpush1.bf16.msra.mxu1 %v11713_v17  ;;  %15437 = vst [vmem:[#allocation432_spill] sm:$0xff] %v11730_v44  ;;  %v1411_v6 = vld [vmem:[#allocation2 + $0x7d8] sm:$0xff]  ;;  %15439 = vst [vmem:[#allocation434_spill] sm:$0xff] %v11737_v42  ;;  %v11739_v7 = vcombine.high %v1283_v45, %v1287_v61  ;;  %v11745_v29 = vcombine.low %v1283_v45, %v1287_v61 }
 0x36e   :  { %4818 = vmatprep.subr.bf16.mxu1 %v11718_v35  ;;  %v1415_v14 = vld [vmem:[#allocation2 + $0x7f8] sm:$0xff] }
 0x36f   :  { %4778 = vmatpush1.bf16.msra.mxu0 %v11721_v57  ;;  %15440 = vst [vmem:[#allocation435_spill] sm:$0xff] %v11739_v7  ;;  %v11742_v20 = vcombine.high %v1411_v6, %v1415_v14  ;;  %v1275_v35 = vld [vmem:[#allocation2 + $0x398] sm:$0xff]  ;;  %15442 = vst [vmem:[#allocation437_spill] sm:$0xff] %v11745_v29  ;;  %v11749_v8 = vcombine.low %v1411_v6, %v1415_v14 }
 0x370   :  { %4779 = vmatprep.subr.bf16.mxu0 %v11727_v13  ;;  %v1279_v56 = vld [vmem:[#allocation2 + $0x3b8] sm:$0xff] }
 0x371   :  { %4819 = vmatpush1.bf16.msra.mxu1 %v11725_v15  ;;  %15441 = vst [vmem:[#allocation436_spill] sm:$0xff] %v11742_v20  ;;  %v1403_v17 = vld [vmem:[#allocation2 + $0x798] sm:$0xff]  ;;  %15443 = vst [vmem:[#allocation438_spill] sm:$0xff] %v11749_v8  ;;  %v11751_v55 = vcombine.high %v1275_v35, %v1279_v56  ;;  %v11757_v61 = vcombine.low %v1275_v35, %v1279_v56 }
 0x372   :  { %4820 = vmatprep.subr.bf16.mxu1 %v11730_v44  ;;  %v1407_v30 = vld [vmem:[#allocation2 + $0x7b8] sm:$0xff] }
 0x373   :  { %4780 = vmatpush1.bf16.msra.mxu0 %v11733_v19  ;;  %15444 = vst [vmem:[#allocation439_spill] sm:$0xff] %v11751_v55  ;;  %v11754_v59 = vcombine.high %v1403_v17, %v1407_v30  ;;  %v1267_v44 = vld [vmem:[#allocation2 + $0x358] sm:$0xff]  ;;  %15446 = vst [vmem:[#allocation441_spill] sm:$0xff] %v11757_v61  ;;  %v11761_v14 = vcombine.low %v1403_v17, %v1407_v30 }
 0x374   :  { %4781 = vmatprep.subr.bf16.mxu0 %v11739_v7  ;;  %v1271_v13 = vld [vmem:[#allocation2 + $0x378] sm:$0xff] }
 0x375   :  { %4821 = vmatpush1.bf16.msra.mxu1 %v11737_v42  ;;  %15445 = vst [vmem:[#allocation440_spill] sm:$0xff] %v11754_v59  ;;  %v1395_v15 = vld [vmem:[#allocation2 + $0x758] sm:$0xff]  ;;  %15447 = vst [vmem:[#allocation442_spill] sm:$0xff] %v11761_v14  ;;  %v11763_v6 = vcombine.high %v1267_v44, %v1271_v13  ;;  %v11769_v56 = vcombine.low %v1267_v44, %v1271_v13 }
 0x376   :  { %4822 = vmatprep.subr.bf16.mxu1 %v11742_v20  ;;  %v1399_v57 = vld [vmem:[#allocation2 + $0x778] sm:$0xff] }
 0x377   :  { %4782 = vmatpush2.bf16.msra.mxu0 %v11745_v29  ;;  %15448 = vst [vmem:[#allocation443_spill] sm:$0xff] %v11763_v6  ;;  %v11766_v45 = vcombine.high %v1395_v15, %v1399_v57  ;;  %v1259_v20 = vld [vmem:[#allocation2 + $0x318] sm:$0xff]  ;;  %15450 = vst [vmem:[#allocation445_spill] sm:$0xff] %v11769_v56  ;;  %v11773_v30 = vcombine.low %v1395_v15, %v1399_v57 }
 0x378   :  { %4783 = vmatprep.subr.bf16.mxu0 %v11751_v55  ;;  %v1263_v7 = vld [vmem:[#allocation2 + $0x338] sm:$0xff] }
 0x379   :  { %4823 = vmatpush2.bf16.msra.mxu1 %v11749_v8  ;;  %15449 = vst [vmem:[#allocation444_spill] sm:$0xff] %v11766_v45  ;;  %v1387_v42 = vld [vmem:[#allocation2 + $0x718] sm:$0xff]  ;;  %15451 = vst [vmem:[#allocation446_spill] sm:$0xff] %v11773_v30  ;;  %v11775_v17 = vcombine.high %v1259_v20, %v1263_v7  ;;  %v11781_v13 = vcombine.low %v1259_v20, %v1263_v7 }
 0x37a   :  { %4824 = vmatprep.subr.bf16.mxu1 %v11754_v59  ;;  %v1391_v19 = vld [vmem:[#allocation2 + $0x738] sm:$0xff] }
 0x37b   :  { %4784 = vmatpush2.bf16.msra.mxu0 %v11757_v61  ;;  %15452 = vst [vmem:[#allocation447_spill] sm:$0xff] %v11775_v17  ;;  %v11778_v35 = vcombine.high %v1387_v42, %v1391_v19  ;;  %v1251_v59 = vld [vmem:[#allocation2 + $0x2d8] sm:$0xff]  ;;  %15454 = vst [vmem:[#allocation449_spill] sm:$0xff] %v11781_v13  ;;  %v11785_v57 = vcombine.low %v1387_v42, %v1391_v19 }
 0x37c   :  { %4785 = vmatprep.subr.bf16.mxu0 %v11763_v6  ;;  %v1255_v55 = vld [vmem:[#allocation2 + $0x2f8] sm:$0xff] }
 0x37d   :  { %4825 = vmatpush2.bf16.msra.mxu1 %v11761_v14  ;;  %15453 = vst [vmem:[#allocation448_spill] sm:$0xff] %v11778_v35  ;;  %v1379_v8 = vld [vmem:[#allocation2 + $0x6d8] sm:$0xff]  ;;  %15455 = vst [vmem:[#allocation450_spill] sm:$0xff] %v11785_v57  ;;  %v11787_v15 = vcombine.high %v1251_v59, %v1255_v55  ;;  %v11793_v7 = vcombine.low %v1251_v59, %v1255_v55 }
 0x37e   :  { %4826 = vmatprep.subr.bf16.mxu1 %v11766_v45  ;;  %v1383_v29 = vld [vmem:[#allocation2 + $0x6f8] sm:$0xff] }
 0x37f   :  { %4786 = vmatpush2.bf16.msra.mxu0 %v11769_v56  ;;  %15456 = vst [vmem:[#allocation451_spill] sm:$0xff] %v11787_v15  ;;  %v11790_v44 = vcombine.high %v1379_v8, %v1383_v29  ;;  %v1243_v45 = vld [vmem:[#allocation2 + $0x298] sm:$0xff]  ;;  %15458 = vst [vmem:[#allocation453_spill] sm:$0xff] %v11793_v7  ;;  %v11797_v19 = vcombine.low %v1379_v8, %v1383_v29 }
 0x380   :  { %4787 = vmatprep.subr.bf16.mxu0 %v11775_v17  ;;  %v1247_v6 = vld [vmem:[#allocation2 + $0x2b8] sm:$0xff] }
 0x381   :  { %4827 = vmatpush2.bf16.msra.mxu1 %v11773_v30  ;;  %15457 = vst [vmem:[#allocation452_spill] sm:$0xff] %v11790_v44  ;;  %v1371_v14 = vld [vmem:[#allocation2 + $0x698] sm:$0xff]  ;;  %15459 = vst [vmem:[#allocation454_spill] sm:$0xff] %v11797_v19  ;;  %v11799_v42 = vcombine.high %v1243_v45, %v1247_v6  ;;  %v11805_v55 = vcombine.low %v1243_v45, %v1247_v6 }
 0x382   :  { %4828 = vmatprep.subr.bf16.mxu1 %v11778_v35  ;;  %v1375_v61 = vld [vmem:[#allocation2 + $0x6b8] sm:$0xff] }
 0x383   :  { %4788 = vmatpush2.bf16.msra.mxu0 %v11781_v13  ;;  %15460 = vst [vmem:[#allocation455_spill] sm:$0xff] %v11799_v42  ;;  %v11802_v20 = vcombine.high %v1371_v14, %v1375_v61  ;;  %v1235_v35 = vld [vmem:[#allocation2 + $0x258] sm:$0xff]  ;;  %15462 = vst [vmem:[#allocation457_spill] sm:$0xff] %v11805_v55  ;;  %v11809_v29 = vcombine.low %v1371_v14, %v1375_v61 }
 0x384   :  { %4789 = vmatprep.subr.bf16.mxu0 %v11787_v15  ;;  %v1239_v17 = vld [vmem:[#allocation2 + $0x278] sm:$0xff] }
 0x385   :  { %4829 = vmatpush2.bf16.msra.mxu1 %v11785_v57  ;;  %15461 = vst [vmem:[#allocation456_spill] sm:$0xff] %v11802_v20  ;;  %v1363_v30 = vld [vmem:[#allocation2 + $0x658] sm:$0xff]  ;;  %15463 = vst [vmem:[#allocation458_spill] sm:$0xff] %v11809_v29  ;;  %v11811_v8 = vcombine.high %v1235_v35, %v1239_v17  ;;  %v11817_v6 = vcombine.low %v1235_v35, %v1239_v17 }
 0x386   :  { %4830 = vmatprep.subr.bf16.mxu1 %v11790_v44  ;;  %v1367_v56 = vld [vmem:[#allocation2 + $0x678] sm:$0xff] }
 0x387   :  { %4790 = vmatpush2.bf16.msra.mxu0 %v11793_v7  ;;  %15464 = vst [vmem:[#allocation459_spill] sm:$0xff] %v11811_v8  ;;  %v11814_v59 = vcombine.high %v1363_v30, %v1367_v56  ;;  %v1227_v44 = vld [vmem:[#allocation2 + $0x218] sm:$0xff]  ;;  %15466 = vst [vmem:[#allocation461_spill] sm:$0xff] %v11817_v6  ;;  %v11821_v61 = vcombine.low %v1363_v30, %v1367_v56 }
 0x388   :  { %4791 = vmatprep.subr.bf16.mxu0 %v11799_v42  ;;  %v1231_v15 = vld [vmem:[#allocation2 + $0x238] sm:$0xff] }
 0x389   :  { %4831 = vmatpush2.bf16.msra.mxu1 %v11797_v19  ;;  %15465 = vst [vmem:[#allocation460_spill] sm:$0xff] %v11814_v59  ;;  %v1355_v57 = vld [vmem:[#allocation2 + $0x618] sm:$0xff]  ;;  %15467 = vst [vmem:[#allocation462_spill] sm:$0xff] %v11821_v61  ;;  %v11823_v14 = vcombine.high %v1227_v44, %v1231_v15  ;;  %v11829_v17 = vcombine.low %v1227_v44, %v1231_v15 }
 0x38a   :  { %4832 = vmatprep.subr.bf16.mxu1 %v11802_v20  ;;  %v1359_v13 = vld [vmem:[#allocation2 + $0x638] sm:$0xff] }
 0x38b   :  { %4792 = vmatpush2.bf16.msra.mxu0 %v11805_v55  ;;  %15468 = vst [vmem:[#allocation463_spill] sm:$0xff] %v11823_v14  ;;  %v11826_v45 = vcombine.high %v1355_v57, %v1359_v13  ;;  %v1475_v20 = vld [vmem:[#allocation2 + $0x9d8] sm:$0xff]  ;;  %15470 = vst [vmem:[#allocation465_spill] sm:$0xff] %v11829_v17  ;;  %v11833_v56 = vcombine.low %v1355_v57, %v1359_v13 }
 0x38c   :  { %4793 = vmatprep.subr.bf16.mxu0 %v11811_v8  ;;  %v1479_v42 = vld [vmem:[#allocation2 + $0x9f8] sm:$0xff] }
 0x38d   :  { %4833 = vmatpush2.bf16.msra.mxu1 %v11809_v29  ;;  %15469 = vst [vmem:[#allocation464_spill] sm:$0xff] %v11826_v45  ;;  %v1603_v19 = vld [vmem:[#allocation2 + $0xdd8] sm:$0xff]  ;;  %15471 = vst [vmem:[#allocation466_spill] sm:$0xff] %v11833_v56  ;;  %v11835_v30 = vcombine.high %v1475_v20, %v1479_v42  ;;  %v11841_v15 = vcombine.low %v1475_v20, %v1479_v42 }
 0x38e   :  { %4834 = vmatprep.subr.bf16.mxu1 %v11814_v59  ;;  %v1607_v7 = vld [vmem:[#allocation2 + $0xdf8] sm:$0xff] }
 0x38f   :  { %4794 = vmatpush2.bf16.msra.mxu0 %v11817_v6  ;;  %15472 = vst [vmem:[#allocation467_spill] sm:$0xff] %v11835_v30  ;;  %v11838_v35 = vcombine.high %v1603_v19, %v1607_v7  ;;  %v1467_v59 = vld [vmem:[#allocation2 + $0x998] sm:$0xff]  ;;  %15474 = vst [vmem:[#allocation469_spill] sm:$0xff] %v11841_v15  ;;  %v11845_v13 = vcombine.low %v1603_v19, %v1607_v7 }
 0x390   :  { %4795 = vmatprep.subr.bf16.mxu0 %v11823_v14  ;;  %v1471_v8 = vld [vmem:[#allocation2 + $0x9b8] sm:$0xff] }
 0x391   :  { %4835 = vmatpush2.bf16.msra.mxu1 %v11821_v61  ;;  %15473 = vst [vmem:[#allocation468_spill] sm:$0xff] %v11838_v35  ;;  %v1595_v29 = vld [vmem:[#allocation2 + $0xd98] sm:$0xff]  ;;  %15475 = vst [vmem:[#allocation470_spill] sm:$0xff] %v11845_v13  ;;  %v11847_v57 = vcombine.high %v1467_v59, %v1471_v8  ;;  %v11856_v7 = vcombine.low %v1467_v59, %v1471_v8 }
 0x392   :  { %4836 = vmatprep.subr.bf16.mxu1 %v11826_v45  ;;  %v1599_v55 = vld [vmem:[#allocation2 + $0xdb8] sm:$0xff] }
 0x393   :  { %4796 = vmatpush2.bf16.msra.mxu0 %v11829_v17  ;;  %15476 = vst [vmem:[#allocation471_spill] sm:$0xff] %v11847_v57  ;;  %v11850_v44 = vcombine.high %v1595_v29, %v1599_v55  ;;  %v1459_v45 = vld [vmem:[#allocation2 + $0x958] sm:$0xff]  ;;  %15478 = vst [vmem:[#allocation473_spill] sm:$0xff] %v11856_v7 }
 0x394   :  { %4847 = vmatprep.subr.bf16.mxu0 %v11835_v30  ;;  %v1463_v14 = vld [vmem:[#allocation2 + $0x978] sm:$0xff] }
 0x395   :  { %4837 = vmatpush2.bf16.msra.mxu1 %v11833_v56  ;;  %15477 = vst [vmem:[#allocation472_spill] sm:$0xff] %v11850_v44  ;;  %v1587_v17 = vld [vmem:[#allocation2 + $0xd58] sm:$0xff] }
 0x396   :  { %4888 = vmatprep.subr.bf16.mxu1 %v11838_v35  ;;  %v4553_v61 = vpop.f32.mrf.mxu0  ;;  %4798 = vmatmul.mubr.bf16.vlgmr.msra.gmra.mxu0 %v10606_v58  ;;  %v1591_v42 = vld [vmem:[#allocation2 + $0xd78] sm:$0xff]  ;;  %v11862_v35 = vcombine.low %v1595_v29, %v1599_v55  ;;  %v11864_v58 = vcombine.high %v1459_v45, %v1463_v14  ;;  %v11876_v29 = vcombine.low %v1459_v45, %v1463_v14 }
 0x397   :  { %v4554_v20 = vadd.f32 %v4553_v61, %v11662_v16  ;;  %4848 = vmatpush1.bf16.msra.mxu0 %v11841_v15  ;;  %v1451_v8 = vld [vmem:[#allocation2 + $0x918] sm:$0xff]  ;;  %4879 = vmatprep.mubr.bf16.mxu0 %v10626_v52 }
 0x398   :  { %v4594_v56 = vpop.f32.mrf.mxu1  ;;  %4839 = vmatmul.mubr.bf16.vlgmr.msra.gmra.mxu1 %v10611_v46  ;;  %v11859_v19 = vpop.f32.mrf.mxu0  ;;  %4849 = vmatprep.subr.bf16.mxu0 %v11847_v57  ;;  %15479 = vst [vmem:[#allocation474_spill] sm:$0xff] %v11864_v58  ;;  %v11871_v46 = vcombine.high %v1587_v17, %v1591_v42  ;;  %v1455_v59 = vld [vmem:[#allocation2 + $0x938] sm:$0xff]  ;;  %15481 = vst [vmem:[#allocation476_spill] sm:$0xff] %v11876_v29 }
 0x399   :  { %4889 = vmatpush1.bf16.msra.mxu1 %v11845_v13  ;;  %v11866_v30 = vadd.f32 %v4594_v56, %v4554_v20  ;;  %v1579_v13 = vld [vmem:[#allocation2 + $0xd18] sm:$0xff]  ;;  %4920 = vmatprep.mubr.bf16.mxu1 %v10631_v4  ;;  %v11880_v20 = vcombine.low %v1587_v17, %v1591_v42  ;;  %v11888_v14 = vcombine.low %v1451_v8, %v1455_v59 }
 0x39a   :  { %v11868_v16 = vpop.f32.mrf.mxu1  ;;  %4890 = vmatprep.subr.bf16.mxu1 %v11850_v44  ;;  %15480 = vst [vmem:[#allocation475_spill] sm:$0xff] %v11871_v46  ;;  %v4557_v61 = vpop.f32.mrf.mxu0  ;;  %v1583_v15 = vld [vmem:[#allocation2 + $0xd38] sm:$0xff]  ;;  %v11882_v44 = vcombine.high %v1451_v8, %v1455_v59 }
 0x39b   :  { %4850 = vmatpush1.bf16.msra.mxu0 %v11856_v7  ;;  %15482 = vst [vmem:[#allocation477_spill] sm:$0xff] %v11880_v20  ;;  %v11885_v61 = vcombine.high %v1579_v13, %v1583_v15  ;;  %v1443_v4 = vld [vmem:[#allocation2 + $0x8d8] sm:$0xff]  ;;  %15485 = vst [vmem:[#allocation480_spill] sm:$0xff] %v11888_v14  ;;  %v11892_v45 = vcombine.low %v1579_v13, %v1583_v15 }
 0x39c   :  { %v4598_v55 = vpop.f32.mrf.mxu1  ;;  %v4558_v56 = vpop.f32.mrf.mxu0  ;;  %4851 = vmatprep.subr.bf16.mxu0 %v11864_v58  ;;  %15483 = vst [vmem:[#allocation478_spill] sm:$0xff] %v11882_v44  ;;  %v1571_v57 = vld [vmem:[#allocation2 + $0xcd8] sm:$0xff] }
 0x39d   :  { %4891 = vmatpush1.bf16.msra.mxu1 %v11862_v35  ;;  %15484 = vst [vmem:[#allocation479_spill] sm:$0xff] %v11885_v61  ;;  %v1447_v55 = vld [vmem:[#allocation2 + $0x8f8] sm:$0xff]  ;;  %15486 = vst [vmem:[#allocation481_spill] sm:$0xff] %v11892_v45 }
 0x39e   :  { %v4599_v52 = vpop.f32.mrf.mxu1  ;;  %4892 = vmatprep.subr.bf16.mxu1 %v11871_v46  ;;  %v1575_v7 = vld [vmem:[#allocation2 + $0xcf8] sm:$0xff]  ;;  %v11894_v17 = vcombine.high %v1443_v4, %v1447_v55  ;;  %v11900_v8 = vcombine.low %v1443_v4, %v1447_v55 }
 0x39f   :  { %4852 = vmatpush1.bf16.msra.mxu0 %v11876_v29  ;;  %v11897_v42 = vcombine.high %v1571_v57, %v1575_v7  ;;  %v1435_v56 = vld [vmem:[#allocation2 + $0x898] sm:$0xff]  ;;  %v11904_v15 = vcombine.low %v1571_v57, %v1575_v7 }
 0x3a0   :  { %4853 = vmatprep.subr.bf16.mxu0 %v11882_v44  ;;  %15487 = vst [vmem:[#allocation482_spill] sm:$0xff] %v11894_v17  ;;  %v1439_v52 = vld [vmem:[#allocation2 + $0x8b8] sm:$0xff]  ;;  %15489 = vst [vmem:[#allocation484_spill] sm:$0xff] %v11900_v8 }
 0x3a1   :  { %4893 = vmatpush1.bf16.msra.mxu1 %v11880_v20  ;;  %15488 = vst [vmem:[#allocation483_spill] sm:$0xff] %v11897_v42  ;;  %v1563_v46 = vld [vmem:[#allocation2 + $0xc98] sm:$0xff]  ;;  %15490 = vst [vmem:[#allocation485_spill] sm:$0xff] %v11904_v15  ;;  %v11906_v13 = vcombine.high %v1435_v56, %v1439_v52  ;;  %v11912_v4 = vcombine.low %v1435_v56, %v1439_v52 }
 0x3a2   :  { %4894 = vmatprep.subr.bf16.mxu1 %v11885_v61  ;;  %v1567_v58 = vld [vmem:[#allocation2 + $0xcb8] sm:$0xff] }
 0x3a3   :  { %4854 = vmatpush1.bf16.msra.mxu0 %v11888_v14  ;;  %15491 = vst [vmem:[#allocation486_spill] sm:$0xff] %v11906_v13  ;;  %v11909_v59 = vcombine.high %v1563_v46, %v1567_v58  ;;  %v1427_v61 = vld [vmem:[#allocation2 + $0x858] sm:$0xff]  ;;  %15493 = vst [vmem:[#allocation488_spill] sm:$0xff] %v11912_v4  ;;  %v11916_v57 = vcombine.low %v1563_v46, %v1567_v58 }
 0x3a4   :  { %4855 = vmatprep.subr.bf16.mxu0 %v11894_v17  ;;  %v1431_v44 = vld [vmem:[#allocation2 + $0x878] sm:$0xff] }
 0x3a5   :  { %4895 = vmatpush1.bf16.msra.mxu1 %v11892_v45  ;;  %15492 = vst [vmem:[#allocation487_spill] sm:$0xff] %v11909_v59  ;;  %v1555_v20 = vld [vmem:[#allocation2 + $0xc58] sm:$0xff]  ;;  %15494 = vst [vmem:[#allocation489_spill] sm:$0xff] %v11916_v57  ;;  %v11918_v7 = vcombine.high %v1427_v61, %v1431_v44  ;;  %v11924_v56 = vcombine.low %v1427_v61, %v1431_v44 }
 0x3a6   :  { %4896 = vmatprep.subr.bf16.mxu1 %v11897_v42  ;;  %v1559_v29 = vld [vmem:[#allocation2 + $0xc78] sm:$0xff] }
 0x3a7   :  { %4856 = vmatpush1.bf16.msra.mxu0 %v11900_v8  ;;  %15495 = vst [vmem:[#allocation490_spill] sm:$0xff] %v11918_v7  ;;  %v11921_v55 = vcombine.high %v1555_v20, %v1559_v29  ;;  %v1419_v42 = vld [vmem:[#allocation2 + $0x818] sm:$0xff]  ;;  %15497 = vst [vmem:[#allocation492_spill] sm:$0xff] %v11924_v56  ;;  %v11928_v58 = vcombine.low %v1555_v20, %v1559_v29 }
 0x3a8   :  { %4857 = vmatprep.subr.bf16.mxu0 %v11906_v13  ;;  %v1423_v17 = vld [vmem:[#allocation2 + $0x838] sm:$0xff] }
 0x3a9   :  { %4897 = vmatpush1.bf16.msra.mxu1 %v11904_v15  ;;  %15496 = vst [vmem:[#allocation491_spill] sm:$0xff] %v11921_v55  ;;  %v1547_v45 = vld [vmem:[#allocation2 + $0xc18] sm:$0xff]  ;;  %15498 = vst [vmem:[#allocation493_spill] sm:$0xff] %v11928_v58  ;;  %v11930_v46 = vcombine.high %v1419_v42, %v1423_v17  ;;  %v11936_v44 = vcombine.low %v1419_v42, %v1423_v17 }
 0x3aa   :  { %4898 = vmatprep.subr.bf16.mxu1 %v11909_v59  ;;  %v1551_v14 = vld [vmem:[#allocation2 + $0xc38] sm:$0xff] }
 0x3ab   :  { %4858 = vmatpush1.bf16.msra.mxu0 %v11912_v4  ;;  %15499 = vst [vmem:[#allocation494_spill] sm:$0xff] %v11930_v46  ;;  %v11933_v52 = vcombine.high %v1547_v45, %v1551_v14  ;;  %v1539_v59 = vld [vmem:[#allocation2 + $0xbd8] sm:$0xff]  ;;  %15501 = vst [vmem:[#allocation496_spill] sm:$0xff] %v11936_v44  ;;  %v11940_v29 = vcombine.low %v1547_v45, %v1551_v14 }
 0x3ac   :  { %4859 = vmatprep.subr.bf16.mxu0 %v11918_v7  ;;  %v1543_v13 = vld [vmem:[#allocation2 + $0xbf8] sm:$0xff] }
 0x3ad   :  { %4899 = vmatpush1.bf16.msra.mxu1 %v11916_v57  ;;  %15500 = vst [vmem:[#allocation495_spill] sm:$0xff] %v11933_v52  ;;  %v1667_v15 = vld [vmem:[#allocation2 + $0xfd8] sm:$0xff]  ;;  %15502 = vst [vmem:[#allocation497_spill] sm:$0xff] %v11940_v29  ;;  %v11942_v20 = vcombine.high %v1539_v59, %v1543_v13  ;;  %v11948_v17 = vcombine.low %v1539_v59, %v1543_v13 }
 0x3ae   :  { %4900 = vmatprep.subr.bf16.mxu1 %v11921_v55  ;;  %v1671_v8 = vld [vmem:[#allocation2 + $0xff8] sm:$0xff] }
 0x3af   :  { %4860 = vmatpush1.bf16.msra.mxu0 %v11924_v56  ;;  %15503 = vst [vmem:[#allocation498_spill] sm:$0xff] %v11942_v20  ;;  %v11945_v61 = vcombine.high %v1667_v15, %v1671_v8  ;;  %v1531_v55 = vld [vmem:[#allocation2 + $0xb98] sm:$0xff]  ;;  %15505 = vst [vmem:[#allocation500_spill] sm:$0xff] %v11948_v17  ;;  %v11952_v14 = vcombine.low %v1667_v15, %v1671_v8 }
 0x3b0   :  { %4861 = vmatprep.subr.bf16.mxu0 %v11930_v46  ;;  %v1535_v7 = vld [vmem:[#allocation2 + $0xbb8] sm:$0xff] }
 0x3b1   :  { %4901 = vmatpush1.bf16.msra.mxu1 %v11928_v58  ;;  %15504 = vst [vmem:[#allocation499_spill] sm:$0xff] %v11945_v61  ;;  %v1659_v57 = vld [vmem:[#allocation2 + $0xf98] sm:$0xff]  ;;  %15506 = vst [vmem:[#allocation501_spill] sm:$0xff] %v11952_v14  ;;  %v11954_v45 = vcombine.high %v1531_v55, %v1535_v7  ;;  %v11960_v13 = vcombine.low %v1531_v55, %v1535_v7 }
 0x3b2   :  { %4902 = vmatprep.subr.bf16.mxu1 %v11933_v52  ;;  %v1663_v4 = vld [vmem:[#allocation2 + $0xfb8] sm:$0xff] }
 0x3b3   :  { %4862 = vmatpush1.bf16.msra.mxu0 %v11936_v44  ;;  %15507 = vst [vmem:[#allocation502_spill] sm:$0xff] %v11954_v45  ;;  %v11957_v42 = vcombine.high %v1659_v57, %v1663_v4  ;;  %v1523_v52 = vld [vmem:[#allocation2 + $0xb58] sm:$0xff]  ;;  %15509 = vst [vmem:[#allocation504_spill] sm:$0xff] %v11960_v13  ;;  %v11964_v8 = vcombine.low %v1659_v57, %v1663_v4 }
 0x3b4   :  { %4863 = vmatprep.subr.bf16.mxu0 %v11942_v20  ;;  %v1527_v46 = vld [vmem:[#allocation2 + $0xb78] sm:$0xff] }
 0x3b5   :  { %4903 = vmatpush1.bf16.msra.mxu1 %v11940_v29  ;;  %15508 = vst [vmem:[#allocation503_spill] sm:$0xff] %v11957_v42  ;;  %v1651_v58 = vld [vmem:[#allocation2 + $0xf58] sm:$0xff]  ;;  %15510 = vst [vmem:[#allocation505_spill] sm:$0xff] %v11964_v8  ;;  %v11966_v15 = vcombine.high %v1523_v52, %v1527_v46  ;;  %v11972_v7 = vcombine.low %v1523_v52, %v1527_v46 }
 0x3b6   :  { %4904 = vmatprep.subr.bf16.mxu1 %v11945_v61  ;;  %v1655_v56 = vld [vmem:[#allocation2 + $0xf78] sm:$0xff] }
 0x3b7   :  { %4864 = vmatpush2.bf16.msra.mxu0 %v11948_v17  ;;  %15511 = vst [vmem:[#allocation506_spill] sm:$0xff] %v11966_v15  ;;  %v11969_v59 = vcombine.high %v1651_v58, %v1655_v56  ;;  %v1515_v61 = vld [vmem:[#allocation2 + $0xb18] sm:$0xff]  ;;  %15513 = vst [vmem:[#allocation508_spill] sm:$0xff] %v11972_v7  ;;  %v11976_v4 = vcombine.low %v1651_v58, %v1655_v56 }
 0x3b8   :  { %4865 = vmatprep.subr.bf16.mxu0 %v11954_v45  ;;  %v1519_v20 = vld [vmem:[#allocation2 + $0xb38] sm:$0xff] }
 0x3b9   :  { %4905 = vmatpush2.bf16.msra.mxu1 %v11952_v14  ;;  %15512 = vst [vmem:[#allocation507_spill] sm:$0xff] %v11969_v59  ;;  %v1643_v29 = vld [vmem:[#allocation2 + $0xf18] sm:$0xff]  ;;  %15514 = vst [vmem:[#allocation509_spill] sm:$0xff] %v11976_v4  ;;  %v11978_v57 = vcombine.high %v1515_v61, %v1519_v20  ;;  %v11984_v46 = vcombine.low %v1515_v61, %v1519_v20 }
 0x3ba   :  { %4906 = vmatprep.subr.bf16.mxu1 %v11957_v42  ;;  %v1647_v44 = vld [vmem:[#allocation2 + $0xf38] sm:$0xff] }
 0x3bb   :  { %4866 = vmatpush2.bf16.msra.mxu0 %v11960_v13  ;;  %15515 = vst [vmem:[#allocation510_spill] sm:$0xff] %v11978_v57  ;;  %v11981_v55 = vcombine.high %v1643_v29, %v1647_v44  ;;  %v1507_v42 = vld [vmem:[#allocation2 + $0xad8] sm:$0xff]  ;;  %15517 = vst [vmem:[#allocation512_spill] sm:$0xff] %v11984_v46  ;;  %v11988_v56 = vcombine.low %v1643_v29, %v1647_v44 }
 0x3bc   :  { %4867 = vmatprep.subr.bf16.mxu0 %v11966_v15  ;;  %v1511_v45 = vld [vmem:[#allocation2 + $0xaf8] sm:$0xff] }
 0x3bd   :  { %4907 = vmatpush2.bf16.msra.mxu1 %v11964_v8  ;;  %15516 = vst [vmem:[#allocation511_spill] sm:$0xff] %v11981_v55  ;;  %v1635_v14 = vld [vmem:[#allocation2 + $0xed8] sm:$0xff]  ;;  %15518 = vst [vmem:[#allocation513_spill] sm:$0xff] %v11988_v56  ;;  %v11990_v58 = vcombine.high %v1507_v42, %v1511_v45  ;;  %v11996_v20 = vcombine.low %v1507_v42, %v1511_v45 }
 0x3be   :  { %4908 = vmatprep.subr.bf16.mxu1 %v11969_v59  ;;  %v1639_v17 = vld [vmem:[#allocation2 + $0xef8] sm:$0xff] }
 0x3bf   :  { %4868 = vmatpush2.bf16.msra.mxu0 %v11972_v7  ;;  %15519 = vst [vmem:[#allocation514_spill] sm:$0xff] %v11990_v58  ;;  %v11993_v52 = vcombine.high %v1635_v14, %v1639_v17  ;;  %v1499_v59 = vld [vmem:[#allocation2 + $0xa98] sm:$0xff]  ;;  %15521 = vst [vmem:[#allocation516_spill] sm:$0xff] %v11996_v20  ;;  %v12000_v44 = vcombine.low %v1635_v14, %v1639_v17 }
 0x3c0   :  { %4869 = vmatprep.subr.bf16.mxu0 %v11978_v57  ;;  %v1503_v15 = vld [vmem:[#allocation2 + $0xab8] sm:$0xff] }
 0x3c1   :  { %4909 = vmatpush2.bf16.msra.mxu1 %v11976_v4  ;;  %15520 = vst [vmem:[#allocation515_spill] sm:$0xff] %v11993_v52  ;;  %v1627_v8 = vld [vmem:[#allocation2 + $0xe98] sm:$0xff]  ;;  %15522 = vst [vmem:[#allocation517_spill] sm:$0xff] %v12000_v44  ;;  %v12002_v29 = vcombine.high %v1499_v59, %v1503_v15  ;;  %v12008_v45 = vcombine.low %v1499_v59, %v1503_v15 }
 0x3c2   :  { %4910 = vmatprep.subr.bf16.mxu1 %v11981_v55  ;;  %v1631_v13 = vld [vmem:[#allocation2 + $0xeb8] sm:$0xff] }
 0x3c3   :  { %4870 = vmatpush2.bf16.msra.mxu0 %v11984_v46  ;;  %15523 = vst [vmem:[#allocation518_spill] sm:$0xff] %v12002_v29  ;;  %v12005_v61 = vcombine.high %v1627_v8, %v1631_v13  ;;  %v1491_v55 = vld [vmem:[#allocation2 + $0xa58] sm:$0xff]  ;;  %15525 = vst [vmem:[#allocation520_spill] sm:$0xff] %v12008_v45  ;;  %v12012_v17 = vcombine.low %v1627_v8, %v1631_v13 }
 0x3c4   :  { %4871 = vmatprep.subr.bf16.mxu0 %v11990_v58  ;;  %v1495_v57 = vld [vmem:[#allocation2 + $0xa78] sm:$0xff] }
 0x3c5   :  { %4911 = vmatpush2.bf16.msra.mxu1 %v11988_v56  ;;  %15524 = vst [vmem:[#allocation519_spill] sm:$0xff] %v12005_v61  ;;  %v1619_v4 = vld [vmem:[#allocation2 + $0xe58] sm:$0xff]  ;;  %15526 = vst [vmem:[#allocation521_spill] sm:$0xff] %v12012_v17  ;;  %v12014_v14 = vcombine.high %v1491_v55, %v1495_v57  ;;  %v12020_v15 = vcombine.low %v1491_v55, %v1495_v57 }
 0x3c6   :  { %4912 = vmatprep.subr.bf16.mxu1 %v11993_v52  ;;  %v1623_v7 = vld [vmem:[#allocation2 + $0xe78] sm:$0xff] }
 0x3c7   :  { %4872 = vmatpush2.bf16.msra.mxu0 %v11996_v20  ;;  %15527 = vst [vmem:[#allocation522_spill] sm:$0xff] %v12014_v14  ;;  %v12017_v42 = vcombine.high %v1619_v4, %v1623_v7  ;;  %v1483_v52 = vld [vmem:[#allocation2 + $0xa18] sm:$0xff]  ;;  %15529 = vst [vmem:[#allocation524_spill] sm:$0xff] %v12020_v15  ;;  %v12024_v13 = vcombine.low %v1619_v4, %v1623_v7 }
 0x3c8   :  { %4873 = vmatprep.subr.bf16.mxu0 %v12002_v29  ;;  %v1487_v58 = vld [vmem:[#allocation2 + $0xa38] sm:$0xff] }
 0x3c9   :  { %4913 = vmatpush2.bf16.msra.mxu1 %v12000_v44  ;;  %15528 = vst [vmem:[#allocation523_spill] sm:$0xff] %v12017_v42  ;;  %v1611_v56 = vld [vmem:[#allocation2 + $0xe18] sm:$0xff]  ;;  %15530 = vst [vmem:[#allocation525_spill] sm:$0xff] %v12024_v13  ;;  %v12026_v8 = vcombine.high %v1483_v52, %v1487_v58 }
 0x3ca   :  { %4914 = vmatprep.subr.bf16.mxu1 %v12005_v61  ;;  %v1615_v46 = vld [vmem:[#allocation2 + $0xe38] sm:$0xff]  ;;  %v4556_v61 = vadd.f32 %v11859_v19, %v11670_v60  ;;  %v15535_v60 = vsub.s32 4, %v10314_v23 }
 0x3cb   :  { %4874 = vmatpush2.bf16.msra.mxu0 %v12008_v45  ;;  %15531 = vst [vmem:[#allocation526_spill] sm:$0xff] %v12026_v8  ;;  %v12029_v59 = vcombine.high %v1611_v56, %v1615_v46  ;;  %v12034_v45 = vcombine.low %v1483_v52, %v1487_v58  ;;  %v12038_v57 = vcombine.low %v1611_v56, %v1615_v46  ;;  %v9643_v7 = vld [vmem:[#allocation8 + $0x74] ss:$8 sps:$4 sm:$0xff]   ;;  %v9641_v58 = vld [vmem:[#allocation8 + $0x70] ss:$8 sps:$4 sm:$0xff]  }
 0x3cc   :  { %4875 = vmatprep.subr.bf16.mxu0 %v12014_v14  ;;  %v9646_v4 = vld [vmem:[#allocation8 + $0x174] ss:$8 sps:$4 sm:$0xff]   ;;  %v4597_v55 = vadd.f32 %v11868_v16, %v4556_v61  ;;  %v12046_v19 = vrot.slane %v10230_v0, %v15535_v60  ;;  %v9644_v52 = vld [vmem:[#allocation8 + $0x170] ss:$8 sps:$4 sm:$0xff]   ;;  %v9649_v46 = vld [vmem:[#allocation8 + $0x64] ss:$8 sps:$4 sm:$0xff]   ;;  %v4930_v56 = vpack.c.bf16 %v11458_v62, %v11458_v62 }
 0x3cd   :  { %4915 = vmatpush2.bf16.msra.mxu1 %v12012_v17  ;;  %15532 = vst [vmem:[#allocation527_spill] sm:$0xff] %v12029_v59  ;;  %15533 = vst [vmem:[#allocation528_spill] sm:$0xff] %v12034_v45  ;;  %v9652_v16 = vld [vmem:[#allocation8 + $0x164] ss:$8 sps:$4 sm:$0xff]   ;;  %v9647_v60 = vld [vmem:[#allocation8 + $0x60] ss:$8 sps:$4 sm:$0xff]  }
 0x3ce   :  { %4916 = vmatprep.subr.bf16.mxu1 %v12017_v42  ;;  %15534 = vst [vmem:[#allocation529_spill] sm:$0xff] %v12038_v57  ;;  %15536 = vst [vmem:[#allocation530_spill] sm:$0xff] %v12046_v19  ;;  %v4932_v61 = vpack.c.bf16 %v4597_v55, %v4597_v55 }
 0x3cf   :  { %4876 = vmatpush2.bf16.msra.mxu0 %v12020_v15  ;;  %v9664_v15 = vld [vmem:[#allocation8 + $0x144] ss:$8 sps:$4 sm:$0xff]  }
 0x3d0   :  { %4877 = vmatprep.subr.bf16.mxu0 %v12026_v8 }
 0x3d1   :  { %4917 = vmatpush2.bf16.msra.mxu1 %v12024_v13 }
 0x3d2   :  { %4918 = vmatprep.subr.bf16.mxu1 %v12029_v59 }
 0x3d3   :  { %4878 = vmatpush2.bf16.msra.mxu0 %v12034_v45 }
 0x3d4   :  { %5705 = vmatprep.subr.bf16.mxu0 %v9643_v7 }
 0x3d5   :  { %4919 = vmatpush2.bf16.msra.mxu1 %v12038_v57  ;;  %v9655_v57 = vld [vmem:[#allocation8 + $0x54] ss:$8 sps:$4 sm:$0xff]  }
 0x3d6   :  { %5746 = vmatprep.subr.bf16.mxu1 %v9646_v4  ;;  %v4635_v59 = vpop.f32.mrf.mxu0  ;;  %4880 = vmatmul.mubr.bf16.vlgmr.msra.gmra.mxu0 %v10818_v49  ;;  %v9650_v4 = vld [vmem:[#allocation8 + $0x160] ss:$8 sps:$4 sm:$0xff]   ;;  %v9658_v49 = vld [vmem:[#allocation8 + $0x154] ss:$8 sps:$4 sm:$0xff]  }
 0x3d7   :  { %v4636_v45 = vadd.f32 %v4635_v59, %v12046_v19  ;;  %5706 = vmatpush1.bf16.msra.mxu0 %v9641_v58  ;;  %5737 = vmatprep.mubr.bf16.mxu0 %v4930_v56  ;;  %v9661_v56 = vld [vmem:[#allocation8 + $0x44] ss:$8 sps:$4 sm:$0xff]  }
 0x3d8   :  { %v4676_v8 = vpop.f32.mrf.mxu1  ;;  %4921 = vmatmul.mubr.bf16.vlgmr.msra.gmra.mxu1 %v10823_v3  ;;  %v12054_v7 = vpop.f32.mrf.mxu0  ;;  %5707 = vmatprep.subr.bf16.mxu0 %v9649_v46  ;;  %v9653_v3 = vld [vmem:[#allocation8 + $0x50] ss:$8 sps:$4 sm:$0xff]   ;;  %v9667_v46 = vld [vmem:[#allocation8 + $0x34] ss:$8 sps:$4 sm:$0xff]  }
 0x3d9   :  { %5747 = vmatpush1.bf16.msra.mxu1 %v9644_v52  ;;  %v12056_v13 = vadd.f32 %v4676_v8, %v4636_v45  ;;  %5778 = vmatprep.mubr.bf16.mxu1 %v4932_v61  ;;  %v9656_v52 = vld [vmem:[#allocation8 + $0x150] ss:$8 sps:$4 sm:$0xff]   ;;  %v9659_v45 = vld [vmem:[#allocation8 + $0x40] ss:$8 sps:$4 sm:$0xff]   ;;  %v9670_v61 = vld [vmem:[#allocation8 + $0x134] ss:$8 sps:$4 sm:$0xff]  }
 0x3da   :  { %v12058_v62 = vpop.f32.mrf.mxu1  ;;  %v4639_v55 = vpop.f32.mrf.mxu0  ;;  %5748 = vmatprep.subr.bf16.mxu1 %v9652_v16  ;;  %v9662_v8 = vld [vmem:[#allocation8 + $0x140] ss:$8 sps:$4 sm:$0xff]   ;;  %v9665_v16 = vld [vmem:[#allocation8 + $0x30] ss:$8 sps:$4 sm:$0xff]  }
 0x3db   :  { %5708 = vmatpush1.bf16.msra.mxu0 %v9647_v60  ;;  %v9668_v60 = vld [vmem:[#allocation8 + $0x130] ss:$8 sps:$4 sm:$0xff]   ;;  %v9679_v55 = vld [vmem:[#allocation8 + $0x14] ss:$8 sps:$4 sm:$0xff]  }
 0x3dc   :  { %v4680_v59 = vpop.f32.mrf.mxu1  ;;  %v4640_v58 = vpop.f32.mrf.mxu0  ;;  %5709 = vmatprep.subr.bf16.mxu0 %v9655_v57  ;;  %v9676_v57 = vld [vmem:[#allocation8 + $0x124] ss:$8 sps:$4 sm:$0xff]  }
 0x3dd   :  { %5749 = vmatpush1.bf16.msra.mxu1 %v9650_v4  ;;  %v9673_v4 = vld [vmem:[#allocation8 + $0x24] ss:$8 sps:$4 sm:$0xff]   ;;  %v9682_v59 = vld [vmem:[#allocation8 + $0x114] ss:$8 sps:$4 sm:$0xff]  }
 0x3de   :  { %v4681_v19 = vpop.f32.mrf.mxu1  ;;  %5750 = vmatprep.subr.bf16.mxu1 %v9658_v49  ;;  %v9674_v49 = vld [vmem:[#allocation8 + $0x120] ss:$8 sps:$4 sm:$0xff]   ;;  %v9685_v58 = vld [vmem:[#allocation8 + $0x4] ss:$8 sps:$4 sm:$0xff]  }
 0x3df   :  { %5710 = vmatpush1.bf16.msra.mxu0 %v9653_v3  ;;  %v9671_v19 = vld [vmem:[#allocation8 + $0x20] ss:$8 sps:$4 sm:$0xff]   ;;  %v9677_v3 = vld [vmem:[#allocation8 + $0x10] ss:$8 sps:$4 sm:$0xff]  }
 0x3e0   :  { %5711 = vmatprep.subr.bf16.mxu0 %v9661_v56  ;;  %v9683_v56 = vld [vmem:[#allocation8] ss:$8 sps:$4 sm:$0xff]  }
 0x3e1   :  { %5751 = vmatpush1.bf16.msra.mxu1 %v9656_v52  ;;  %v9688_v52 = vld [vmem:[#allocation8 + $0x104] ss:$8 sps:$4 sm:$0xff]  }
 0x3e2   :  { %5752 = vmatprep.subr.bf16.mxu1 %v9664_v15  ;;  %v9680_v15 = vld [vmem:[#allocation8 + $0x110] ss:$8 sps:$4 sm:$0xff]  }
 0x3e3   :  { %5712 = vmatpush1.bf16.msra.mxu0 %v9659_v45  ;;  %v9686_v45 = vld [vmem:[#allocation8 + $0x100] ss:$8 sps:$4 sm:$0xff]  }
 0x3e4   :  { %5713 = vmatprep.subr.bf16.mxu0 %v9667_v46  ;;  %v9694_v46 = vld [vmem:[#allocation8 + $0x1f4] ss:$8 sps:$4 sm:$0xff]  }
 0x3e5   :  { %5753 = vmatpush1.bf16.msra.mxu1 %v9662_v8  ;;  %v9691_v8 = vld [vmem:[#allocation8 + $0xf4] ss:$8 sps:$4 sm:$0xff]  }
 0x3e6   :  { %5754 = vmatprep.subr.bf16.mxu1 %v9670_v61  ;;  %v9689_v61 = vld [vmem:[#allocation8 + $0xf0] ss:$8 sps:$4 sm:$0xff]  }
 0x3e7   :  { %5714 = vmatpush1.bf16.msra.mxu0 %v9665_v16  ;;  %v9692_v16 = vld [vmem:[#allocation8 + $0x1f0] ss:$8 sps:$4 sm:$0xff]  }
 0x3e8   :  { %5715 = vmatprep.subr.bf16.mxu0 %v9673_v4  ;;  %v9700_v4 = vld [vmem:[#allocation8 + $0x1e4] ss:$8 sps:$4 sm:$0xff]  }
 0x3e9   :  { %5755 = vmatpush1.bf16.msra.mxu1 %v9668_v60  ;;  %v9697_v60 = vld [vmem:[#allocation8 + $0xe4] ss:$8 sps:$4 sm:$0xff]  }
 0x3ea   :  { %5756 = vmatprep.subr.bf16.mxu1 %v9676_v57  ;;  %v9695_v57 = vld [vmem:[#allocation8 + $0xe0] ss:$8 sps:$4 sm:$0xff]  }
 0x3eb   :  { %5716 = vmatpush1.bf16.msra.mxu0 %v9671_v19  ;;  %v9698_v19 = vld [vmem:[#allocation8 + $0x1e0] ss:$8 sps:$4 sm:$0xff]  }
 0x3ec   :  { %5717 = vmatprep.subr.bf16.mxu0 %v9679_v55  ;;  %v9706_v55 = vld [vmem:[#allocation8 + $0x1d4] ss:$8 sps:$4 sm:$0xff]  }
 0x3ed   :  { %5757 = vmatpush1.bf16.msra.mxu1 %v9674_v49  ;;  %v9703_v49 = vld [vmem:[#allocation8 + $0xd4] ss:$8 sps:$4 sm:$0xff]  }
 0x3ee   :  { %5758 = vmatprep.subr.bf16.mxu1 %v9682_v59  ;;  %v9701_v59 = vld [vmem:[#allocation8 + $0xd0] ss:$8 sps:$4 sm:$0xff]  }
 0x3ef   :  { %5718 = vmatpush1.bf16.msra.mxu0 %v9677_v3  ;;  %v9704_v3 = vld [vmem:[#allocation8 + $0x1d0] ss:$8 sps:$4 sm:$0xff]  }
 0x3f0   :  { %5719 = vmatprep.subr.bf16.mxu0 %v9685_v58  ;;  %v9712_v58 = vld [vmem:[#allocation8 + $0x1c4] ss:$8 sps:$4 sm:$0xff]  }
 0x3f1   :  { %5759 = vmatpush1.bf16.msra.mxu1 %v9680_v15  ;;  %v9709_v15 = vld [vmem:[#allocation8 + $0xc4] ss:$8 sps:$4 sm:$0xff]  }
 0x3f2   :  { %5760 = vmatprep.subr.bf16.mxu1 %v9688_v52  ;;  %v9707_v52 = vld [vmem:[#allocation8 + $0xc0] ss:$8 sps:$4 sm:$0xff]  }
 0x3f3   :  { %5720 = vmatpush1.bf16.msra.mxu0 %v9683_v56  ;;  %v9710_v56 = vld [vmem:[#allocation8 + $0x1c0] ss:$8 sps:$4 sm:$0xff]  }
 0x3f4   :  { %5721 = vmatprep.subr.bf16.mxu0 %v9691_v8  ;;  %v9718_v8 = vld [vmem:[#allocation8 + $0x1b4] ss:$8 sps:$4 sm:$0xff]  }
 0x3f5   :  { %5761 = vmatpush1.bf16.msra.mxu1 %v9686_v45  ;;  %v9715_v45 = vld [vmem:[#allocation8 + $0xb4] ss:$8 sps:$4 sm:$0xff]  }
 0x3f6   :  { %5762 = vmatprep.subr.bf16.mxu1 %v9694_v46  ;;  %v9713_v46 = vld [vmem:[#allocation8 + $0xb0] ss:$8 sps:$4 sm:$0xff]  }
 0x3f7   :  { %5722 = vmatpush2.bf16.msra.mxu0 %v9689_v61  ;;  %v9716_v61 = vld [vmem:[#allocation8 + $0x1b0] ss:$8 sps:$4 sm:$0xff]  }
 0x3f8   :  { %5723 = vmatprep.subr.bf16.mxu0 %v9697_v60  ;;  %v9724_v60 = vld [vmem:[#allocation8 + $0x1a4] ss:$8 sps:$4 sm:$0xff]  }
 0x3f9   :  { %5763 = vmatpush2.bf16.msra.mxu1 %v9692_v16  ;;  %v9721_v16 = vld [vmem:[#allocation8 + $0xa4] ss:$8 sps:$4 sm:$0xff]  }
 0x3fa   :  { %5764 = vmatprep.subr.bf16.mxu1 %v9700_v4  ;;  %v9719_v4 = vld [vmem:[#allocation8 + $0xa0] ss:$8 sps:$4 sm:$0xff]  }
 0x3fb   :  { %5724 = vmatpush2.bf16.msra.mxu0 %v9695_v57  ;;  %v9722_v57 = vld [vmem:[#allocation8 + $0x1a0] ss:$8 sps:$4 sm:$0xff]  }
 0x3fc   :  { %5725 = vmatprep.subr.bf16.mxu0 %v9703_v49  ;;  %v9730_v49 = vld [vmem:[#allocation8 + $0x194] ss:$8 sps:$4 sm:$0xff]  }
 0x3fd   :  { %5765 = vmatpush2.bf16.msra.mxu1 %v9698_v19  ;;  %v9727_v19 = vld [vmem:[#allocation8 + $0x94] ss:$8 sps:$4 sm:$0xff]  }
 0x3fe   :  { %5766 = vmatprep.subr.bf16.mxu1 %v9706_v55  ;;  %v9725_v55 = vld [vmem:[#allocation8 + $0x90] ss:$8 sps:$4 sm:$0xff]  }
 0x3ff   :  { %5726 = vmatpush2.bf16.msra.mxu0 %v9701_v59  ;;  %v9728_v59 = vld [vmem:[#allocation8 + $0x190] ss:$8 sps:$4 sm:$0xff]  }
 0x400   :  { %5727 = vmatprep.subr.bf16.mxu0 %v9709_v15  ;;  %v9736_v15 = vld [vmem:[#allocation8 + $0x184] ss:$8 sps:$4 sm:$0xff]  }
 0x401   :  { %5767 = vmatpush2.bf16.msra.mxu1 %v9704_v3  ;;  %v9733_v3 = vld [vmem:[#allocation8 + $0x84] ss:$8 sps:$4 sm:$0xff]  }
 0x402   :  { %5768 = vmatprep.subr.bf16.mxu1 %v9712_v58  ;;  %v15537_v58 = vsub.s32 5, %v10314_v23 }
 0x403   :  { %5728 = vmatpush2.bf16.msra.mxu0 %v9707_v52 }
 0x404   :  { %5729 = vmatprep.subr.bf16.mxu0 %v9715_v45  ;;  %v12063_v52 = vrot.slane %v10230_v0, %v15537_v58  ;;  %v9734_v45 = vld [vmem:[#allocation8 + $0x180] ss:$8 sps:$4 sm:$0xff]  }
 0x405   :  { %5769 = vmatpush2.bf16.msra.mxu1 %v9710_v56  ;;  %v9731_v56 = vld [vmem:[#allocation8 + $0x80] ss:$8 sps:$4 sm:$0xff]  }
 0x406   :  { %5770 = vmatprep.subr.bf16.mxu1 %v9718_v8  ;;  %15538 = vst [vmem:[#allocation531_spill] sm:$0xff] %v12063_v52  ;;  %v9739_v8 = vld [vmem:[#allocation8 + $0x274] ss:$8 sps:$4 sm:$0xff]   ;;  %v9788_v58 = vld [vmem:[#allocation8 + $0x360] ss:$8 sps:$4 sm:$0xff]  }
 0x407   :  { %5730 = vmatpush2.bf16.msra.mxu0 %v9713_v46  ;;  %v9787_v46 = vld [vmem:[#allocation8 + $0x374] ss:$8 sps:$4 sm:$0xff]  }
 0x408   :  { %5731 = vmatprep.subr.bf16.mxu0 %v9721_v16  ;;  %v9737_v16 = vld [vmem:[#allocation8 + $0x270] ss:$8 sps:$4 sm:$0xff]  }
 0x409   :  { %5771 = vmatpush2.bf16.msra.mxu1 %v9716_v61  ;;  %v4638_v61 = vadd.f32 %v12054_v7, %v12063_v52 }
 0x40a   :  { %5772 = vmatprep.subr.bf16.mxu1 %v9724_v60  ;;  %v4929_v60 = vpack.c.bf16 %v11450_v51, %v11450_v51 }
 0x40b   :  { %5732 = vmatpush2.bf16.msra.mxu0 %v9719_v4  ;;  %v9742_v4 = vld [vmem:[#allocation8 + $0x264] ss:$8 sps:$4 sm:$0xff]  }
 0x40c   :  { %5733 = vmatprep.subr.bf16.mxu0 %v9727_v19  ;;  %v4931_v19 = vpack.c.bf16 %v11866_v30, %v11866_v30  ;;  %v9793_v30 = vld [vmem:[#allocation8 + $0x354] ss:$8 sps:$4 sm:$0xff]  }
 0x40d   :  { %5773 = vmatpush2.bf16.msra.mxu1 %v9722_v57  ;;  %v9785_v57 = vld [vmem:[#allocation8 + $0x370] ss:$8 sps:$4 sm:$0xff]  }
 0x40e   :  { %5774 = vmatprep.subr.bf16.mxu1 %v9730_v49  ;;  %v9790_v49 = vld [vmem:[#allocation8 + $0x364] ss:$8 sps:$4 sm:$0xff]  }
 0x40f   :  { %5734 = vmatpush2.bf16.msra.mxu0 %v9725_v55 }
 0x410   :  { %5735 = vmatprep.subr.bf16.mxu0 %v9733_v3  ;;  %v9740_v3 = vld [vmem:[#allocation8 + $0x260] ss:$8 sps:$4 sm:$0xff]  }
 0x411   :  { %5775 = vmatpush2.bf16.msra.mxu1 %v9728_v59  ;;  %v4679_v59 = vadd.f32 %v12058_v62, %v4638_v61  ;;  %v9748_v61 = vld [vmem:[#allocation8 + $0x244] ss:$8 sps:$4 sm:$0xff]  }
 0x412   :  { %5776 = vmatprep.subr.bf16.mxu1 %v9736_v15  ;;  %v9745_v15 = vld [vmem:[#allocation8 + $0x254] ss:$8 sps:$4 sm:$0xff]  }
 0x413   :  { %5736 = vmatpush2.bf16.msra.mxu0 %v9731_v56 }
 0x414   :  { %5787 = vmatprep.subr.bf16.mxu0 %v9739_v8 }
 0x415   :  { %5777 = vmatpush2.bf16.msra.mxu1 %v9734_v45 }
 0x416   :  { %5828 = vmatprep.subr.bf16.mxu1 %v9787_v46  ;;  %v12071_v55 = vpop.f32.mrf.mxu0  ;;  %5738 = vmatmul.mubr.bf16.vlgmr.msra.gmra.mxu0 %v4929_v60  ;;  %v9743_v60 = vld [vmem:[#allocation8 + $0x250] ss:$8 sps:$4 sm:$0xff]  }
 0x417   :  { %5788 = vmatpush1.bf16.msra.mxu0 %v9737_v16  ;;  %v9791_v16 = vld [vmem:[#allocation8 + $0x350] ss:$8 sps:$4 sm:$0xff]  }
 0x418   :  { %v12074_v7 = vpop.f32.mrf.mxu1  ;;  %5779 = vmatmul.mubr.bf16.vlgmr.msra.gmra.mxu1 %v4931_v19  ;;  %v4719_v51 = vpop.f32.mrf.mxu0  ;;  %5789 = vmatprep.subr.bf16.mxu0 %v9742_v4  ;;  %v9796_v4 = vld [vmem:[#allocation8 + $0x344] ss:$8 sps:$4 sm:$0xff]  }
 0x419   :  { %5829 = vmatpush1.bf16.msra.mxu1 %v9785_v57  ;;  %v4720_v56 = vadd.f32 %v4719_v51, %v4679_v59  ;;  %v9746_v57 = vld [vmem:[#allocation8 + $0x240] ss:$8 sps:$4 sm:$0xff]   ;;  %v9754_v51 = vld [vmem:[#allocation8 + $0x224] ss:$8 sps:$4 sm:$0xff]  }
 0x41a   :  { %v4760_v45 = vpop.f32.mrf.mxu1  ;;  %5830 = vmatprep.subr.bf16.mxu1 %v9790_v49  ;;  %v4721_v8 = vpop.f32.mrf.mxu0  ;;  %v9751_v49 = vld [vmem:[#allocation8 + $0x234] ss:$8 sps:$4 sm:$0xff]   ;;  %v9794_v59 = vld [vmem:[#allocation8 + $0x340] ss:$8 sps:$4 sm:$0xff]  }
 0x41b   :  { %v4761_v46 = vadd.f32 %v4760_v45, %v4720_v56  ;;  %5790 = vmatpush1.bf16.msra.mxu0 %v9740_v3  ;;  %v9749_v3 = vld [vmem:[#allocation8 + $0x230] ss:$8 sps:$4 sm:$0xff]   ;;  %v9757_v56 = vld [vmem:[#allocation8 + $0x214] ss:$8 sps:$4 sm:$0xff]   ;;  %v9800_v45 = vld [vmem:[#allocation8 + $0x320] ss:$8 sps:$4 sm:$0xff]  }
 0x41c   :  { %v4762_v52 = vpop.f32.mrf.mxu1  ;;  %v4722_v62 = vpop.f32.mrf.mxu0  ;;  %5791 = vmatprep.subr.bf16.mxu0 %v9745_v15  ;;  %v9797_v15 = vld [vmem:[#allocation8 + $0x330] ss:$8 sps:$4 sm:$0xff]  }
 0x41d   :  { %5831 = vmatpush1.bf16.msra.mxu1 %v9788_v58  ;;  %v4934_v19 = vpack.c.bf16 %v4761_v46, %v4761_v46  ;;  %v9799_v52 = vld [vmem:[#allocation8 + $0x334] ss:$8 sps:$4 sm:$0xff]   ;;  %v9802_v58 = vld [vmem:[#allocation8 + $0x324] ss:$8 sps:$4 sm:$0xff]   ;;  %v9755_v8 = vld [vmem:[#allocation8 + $0x210] ss:$8 sps:$4 sm:$0xff]  }
 0x41e   :  { %v4763_v42 = vpop.f32.mrf.mxu1  ;;  %5832 = vmatprep.subr.bf16.mxu1 %v9793_v30  ;;  %v9805_v30 = vld [vmem:[#allocation8 + $0x314] ss:$8 sps:$4 sm:$0xff]   ;;  %v9760_v46 = vld [vmem:[#allocation8 + $0x204] ss:$8 sps:$4 sm:$0xff]  }
 0x41f   :  { %5792 = vmatpush1.bf16.msra.mxu0 %v9743_v60  ;;  %5819 = vmatprep.mubr.bf16.mxu0 %v4934_v19  ;;  %v9752_v42 = vld [vmem:[#allocation8 + $0x220] ss:$8 sps:$4 sm:$0xff]   ;;  %v9803_v60 = vld [vmem:[#allocation8 + $0x310] ss:$8 sps:$4 sm:$0xff]   ;;  %v9808_v62 = vld [vmem:[#allocation8 + $0x304] ss:$8 sps:$4 sm:$0xff]  }
 0x420   :  { %5793 = vmatprep.subr.bf16.mxu0 %v9748_v61  ;;  %v9758_v61 = vld [vmem:[#allocation8 + $0x200] ss:$8 sps:$4 sm:$0xff]  }
 0x421   :  { %5833 = vmatpush1.bf16.msra.mxu1 %v9791_v16  ;;  %v9763_v16 = vld [vmem:[#allocation8 + $0x2f4] ss:$8 sps:$4 sm:$0xff]   ;;  %v9806_v19 = vld [vmem:[#allocation8 + $0x300] ss:$8 sps:$4 sm:$0xff]  }
 0x422   :  { %5834 = vmatprep.subr.bf16.mxu1 %v9796_v4  ;;  %v9811_v4 = vld [vmem:[#allocation8 + $0x3f4] ss:$8 sps:$4 sm:$0xff]  }
 0x423   :  { %5794 = vmatpush1.bf16.msra.mxu0 %v9746_v57  ;;  %v9761_v57 = vld [vmem:[#allocation8 + $0x2f0] ss:$8 sps:$4 sm:$0xff]  }
 0x424   :  { %5795 = vmatprep.subr.bf16.mxu0 %v9751_v49  ;;  %v9766_v49 = vld [vmem:[#allocation8 + $0x2e4] ss:$8 sps:$4 sm:$0xff]  }
 0x425   :  { %5835 = vmatpush1.bf16.msra.mxu1 %v9794_v59  ;;  %v9809_v59 = vld [vmem:[#allocation8 + $0x3f0] ss:$8 sps:$4 sm:$0xff]  }
 0x426   :  { %5836 = vmatprep.subr.bf16.mxu1 %v9799_v52  ;;  %v9814_v52 = vld [vmem:[#allocation8 + $0x3e4] ss:$8 sps:$4 sm:$0xff]  }
 0x427   :  { %5796 = vmatpush1.bf16.msra.mxu0 %v9749_v3  ;;  %v9764_v3 = vld [vmem:[#allocation8 + $0x2e0] ss:$8 sps:$4 sm:$0xff]  }
 0x428   :  { %5797 = vmatprep.subr.bf16.mxu0 %v9754_v51  ;;  %v9769_v51 = vld [vmem:[#allocation8 + $0x2d4] ss:$8 sps:$4 sm:$0xff]  }
 0x429   :  { %5837 = vmatpush1.bf16.msra.mxu1 %v9797_v15  ;;  %v9812_v15 = vld [vmem:[#allocation8 + $0x3e0] ss:$8 sps:$4 sm:$0xff]  }
 0x42a   :  { %5838 = vmatprep.subr.bf16.mxu1 %v9802_v58  ;;  %v9817_v58 = vld [vmem:[#allocation8 + $0x3d4] ss:$8 sps:$4 sm:$0xff]  }
 0x42b   :  { %5798 = vmatpush1.bf16.msra.mxu0 %v9752_v42  ;;  %v9767_v42 = vld [vmem:[#allocation8 + $0x2d0] ss:$8 sps:$4 sm:$0xff]  }
 0x42c   :  { %5799 = vmatprep.subr.bf16.mxu0 %v9757_v56  ;;  %v9772_v56 = vld [vmem:[#allocation8 + $0x2c4] ss:$8 sps:$4 sm:$0xff]  }
 0x42d   :  { %5839 = vmatpush1.bf16.msra.mxu1 %v9800_v45  ;;  %v9815_v45 = vld [vmem:[#allocation8 + $0x3d0] ss:$8 sps:$4 sm:$0xff]  }
 0x42e   :  { %5840 = vmatprep.subr.bf16.mxu1 %v9805_v30  ;;  %v9820_v30 = vld [vmem:[#allocation8 + $0x3c4] ss:$8 sps:$4 sm:$0xff]  }
 0x42f   :  { %5800 = vmatpush1.bf16.msra.mxu0 %v9755_v8  ;;  %v9770_v8 = vld [vmem:[#allocation8 + $0x2c0] ss:$8 sps:$4 sm:$0xff]  }
 0x430   :  { %5801 = vmatprep.subr.bf16.mxu0 %v9760_v46  ;;  %v9775_v46 = vld [vmem:[#allocation8 + $0x2b4] ss:$8 sps:$4 sm:$0xff]  }
 0x431   :  { %5841 = vmatpush1.bf16.msra.mxu1 %v9803_v60  ;;  %v9818_v60 = vld [vmem:[#allocation8 + $0x3c0] ss:$8 sps:$4 sm:$0xff]  }
 0x432   :  { %5842 = vmatprep.subr.bf16.mxu1 %v9808_v62  ;;  %v9823_v62 = vld [vmem:[#allocation8 + $0x3b4] ss:$8 sps:$4 sm:$0xff]  }
 0x433   :  { %5802 = vmatpush1.bf16.msra.mxu0 %v9758_v61  ;;  %v9773_v61 = vld [vmem:[#allocation8 + $0x2b0] ss:$8 sps:$4 sm:$0xff]  }
 0x434   :  { %5803 = vmatprep.subr.bf16.mxu0 %v9763_v16  ;;  %v9778_v16 = vld [vmem:[#allocation8 + $0x2a4] ss:$8 sps:$4 sm:$0xff]  }
 0x435   :  { %5843 = vmatpush1.bf16.msra.mxu1 %v9806_v19  ;;  %v9821_v19 = vld [vmem:[#allocation8 + $0x3b0] ss:$8 sps:$4 sm:$0xff]  }
 0x436   :  { %5844 = vmatprep.subr.bf16.mxu1 %v9811_v4  ;;  %v9826_v4 = vld [vmem:[#allocation8 + $0x3a4] ss:$8 sps:$4 sm:$0xff]  }
 0x437   :  { %5804 = vmatpush2.bf16.msra.mxu0 %v9761_v57  ;;  %v9776_v57 = vld [vmem:[#allocation8 + $0x2a0] ss:$8 sps:$4 sm:$0xff]  }
 0x438   :  { %5805 = vmatprep.subr.bf16.mxu0 %v9766_v49  ;;  %v9781_v49 = vld [vmem:[#allocation8 + $0x294] ss:$8 sps:$4 sm:$0xff]  }
 0x439   :  { %5845 = vmatpush2.bf16.msra.mxu1 %v9809_v59  ;;  %v9824_v59 = vld [vmem:[#allocation8 + $0x3a0] ss:$8 sps:$4 sm:$0xff]  }
 0x43a   :  { %5846 = vmatprep.subr.bf16.mxu1 %v9814_v52  ;;  %v9829_v52 = vld [vmem:[#allocation8 + $0x394] ss:$8 sps:$4 sm:$0xff]  }
 0x43b   :  { %5806 = vmatpush2.bf16.msra.mxu0 %v9764_v3  ;;  %v9779_v3 = vld [vmem:[#allocation8 + $0x290] ss:$8 sps:$4 sm:$0xff]  }
 0x43c   :  { %5807 = vmatprep.subr.bf16.mxu0 %v9769_v51  ;;  %v4718_v51 = vadd.f32 %v12071_v55, %v12056_v13 }
 0x43d   :  { %5847 = vmatpush2.bf16.msra.mxu1 %v9812_v15  ;;  %v9784_v15 = vld [vmem:[#allocation8 + $0x284] ss:$8 sps:$4 sm:$0xff]  }
 0x43e   :  { %5848 = vmatprep.subr.bf16.mxu1 %v9817_v58  ;;  %v9827_v58 = vld [vmem:[#allocation8 + $0x390] ss:$8 sps:$4 sm:$0xff]  }
 0x43f   :  { %5808 = vmatpush2.bf16.msra.mxu0 %v9767_v42  ;;  %v9832_v42 = vld [vmem:[#allocation8 + $0x384] ss:$8 sps:$4 sm:$0xff]  }
 0x440   :  { %5809 = vmatprep.subr.bf16.mxu0 %v9772_v56  ;;  %v9782_v56 = vld [vmem:[#allocation8 + $0x280] ss:$8 sps:$4 sm:$0xff]  }
 0x441   :  { %5849 = vmatpush2.bf16.msra.mxu1 %v9815_v45  ;;  %v4759_v45 = vadd.f32 %v12074_v7, %v4718_v51 }
 0x442   :  { %5850 = vmatprep.subr.bf16.mxu1 %v9820_v30  ;;  %v9830_v30 = vld [vmem:[#allocation8 + $0x380] ss:$8 sps:$4 sm:$0xff]  }
 0x443   :  { %5810 = vmatpush2.bf16.msra.mxu0 %v9770_v8  ;;  %v4933_v8 = vpack.c.bf16 %v4759_v45, %v4759_v45 }
 0x444   :  { %5811 = vmatprep.subr.bf16.mxu0 %v9775_v46 }
 0x445   :  { %5851 = vmatpush2.bf16.msra.mxu1 %v9818_v60 }
 0x446   :  { %5852 = vmatprep.subr.bf16.mxu1 %v9823_v62 }
 0x447   :  { %5812 = vmatpush2.bf16.msra.mxu0 %v9773_v61 }
 0x448   :  { %5813 = vmatprep.subr.bf16.mxu0 %v9778_v16 }
 0x449   :  { %5853 = vmatpush2.bf16.msra.mxu1 %v9821_v19 }
 0x44a   :  { %5854 = vmatprep.subr.bf16.mxu1 %v9826_v4  ;;  %v15539_v4 = vsub.s32 6, %v10314_v23 }
 0x44b   :  { %5814 = vmatpush2.bf16.msra.mxu0 %v9776_v57  ;;  %v15541_v57 = vsub.s32 7, %v10314_v23 }
 0x44c   :  { %5815 = vmatprep.subr.bf16.mxu0 %v9781_v49  ;;  %v12082_v7 = vrot.slane %v10230_v0, %v15539_v4  ;;  %v5970_v4 = vld [vmem:[#allocation6 + $0x1c8] sm:$0xff] }
 0x44d   :  { %5855 = vmatpush2.bf16.msra.mxu1 %v9824_v59  ;;  %v12087_v49 = vrot.slane %v10230_v0, %v15541_v57  ;;  %v5973_v0 = vld [vmem:[#allocation6 + $0x1e0] sm:$0xff] }
 0x44e   :  { %5856 = vmatprep.subr.bf16.mxu1 %v9829_v52  ;;  %15540 = vst [vmem:[#allocation532_spill] sm:$0xff] %v12082_v7 }
 0x44f   :  { %5816 = vmatpush2.bf16.msra.mxu0 %v9779_v3  ;;  %15542 = vst [vmem:[#allocation533_spill] sm:$0xff] %v12087_v49 }
 0x450   :  { %5817 = vmatprep.subr.bf16.mxu0 %v9784_v15 }
 0x451   :  { %5857 = vmatpush2.bf16.msra.mxu1 %v9827_v58 }
 0x452   :  { %5858 = vmatprep.subr.bf16.mxu1 %v9832_v42 }
 0x453   :  { %5818 = vmatpush2.bf16.msra.mxu0 %v9782_v56 }
 0x455   :  { %5859 = vmatpush2.bf16.msra.mxu1 %v9830_v30 }
 0x456   :  { %v4799_v46 = vpop.f32.mrf.mxu0  ;;  %5820 = vmatmul.mubr.bf16.vlgmr.msra.gmra.mxu0 %v4933_v8 }
 0x457   :  { %v4800_v59 = vadd.f32 %v4799_v46, %v12082_v7 }
 0x458   :  { %v4840_v13 = vpop.f32.mrf.mxu1  ;;  %v4801_v55 = vpop.f32.mrf.mxu0 }
 0x459   :  { %v4802_v52 = vadd.f32 %v4801_v55, %v12087_v49  ;;  %v4841_v3 = vadd.f32 %v4840_v13, %v4800_v59  ;;  %v5974_v55 = vld [vmem:[#allocation6 + $0x1e8] sm:$0xff]  ;;  %v5965_v59 = vld [vmem:[#allocation6 + $0x1a0] sm:$0xff] }
 0x45a   :  { %v4842_v60 = vpop.f32.mrf.mxu1  ;;  %v4803_v62 = vpop.f32.mrf.mxu0  ;;  %v5930_v49 = vld [vmem:[#allocation6 + $0x88] sm:$0xff] }
 0x45b   :  { %v4843_v15 = vadd.f32 %v4842_v60, %v4802_v52  ;;  %v5961_v60 = vld [vmem:[#allocation6 + $0x180] sm:$0xff] }
 0x45c   :  { %v4844_v61 = vpop.f32.mrf.mxu1  ;;  %v4804_v16 = vpop.f32.mrf.mxu0 }
 0x45e   :  { %v4845_v19 = vpop.f32.mrf.mxu1 }
 0x45f   :  { %v5969_v19 = vld [vmem:[#allocation6 + $0x1c0] sm:$0xff] }
 0x460   :  { %v12091_v7 = vcombine.low %v5969_v19, %v5973_v0  ;;  %v12093_v13 = vcombine.high %v5969_v19, %v5973_v0  ;;  %v5945_v0 = vld [vmem:[#allocation6 + $0x100] sm:$0xff] }
 0x462   :  { %6681 = vmatprep.subr.bf16.mxu0 %v12093_v13 }
 0x463   :  { %6682 = vmatpush1.bf16.msra.mxu0 %v12091_v7 }
 0x496   :  { %v4881_v51 = vpop.f32.mrf.mxu0 }
 0x497   :  { %v4882_v58 = vadd.f32 %v4881_v51, %v4841_v3  ;;  %v12095_v3 = vcombine.low %v5970_v4, %v5974_v55  ;;  %v12097_v51 = vcombine.high %v5970_v4, %v5974_v55  ;;  %v5949_v4 = vld [vmem:[#allocation6 + $0x120] sm:$0xff] }
 0x498   :  { %v4922_v42 = vpop.f32.mrf.mxu1  ;;  %v4883_v56 = vpop.f32.mrf.mxu0 }
 0x499   :  { %v4884_v45 = vadd.f32 %v4883_v56, %v4843_v15  ;;  %v4923_v8 = vadd.f32 %v4922_v42, %v4882_v58  ;;  %15543 = vst [vmem:[#allocation534_spill] sm:$0xff] %v12095_v3  ;;  %v12099_v15 = vcombine.high %v5961_v60, %v5965_v59  ;;  %v5962_v58 = vld [vmem:[#allocation6 + $0x188] sm:$0xff]  ;;  %v5953_v56 = vld [vmem:[#allocation6 + $0x140] sm:$0xff]  ;;  %6722 = vmatprep.subr.bf16.mxu1 %v12097_v51 }
 0x49a   :  { %v4924_v30 = vpop.f32.mrf.mxu1  ;;  %v4885_v62 = vpop.f32.mrf.mxu0  ;;  %v5966_v42 = vld [vmem:[#allocation6 + $0x1a8] sm:$0xff] }
 0x49b   :  { %v4925_v61 = vadd.f32 %v4924_v30, %v4884_v45  ;;  %v4935_v52 = vpack.c.bf16 %v4923_v8, %v4923_v8  ;;  %v12102_v45 = vcombine.high %v5962_v58, %v5966_v42  ;;  %v5957_v30 = vld [vmem:[#allocation6 + $0x160] sm:$0xff]  ;;  %v5954_v62 = vld [vmem:[#allocation6 + $0x148] sm:$0xff]  ;;  %v12107_v8 = vcombine.low %v5961_v60, %v5965_v59  ;;  %6683 = vmatprep.subr.bf16.mxu0 %v12099_v15 }
 0x49c   :  { %v4926_v16 = vpop.f32.mrf.mxu1  ;;  %v4886_v23 = vpop.f32.mrf.mxu0  ;;  %v12119_v55 = vcombine.low %v5953_v56, %v5957_v30  ;;  %v12125_v59 = vcombine.high %v5945_v0, %v5949_v4 }
 0x49d   :  { %v4936_v57 = vpack.c.bf16 %v4925_v61, %v4925_v61  ;;  %15544 = vst [vmem:[#allocation535_spill] sm:$0xff] %v12102_v45  ;;  %v5958_v61 = vld [vmem:[#allocation6 + $0x168] sm:$0xff]  ;;  %v12109_v16 = vcombine.low %v5962_v58, %v5966_v42  ;;  %v12113_v23 = vcombine.high %v5953_v56, %v5957_v30  ;;  %6684 = vmatpush1.bf16.msra.mxu0 %v12107_v8  ;;  %v5937_v58 = vld [vmem:[#allocation6 + $0xc0] sm:$0xff] }
 0x49e   :  { %v4927_v46 = vpop.f32.mrf.mxu1  ;;  %v12115_v19 = vcombine.high %v5954_v62, %v5958_v61  ;;  %15548 = vst [vmem:[#allocation539_spill] sm:$0xff] %v12119_v55  ;;  %v12121_v60 = vcombine.low %v5954_v62, %v5958_v61  ;;  %15550 = vst [vmem:[#allocation541_spill] sm:$0xff] %v12125_v59  ;;  %v5941_v42 = vld [vmem:[#allocation6 + $0xe0] sm:$0xff]  ;;  %v12131_v56 = vcombine.low %v5945_v0, %v5949_v4 }
 0x49f   :  { %5860 = vmatprep.mubr.bf16.mxu1 %v4936_v57  ;;  %15545 = vst [vmem:[#allocation536_spill] sm:$0xff] %v12109_v16  ;;  %15546 = vst [vmem:[#allocation537_spill] sm:$0xff] %v12113_v23  ;;  %v5946_v57 = vld [vmem:[#allocation6 + $0x108] sm:$0xff]  ;;  %6685 = vmatprep.subr.bf16.mxu0 %v12113_v23  ;;  %v12137_v62 = vcombine.high %v5937_v58, %v5941_v42  ;;  %v12143_v0 = vcombine.low %v5937_v58, %v5941_v42 }
 0x4a0   :  { %5861 = vmatmul.mubr.bf16.vlgmr.msra.gmra.mxu1 %v4935_v52  ;;  %15547 = vst [vmem:[#allocation538_spill] sm:$0xff] %v12115_v19  ;;  %v5950_v46 = vld [vmem:[#allocation6 + $0x128] sm:$0xff]  ;;  %15549 = vst [vmem:[#allocation540_spill] sm:$0xff] %v12121_v60 }
 0x4a1   :  { %6723 = vmatpush1.bf16.msra.mxu1 %v12095_v3  ;;  %v12127_v52 = vcombine.high %v5946_v57, %v5950_v46  ;;  %v5942_v3 = vld [vmem:[#allocation6 + $0xe8] sm:$0xff]  ;;  %6686 = vmatpush1.bf16.msra.mxu0 %v12119_v55  ;;  %15552 = vst [vmem:[#allocation543_spill] sm:$0xff] %v12131_v56  ;;  %v12133_v30 = vcombine.low %v5946_v57, %v5950_v46  ;;  %15554 = vst [vmem:[#allocation545_spill] sm:$0xff] %v12137_v62 }
 0x4a2   :  { %6724 = vmatprep.subr.bf16.mxu1 %v12102_v45  ;;  %v5938_v45 = vld [vmem:[#allocation6 + $0xc8] sm:$0xff]  ;;  %6687 = vmatprep.subr.bf16.mxu0 %v12125_v59  ;;  %15556 = vst [vmem:[#allocation547_spill] sm:$0xff] %v12143_v0 }
 0x4a3   :  { %15551 = vst [vmem:[#allocation542_spill] sm:$0xff] %v12127_v52  ;;  %15553 = vst [vmem:[#allocation544_spill] sm:$0xff] %v12133_v30  ;;  %v12139_v61 = vcombine.high %v5938_v45, %v5942_v3  ;;  %v5934_v23 = vld [vmem:[#allocation6 + $0xa8] sm:$0xff]  ;;  %v12145_v4 = vcombine.low %v5938_v45, %v5942_v3 }
 0x4a4   :  { %v12151_v46 = vcombine.high %v5930_v49, %v5934_v23  ;;  %v5922_v59 = vld [vmem:[#allocation6 + $0x48] sm:$0xff]  ;;  %v12157_v3 = vcombine.low %v5930_v49, %v5934_v23 }
 0x4a5   :  { %6725 = vmatpush1.bf16.msra.mxu1 %v12109_v16  ;;  %15555 = vst [vmem:[#allocation546_spill] sm:$0xff] %v12139_v61  ;;  %v5933_v16 = vld [vmem:[#allocation6 + $0xa0] sm:$0xff]  ;;  %6688 = vmatpush1.bf16.msra.mxu0 %v12131_v56  ;;  %15557 = vst [vmem:[#allocation548_spill] sm:$0xff] %v12145_v4  ;;  %v5926_v55 = vld [vmem:[#allocation6 + $0x68] sm:$0xff] }
 0x4a6   :  { %6726 = vmatprep.subr.bf16.mxu1 %v12115_v19  ;;  %v5929_v19 = vld [vmem:[#allocation6 + $0x80] sm:$0xff]  ;;  %6689 = vmatprep.subr.bf16.mxu0 %v12137_v62  ;;  %15559 = vst [vmem:[#allocation550_spill] sm:$0xff] %v12151_v46  ;;  %15561 = vst [vmem:[#allocation552_spill] sm:$0xff] %v12157_v3  ;;  %v12163_v42 = vcombine.high %v5922_v59, %v5926_v55  ;;  %v5914_v62 = vld [vmem:[#allocation6 + $0x8] sm:$0xff]  ;;  %v12169_v49 = vcombine.low %v5922_v59, %v5926_v55 }
 0x4a7   :  { %v12149_v57 = vcombine.high %v5929_v19, %v5933_v16  ;;  %v12155_v58 = vcombine.low %v5929_v19, %v5933_v16  ;;  %v5918_v56 = vld [vmem:[#allocation6 + $0x28] sm:$0xff] }
 0x4a8   :  { %15563 = vst [vmem:[#allocation554_spill] sm:$0xff] %v12163_v42  ;;  %15565 = vst [vmem:[#allocation556_spill] sm:$0xff] %v12169_v49  ;;  %v12175_v19 = vcombine.high %v5914_v62, %v5918_v56  ;;  %v12181_v55 = vcombine.low %v5914_v62, %v5918_v56 }
 0x4a9   :  { %6727 = vmatpush1.bf16.msra.mxu1 %v12121_v60  ;;  %15558 = vst [vmem:[#allocation549_spill] sm:$0xff] %v12149_v57  ;;  %v5925_v60 = vld [vmem:[#allocation6 + $0x60] sm:$0xff]  ;;  %6690 = vmatpush1.bf16.msra.mxu0 %v12143_v0  ;;  %15560 = vst [vmem:[#allocation551_spill] sm:$0xff] %v12155_v58  ;;  %v6038_v0 = vld [vmem:[#allocation6 + $0x3e8] sm:$0xff] }
 0x4aa   :  { %6728 = vmatprep.subr.bf16.mxu1 %v12127_v52  ;;  %v5921_v52 = vld [vmem:[#allocation6 + $0x40] sm:$0xff]  ;;  %6691 = vmatprep.subr.bf16.mxu0 %v12149_v57  ;;  %15567 = vst [vmem:[#allocation558_spill] sm:$0xff] %v12175_v19  ;;  %v6034_v57 = vld [vmem:[#allocation6 + $0x3c8] sm:$0xff]  ;;  %15569 = vst [vmem:[#allocation560_spill] sm:$0xff] %v12181_v55 }
 0x4ab   :  { %v12161_v45 = vcombine.high %v5921_v52, %v5925_v60  ;;  %v12167_v16 = vcombine.low %v5921_v52, %v5925_v60  ;;  %v12187_v52 = vcombine.high %v6034_v57, %v6038_v0  ;;  %v12193_v56 = vcombine.low %v6034_v57, %v6038_v0 }
 0x4ad   :  { %6729 = vmatpush1.bf16.msra.mxu1 %v12133_v30  ;;  %15562 = vst [vmem:[#allocation553_spill] sm:$0xff] %v12161_v45  ;;  %v5917_v30 = vld [vmem:[#allocation6 + $0x20] sm:$0xff]  ;;  %6692 = vmatpush1.bf16.msra.mxu0 %v12155_v58  ;;  %15564 = vst [vmem:[#allocation555_spill] sm:$0xff] %v12167_v16  ;;  %v6030_v58 = vld [vmem:[#allocation6 + $0x3a8] sm:$0xff] }
 0x4ae   :  { %6730 = vmatprep.subr.bf16.mxu1 %v12139_v61  ;;  %v5913_v61 = vld [vmem:[#allocation6] sm:$0xff]  ;;  %6693 = vmatprep.subr.bf16.mxu0 %v12161_v45  ;;  %15571 = vst [vmem:[#allocation562_spill] sm:$0xff] %v12187_v52  ;;  %v6026_v45 = vld [vmem:[#allocation6 + $0x388] sm:$0xff]  ;;  %15573 = vst [vmem:[#allocation564_spill] sm:$0xff] %v12193_v56 }
 0x4af   :  { %v12173_v23 = vcombine.high %v5913_v61, %v5917_v30  ;;  %v12179_v60 = vcombine.low %v5913_v61, %v5917_v30  ;;  %v12199_v61 = vcombine.high %v6026_v45, %v6030_v58  ;;  %v12205_v0 = vcombine.low %v6026_v45, %v6030_v58 }
 0x4b1   :  { %6731 = vmatpush1.bf16.msra.mxu1 %v12145_v4  ;;  %15566 = vst [vmem:[#allocation557_spill] sm:$0xff] %v12173_v23  ;;  %v6037_v4 = vld [vmem:[#allocation6 + $0x3e0] sm:$0xff]  ;;  %6694 = vmatpush1.bf16.msra.mxu0 %v12167_v16  ;;  %15568 = vst [vmem:[#allocation559_spill] sm:$0xff] %v12179_v60  ;;  %v6022_v16 = vld [vmem:[#allocation6 + $0x368] sm:$0xff] }
 0x4b2   :  { %6732 = vmatprep.subr.bf16.mxu1 %v12151_v46  ;;  %v6033_v46 = vld [vmem:[#allocation6 + $0x3c0] sm:$0xff]  ;;  %6695 = vmatprep.subr.bf16.mxu0 %v12173_v23  ;;  %15575 = vst [vmem:[#allocation566_spill] sm:$0xff] %v12199_v61  ;;  %v6018_v23 = vld [vmem:[#allocation6 + $0x348] sm:$0xff]  ;;  %15577 = vst [vmem:[#allocation568_spill] sm:$0xff] %v12205_v0 }
 0x4b3   :  { %v12185_v59 = vcombine.high %v6033_v46, %v6037_v4  ;;  %v12191_v30 = vcombine.low %v6033_v46, %v6037_v4  ;;  %v12211_v46 = vcombine.high %v6018_v23, %v6022_v16  ;;  %v12217_v58 = vcombine.low %v6018_v23, %v6022_v16 }
 0x4b5   :  { %6733 = vmatpush1.bf16.msra.mxu1 %v12157_v3  ;;  %15570 = vst [vmem:[#allocation561_spill] sm:$0xff] %v12185_v59  ;;  %v6029_v3 = vld [vmem:[#allocation6 + $0x3a0] sm:$0xff]  ;;  %6696 = vmatpush1.bf16.msra.mxu0 %v12179_v60  ;;  %15572 = vst [vmem:[#allocation563_spill] sm:$0xff] %v12191_v30  ;;  %v6014_v60 = vld [vmem:[#allocation6 + $0x328] sm:$0xff] }
 0x4b6   :  { %6734 = vmatprep.subr.bf16.mxu1 %v12163_v42  ;;  %v6025_v42 = vld [vmem:[#allocation6 + $0x380] sm:$0xff]  ;;  %6697 = vmatprep.subr.bf16.mxu0 %v12185_v59  ;;  %15579 = vst [vmem:[#allocation570_spill] sm:$0xff] %v12211_v46  ;;  %v6010_v59 = vld [vmem:[#allocation6 + $0x308] sm:$0xff]  ;;  %15581 = vst [vmem:[#allocation572_spill] sm:$0xff] %v12217_v58 }
 0x4b7   :  { %v12197_v62 = vcombine.high %v6025_v42, %v6029_v3  ;;  %v12203_v4 = vcombine.low %v6025_v42, %v6029_v3  ;;  %v12223_v42 = vcombine.high %v6010_v59, %v6014_v60 }
 0x4b9   :  { %6735 = vmatpush1.bf16.msra.mxu1 %v12169_v49  ;;  %15574 = vst [vmem:[#allocation565_spill] sm:$0xff] %v12197_v62  ;;  %v6021_v49 = vld [vmem:[#allocation6 + $0x360] sm:$0xff]  ;;  %6698 = vmatpush2.bf16.msra.mxu0 %v12191_v30  ;;  %15576 = vst [vmem:[#allocation567_spill] sm:$0xff] %v12203_v4 }
 0x4ba   :  { %6736 = vmatprep.subr.bf16.mxu1 %v12175_v19  ;;  %v6017_v19 = vld [vmem:[#allocation6 + $0x340] sm:$0xff]  ;;  %6699 = vmatprep.subr.bf16.mxu0 %v12197_v62  ;;  %15583 = vst [vmem:[#allocation574_spill] sm:$0xff] %v12223_v42 }
 0x4bb   :  { %v12209_v57 = vcombine.high %v6017_v19, %v6021_v49  ;;  %v12215_v3 = vcombine.low %v6017_v19, %v6021_v49 }
 0x4bd   :  { %6737 = vmatpush1.bf16.msra.mxu1 %v12181_v55  ;;  %15578 = vst [vmem:[#allocation569_spill] sm:$0xff] %v12209_v57  ;;  %v6013_v55 = vld [vmem:[#allocation6 + $0x320] sm:$0xff]  ;;  %6700 = vmatpush2.bf16.msra.mxu0 %v12203_v4  ;;  %15580 = vst [vmem:[#allocation571_spill] sm:$0xff] %v12215_v3 }
 0x4be   :  { %6738 = vmatprep.subr.bf16.mxu1 %v12187_v52  ;;  %v6009_v52 = vld [vmem:[#allocation6 + $0x300] sm:$0xff]  ;;  %6701 = vmatprep.subr.bf16.mxu0 %v12209_v57 }
 0x4bf   :  { %v12221_v45 = vcombine.high %v6009_v52, %v6013_v55 }
 0x4c1   :  { %6739 = vmatpush2.bf16.msra.mxu1 %v12193_v56  ;;  %15582 = vst [vmem:[#allocation573_spill] sm:$0xff] %v12221_v45  ;;  %6702 = vmatpush2.bf16.msra.mxu0 %v12215_v3  ;;  %v12229_v56 = vcombine.low %v6010_v59, %v6014_v60  ;;  %v6002_v3 = vld [vmem:[#allocation6 + $0x2c8] sm:$0xff] }
 0x4c2   :  { %6740 = vmatprep.subr.bf16.mxu1 %v12199_v61  ;;  %v12227_v61 = vcombine.low %v6009_v52, %v6013_v55  ;;  %6703 = vmatprep.subr.bf16.mxu0 %v12221_v45  ;;  %v6005_v45 = vld [vmem:[#allocation6 + $0x2e0] sm:$0xff] }
 0x4c3   :  { %15585 = vst [vmem:[#allocation576_spill] sm:$0xff] %v12229_v56 }
 0x4c4   :  { %15584 = vst [vmem:[#allocation575_spill] sm:$0xff] %v12227_v61 }
 0x4c5   :  { %6741 = vmatpush2.bf16.msra.mxu1 %v12205_v0  ;;  %6704 = vmatpush2.bf16.msra.mxu0 %v12227_v61  ;;  %v6006_v61 = vld [vmem:[#allocation6 + $0x2e8] sm:$0xff] }
 0x4c6   :  { %6742 = vmatprep.subr.bf16.mxu1 %v12211_v46 }
 0x4c9   :  { %6743 = vmatpush2.bf16.msra.mxu1 %v12217_v58  ;;  %v6001_v58 = vld [vmem:[#allocation6 + $0x2c0] sm:$0xff] }
 0x4ca   :  { %6744 = vmatprep.subr.bf16.mxu1 %v12223_v42  ;;  %v12239_v42 = vcombine.high %v6001_v58, %v6005_v45  ;;  %v12241_v57 = vcombine.low %v6001_v58, %v6005_v45 }
 0x4cc   :  { %15586 = vst [vmem:[#allocation577_spill] sm:$0xff] %v12239_v42  ;;  %15587 = vst [vmem:[#allocation578_spill] sm:$0xff] %v12241_v57  ;;  %6705 = vmatprep.subr.bf16.mxu0 %v12239_v42 }
 0x4cd   :  { %6745 = vmatpush2.bf16.msra.mxu1 %v12229_v56  ;;  %v12243_v56 = vcombine.low %v6002_v3, %v6006_v61  ;;  %6706 = vmatpush2.bf16.msra.mxu0 %v12241_v57  ;;  %v5982_v57 = vld [vmem:[#allocation6 + $0x228] sm:$0xff] }
 0x4cf   :  { %15588 = vst [vmem:[#allocation579_spill] sm:$0xff] %v12243_v56 }
 0x4d6   :  { %v5739_v16 = vpop.f32.mrf.mxu0 }
 0x4d8   :  { %v5780_v49 = vpop.f32.mrf.mxu1  ;;  %v5741_v19 = vpop.f32.mrf.mxu0 }
 0x4d9   :  { %v12235_v23 = vadd.f32 %v5780_v49, %v5739_v16  ;;  %v12245_v16 = vcombine.high %v6002_v3, %v6006_v61  ;;  %v5997_v49 = vld [vmem:[#allocation6 + $0x2a0] sm:$0xff] }
 0x4da   :  { %v5782_v46 = vpop.f32.mrf.mxu1  ;;  %v5743_v55 = vpop.f32.mrf.mxu0  ;;  %v5985_v3 = vld [vmem:[#allocation6 + $0x240] sm:$0xff] }
 0x4db   :  { %v12237_v0 = vadd.f32 %v5782_v46, %v5741_v19  ;;  %15589 = vst [vmem:[#allocation580_spill] sm:$0xff] %v12245_v16  ;;  %6746 = vmatprep.subr.bf16.mxu1 %v12245_v16  ;;  %v5993_v46 = vld [vmem:[#allocation6 + $0x280] sm:$0xff]  ;;  %v5994_v19 = vld [vmem:[#allocation6 + $0x288] sm:$0xff] }
 0x4dc   :  { %v5784_v52 = vpop.f32.mrf.mxu1  ;;  %v5744_v60 = vpop.f32.mrf.mxu0  ;;  %6747 = vmatpush2.bf16.msra.mxu1 %v12243_v56  ;;  %v12251_v55 = vcombine.high %v5993_v46, %v5997_v49  ;;  %v12253_v58 = vcombine.low %v5993_v46, %v5997_v49  ;;  %v5990_v16 = vld [vmem:[#allocation6 + $0x268] sm:$0xff] }
 0x4dd   :  { %v5998_v52 = vld [vmem:[#allocation6 + $0x2a8] sm:$0xff]  ;;  %v5989_v60 = vld [vmem:[#allocation6 + $0x260] sm:$0xff] }
 0x4de   :  { %v5785_v59 = vpop.f32.mrf.mxu1  ;;  %15590 = vst [vmem:[#allocation581_spill] sm:$0xff] %v12251_v55  ;;  %15591 = vst [vmem:[#allocation582_spill] sm:$0xff] %v12253_v58  ;;  %v12255_v45 = vcombine.low %v5994_v19, %v5998_v52  ;;  %v12257_v61 = vcombine.high %v5994_v19, %v5998_v52  ;;  %6707 = vmatprep.subr.bf16.mxu0 %v12251_v55  ;;  %v12263_v56 = vcombine.high %v5985_v3, %v5989_v60  ;;  %v5977_v52 = vld [vmem:[#allocation6 + $0x200] sm:$0xff]  ;;  %v5978_v55 = vld [vmem:[#allocation6 + $0x208] sm:$0xff] }
 0x4df   :  { %6708 = vmatpush2.bf16.msra.mxu0 %v12253_v58  ;;  %v5986_v59 = vld [vmem:[#allocation6 + $0x248] sm:$0xff]  ;;  %v12265_v46 = vcombine.low %v5985_v3, %v5989_v60  ;;  %v12279_v3 = vcombine.low %v5978_v55, %v5982_v57  ;;  %v5971_v60 = vld [vmem:[#allocation6 + $0x1d0] sm:$0xff] }
 0x4e0   :  { %15592 = vst [vmem:[#allocation583_spill] sm:$0xff] %v12255_v45  ;;  %15593 = vst [vmem:[#allocation584_spill] sm:$0xff] %v12257_v61  ;;  %6748 = vmatprep.subr.bf16.mxu1 %v12257_v61  ;;  %v12267_v49 = vcombine.low %v5986_v59, %v5990_v16  ;;  %v12269_v19 = vcombine.high %v5986_v59, %v5990_v16  ;;  %6709 = vmatprep.subr.bf16.mxu0 %v12263_v56  ;;  %v5981_v61 = vld [vmem:[#allocation6 + $0x220] sm:$0xff]  ;;  %v5975_v59 = vld [vmem:[#allocation6 + $0x1f0] sm:$0xff] }
 0x4e1   :  { %6749 = vmatpush2.bf16.msra.mxu1 %v12255_v45  ;;  %15594 = vst [vmem:[#allocation585_spill] sm:$0xff] %v12263_v56  ;;  %15595 = vst [vmem:[#allocation586_spill] sm:$0xff] %v12265_v46  ;;  %v12274_v58 = vcombine.low %v5977_v52, %v5981_v61  ;;  %v12276_v45 = vcombine.high %v5977_v52, %v5981_v61  ;;  %v12281_v16 = vcombine.high %v5978_v55, %v5982_v57 }
 0x4e2   :  { %15596 = vst [vmem:[#allocation587_spill] sm:$0xff] %v12267_v49  ;;  %15597 = vst [vmem:[#allocation588_spill] sm:$0xff] %v12269_v19  ;;  %6750 = vmatprep.subr.bf16.mxu1 %v12269_v19  ;;  %v5972_v19 = vld [vmem:[#allocation6 + $0x1d8] sm:$0xff]  ;;  %v12287_v61 = vcombine.low %v5971_v60, %v5975_v59  ;;  %v12289_v52 = vcombine.high %v5971_v60, %v5975_v59  ;;  %v5885_v60 = vrot.slane %v10232_v1, %v10343_v41 }
 0x4e3   :  { %6710 = vmatpush2.bf16.msra.mxu0 %v12265_v46  ;;  %15598 = vst [vmem:[#allocation589_spill] sm:$0xff] %v12274_v58  ;;  %15599 = vst [vmem:[#allocation590_spill] sm:$0xff] %v12276_v45  ;;  %v5889_v59 = vrot.slane %v10232_v1, %v10347_v43 }
 0x4e4   :  { %15600 = vst [vmem:[#allocation591_spill] sm:$0xff] %v12279_v3  ;;  %15601 = vst [vmem:[#allocation592_spill] sm:$0xff] %v12281_v16  ;;  %6711 = vmatprep.subr.bf16.mxu0 %v12276_v45 }
 0x4e5   :  { %6751 = vmatpush2.bf16.msra.mxu1 %v12267_v49  ;;  %15602 = vst [vmem:[#allocation593_spill] sm:$0xff] %v12289_v52  ;;  %v5976_v49 = vld [vmem:[#allocation6 + $0x1f8] sm:$0xff]  ;;  %v5890_v4 = vcombine.low %v5885_v60, %v5889_v59 }
 0x4e6   :  { %6752 = vmatprep.subr.bf16.mxu1 %v12281_v16  ;;  %v12291_v46 = vcombine.low %v5972_v19, %v5976_v49  ;;  %v12293_v57 = vcombine.high %v5972_v19, %v5976_v49 }
 0x4e7   :  { %6712 = vmatpush2.bf16.msra.mxu0 %v12274_v58 }
 0x4e8   :  { %15603 = vst [vmem:[#allocation594_spill] sm:$0xff] %v12291_v46  ;;  %15604 = vst [vmem:[#allocation595_spill] sm:$0xff] %v12293_v57  ;;  %6763 = vmatprep.subr.bf16.mxu0 %v12289_v52 }
 0x4e9   :  { %6753 = vmatpush2.bf16.msra.mxu1 %v12279_v3 }
 0x4ea   :  { %6804 = vmatprep.subr.bf16.mxu1 %v12293_v57 }
 0x516   :  { %v5821_v55 = vpop.f32.mrf.mxu0 }
 0x517   :  { %v5822_v16 = vadd.f32 %v5821_v55, %v12235_v23  ;;  %v5960_v55 = vld [vmem:[#allocation6 + $0x178] sm:$0xff] }
 0x518   :  { %v5823_v58 = vpop.f32.mrf.mxu0 }
 0x519   :  { %v5824_v45 = vadd.f32 %v5823_v58, %v12237_v0  ;;  %v12305_v0 = vrot.slane %v5890_v4, %v10317_v26  ;;  %v5963_v58 = vld [vmem:[#allocation6 + $0x190] sm:$0xff] }
 0x51a   :  { %v5825_v3 = vpop.f32.mrf.mxu0 }
 0x51b   :  { %v5964_v3 = vld [vmem:[#allocation6 + $0x198] sm:$0xff] }
 0x51c   :  { %v5826_v56 = vpop.f32.mrf.mxu0 }
 0x560   :  { %v5862_v49 = vpop.f32.mrf.mxu1 }
 0x561   :  { %v5863_v42 = vadd.f32 %v5862_v49, %v5822_v16  ;;  %v5968_v16 = vld [vmem:[#allocation6 + $0x1b8] sm:$0xff] }
 0x562   :  { %v5864_v19 = vpop.f32.mrf.mxu1  ;;  %v12325_v59 = vcombine.low %v5964_v3, %v5968_v16 }
 0x563   :  { %v5865_v52 = vadd.f32 %v5864_v19, %v5824_v45  ;;  %v5967_v45 = vld [vmem:[#allocation6 + $0x1b0] sm:$0xff] }
 0x564   :  { %v5866_v57 = vpop.f32.mrf.mxu1  ;;  %v12315_v4 = vcombine.high %v5963_v58, %v5967_v45  ;;  %v12323_v60 = vcombine.low %v5963_v58, %v5967_v45  ;;  %15608 = vst [vmem:[#allocation599_spill] sm:$0xff] %v12325_v59 }
 0x565   :  { %v5871_v62 = vcombine.low %v5863_v42, %v5865_v52  ;;  %v5959_v52 = vld [vmem:[#allocation6 + $0x170] sm:$0xff]  ;;  %v5956_v57 = vld [vmem:[#allocation6 + $0x158] sm:$0xff] }
 0x566   :  { %v5867_v30 = vpop.f32.mrf.mxu1  ;;  %15605 = vst [vmem:[#allocation596_spill] sm:$0xff] %v12315_v4  ;;  %15607 = vst [vmem:[#allocation598_spill] sm:$0xff] %v12323_v60  ;;  %v12329_v19 = vcombine.high %v5956_v57, %v5960_v55  ;;  %v12337_v45 = vcombine.low %v5956_v57, %v5960_v55 }
 0x567   :  { %v5878_v23 = vrot.slane %v5871_v62, %v10317_v26  ;;  %v5955_v62 = vld [vmem:[#allocation6 + $0x150] sm:$0xff] }
 0x568   :  { %v12327_v49 = vcombine.high %v5955_v62, %v5959_v52  ;;  %15610 = vst [vmem:[#allocation601_spill] sm:$0xff] %v12329_v19  ;;  %v12335_v58 = vcombine.low %v5955_v62, %v5959_v52  ;;  %15612 = vst [vmem:[#allocation603_spill] sm:$0xff] %v12337_v45 }
 0x569   :  { %v5880_v56 = vadd.f32 %v5878_v23, %v10323_v32  ;;  %v12317_v32 = vcombine.high %v5964_v3, %v5968_v16  ;;  %v5947_v23 = vld [vmem:[#allocation6 + $0x110] sm:$0xff] }
 0x56a   :  { %15609 = vst [vmem:[#allocation600_spill] sm:$0xff] %v12327_v49  ;;  %15611 = vst [vmem:[#allocation602_spill] sm:$0xff] %v12335_v58 }
 0x56b   :  { %v12309_v41 = vadd.f32 %v12305_v0, %v5880_v56  ;;  %15606 = vst [vmem:[#allocation597_spill] sm:$0xff] %v12317_v32  ;;  %v5951_v56 = vld [vmem:[#allocation6 + $0x130] sm:$0xff] }
 0x56c   :  { %v12341_v3 = vcombine.high %v5947_v23, %v5951_v56  ;;  %v12347_v62 = vcombine.low %v5947_v23, %v5951_v56 }
 0x56d   :  { %v5907_v1 = vrot.slane %v12309_v41, %v10317_v26 }
 0x56e   :  { %15613 = vst [vmem:[#allocation604_spill] sm:$0xff] %v12341_v3  ;;  %15615 = vst [vmem:[#allocation606_spill] sm:$0xff] %v12347_v62 }
 0x56f   :  { %v5908_v43 = vcombine.high %v5907_v1, %v5907_v1  ;;  %v12313_v30 = vpack.c.bf16 %v5907_v1, %v5907_v1  ;;  %v5948_v1 = vld [vmem:[#allocation6 + $0x118] sm:$0xff] }
 0x571   :  { %v5912_v42 = vpack.c.bf16 %v5908_v43, %v5908_v43  ;;  %v5952_v43 = vld [vmem:[#allocation6 + $0x138] sm:$0xff] }
 0x572   :  { %v12343_v16 = vcombine.high %v5948_v1, %v5952_v43  ;;  %v12349_v52 = vcombine.low %v5948_v1, %v5952_v43 }
 0x573   :  { %6713 = vmatprep.mubr.bf16.mxu0 %v5912_v42  ;;  %6754 = vmatprep.mubr.bf16.mxu1 %v5912_v42 }
 0x574   :  { %6714 = vmatmul.mubr.bf16.vlgmr.msra.gmra.mxu0 %v12313_v30  ;;  %6755 = vmatmul.mubr.bf16.vlgmr.msra.gmra.mxu1 %v12313_v30  ;;  %15614 = vst [vmem:[#allocation605_spill] sm:$0xff] %v12343_v16  ;;  %15616 = vst [vmem:[#allocation607_spill] sm:$0xff] %v12349_v52 }
 0x575   :  { %6764 = vmatpush1.bf16.msra.mxu0 %v12287_v61  ;;  %6805 = vmatpush1.bf16.msra.mxu1 %v12291_v46  ;;  %v5944_v46 = vld [vmem:[#allocation6 + $0xf8] sm:$0xff] }
 0x576   :  { %6795 = vmatprep.mubr.bf16.mxu0 %v5912_v42  ;;  %6836 = vmatprep.mubr.bf16.mxu1 %v5912_v42  ;;  %v5939_v42 = vld [vmem:[#allocation6 + $0xd0] sm:$0xff] }
 0x577   :  { %6765 = vmatprep.subr.bf16.mxu0 %v12315_v4  ;;  %6806 = vmatprep.subr.bf16.mxu1 %v12317_v32  ;;  %v5943_v32 = vld [vmem:[#allocation6 + $0xf0] sm:$0xff]  ;;  %v5940_v4 = vld [vmem:[#allocation6 + $0xd8] sm:$0xff] }
 0x578   :  { %v12353_v57 = vcombine.high %v5939_v42, %v5943_v32  ;;  %v12355_v55 = vcombine.high %v5940_v4, %v5944_v46  ;;  %v12359_v23 = vcombine.low %v5939_v42, %v5943_v32  ;;  %v12361_v56 = vcombine.low %v5940_v4, %v5944_v46 }
 0x579   :  { %6766 = vmatpush1.bf16.msra.mxu0 %v12323_v60  ;;  %6807 = vmatpush1.bf16.msra.mxu1 %v12325_v59  ;;  %v5932_v59 = vld [vmem:[#allocation6 + $0x98] sm:$0xff] }
 0x57a   :  { %6767 = vmatprep.subr.bf16.mxu0 %v12327_v49  ;;  %6808 = vmatprep.subr.bf16.mxu1 %v12329_v19  ;;  %15617 = vst [vmem:[#allocation608_spill] sm:$0xff] %v12353_v57  ;;  %15618 = vst [vmem:[#allocation609_spill] sm:$0xff] %v12355_v55  ;;  %v5931_v19 = vld [vmem:[#allocation6 + $0x90] sm:$0xff]  ;;  %v5936_v60 = vld [vmem:[#allocation6 + $0xb8] sm:$0xff] }
 0x57b   :  { %v5935_v49 = vld [vmem:[#allocation6 + $0xb0] sm:$0xff]  ;;  %15619 = vst [vmem:[#allocation610_spill] sm:$0xff] %v12359_v23  ;;  %15620 = vst [vmem:[#allocation611_spill] sm:$0xff] %v12361_v56  ;;  %v12367_v43 = vcombine.high %v5932_v59, %v5936_v60  ;;  %v12373_v46 = vcombine.low %v5932_v59, %v5936_v60 }
 0x57c   :  { %v12365_v1 = vcombine.high %v5931_v19, %v5935_v49  ;;  %v12371_v32 = vcombine.low %v5931_v19, %v5935_v49 }
 0x57d   :  { %6768 = vmatpush1.bf16.msra.mxu0 %v12335_v58  ;;  %6809 = vmatpush1.bf16.msra.mxu1 %v12337_v45  ;;  %15622 = vst [vmem:[#allocation613_spill] sm:$0xff] %v12367_v43  ;;  %v5924_v45 = vld [vmem:[#allocation6 + $0x58] sm:$0xff]  ;;  %15624 = vst [vmem:[#allocation615_spill] sm:$0xff] %v12373_v46 }
 0x57e   :  { %6769 = vmatprep.subr.bf16.mxu0 %v12341_v3  ;;  %6810 = vmatprep.subr.bf16.mxu1 %v12343_v16  ;;  %15621 = vst [vmem:[#allocation612_spill] sm:$0xff] %v12365_v1  ;;  %v5923_v16 = vld [vmem:[#allocation6 + $0x50] sm:$0xff]  ;;  %v5928_v58 = vld [vmem:[#allocation6 + $0x78] sm:$0xff]  ;;  %15623 = vst [vmem:[#allocation614_spill] sm:$0xff] %v12371_v32 }
 0x57f   :  { %v5927_v3 = vld [vmem:[#allocation6 + $0x70] sm:$0xff]  ;;  %v12379_v42 = vcombine.high %v5924_v45, %v5928_v58  ;;  %v12385_v60 = vcombine.low %v5924_v45, %v5928_v58 }
 0x580   :  { %v12377_v4 = vcombine.high %v5923_v16, %v5927_v3  ;;  %v12383_v49 = vcombine.low %v5923_v16, %v5927_v3 }
 0x581   :  { %6770 = vmatpush1.bf16.msra.mxu0 %v12347_v62  ;;  %6811 = vmatpush1.bf16.msra.mxu1 %v12349_v52  ;;  %15626 = vst [vmem:[#allocation617_spill] sm:$0xff] %v12379_v42  ;;  %v5916_v52 = vld [vmem:[#allocation6 + $0x18] sm:$0xff]  ;;  %15628 = vst [vmem:[#allocation619_spill] sm:$0xff] %v12385_v60 }
 0x582   :  { %6771 = vmatprep.subr.bf16.mxu0 %v12353_v57  ;;  %6812 = vmatprep.subr.bf16.mxu1 %v12355_v55  ;;  %15625 = vst [vmem:[#allocation616_spill] sm:$0xff] %v12377_v4  ;;  %v5915_v55 = vld [vmem:[#allocation6 + $0x10] sm:$0xff]  ;;  %v5920_v62 = vld [vmem:[#allocation6 + $0x38] sm:$0xff]  ;;  %15627 = vst [vmem:[#allocation618_spill] sm:$0xff] %v12383_v49 }
 0x583   :  { %v5919_v57 = vld [vmem:[#allocation6 + $0x30] sm:$0xff]  ;;  %v12391_v19 = vcombine.high %v5916_v52, %v5920_v62  ;;  %v12397_v58 = vcombine.low %v5916_v52, %v5920_v62 }
 0x584   :  { %v12389_v59 = vcombine.high %v5915_v55, %v5919_v57  ;;  %v12395_v3 = vcombine.low %v5915_v55, %v5919_v57 }
 0x585   :  { %6772 = vmatpush1.bf16.msra.mxu0 %v12359_v23  ;;  %6813 = vmatpush1.bf16.msra.mxu1 %v12361_v56  ;;  %15630 = vst [vmem:[#allocation621_spill] sm:$0xff] %v12391_v19  ;;  %v6036_v56 = vld [vmem:[#allocation6 + $0x3d8] sm:$0xff]  ;;  %15632 = vst [vmem:[#allocation623_spill] sm:$0xff] %v12397_v58 }
 0x586   :  { %6773 = vmatprep.subr.bf16.mxu0 %v12365_v1  ;;  %6814 = vmatprep.subr.bf16.mxu1 %v12367_v43  ;;  %15629 = vst [vmem:[#allocation620_spill] sm:$0xff] %v12389_v59  ;;  %v6035_v43 = vld [vmem:[#allocation6 + $0x3d0] sm:$0xff]  ;;  %v6040_v23 = vld [vmem:[#allocation6 + $0x3f8] sm:$0xff]  ;;  %15631 = vst [vmem:[#allocation622_spill] sm:$0xff] %v12395_v3 }
 0x587   :  { %v6039_v1 = vld [vmem:[#allocation6 + $0x3f0] sm:$0xff]  ;;  %v12403_v16 = vcombine.high %v6036_v56, %v6040_v23  ;;  %v12409_v62 = vcombine.low %v6036_v56, %v6040_v23 }
 0x588   :  { %v12401_v45 = vcombine.high %v6035_v43, %v6039_v1  ;;  %v12407_v57 = vcombine.low %v6035_v43, %v6039_v1 }
 0x589   :  { %6774 = vmatpush1.bf16.msra.mxu0 %v12371_v32  ;;  %6815 = vmatpush1.bf16.msra.mxu1 %v12373_v46  ;;  %15634 = vst [vmem:[#allocation625_spill] sm:$0xff] %v12403_v16  ;;  %v6028_v46 = vld [vmem:[#allocation6 + $0x398] sm:$0xff]  ;;  %15636 = vst [vmem:[#allocation627_spill] sm:$0xff] %v12409_v62 }
 0x58a   :  { %6775 = vmatprep.subr.bf16.mxu0 %v12377_v4  ;;  %6816 = vmatprep.subr.bf16.mxu1 %v12379_v42  ;;  %15633 = vst [vmem:[#allocation624_spill] sm:$0xff] %v12401_v45  ;;  %v6027_v42 = vld [vmem:[#allocation6 + $0x390] sm:$0xff]  ;;  %v6032_v32 = vld [vmem:[#allocation6 + $0x3b8] sm:$0xff]  ;;  %15635 = vst [vmem:[#allocation626_spill] sm:$0xff] %v12407_v57 }
 0x58b   :  { %v6031_v4 = vld [vmem:[#allocation6 + $0x3b0] sm:$0xff]  ;;  %v12415_v55 = vcombine.high %v6028_v46, %v6032_v32  ;;  %v12421_v23 = vcombine.low %v6028_v46, %v6032_v32 }
 0x58c   :  { %v12413_v52 = vcombine.high %v6027_v42, %v6031_v4  ;;  %v12419_v1 = vcombine.low %v6027_v42, %v6031_v4 }
 0x58d   :  { %6776 = vmatpush1.bf16.msra.mxu0 %v12383_v49  ;;  %6817 = vmatpush1.bf16.msra.mxu1 %v12385_v60  ;;  %15638 = vst [vmem:[#allocation629_spill] sm:$0xff] %v12415_v55  ;;  %v6020_v60 = vld [vmem:[#allocation6 + $0x358] sm:$0xff]  ;;  %15640 = vst [vmem:[#allocation631_spill] sm:$0xff] %v12421_v23 }
 0x58e   :  { %6777 = vmatprep.subr.bf16.mxu0 %v12389_v59  ;;  %6818 = vmatprep.subr.bf16.mxu1 %v12391_v19  ;;  %15637 = vst [vmem:[#allocation628_spill] sm:$0xff] %v12413_v52  ;;  %v6019_v19 = vld [vmem:[#allocation6 + $0x350] sm:$0xff]  ;;  %v6024_v49 = vld [vmem:[#allocation6 + $0x378] sm:$0xff]  ;;  %15639 = vst [vmem:[#allocation630_spill] sm:$0xff] %v12419_v1 }
 0x58f   :  { %v6023_v59 = vld [vmem:[#allocation6 + $0x370] sm:$0xff]  ;;  %v12427_v43 = vcombine.high %v6020_v60, %v6024_v49  ;;  %v12433_v32 = vcombine.low %v6020_v60, %v6024_v49 }
 0x590   :  { %v12425_v56 = vcombine.high %v6019_v19, %v6023_v59  ;;  %v12431_v4 = vcombine.low %v6019_v19, %v6023_v59 }
 0x591   :  { %6778 = vmatpush1.bf16.msra.mxu0 %v12395_v3  ;;  %6819 = vmatpush1.bf16.msra.mxu1 %v12397_v58  ;;  %15642 = vst [vmem:[#allocation633_spill] sm:$0xff] %v12427_v43  ;;  %v6012_v58 = vld [vmem:[#allocation6 + $0x318] sm:$0xff]  ;;  %15644 = vst [vmem:[#allocation635_spill] sm:$0xff] %v12433_v32 }
 0x592   :  { %6779 = vmatprep.subr.bf16.mxu0 %v12401_v45  ;;  %6820 = vmatprep.subr.bf16.mxu1 %v12403_v16  ;;  %15641 = vst [vmem:[#allocation632_spill] sm:$0xff] %v12425_v56  ;;  %v6011_v16 = vld [vmem:[#allocation6 + $0x310] sm:$0xff]  ;;  %v6016_v3 = vld [vmem:[#allocation6 + $0x338] sm:$0xff]  ;;  %15643 = vst [vmem:[#allocation634_spill] sm:$0xff] %v12431_v4 }
 0x593   :  { %v6015_v45 = vld [vmem:[#allocation6 + $0x330] sm:$0xff]  ;;  %v12439_v42 = vcombine.high %v6012_v58, %v6016_v3  ;;  %v12445_v49 = vcombine.low %v6012_v58, %v6016_v3 }
 0x594   :  { %v12437_v46 = vcombine.high %v6011_v16, %v6015_v45  ;;  %v12443_v59 = vcombine.low %v6011_v16, %v6015_v45 }
 0x595   :  { %6780 = vmatpush2.bf16.msra.mxu0 %v12407_v57  ;;  %6821 = vmatpush2.bf16.msra.mxu1 %v12409_v62  ;;  %15646 = vst [vmem:[#allocation637_spill] sm:$0xff] %v12439_v42  ;;  %v6004_v62 = vld [vmem:[#allocation6 + $0x2d8] sm:$0xff]  ;;  %15648 = vst [vmem:[#allocation639_spill] sm:$0xff] %v12445_v49 }
 0x596   :  { %6781 = vmatprep.subr.bf16.mxu0 %v12413_v52  ;;  %6822 = vmatprep.subr.bf16.mxu1 %v12415_v55  ;;  %15645 = vst [vmem:[#allocation636_spill] sm:$0xff] %v12437_v46  ;;  %v6003_v55 = vld [vmem:[#allocation6 + $0x2d0] sm:$0xff]  ;;  %v6008_v57 = vld [vmem:[#allocation6 + $0x2f8] sm:$0xff]  ;;  %15647 = vst [vmem:[#allocation638_spill] sm:$0xff] %v12443_v59 }
 0x597   :  { %v6007_v52 = vld [vmem:[#allocation6 + $0x2f0] sm:$0xff]  ;;  %v12451_v19 = vcombine.high %v6004_v62, %v6008_v57  ;;  %v12457_v3 = vcombine.low %v6004_v62, %v6008_v57 }
 0x598   :  { %v12449_v60 = vcombine.high %v6003_v55, %v6007_v52  ;;  %v12455_v45 = vcombine.low %v6003_v55, %v6007_v52 }
 0x599   :  { %6782 = vmatpush2.bf16.msra.mxu0 %v12419_v1  ;;  %6823 = vmatpush2.bf16.msra.mxu1 %v12421_v23  ;;  %15650 = vst [vmem:[#allocation641_spill] sm:$0xff] %v12451_v19  ;;  %v5996_v23 = vld [vmem:[#allocation6 + $0x298] sm:$0xff] }
 0x59a   :  { %6783 = vmatprep.subr.bf16.mxu0 %v12425_v56  ;;  %6824 = vmatprep.subr.bf16.mxu1 %v12427_v43  ;;  %15649 = vst [vmem:[#allocation640_spill] sm:$0xff] %v12449_v60  ;;  %v5995_v43 = vld [vmem:[#allocation6 + $0x290] sm:$0xff]  ;;  %v6000_v1 = vld [vmem:[#allocation6 + $0x2b8] sm:$0xff] }
 0x59b   :  { %v5999_v56 = vld [vmem:[#allocation6 + $0x2b0] sm:$0xff]  ;;  %v12463_v16 = vcombine.high %v5996_v23, %v6000_v1  ;;  %v12469_v57 = vcombine.low %v5996_v23, %v6000_v1 }
 0x59c   :  { %v12461_v58 = vcombine.high %v5995_v43, %v5999_v56  ;;  %v12467_v52 = vcombine.low %v5995_v43, %v5999_v56 }
 0x59d   :  { %6784 = vmatpush2.bf16.msra.mxu0 %v12431_v4  ;;  %6825 = vmatpush2.bf16.msra.mxu1 %v12433_v32  ;;  %15651 = vst [vmem:[#allocation642_spill] sm:$0xff] %v12463_v16  ;;  %v5988_v32 = vld [vmem:[#allocation6 + $0x258] sm:$0xff] }
 0x59e   :  { %6785 = vmatprep.subr.bf16.mxu0 %v12437_v46  ;;  %6826 = vmatprep.subr.bf16.mxu1 %v12439_v42  ;;  %v5987_v42 = vld [vmem:[#allocation6 + $0x250] sm:$0xff]  ;;  %v5992_v4 = vld [vmem:[#allocation6 + $0x278] sm:$0xff]  ;;  %15652 = vst [vmem:[#allocation643_spill] sm:$0xff] %v12467_v52 }
 0x59f   :  { %v5991_v46 = vld [vmem:[#allocation6 + $0x270] sm:$0xff]  ;;  %v12475_v55 = vcombine.high %v5988_v32, %v5992_v4  ;;  %v12481_v1 = vcombine.low %v5988_v32, %v5992_v4  ;;  %v15654_v4 = vld [vmem:[#allocation41_spill] sm:$0xff] }
 0x5a0   :  { %v12473_v62 = vcombine.high %v5987_v42, %v5991_v46  ;;  %v12479_v56 = vcombine.low %v5987_v42, %v5991_v46  ;;  %v15655_v32 = vld [vmem:[#allocation42_spill] sm:$0xff]  ;;  %v15656_v46 = vld [vmem:[#allocation43_spill] sm:$0xff]  ;;  %v15657_v42 = vld [vmem:[#allocation44_spill] sm:$0xff] }
 0x5a1   :  { %6786 = vmatpush2.bf16.msra.mxu0 %v12443_v59  ;;  %6827 = vmatpush2.bf16.msra.mxu1 %v12445_v49  ;;  %v5980_v49 = vld [vmem:[#allocation6 + $0x218] sm:$0xff] }
 0x5a2   :  { %6787 = vmatprep.subr.bf16.mxu0 %v12449_v60  ;;  %6828 = vmatprep.subr.bf16.mxu1 %v12451_v19  ;;  %v5979_v19 = vld [vmem:[#allocation6 + $0x210] sm:$0xff]  ;;  %v5984_v59 = vld [vmem:[#allocation6 + $0x238] sm:$0xff] }
 0x5a3   :  { %v5983_v60 = vld [vmem:[#allocation6 + $0x230] sm:$0xff]  ;;  %v12487_v43 = vcombine.high %v5980_v49, %v5984_v59 }
 0x5a4   :  { %v12485_v23 = vcombine.high %v5979_v19, %v5983_v60 }
 0x5a5   :  { %6788 = vmatpush2.bf16.msra.mxu0 %v12455_v45  ;;  %6829 = vmatpush2.bf16.msra.mxu1 %v12457_v3 }
 0x5a6   :  { %6789 = vmatprep.subr.bf16.mxu0 %v12461_v58  ;;  %6830 = vmatprep.subr.bf16.mxu1 %v12463_v16  ;;  %v12491_v16 = vcombine.low %v5979_v19, %v5983_v60  ;;  %v15660_v60 = vld [vmem:[#allocation47_spill] sm:$0xff]  ;;  %v15661_v19 = vld [vmem:[#allocation48_spill] sm:$0xff] }
 0x5a9   :  { %6790 = vmatpush2.bf16.msra.mxu0 %v12467_v52  ;;  %6831 = vmatpush2.bf16.msra.mxu1 %v12469_v57  ;;  %v12493_v52 = vcombine.low %v5980_v49, %v5984_v59  ;;  %v15658_v59 = vld [vmem:[#allocation45_spill] sm:$0xff]  ;;  %v15659_v49 = vld [vmem:[#allocation46_spill] sm:$0xff] }
 0x5aa   :  { %6791 = vmatprep.subr.bf16.mxu0 %v12473_v62  ;;  %6832 = vmatprep.subr.bf16.mxu1 %v12475_v55 }
 0x5ad   :  { %6792 = vmatpush2.bf16.msra.mxu0 %v12479_v56  ;;  %6833 = vmatpush2.bf16.msra.mxu1 %v12481_v1 }
 0x5ae   :  { %6793 = vmatprep.subr.bf16.mxu0 %v12485_v23  ;;  %6834 = vmatprep.subr.bf16.mxu1 %v12487_v43 }
 0x5b1   :  { %6794 = vmatpush2.bf16.msra.mxu0 %v12491_v16  ;;  %6835 = vmatpush2.bf16.msra.mxu1 %v12493_v52 }
 0x5b2   :  { %6853 = vmatprep.subr.bf16.mxu0 %v10410_v25  ;;  %6894 = vmatprep.subr.bf16.mxu1 %v10414_v31 }
 0x5b4   :  { %6796 = vmatmul.mubr.bf16.vlgmr.msra.gmra.mxu0 %v12313_v30  ;;  %6837 = vmatmul.mubr.bf16.vlgmr.msra.gmra.mxu1 %v12313_v30  ;;  %v15653_v30 = vld [vmem:[#allocation40_spill] sm:$0xff] }
 0x5b5   :  { %6854 = vmatpush1.bf16.msra.mxu0 %v10412_v28  ;;  %6895 = vmatpush1.bf16.msra.mxu1 %v10416_v33 }
 0x5b6   :  { %6855 = vmatprep.subr.bf16.mxu0 %v10418_v34  ;;  %6896 = vmatprep.subr.bf16.mxu1 %v10421_v38 }
 0x5b9   :  { %6856 = vmatpush1.bf16.msra.mxu0 %v10425_v50  ;;  %6897 = vmatpush1.bf16.msra.mxu1 %v10429_v53 }
 0x5ba   :  { %6857 = vmatprep.subr.bf16.mxu0 %v10431_v54  ;;  %6898 = vmatprep.subr.bf16.mxu1 %v10434_v2  ;;  %v15905_v54 = vld [vmem:[#allocation284_spill] sm:$0xff] }
 0x5bd   :  { %6858 = vmatpush1.bf16.msra.mxu0 %v10437_v11  ;;  %6899 = vmatpush1.bf16.msra.mxu1 %v10441_v63 }
 0x5be   :  { %6859 = vmatprep.subr.bf16.mxu0 %v10443_v5  ;;  %6900 = vmatprep.subr.bf16.mxu1 %v10446_v9  ;;  %v15762_v9 = vld [vmem:[#allocation23_spill] sm:$0xff] }
 0x5c1   :  { %6860 = vmatpush1.bf16.msra.mxu0 %v10449_v18  ;;  %6901 = vmatpush1.bf16.msra.mxu1 %v10453_v21 }
 0x5c2   :  { %6861 = vmatprep.subr.bf16.mxu0 %v10455_v22  ;;  %6902 = vmatprep.subr.bf16.mxu1 %v10458_v24  ;;  %v15698_v24 = vld [vmem:[#allocation19_spill] sm:$0xff] }
 0x5c5   :  { %6862 = vmatpush1.bf16.msra.mxu0 %v10461_v36  ;;  %6903 = vmatpush1.bf16.msra.mxu1 %v10465_v37  ;;  %v15697_v36 = vld [vmem:[#allocation18_spill] sm:$0xff] }
 0x5c6   :  { %6863 = vmatprep.subr.bf16.mxu0 %v10467_v39  ;;  %6904 = vmatprep.subr.bf16.mxu1 %v10470_v40  ;;  %v15695_v40 = vld [vmem:[#allocation16_spill] sm:$0xff]  ;;  %v15696_v39 = vld [vmem:[#allocation17_spill] sm:$0xff] }
 0x5c9   :  { %6864 = vmatpush1.bf16.msra.mxu0 %v10473_v10  ;;  %6905 = vmatpush1.bf16.msra.mxu1 %v10477_v12  ;;  %v15662_v10 = vld [vmem:[#allocation49_spill] sm:$0xff]  ;;  %v15663_v12 = vld [vmem:[#allocation50_spill] sm:$0xff] }
 0x5ca   :  { %6865 = vmatprep.subr.bf16.mxu0 %v15653_v30  ;;  %6906 = vmatprep.subr.bf16.mxu1 %v15654_v4  ;;  %v15664_v30 = vld [vmem:[#allocation51_spill] sm:$0xff]  ;;  %v15665_v4 = vld [vmem:[#allocation52_spill] sm:$0xff] }
 0x5cd   :  { %6866 = vmatpush1.bf16.msra.mxu0 %v15655_v32  ;;  %6907 = vmatpush1.bf16.msra.mxu1 %v15656_v46  ;;  %v15666_v32 = vld [vmem:[#allocation53_spill] sm:$0xff]  ;;  %v15667_v46 = vld [vmem:[#allocation54_spill] sm:$0xff] }
 0x5ce   :  { %6867 = vmatprep.subr.bf16.mxu0 %v15657_v42  ;;  %6908 = vmatprep.subr.bf16.mxu1 %v15658_v59  ;;  %v15668_v42 = vld [vmem:[#allocation55_spill] sm:$0xff]  ;;  %v15669_v59 = vld [vmem:[#allocation56_spill] sm:$0xff] }
 0x5d1   :  { %6868 = vmatpush1.bf16.msra.mxu0 %v15659_v49  ;;  %6909 = vmatpush1.bf16.msra.mxu1 %v15660_v60  ;;  %v15670_v49 = vld [vmem:[#allocation57_spill] sm:$0xff]  ;;  %v15671_v60 = vld [vmem:[#allocation58_spill] sm:$0xff] }
 0x5d2   :  { %6869 = vmatprep.subr.bf16.mxu0 %v15661_v19  ;;  %6910 = vmatprep.subr.bf16.mxu1 %v15662_v10  ;;  %v15672_v19 = vld [vmem:[#allocation59_spill] sm:$0xff]  ;;  %v15673_v10 = vld [vmem:[#allocation60_spill] sm:$0xff] }
 0x5d5   :  { %6870 = vmatpush2.bf16.msra.mxu0 %v15663_v12  ;;  %6911 = vmatpush2.bf16.msra.mxu1 %v15664_v30  ;;  %v15674_v12 = vld [vmem:[#allocation61_spill] sm:$0xff]  ;;  %v15675_v30 = vld [vmem:[#allocation62_spill] sm:$0xff] }
 0x5d6   :  { %6871 = vmatprep.subr.bf16.mxu0 %v15665_v4  ;;  %6912 = vmatprep.subr.bf16.mxu1 %v15666_v32  ;;  %v15676_v4 = vld [vmem:[#allocation63_spill] sm:$0xff]  ;;  %v15677_v32 = vld [vmem:[#allocation64_spill] sm:$0xff] }
 0x5d9   :  { %6872 = vmatpush2.bf16.msra.mxu0 %v15667_v46  ;;  %6913 = vmatpush2.bf16.msra.mxu1 %v15668_v42  ;;  %v15678_v46 = vld [vmem:[#allocation65_spill] sm:$0xff]  ;;  %v15679_v42 = vld [vmem:[#allocation66_spill] sm:$0xff] }
 0x5da   :  { %6873 = vmatprep.subr.bf16.mxu0 %v15669_v59  ;;  %6914 = vmatprep.subr.bf16.mxu1 %v15670_v49  ;;  %v15680_v59 = vld [vmem:[#allocation67_spill] sm:$0xff]  ;;  %v15681_v49 = vld [vmem:[#allocation68_spill] sm:$0xff] }
 0x5dd   :  { %6874 = vmatpush2.bf16.msra.mxu0 %v15671_v60  ;;  %6915 = vmatpush2.bf16.msra.mxu1 %v15672_v19  ;;  %v15682_v60 = vld [vmem:[#allocation69_spill] sm:$0xff]  ;;  %v15683_v19 = vld [vmem:[#allocation70_spill] sm:$0xff] }
 0x5de   :  { %6875 = vmatprep.subr.bf16.mxu0 %v15673_v10  ;;  %6916 = vmatprep.subr.bf16.mxu1 %v15674_v12  ;;  %v15684_v10 = vld [vmem:[#allocation71_spill] sm:$0xff]  ;;  %v15685_v12 = vld [vmem:[#allocation72_spill] sm:$0xff] }
 0x5e1   :  { %6876 = vmatpush2.bf16.msra.mxu0 %v15675_v30  ;;  %6917 = vmatpush2.bf16.msra.mxu1 %v15676_v4  ;;  %v15686_v30 = vld [vmem:[#allocation73_spill] sm:$0xff]  ;;  %v15687_v4 = vld [vmem:[#allocation74_spill] sm:$0xff] }
 0x5e2   :  { %6877 = vmatprep.subr.bf16.mxu0 %v15677_v32  ;;  %6918 = vmatprep.subr.bf16.mxu1 %v15678_v46  ;;  %v15688_v32 = vld [vmem:[#allocation75_spill] sm:$0xff]  ;;  %v15689_v46 = vld [vmem:[#allocation76_spill] sm:$0xff] }
 0x5e5   :  { %6878 = vmatpush2.bf16.msra.mxu0 %v15679_v42  ;;  %6919 = vmatpush2.bf16.msra.mxu1 %v15680_v59  ;;  %v15690_v42 = vld [vmem:[#allocation77_spill] sm:$0xff]  ;;  %v15691_v59 = vld [vmem:[#allocation78_spill] sm:$0xff] }
 0x5e6   :  { %6879 = vmatprep.subr.bf16.mxu0 %v15681_v49  ;;  %6920 = vmatprep.subr.bf16.mxu1 %v15682_v60  ;;  %v15692_v49 = vld [vmem:[#allocation79_spill] sm:$0xff]  ;;  %v15693_v60 = vld [vmem:[#allocation80_spill] sm:$0xff] }
 0x5e9   :  { %6880 = vmatpush2.bf16.msra.mxu0 %v15683_v19  ;;  %6921 = vmatpush2.bf16.msra.mxu1 %v15684_v10  ;;  %v15694_v19 = vld [vmem:[#allocation81_spill] sm:$0xff] }
 0x5ea   :  { %6881 = vmatprep.subr.bf16.mxu0 %v15685_v12  ;;  %6922 = vmatprep.subr.bf16.mxu1 %v15686_v30 }
 0x5ed   :  { %6882 = vmatpush2.bf16.msra.mxu0 %v15687_v4  ;;  %6923 = vmatpush2.bf16.msra.mxu1 %v15688_v32 }
 0x5ee   :  { %6883 = vmatprep.subr.bf16.mxu0 %v15689_v46  ;;  %6924 = vmatprep.subr.bf16.mxu1 %v15690_v42 }
 0x5f1   :  { %6884 = vmatpush2.bf16.msra.mxu0 %v15691_v59  ;;  %6925 = vmatpush2.bf16.msra.mxu1 %v15692_v49 }
 0x5f2   :  { %6935 = vmatprep.subr.bf16.mxu0 %v15693_v60  ;;  %6976 = vmatprep.subr.bf16.mxu1 %v15694_v19 }
 0x634   :  { %v6715_v10 = vpop.f32.mrf.mxu0  ;;  %v6756_v12 = vpop.f32.mrf.mxu1 }
 0x635   :  { %v6716_v30 = vadd.f32 %v6715_v10, %v15695_v40  ;;  %v6757_v4 = vadd.f32 %v6756_v12, %v15696_v39  ;;  %v15701_v12 = vld [vmem:[#allocation84_spill] sm:$0xff] }
 0x636   :  { %v6717_v37 = vpop.f32.mrf.mxu0  ;;  %v6758_v32 = vpop.f32.mrf.mxu1  ;;  %v15759_v40 = vld [vmem:[#allocation140_spill] sm:$0xff] }
 0x637   :  { %v6718_v46 = vadd.f32 %v6717_v37, %v15697_v36  ;;  %v6759_v42 = vadd.f32 %v6758_v32, %v15698_v24  ;;  %v12575_v60 = vpack.c.bf16 %v6716_v30, %v6716_v30  ;;  %v12577_v19 = vpack.c.bf16 %v6757_v4, %v6757_v4  ;;  %v15700_v37 = vld [vmem:[#allocation83_spill] sm:$0xff]  ;;  %v15702_v30 = vld [vmem:[#allocation85_spill] sm:$0xff]  ;;  %v15703_v4 = vld [vmem:[#allocation86_spill] sm:$0xff] }
 0x638   :  { %v6719_v22 = vpop.f32.mrf.mxu0  ;;  %v6760_v59 = vpop.f32.mrf.mxu1  ;;  %v15705_v32 = vld [vmem:[#allocation88_spill] sm:$0xff]  ;;  %v15755_v24 = vld [vmem:[#allocation138_spill] sm:$0xff]  ;;  %v15758_v36 = vld [vmem:[#allocation21_spill] sm:$0xff] }
 0x639   :  { %v12571_v21 = vpack.c.bf16 %v6718_v46, %v6718_v46  ;;  %v12573_v49 = vpack.c.bf16 %v6759_v42, %v6759_v42  ;;  %v15699_v22 = vld [vmem:[#allocation82_spill] sm:$0xff]  ;;  %v15706_v46 = vld [vmem:[#allocation89_spill] sm:$0xff]  ;;  %v15708_v59 = vld [vmem:[#allocation91_spill] sm:$0xff] }
 0x63a   :  { %v6720_v18 = vpop.f32.mrf.mxu0  ;;  %v6761_v10 = vpop.f32.mrf.mxu1  ;;  %v15707_v42 = vld [vmem:[#allocation90_spill] sm:$0xff] }
 0x63b   :  { %6885 = vmatprep.mubr.bf16.mxu0 %v12571_v21  ;;  %6926 = vmatprep.mubr.bf16.mxu1 %v12573_v49  ;;  %v15704_v18 = vld [vmem:[#allocation87_spill] sm:$0xff]  ;;  %v15709_v10 = vld [vmem:[#allocation92_spill] sm:$0xff] }
 0x63c   :  { %6886 = vmatmul.mubr.bf16.vlgmr.msra.gmra.mxu0 %v12575_v60  ;;  %6927 = vmatmul.mubr.bf16.vlgmr.msra.gmra.mxu1 %v12577_v19 }
 0x63d   :  { %6936 = vmatpush1.bf16.msra.mxu0 %v15699_v22  ;;  %6977 = vmatpush1.bf16.msra.mxu1 %v15700_v37  ;;  %v15710_v22 = vld [vmem:[#allocation93_spill] sm:$0xff]  ;;  %v15711_v37 = vld [vmem:[#allocation94_spill] sm:$0xff] }
 0x63e   :  { %6937 = vmatprep.subr.bf16.mxu0 %v15701_v12  ;;  %6978 = vmatprep.subr.bf16.mxu1 %v15702_v30  ;;  %v15712_v12 = vld [vmem:[#allocation95_spill] sm:$0xff]  ;;  %v15713_v30 = vld [vmem:[#allocation96_spill] sm:$0xff] }
 0x641   :  { %6938 = vmatpush1.bf16.msra.mxu0 %v15703_v4  ;;  %6979 = vmatpush1.bf16.msra.mxu1 %v15704_v18  ;;  %v15714_v4 = vld [vmem:[#allocation97_spill] sm:$0xff]  ;;  %v15715_v18 = vld [vmem:[#allocation98_spill] sm:$0xff] }
 0x642   :  { %6939 = vmatprep.subr.bf16.mxu0 %v15705_v32  ;;  %6980 = vmatprep.subr.bf16.mxu1 %v15706_v46  ;;  %v15716_v32 = vld [vmem:[#allocation99_spill] sm:$0xff]  ;;  %v15717_v46 = vld [vmem:[#allocation100_spill] sm:$0xff] }
 0x645   :  { %6940 = vmatpush1.bf16.msra.mxu0 %v15707_v42  ;;  %6981 = vmatpush1.bf16.msra.mxu1 %v15708_v59  ;;  %v15718_v42 = vld [vmem:[#allocation101_spill] sm:$0xff]  ;;  %v15719_v59 = vld [vmem:[#allocation102_spill] sm:$0xff] }
 0x646   :  { %6941 = vmatprep.subr.bf16.mxu0 %v15709_v10  ;;  %6982 = vmatprep.subr.bf16.mxu1 %v15710_v22  ;;  %v15720_v10 = vld [vmem:[#allocation103_spill] sm:$0xff]  ;;  %v15721_v22 = vld [vmem:[#allocation104_spill] sm:$0xff] }
 0x649   :  { %6942 = vmatpush1.bf16.msra.mxu0 %v15711_v37  ;;  %6983 = vmatpush1.bf16.msra.mxu1 %v15712_v12  ;;  %v15722_v37 = vld [vmem:[#allocation105_spill] sm:$0xff]  ;;  %v15723_v12 = vld [vmem:[#allocation106_spill] sm:$0xff] }
 0x64a   :  { %6943 = vmatprep.subr.bf16.mxu0 %v15713_v30  ;;  %6984 = vmatprep.subr.bf16.mxu1 %v15714_v4  ;;  %v15724_v30 = vld [vmem:[#allocation107_spill] sm:$0xff]  ;;  %v15725_v4 = vld [vmem:[#allocation108_spill] sm:$0xff] }
 0x64d   :  { %6944 = vmatpush1.bf16.msra.mxu0 %v15715_v18  ;;  %6985 = vmatpush1.bf16.msra.mxu1 %v15716_v32  ;;  %v15726_v18 = vld [vmem:[#allocation109_spill] sm:$0xff]  ;;  %v15727_v32 = vld [vmem:[#allocation110_spill] sm:$0xff] }
 0x64e   :  { %6945 = vmatprep.subr.bf16.mxu0 %v15717_v46  ;;  %6986 = vmatprep.subr.bf16.mxu1 %v15718_v42  ;;  %v15728_v46 = vld [vmem:[#allocation111_spill] sm:$0xff]  ;;  %v15729_v42 = vld [vmem:[#allocation112_spill] sm:$0xff] }
 0x651   :  { %6946 = vmatpush1.bf16.msra.mxu0 %v15719_v59  ;;  %6987 = vmatpush1.bf16.msra.mxu1 %v15720_v10  ;;  %v15730_v59 = vld [vmem:[#allocation113_spill] sm:$0xff]  ;;  %v15731_v10 = vld [vmem:[#allocation114_spill] sm:$0xff] }
 0x652   :  { %6947 = vmatprep.subr.bf16.mxu0 %v15721_v22  ;;  %6988 = vmatprep.subr.bf16.mxu1 %v15722_v37  ;;  %v15732_v22 = vld [vmem:[#allocation115_spill] sm:$0xff]  ;;  %v15733_v37 = vld [vmem:[#allocation116_spill] sm:$0xff] }
 0x655   :  { %6948 = vmatpush1.bf16.msra.mxu0 %v15723_v12  ;;  %6989 = vmatpush1.bf16.msra.mxu1 %v15724_v30  ;;  %v15734_v12 = vld [vmem:[#allocation117_spill] sm:$0xff]  ;;  %v15735_v30 = vld [vmem:[#allocation118_spill] sm:$0xff] }
 0x656   :  { %6949 = vmatprep.subr.bf16.mxu0 %v15725_v4  ;;  %6990 = vmatprep.subr.bf16.mxu1 %v15726_v18  ;;  %v15736_v4 = vld [vmem:[#allocation119_spill] sm:$0xff]  ;;  %v15737_v18 = vld [vmem:[#allocation120_spill] sm:$0xff] }
 0x659   :  { %6950 = vmatpush1.bf16.msra.mxu0 %v15727_v32  ;;  %6991 = vmatpush1.bf16.msra.mxu1 %v15728_v46  ;;  %v15738_v32 = vld [vmem:[#allocation121_spill] sm:$0xff]  ;;  %v15739_v46 = vld [vmem:[#allocation122_spill] sm:$0xff] }
 0x65a   :  { %6951 = vmatprep.subr.bf16.mxu0 %v15729_v42  ;;  %6992 = vmatprep.subr.bf16.mxu1 %v15730_v59  ;;  %v15740_v42 = vld [vmem:[#allocation123_spill] sm:$0xff]  ;;  %v15741_v59 = vld [vmem:[#allocation124_spill] sm:$0xff] }
 0x65d   :  { %6952 = vmatpush2.bf16.msra.mxu0 %v15731_v10  ;;  %6993 = vmatpush2.bf16.msra.mxu1 %v15732_v22  ;;  %v15742_v10 = vld [vmem:[#allocation125_spill] sm:$0xff]  ;;  %v15743_v22 = vld [vmem:[#allocation126_spill] sm:$0xff] }
 0x65e   :  { %6953 = vmatprep.subr.bf16.mxu0 %v15733_v37  ;;  %6994 = vmatprep.subr.bf16.mxu1 %v15734_v12  ;;  %v15744_v37 = vld [vmem:[#allocation127_spill] sm:$0xff]  ;;  %v15745_v12 = vld [vmem:[#allocation128_spill] sm:$0xff] }
 0x661   :  { %6954 = vmatpush2.bf16.msra.mxu0 %v15735_v30  ;;  %6995 = vmatpush2.bf16.msra.mxu1 %v15736_v4  ;;  %v15746_v30 = vld [vmem:[#allocation129_spill] sm:$0xff]  ;;  %v15747_v4 = vld [vmem:[#allocation130_spill] sm:$0xff] }
 0x662   :  { %6955 = vmatprep.subr.bf16.mxu0 %v15737_v18  ;;  %6996 = vmatprep.subr.bf16.mxu1 %v15738_v32  ;;  %v15748_v18 = vld [vmem:[#allocation131_spill] sm:$0xff]  ;;  %v15749_v32 = vld [vmem:[#allocation132_spill] sm:$0xff] }
 0x665   :  { %6956 = vmatpush2.bf16.msra.mxu0 %v15739_v46  ;;  %6997 = vmatpush2.bf16.msra.mxu1 %v15740_v42  ;;  %v15750_v46 = vld [vmem:[#allocation133_spill] sm:$0xff]  ;;  %v15751_v42 = vld [vmem:[#allocation134_spill] sm:$0xff] }
 0x666   :  { %6957 = vmatprep.subr.bf16.mxu0 %v15741_v59  ;;  %6998 = vmatprep.subr.bf16.mxu1 %v15742_v10  ;;  %v15752_v59 = vld [vmem:[#allocation135_spill] sm:$0xff]  ;;  %v15753_v10 = vld [vmem:[#allocation136_spill] sm:$0xff] }
 0x669   :  { %6958 = vmatpush2.bf16.msra.mxu0 %v15743_v22  ;;  %6999 = vmatpush2.bf16.msra.mxu1 %v15744_v37  ;;  %v15754_v22 = vld [vmem:[#allocation137_spill] sm:$0xff] }
 0x66a   :  { %6959 = vmatprep.subr.bf16.mxu0 %v15745_v12  ;;  %7000 = vmatprep.subr.bf16.mxu1 %v15746_v30  ;;  %v15756_v30 = vld [vmem:[#allocation139_spill] sm:$0xff] }
 0x66d   :  { %6960 = vmatpush2.bf16.msra.mxu0 %v15747_v4  ;;  %7001 = vmatpush2.bf16.msra.mxu1 %v15748_v18  ;;  %v15757_v4 = vld [vmem:[#allocation20_spill] sm:$0xff] }
 0x66e   :  { %6961 = vmatprep.subr.bf16.mxu0 %v15749_v32  ;;  %7002 = vmatprep.subr.bf16.mxu1 %v15750_v46 }
 0x671   :  { %6962 = vmatpush2.bf16.msra.mxu0 %v15751_v42  ;;  %7003 = vmatpush2.bf16.msra.mxu1 %v15752_v59  ;;  %v15760_v42 = vld [vmem:[#allocation141_spill] sm:$0xff]  ;;  %v15761_v59 = vld [vmem:[#allocation22_spill] sm:$0xff] }
 0x672   :  { %6963 = vmatprep.subr.bf16.mxu0 %v15753_v10  ;;  %7004 = vmatprep.subr.bf16.mxu1 %v15754_v22 }
 0x674   :  { %v6797_v37 = vpop.f32.mrf.mxu0  ;;  %v6838_v12 = vpop.f32.mrf.mxu1 }
 0x675   :  { %6964 = vmatpush2.bf16.msra.mxu0 %v15755_v24  ;;  %7005 = vmatpush2.bf16.msra.mxu1 %v15756_v30  ;;  %v6798_v18 = vadd.f32 %v6797_v37, %v15757_v4  ;;  %v6839_v32 = vadd.f32 %v6838_v12, %v15758_v36  ;;  %v15763_v30 = vld [vmem:[#allocation142_spill] sm:$0xff]  ;;  %v15764_v37 = vld [vmem:[#allocation143_spill] sm:$0xff]  ;;  %v15765_v4 = vld [vmem:[#allocation144_spill] sm:$0xff] }
 0x676   :  { %v6799_v39 = vpop.f32.mrf.mxu0  ;;  %v6840_v46 = vpop.f32.mrf.mxu1  ;;  %6965 = vmatprep.subr.bf16.mxu0 %v15759_v40  ;;  %7006 = vmatprep.subr.bf16.mxu1 %v15760_v42 }
 0x677   :  { %v6800_v10 = vadd.f32 %v6799_v39, %v15761_v59  ;;  %v6841_v22 = vadd.f32 %v6840_v46, %v15762_v9  ;;  %v12653_v12 = vpack.c.bf16 %v6798_v18, %v6798_v18  ;;  %v12655_v36 = vpack.c.bf16 %v6839_v32, %v6839_v32  ;;  %v15766_v39 = vld [vmem:[#allocation145_spill] sm:$0xff]  ;;  %v15771_v18 = vld [vmem:[#allocation150_spill] sm:$0xff]  ;;  %v15772_v32 = vld [vmem:[#allocation151_spill] sm:$0xff] }
 0x678   :  { %v6801_v5 = vpop.f32.mrf.mxu0  ;;  %v6842_v63 = vpop.f32.mrf.mxu1  ;;  %v15773_v46 = vld [vmem:[#allocation152_spill] sm:$0xff]  ;;  %v15902_v59 = vld [vmem:[#allocation281_spill] sm:$0xff] }
 0x679   :  { %v12647_v11 = vpack.c.bf16 %v6800_v10, %v6800_v10  ;;  %v12649_v24 = vpack.c.bf16 %v6841_v22, %v6841_v22  ;;  %6966 = vmatpush2.bf16.msra.mxu0 %v15763_v30  ;;  %7007 = vmatpush2.bf16.msra.mxu1 %v15764_v37  ;;  %v15767_v63 = vld [vmem:[#allocation146_spill] sm:$0xff]  ;;  %v15768_v5 = vld [vmem:[#allocation147_spill] sm:$0xff]  ;;  %v15770_v22 = vld [vmem:[#allocation149_spill] sm:$0xff] }
 0x67a   :  { %v6802_v40 = vpop.f32.mrf.mxu0  ;;  %v6843_v42 = vpop.f32.mrf.mxu1  ;;  %7017 = vmatprep.subr.bf16.mxu0 %v15765_v4  ;;  %7058 = vmatprep.subr.bf16.mxu1 %v15766_v39  ;;  %v15775_v10 = vld [vmem:[#allocation154_spill] sm:$0xff]  ;;  %v15777_v39 = vld [vmem:[#allocation156_spill] sm:$0xff]  ;;  %v15899_v37 = vld [vmem:[#allocation277_spill] sm:$0xff] }
 0x67b   :  { %6967 = vmatprep.mubr.bf16.mxu0 %v12647_v11  ;;  %7008 = vmatprep.mubr.bf16.mxu1 %v12649_v24  ;;  %v15769_v40 = vld [vmem:[#allocation148_spill] sm:$0xff]  ;;  %v15774_v42 = vld [vmem:[#allocation153_spill] sm:$0xff]  ;;  %v15779_v4 = vld [vmem:[#allocation158_spill] sm:$0xff] }
 0x67c   :  { %6968 = vmatmul.mubr.bf16.vlgmr.msra.gmra.mxu0 %v12653_v12  ;;  %7009 = vmatmul.mubr.bf16.vlgmr.msra.gmra.mxu1 %v12655_v36  ;;  %v15900_v30 = vld [vmem:[#allocation279_spill] sm:$0xff] }
 0x67d   :  { %7018 = vmatpush1.bf16.msra.mxu0 %v15767_v63  ;;  %7049 = vmatprep.mubr.bf16.mxu0 %v12571_v21  ;;  %v15776_v63 = vld [vmem:[#allocation155_spill] sm:$0xff] }
 0x67e   :  { %7059 = vmatpush1.bf16.msra.mxu1 %v15768_v5  ;;  %7090 = vmatprep.mubr.bf16.mxu1 %v12573_v49  ;;  %v15778_v5 = vld [vmem:[#allocation157_spill] sm:$0xff] }
 0x67f   :  { %7019 = vmatprep.subr.bf16.mxu0 %v15769_v40  ;;  %7060 = vmatprep.subr.bf16.mxu1 %v15770_v22  ;;  %v15780_v40 = vld [vmem:[#allocation159_spill] sm:$0xff]  ;;  %v15781_v22 = vld [vmem:[#allocation160_spill] sm:$0xff] }
 0x681   :  { %7020 = vmatpush1.bf16.msra.mxu0 %v15771_v18  ;;  %v15782_v18 = vld [vmem:[#allocation161_spill] sm:$0xff] }
 0x682   :  { %7061 = vmatpush1.bf16.msra.mxu1 %v15772_v32  ;;  %7021 = vmatprep.subr.bf16.mxu0 %v15773_v46  ;;  %v15783_v32 = vld [vmem:[#allocation162_spill] sm:$0xff]  ;;  %v15784_v46 = vld [vmem:[#allocation163_spill] sm:$0xff] }
 0x683   :  { %7062 = vmatprep.subr.bf16.mxu1 %v15774_v42  ;;  %v15785_v42 = vld [vmem:[#allocation164_spill] sm:$0xff] }
 0x685   :  { %7022 = vmatpush1.bf16.msra.mxu0 %v15775_v10  ;;  %v15786_v10 = vld [vmem:[#allocation165_spill] sm:$0xff] }
 0x686   :  { %7063 = vmatpush1.bf16.msra.mxu1 %v15776_v63  ;;  %7023 = vmatprep.subr.bf16.mxu0 %v15777_v39  ;;  %v15787_v63 = vld [vmem:[#allocation166_spill] sm:$0xff]  ;;  %v15788_v39 = vld [vmem:[#allocation167_spill] sm:$0xff] }
 0x687   :  { %7064 = vmatprep.subr.bf16.mxu1 %v15778_v5  ;;  %v15789_v5 = vld [vmem:[#allocation168_spill] sm:$0xff] }
 0x689   :  { %7024 = vmatpush1.bf16.msra.mxu0 %v15779_v4  ;;  %v15790_v4 = vld [vmem:[#allocation169_spill] sm:$0xff] }
 0x68a   :  { %7065 = vmatpush1.bf16.msra.mxu1 %v15780_v40  ;;  %7025 = vmatprep.subr.bf16.mxu0 %v15781_v22  ;;  %v15791_v40 = vld [vmem:[#allocation170_spill] sm:$0xff]  ;;  %v15792_v22 = vld [vmem:[#allocation171_spill] sm:$0xff] }
 0x68b   :  { %7066 = vmatprep.subr.bf16.mxu1 %v15782_v18  ;;  %v15793_v18 = vld [vmem:[#allocation172_spill] sm:$0xff] }
 0x68d   :  { %7026 = vmatpush1.bf16.msra.mxu0 %v15783_v32  ;;  %v15794_v32 = vld [vmem:[#allocation173_spill] sm:$0xff] }
 0x68e   :  { %7067 = vmatpush1.bf16.msra.mxu1 %v15784_v46  ;;  %7027 = vmatprep.subr.bf16.mxu0 %v15785_v42  ;;  %v15795_v46 = vld [vmem:[#allocation174_spill] sm:$0xff]  ;;  %v15796_v42 = vld [vmem:[#allocation175_spill] sm:$0xff] }
 0x68f   :  { %7068 = vmatprep.subr.bf16.mxu1 %v15786_v10  ;;  %v15797_v10 = vld [vmem:[#allocation176_spill] sm:$0xff] }
 0x691   :  { %7028 = vmatpush1.bf16.msra.mxu0 %v15787_v63  ;;  %v15798_v63 = vld [vmem:[#allocation177_spill] sm:$0xff] }
 0x692   :  { %7069 = vmatpush1.bf16.msra.mxu1 %v15788_v39  ;;  %7029 = vmatprep.subr.bf16.mxu0 %v15789_v5  ;;  %v15799_v39 = vld [vmem:[#allocation178_spill] sm:$0xff]  ;;  %v15800_v5 = vld [vmem:[#allocation179_spill] sm:$0xff] }
 0x693   :  { %7070 = vmatprep.subr.bf16.mxu1 %v15790_v4  ;;  %v15801_v4 = vld [vmem:[#allocation180_spill] sm:$0xff] }
 0x695   :  { %7030 = vmatpush1.bf16.msra.mxu0 %v15791_v40  ;;  %v15802_v40 = vld [vmem:[#allocation181_spill] sm:$0xff] }
 0x696   :  { %7071 = vmatpush1.bf16.msra.mxu1 %v15792_v22  ;;  %7031 = vmatprep.subr.bf16.mxu0 %v15793_v18  ;;  %v15803_v22 = vld [vmem:[#allocation182_spill] sm:$0xff]  ;;  %v15804_v18 = vld [vmem:[#allocation183_spill] sm:$0xff] }
 0x697   :  { %7072 = vmatprep.subr.bf16.mxu1 %v15794_v32  ;;  %v15805_v32 = vld [vmem:[#allocation184_spill] sm:$0xff] }
 0x699   :  { %7032 = vmatpush1.bf16.msra.mxu0 %v15795_v46  ;;  %v15806_v46 = vld [vmem:[#allocation185_spill] sm:$0xff] }
 0x69a   :  { %7073 = vmatpush1.bf16.msra.mxu1 %v15796_v42  ;;  %7033 = vmatprep.subr.bf16.mxu0 %v15797_v10  ;;  %v15807_v42 = vld [vmem:[#allocation186_spill] sm:$0xff]  ;;  %v15808_v10 = vld [vmem:[#allocation187_spill] sm:$0xff] }
 0x69b   :  { %7074 = vmatprep.subr.bf16.mxu1 %v15798_v63  ;;  %v15809_v63 = vld [vmem:[#allocation188_spill] sm:$0xff] }
 0x69d   :  { %7034 = vmatpush2.bf16.msra.mxu0 %v15799_v39  ;;  %v15810_v39 = vld [vmem:[#allocation189_spill] sm:$0xff] }
 0x69e   :  { %7075 = vmatpush2.bf16.msra.mxu1 %v15800_v5  ;;  %7035 = vmatprep.subr.bf16.mxu0 %v15801_v4  ;;  %v15811_v5 = vld [vmem:[#allocation190_spill] sm:$0xff]  ;;  %v15812_v4 = vld [vmem:[#allocation191_spill] sm:$0xff] }
 0x69f   :  { %7076 = vmatprep.subr.bf16.mxu1 %v15802_v40  ;;  %v15813_v40 = vld [vmem:[#allocation192_spill] sm:$0xff] }
 0x6a1   :  { %7036 = vmatpush2.bf16.msra.mxu0 %v15803_v22  ;;  %v15814_v22 = vld [vmem:[#allocation193_spill] sm:$0xff] }
 0x6a2   :  { %7077 = vmatpush2.bf16.msra.mxu1 %v15804_v18  ;;  %7037 = vmatprep.subr.bf16.mxu0 %v15805_v32  ;;  %v15815_v18 = vld [vmem:[#allocation194_spill] sm:$0xff]  ;;  %v15816_v32 = vld [vmem:[#allocation195_spill] sm:$0xff] }
 0x6a3   :  { %7078 = vmatprep.subr.bf16.mxu1 %v15806_v46  ;;  %v15817_v46 = vld [vmem:[#allocation196_spill] sm:$0xff] }
 0x6a5   :  { %7038 = vmatpush2.bf16.msra.mxu0 %v15807_v42  ;;  %v15818_v42 = vld [vmem:[#allocation197_spill] sm:$0xff] }
 0x6a6   :  { %7079 = vmatpush2.bf16.msra.mxu1 %v15808_v10  ;;  %7039 = vmatprep.subr.bf16.mxu0 %v15809_v63  ;;  %v15819_v10 = vld [vmem:[#allocation198_spill] sm:$0xff]  ;;  %v15820_v63 = vld [vmem:[#allocation199_spill] sm:$0xff] }
 0x6a7   :  { %7080 = vmatprep.subr.bf16.mxu1 %v15810_v39  ;;  %v15821_v39 = vld [vmem:[#allocation200_spill] sm:$0xff] }
 0x6a9   :  { %7040 = vmatpush2.bf16.msra.mxu0 %v15811_v5  ;;  %v15822_v5 = vld [vmem:[#allocation201_spill] sm:$0xff] }
 0x6aa   :  { %7081 = vmatpush2.bf16.msra.mxu1 %v15812_v4  ;;  %7041 = vmatprep.subr.bf16.mxu0 %v15813_v40  ;;  %v15823_v4 = vld [vmem:[#allocation202_spill] sm:$0xff]  ;;  %v15824_v40 = vld [vmem:[#allocation203_spill] sm:$0xff] }
 0x6ab   :  { %7082 = vmatprep.subr.bf16.mxu1 %v15814_v22  ;;  %v15825_v22 = vld [vmem:[#allocation204_spill] sm:$0xff] }
 0x6ad   :  { %7042 = vmatpush2.bf16.msra.mxu0 %v15815_v18  ;;  %v15826_v18 = vld [vmem:[#allocation205_spill] sm:$0xff] }
 0x6ae   :  { %7083 = vmatpush2.bf16.msra.mxu1 %v15816_v32  ;;  %7043 = vmatprep.subr.bf16.mxu0 %v15817_v46  ;;  %v15827_v32 = vld [vmem:[#allocation206_spill] sm:$0xff]  ;;  %v15828_v46 = vld [vmem:[#allocation207_spill] sm:$0xff] }
 0x6af   :  { %7084 = vmatprep.subr.bf16.mxu1 %v15818_v42  ;;  %v15829_v42 = vld [vmem:[#allocation208_spill] sm:$0xff] }
 0x6b1   :  { %7044 = vmatpush2.bf16.msra.mxu0 %v15819_v10  ;;  %v15830_v10 = vld [vmem:[#allocation209_spill] sm:$0xff] }
 0x6b2   :  { %7085 = vmatpush2.bf16.msra.mxu1 %v15820_v63  ;;  %7045 = vmatprep.subr.bf16.mxu0 %v15821_v39  ;;  %v15841_v39 = vld [vmem:[#allocation220_spill] sm:$0xff]  ;;  %v15843_v63 = vld [vmem:[#allocation222_spill] sm:$0xff] }
 0x6b3   :  { %7086 = vmatprep.subr.bf16.mxu1 %v15822_v5  ;;  %v15831_v5 = vld [vmem:[#allocation210_spill] sm:$0xff] }
 0x6b5   :  { %7046 = vmatpush2.bf16.msra.mxu0 %v15823_v4  ;;  %v15839_v4 = vld [vmem:[#allocation218_spill] sm:$0xff] }
 0x6b6   :  { %7087 = vmatpush2.bf16.msra.mxu1 %v15824_v40  ;;  %7047 = vmatprep.subr.bf16.mxu0 %v15825_v22  ;;  %v15832_v40 = vld [vmem:[#allocation211_spill] sm:$0xff]  ;;  %v15838_v22 = vld [vmem:[#allocation217_spill] sm:$0xff] }
 0x6b7   :  { %7088 = vmatprep.subr.bf16.mxu1 %v15826_v18  ;;  %v15833_v18 = vld [vmem:[#allocation212_spill] sm:$0xff] }
 0x6b9   :  { %7048 = vmatpush2.bf16.msra.mxu0 %v15827_v32  ;;  %v15834_v32 = vld [vmem:[#allocation213_spill] sm:$0xff] }
 0x6ba   :  { %7089 = vmatpush2.bf16.msra.mxu1 %v15828_v46  ;;  %7099 = vmatprep.subr.bf16.mxu0 %v15829_v42  ;;  %v15835_v46 = vld [vmem:[#allocation214_spill] sm:$0xff]  ;;  %v15836_v42 = vld [vmem:[#allocation215_spill] sm:$0xff] }
 0x6bb   :  { %7140 = vmatprep.subr.bf16.mxu1 %v15830_v10  ;;  %v15837_v10 = vld [vmem:[#allocation216_spill] sm:$0xff] }
 0x6bc   :  { %7050 = vmatmul.mubr.bf16.vlgmr.msra.gmra.mxu0 %v12575_v60 }
 0x6bd   :  { %7091 = vmatmul.mubr.bf16.vlgmr.msra.gmra.mxu1 %v12577_v19  ;;  %7100 = vmatpush1.bf16.msra.mxu0 %v15831_v5  ;;  %v15840_v5 = vld [vmem:[#allocation219_spill] sm:$0xff] }
 0x6be   :  { %7131 = vmatprep.mubr.bf16.mxu0 %v12647_v11  ;;  %7141 = vmatpush1.bf16.msra.mxu1 %v15832_v40  ;;  %v15842_v40 = vld [vmem:[#allocation221_spill] sm:$0xff] }
 0x6bf   :  { %7172 = vmatprep.mubr.bf16.mxu1 %v12649_v24  ;;  %7101 = vmatprep.subr.bf16.mxu0 %v15833_v18  ;;  %v15844_v18 = vld [vmem:[#allocation223_spill] sm:$0xff] }
 0x6c0   :  { %7142 = vmatprep.subr.bf16.mxu1 %v15834_v32  ;;  %v15845_v32 = vld [vmem:[#allocation224_spill] sm:$0xff] }
 0x6c1   :  { %7102 = vmatpush1.bf16.msra.mxu0 %v15835_v46  ;;  %v15846_v46 = vld [vmem:[#allocation225_spill] sm:$0xff] }
 0x6c2   :  { %7143 = vmatpush1.bf16.msra.mxu1 %v15836_v42  ;;  %7103 = vmatprep.subr.bf16.mxu0 %v15837_v10  ;;  %v15847_v42 = vld [vmem:[#allocation226_spill] sm:$0xff]  ;;  %v15848_v10 = vld [vmem:[#allocation227_spill] sm:$0xff] }
 0x6c3   :  { %7144 = vmatprep.subr.bf16.mxu1 %v15838_v22  ;;  %v15849_v22 = vld [vmem:[#allocation228_spill] sm:$0xff] }
 0x6c5   :  { %7104 = vmatpush1.bf16.msra.mxu0 %v15839_v4  ;;  %v15850_v4 = vld [vmem:[#allocation229_spill] sm:$0xff] }
 0x6c6   :  { %7145 = vmatpush1.bf16.msra.mxu1 %v15840_v5  ;;  %7105 = vmatprep.subr.bf16.mxu0 %v15841_v39  ;;  %v15851_v5 = vld [vmem:[#allocation230_spill] sm:$0xff]  ;;  %v15852_v39 = vld [vmem:[#allocation231_spill] sm:$0xff] }
 0x6c7   :  { %7146 = vmatprep.subr.bf16.mxu1 %v15842_v40  ;;  %v15853_v40 = vld [vmem:[#allocation232_spill] sm:$0xff] }
 0x6c9   :  { %7106 = vmatpush1.bf16.msra.mxu0 %v15843_v63  ;;  %v15854_v63 = vld [vmem:[#allocation233_spill] sm:$0xff] }
 0x6ca   :  { %7147 = vmatpush1.bf16.msra.mxu1 %v15844_v18  ;;  %7107 = vmatprep.subr.bf16.mxu0 %v15845_v32  ;;  %v15855_v18 = vld [vmem:[#allocation234_spill] sm:$0xff]  ;;  %v15856_v32 = vld [vmem:[#allocation235_spill] sm:$0xff] }
 0x6cb   :  { %7148 = vmatprep.subr.bf16.mxu1 %v15846_v46  ;;  %v15857_v46 = vld [vmem:[#allocation236_spill] sm:$0xff] }
 0x6cd   :  { %7108 = vmatpush1.bf16.msra.mxu0 %v15847_v42  ;;  %v15858_v42 = vld [vmem:[#allocation237_spill] sm:$0xff] }
 0x6ce   :  { %7149 = vmatpush1.bf16.msra.mxu1 %v15848_v10  ;;  %7109 = vmatprep.subr.bf16.mxu0 %v15849_v22  ;;  %v15859_v10 = vld [vmem:[#allocation238_spill] sm:$0xff]  ;;  %v15860_v22 = vld [vmem:[#allocation239_spill] sm:$0xff] }
 0x6cf   :  { %7150 = vmatprep.subr.bf16.mxu1 %v15850_v4  ;;  %v15861_v4 = vld [vmem:[#allocation240_spill] sm:$0xff] }
 0x6d1   :  { %7110 = vmatpush1.bf16.msra.mxu0 %v15851_v5  ;;  %v15862_v5 = vld [vmem:[#allocation241_spill] sm:$0xff] }
 0x6d2   :  { %7151 = vmatpush1.bf16.msra.mxu1 %v15852_v39  ;;  %7111 = vmatprep.subr.bf16.mxu0 %v15853_v40  ;;  %v15863_v39 = vld [vmem:[#allocation242_spill] sm:$0xff]  ;;  %v15864_v40 = vld [vmem:[#allocation243_spill] sm:$0xff] }
 0x6d3   :  { %7152 = vmatprep.subr.bf16.mxu1 %v15854_v63  ;;  %v15865_v63 = vld [vmem:[#allocation244_spill] sm:$0xff] }
 0x6d5   :  { %7112 = vmatpush1.bf16.msra.mxu0 %v15855_v18  ;;  %v15866_v18 = vld [vmem:[#allocation245_spill] sm:$0xff] }
 0x6d6   :  { %7153 = vmatpush1.bf16.msra.mxu1 %v15856_v32  ;;  %7113 = vmatprep.subr.bf16.mxu0 %v15857_v46  ;;  %v15867_v32 = vld [vmem:[#allocation246_spill] sm:$0xff]  ;;  %v15868_v46 = vld [vmem:[#allocation247_spill] sm:$0xff] }
 0x6d7   :  { %7154 = vmatprep.subr.bf16.mxu1 %v15858_v42  ;;  %v15869_v42 = vld [vmem:[#allocation248_spill] sm:$0xff] }
 0x6d9   :  { %7114 = vmatpush1.bf16.msra.mxu0 %v15859_v10  ;;  %v15870_v10 = vld [vmem:[#allocation249_spill] sm:$0xff] }
 0x6da   :  { %7155 = vmatpush1.bf16.msra.mxu1 %v15860_v22  ;;  %7115 = vmatprep.subr.bf16.mxu0 %v15861_v4  ;;  %v15871_v22 = vld [vmem:[#allocation250_spill] sm:$0xff]  ;;  %v15872_v4 = vld [vmem:[#allocation251_spill] sm:$0xff] }
 0x6db   :  { %7156 = vmatprep.subr.bf16.mxu1 %v15862_v5  ;;  %v15873_v5 = vld [vmem:[#allocation252_spill] sm:$0xff] }
 0x6dd   :  { %7116 = vmatpush2.bf16.msra.mxu0 %v15863_v39  ;;  %v15874_v39 = vld [vmem:[#allocation253_spill] sm:$0xff] }
 0x6de   :  { %7157 = vmatpush2.bf16.msra.mxu1 %v15864_v40  ;;  %7117 = vmatprep.subr.bf16.mxu0 %v15865_v63  ;;  %v15875_v40 = vld [vmem:[#allocation254_spill] sm:$0xff]  ;;  %v15876_v63 = vld [vmem:[#allocation255_spill] sm:$0xff] }
 0x6df   :  { %7158 = vmatprep.subr.bf16.mxu1 %v15866_v18  ;;  %v15877_v18 = vld [vmem:[#allocation256_spill] sm:$0xff] }
 0x6e1   :  { %7118 = vmatpush2.bf16.msra.mxu0 %v15867_v32  ;;  %v15878_v32 = vld [vmem:[#allocation257_spill] sm:$0xff] }
 0x6e2   :  { %7159 = vmatpush2.bf16.msra.mxu1 %v15868_v46  ;;  %7119 = vmatprep.subr.bf16.mxu0 %v15869_v42  ;;  %v15879_v46 = vld [vmem:[#allocation258_spill] sm:$0xff]  ;;  %v15880_v42 = vld [vmem:[#allocation259_spill] sm:$0xff] }
 0x6e3   :  { %7160 = vmatprep.subr.bf16.mxu1 %v15870_v10  ;;  %v15881_v10 = vld [vmem:[#allocation260_spill] sm:$0xff] }
 0x6e5   :  { %7120 = vmatpush2.bf16.msra.mxu0 %v15871_v22  ;;  %v15882_v22 = vld [vmem:[#allocation261_spill] sm:$0xff] }
 0x6e6   :  { %7161 = vmatpush2.bf16.msra.mxu1 %v15872_v4  ;;  %7121 = vmatprep.subr.bf16.mxu0 %v15873_v5  ;;  %v15883_v4 = vld [vmem:[#allocation262_spill] sm:$0xff]  ;;  %v15884_v5 = vld [vmem:[#allocation263_spill] sm:$0xff] }
 0x6e7   :  { %7162 = vmatprep.subr.bf16.mxu1 %v15874_v39  ;;  %v15885_v39 = vld [vmem:[#allocation264_spill] sm:$0xff] }
 0x6e9   :  { %7122 = vmatpush2.bf16.msra.mxu0 %v15875_v40  ;;  %v15886_v40 = vld [vmem:[#allocation265_spill] sm:$0xff] }
 0x6ea   :  { %7163 = vmatpush2.bf16.msra.mxu1 %v15876_v63  ;;  %7123 = vmatprep.subr.bf16.mxu0 %v15877_v18  ;;  %v15887_v63 = vld [vmem:[#allocation266_spill] sm:$0xff]  ;;  %v15888_v18 = vld [vmem:[#allocation267_spill] sm:$0xff] }
 0x6eb   :  { %7164 = vmatprep.subr.bf16.mxu1 %v15878_v32  ;;  %v15889_v32 = vld [vmem:[#allocation268_spill] sm:$0xff] }
 0x6ed   :  { %7124 = vmatpush2.bf16.msra.mxu0 %v15879_v46  ;;  %v15890_v46 = vld [vmem:[#allocation269_spill] sm:$0xff] }
 0x6ee   :  { %7165 = vmatpush2.bf16.msra.mxu1 %v15880_v42  ;;  %7125 = vmatprep.subr.bf16.mxu0 %v15881_v10  ;;  %v15891_v42 = vld [vmem:[#allocation270_spill] sm:$0xff]  ;;  %v15892_v10 = vld [vmem:[#allocation271_spill] sm:$0xff] }
 0x6ef   :  { %7166 = vmatprep.subr.bf16.mxu1 %v15882_v22  ;;  %v15893_v22 = vld [vmem:[#allocation272_spill] sm:$0xff] }
 0x6f1   :  { %7126 = vmatpush2.bf16.msra.mxu0 %v15883_v4  ;;  %v15894_v4 = vld [vmem:[#allocation273_spill] sm:$0xff] }
 0x6f2   :  { %7167 = vmatpush2.bf16.msra.mxu1 %v15884_v5  ;;  %7127 = vmatprep.subr.bf16.mxu0 %v15885_v39  ;;  %v15896_v5 = vld [vmem:[#allocation275_spill] sm:$0xff] }
 0x6f3   :  { %7168 = vmatprep.subr.bf16.mxu1 %v15886_v40 }
 0x6f5   :  { %7128 = vmatpush2.bf16.msra.mxu0 %v15887_v63  ;;  %v15895_v63 = vld [vmem:[#allocation274_spill] sm:$0xff] }
 0x6f6   :  { %7169 = vmatpush2.bf16.msra.mxu1 %v15888_v18  ;;  %7129 = vmatprep.subr.bf16.mxu0 %v15889_v32 }
 0x6f7   :  { %7170 = vmatprep.subr.bf16.mxu1 %v15890_v46  ;;  %v15897_v46 = vld [vmem:[#allocation276_spill] sm:$0xff] }
 0x6f9   :  { %7130 = vmatpush2.bf16.msra.mxu0 %v15891_v42 }
 0x6fa   :  { %7171 = vmatpush2.bf16.msra.mxu1 %v15892_v10  ;;  %7181 = vmatprep.subr.bf16.mxu0 %v15893_v22 }
 0x6fb   :  { %7222 = vmatprep.subr.bf16.mxu1 %v15894_v4  ;;  %v15898_v4 = vld [vmem:[#allocation278_spill] sm:$0xff] }
 0x6fc   :  { %7132 = vmatmul.mubr.bf16.vlgmr.msra.gmra.mxu0 %v12653_v12  ;;  %v6887_v39 = vpop.f32.mrf.mxu0  ;;  %v6928_v40 = vpop.f32.mrf.mxu1 }
 0x6fd   :  { %7173 = vmatmul.mubr.bf16.vlgmr.msra.gmra.mxu1 %v12655_v36  ;;  %v6888_v18 = vadd.f32 %v6887_v39, %v15895_v63  ;;  %7182 = vmatpush1.bf16.msra.mxu0 %v15896_v5  ;;  %v15901_v5 = vld [vmem:[#allocation280_spill] sm:$0xff] }
 0x6fe   :  { %7213 = vmatprep.mubr.bf16.mxu0 %v12571_v21  ;;  %7223 = vmatpush1.bf16.msra.mxu1 %v15897_v46  ;;  %v6889_v42 = vpop.f32.mrf.mxu0  ;;  %v6930_v10 = vpop.f32.mrf.mxu1 }
 0x6ff   :  { %v12803_v32 = vadd.f32 %v6928_v40, %v6888_v18  ;;  %7254 = vmatprep.mubr.bf16.mxu1 %v12573_v49  ;;  %v6890_v22 = vadd.f32 %v6889_v42, %v15898_v4  ;;  %7183 = vmatprep.subr.bf16.mxu0 %v15899_v37  ;;  %v15903_v40 = vld [vmem:[#allocation282_spill] sm:$0xff]  ;;  %v15904_v18 = vld [vmem:[#allocation283_spill] sm:$0xff]  ;;  %v15906_v42 = vld [vmem:[#allocation285_spill] sm:$0xff] }
 0x700   :  { %7224 = vmatprep.subr.bf16.mxu1 %v15900_v30  ;;  %v6891_v9 = vpop.f32.mrf.mxu0  ;;  %v6932_v39 = vpop.f32.mrf.mxu1  ;;  %v15907_v37 = vld [vmem:[#allocation286_spill] sm:$0xff]  ;;  %v15969_v4 = vld [vmem:[#allocation348_spill] sm:$0xff] }
 0x701   :  { %v12809_v63 = vadd.f32 %v6930_v10, %v6890_v22  ;;  %7184 = vmatpush1.bf16.msra.mxu0 %v15901_v5  ;;  %v15908_v9 = vld [vmem:[#allocation287_spill] sm:$0xff]  ;;  %v15909_v22 = vld [vmem:[#allocation288_spill] sm:$0xff]  ;;  %v15910_v10 = vld [vmem:[#allocation289_spill] sm:$0xff] }
 0x702   :  { %7225 = vmatpush1.bf16.msra.mxu1 %v15902_v59  ;;  %v6892_v46 = vpop.f32.mrf.mxu0  ;;  %v6933_v2 = vpop.f32.mrf.mxu1  ;;  %7185 = vmatprep.subr.bf16.mxu0 %v15903_v40  ;;  %v15911_v39 = vld [vmem:[#allocation290_spill] sm:$0xff]  ;;  %v15914_v40 = vld [vmem:[#allocation293_spill] sm:$0xff] }
 0x703   :  { %7226 = vmatprep.subr.bf16.mxu1 %v15904_v18  ;;  %v15912_v46 = vld [vmem:[#allocation291_spill] sm:$0xff]  ;;  %v15913_v2 = vld [vmem:[#allocation292_spill] sm:$0xff]  ;;  %v15915_v18 = vld [vmem:[#allocation294_spill] sm:$0xff] }
 0x704   :  { %v15966_v5 = vld [vmem:[#allocation345_spill] sm:$0xff] }
 0x705   :  { %7186 = vmatpush1.bf16.msra.mxu0 %v15905_v54  ;;  %v15916_v54 = vld [vmem:[#allocation295_spill] sm:$0xff] }
 0x706   :  { %7227 = vmatpush1.bf16.msra.mxu1 %v15906_v42  ;;  %7187 = vmatprep.subr.bf16.mxu0 %v15907_v37  ;;  %v15917_v42 = vld [vmem:[#allocation296_spill] sm:$0xff]  ;;  %v15918_v37 = vld [vmem:[#allocation297_spill] sm:$0xff] }
 0x707   :  { %7228 = vmatprep.subr.bf16.mxu1 %v15908_v9  ;;  %v15919_v9 = vld [vmem:[#allocation298_spill] sm:$0xff] }
 0x709   :  { %7188 = vmatpush1.bf16.msra.mxu0 %v15909_v22  ;;  %v15920_v22 = vld [vmem:[#allocation299_spill] sm:$0xff] }
 0x70a   :  { %7229 = vmatpush1.bf16.msra.mxu1 %v15910_v10  ;;  %7189 = vmatprep.subr.bf16.mxu0 %v15911_v39  ;;  %v15921_v10 = vld [vmem:[#allocation300_spill] sm:$0xff]  ;;  %v15922_v39 = vld [vmem:[#allocation301_spill] sm:$0xff] }
 0x70b   :  { %7230 = vmatprep.subr.bf16.mxu1 %v15912_v46  ;;  %v15923_v46 = vld [vmem:[#allocation302_spill] sm:$0xff] }
 0x70d   :  { %7190 = vmatpush1.bf16.msra.mxu0 %v15913_v2  ;;  %v15924_v2 = vld [vmem:[#allocation303_spill] sm:$0xff] }
 0x70e   :  { %7231 = vmatpush1.bf16.msra.mxu1 %v15914_v40  ;;  %7191 = vmatprep.subr.bf16.mxu0 %v15915_v18  ;;  %v15925_v40 = vld [vmem:[#allocation304_spill] sm:$0xff]  ;;  %v15926_v18 = vld [vmem:[#allocation305_spill] sm:$0xff] }
 0x70f   :  { %7232 = vmatprep.subr.bf16.mxu1 %v15916_v54  ;;  %v15927_v54 = vld [vmem:[#allocation306_spill] sm:$0xff] }
 0x711   :  { %7192 = vmatpush1.bf16.msra.mxu0 %v15917_v42  ;;  %v15928_v42 = vld [vmem:[#allocation307_spill] sm:$0xff] }
 0x712   :  { %7233 = vmatpush1.bf16.msra.mxu1 %v15918_v37  ;;  %7193 = vmatprep.subr.bf16.mxu0 %v15919_v9  ;;  %v15929_v37 = vld [vmem:[#allocation308_spill] sm:$0xff]  ;;  %v15930_v9 = vld [vmem:[#allocation309_spill] sm:$0xff] }
 0x713   :  { %7234 = vmatprep.subr.bf16.mxu1 %v15920_v22  ;;  %v15931_v22 = vld [vmem:[#allocation310_spill] sm:$0xff] }
 0x715   :  { %7194 = vmatpush1.bf16.msra.mxu0 %v15921_v10  ;;  %v15932_v10 = vld [vmem:[#allocation311_spill] sm:$0xff] }
 0x716   :  { %7235 = vmatpush1.bf16.msra.mxu1 %v15922_v39  ;;  %7195 = vmatprep.subr.bf16.mxu0 %v15923_v46  ;;  %v15933_v39 = vld [vmem:[#allocation312_spill] sm:$0xff]  ;;  %v15934_v46 = vld [vmem:[#allocation313_spill] sm:$0xff] }
 0x717   :  { %7236 = vmatprep.subr.bf16.mxu1 %v15924_v2  ;;  %v15935_v2 = vld [vmem:[#allocation314_spill] sm:$0xff] }
 0x719   :  { %7196 = vmatpush1.bf16.msra.mxu0 %v15925_v40  ;;  %v15936_v40 = vld [vmem:[#allocation315_spill] sm:$0xff] }
 0x71a   :  { %7237 = vmatpush1.bf16.msra.mxu1 %v15926_v18  ;;  %7197 = vmatprep.subr.bf16.mxu0 %v15927_v54  ;;  %v15937_v18 = vld [vmem:[#allocation316_spill] sm:$0xff]  ;;  %v15938_v54 = vld [vmem:[#allocation317_spill] sm:$0xff] }
 0x71b   :  { %7238 = vmatprep.subr.bf16.mxu1 %v15928_v42  ;;  %v15939_v42 = vld [vmem:[#allocation318_spill] sm:$0xff] }
 0x71d   :  { %7198 = vmatpush2.bf16.msra.mxu0 %v15929_v37  ;;  %v15940_v37 = vld [vmem:[#allocation319_spill] sm:$0xff] }
 0x71e   :  { %7239 = vmatpush2.bf16.msra.mxu1 %v15930_v9  ;;  %7199 = vmatprep.subr.bf16.mxu0 %v15931_v22  ;;  %v15941_v9 = vld [vmem:[#allocation320_spill] sm:$0xff]  ;;  %v15942_v22 = vld [vmem:[#allocation321_spill] sm:$0xff] }
 0x71f   :  { %7240 = vmatprep.subr.bf16.mxu1 %v15932_v10  ;;  %v15943_v10 = vld [vmem:[#allocation322_spill] sm:$0xff] }
 0x721   :  { %7200 = vmatpush2.bf16.msra.mxu0 %v15933_v39  ;;  %v15944_v39 = vld [vmem:[#allocation323_spill] sm:$0xff] }
 0x722   :  { %7241 = vmatpush2.bf16.msra.mxu1 %v15934_v46  ;;  %7201 = vmatprep.subr.bf16.mxu0 %v15935_v2  ;;  %v15945_v46 = vld [vmem:[#allocation324_spill] sm:$0xff]  ;;  %v15946_v2 = vld [vmem:[#allocation325_spill] sm:$0xff] }
 0x723   :  { %7242 = vmatprep.subr.bf16.mxu1 %v15936_v40  ;;  %v15947_v40 = vld [vmem:[#allocation326_spill] sm:$0xff] }
 0x725   :  { %7202 = vmatpush2.bf16.msra.mxu0 %v15937_v18  ;;  %v15948_v18 = vld [vmem:[#allocation327_spill] sm:$0xff] }
 0x726   :  { %7243 = vmatpush2.bf16.msra.mxu1 %v15938_v54  ;;  %7203 = vmatprep.subr.bf16.mxu0 %v15939_v42  ;;  %v15949_v54 = vld [vmem:[#allocation328_spill] sm:$0xff]  ;;  %v15950_v42 = vld [vmem:[#allocation329_spill] sm:$0xff] }
 0x727   :  { %7244 = vmatprep.subr.bf16.mxu1 %v15940_v37  ;;  %v15951_v37 = vld [vmem:[#allocation330_spill] sm:$0xff] }
 0x729   :  { %7204 = vmatpush2.bf16.msra.mxu0 %v15941_v9  ;;  %v15952_v9 = vld [vmem:[#allocation331_spill] sm:$0xff] }
 0x72a   :  { %7245 = vmatpush2.bf16.msra.mxu1 %v15942_v22  ;;  %7205 = vmatprep.subr.bf16.mxu0 %v15943_v10  ;;  %v15953_v22 = vld [vmem:[#allocation332_spill] sm:$0xff]  ;;  %v15954_v10 = vld [vmem:[#allocation333_spill] sm:$0xff] }
 0x72b   :  { %7246 = vmatprep.subr.bf16.mxu1 %v15944_v39  ;;  %v15955_v39 = vld [vmem:[#allocation334_spill] sm:$0xff] }
 0x72d   :  { %7206 = vmatpush2.bf16.msra.mxu0 %v15945_v46  ;;  %v15956_v46 = vld [vmem:[#allocation335_spill] sm:$0xff] }
 0x72e   :  { %7247 = vmatpush2.bf16.msra.mxu1 %v15946_v2  ;;  %7207 = vmatprep.subr.bf16.mxu0 %v15947_v40  ;;  %v15957_v2 = vld [vmem:[#allocation336_spill] sm:$0xff]  ;;  %v15958_v40 = vld [vmem:[#allocation337_spill] sm:$0xff] }
 0x72f   :  { %7248 = vmatprep.subr.bf16.mxu1 %v15948_v18  ;;  %v15959_v18 = vld [vmem:[#allocation338_spill] sm:$0xff] }
 0x731   :  { %7208 = vmatpush2.bf16.msra.mxu0 %v15949_v54  ;;  %v15960_v54 = vld [vmem:[#allocation339_spill] sm:$0xff] }
 0x732   :  { %7249 = vmatpush2.bf16.msra.mxu1 %v15950_v42  ;;  %7209 = vmatprep.subr.bf16.mxu0 %v15951_v37 }
 0x733   :  { %7250 = vmatprep.subr.bf16.mxu1 %v15952_v9 }
 0x735   :  { %7210 = vmatpush2.bf16.msra.mxu0 %v15953_v22 }
 0x736   :  { %7251 = vmatpush2.bf16.msra.mxu1 %v15954_v10  ;;  %7211 = vmatprep.subr.bf16.mxu0 %v15955_v39  ;;  %v15961_v10 = vld [vmem:[#allocation340_spill] sm:$0xff] }
 0x737   :  { %7252 = vmatprep.subr.bf16.mxu1 %v15956_v46  ;;  %v15962_v46 = vld [vmem:[#allocation341_spill] sm:$0xff] }
 0x739   :  { %7212 = vmatpush2.bf16.msra.mxu0 %v15957_v2 }
 0x73a   :  { %7253 = vmatpush2.bf16.msra.mxu1 %v15958_v40  ;;  %7263 = vmatprep.subr.bf16.mxu0 %v15959_v18  ;;  %v15963_v18 = vld [vmem:[#allocation342_spill] sm:$0xff] }
 0x73b   :  { %7304 = vmatprep.subr.bf16.mxu1 %v15960_v54 }
 0x73c   :  { %v6969_v42 = vpop.f32.mrf.mxu0  ;;  %v7010_v37 = vpop.f32.mrf.mxu1  ;;  %7214 = vmatmul.mubr.bf16.vlgmr.msra.gmra.mxu0 %v12575_v60 }
 0x73d   :  { %v6970_v22 = vadd.f32 %v6969_v42, %v12803_v32  ;;  %7255 = vmatmul.mubr.bf16.vlgmr.msra.gmra.mxu1 %v12577_v19  ;;  %7264 = vmatpush1.bf16.msra.mxu0 %v15961_v10  ;;  %v15964_v42 = vld [vmem:[#allocation343_spill] sm:$0xff]  ;;  %v15965_v10 = vld [vmem:[#allocation344_spill] sm:$0xff] }
 0x73e   :  { %7295 = vmatprep.mubr.bf16.mxu0 %v12647_v11  ;;  %7305 = vmatpush1.bf16.msra.mxu1 %v15962_v46  ;;  %v6971_v2 = vpop.f32.mrf.mxu0  ;;  %v7012_v40 = vpop.f32.mrf.mxu1 }
 0x73f   :  { %v12877_v39 = vadd.f32 %v7010_v37, %v6970_v22  ;;  %7336 = vmatprep.mubr.bf16.mxu1 %v12649_v24  ;;  %v6972_v54 = vadd.f32 %v6971_v2, %v12809_v63  ;;  %7265 = vmatprep.subr.bf16.mxu0 %v15963_v18  ;;  %v15967_v37 = vld [vmem:[#allocation346_spill] sm:$0xff]  ;;  %v15968_v22 = vld [vmem:[#allocation347_spill] sm:$0xff]  ;;  %v15970_v63 = vld [vmem:[#allocation349_spill] sm:$0xff] }
 0x740   :  { %v6973_v9 = vpop.f32.mrf.mxu0  ;;  %v7014_v32 = vpop.f32.mrf.mxu1  ;;  %7306 = vmatprep.subr.bf16.mxu1 %v15964_v42  ;;  %v15972_v2 = vld [vmem:[#allocation351_spill] sm:$0xff] }
 0x741   :  { %v12883_v59 = vadd.f32 %v7012_v40, %v6972_v54  ;;  %7266 = vmatpush1.bf16.msra.mxu0 %v15965_v10  ;;  %v15971_v9 = vld [vmem:[#allocation350_spill] sm:$0xff]  ;;  %v15973_v54 = vld [vmem:[#allocation352_spill] sm:$0xff]  ;;  %v15974_v40 = vld [vmem:[#allocation353_spill] sm:$0xff] }
 0x742   :  { %7307 = vmatpush1.bf16.msra.mxu1 %v15966_v5  ;;  %v6974_v46 = vpop.f32.mrf.mxu0  ;;  %v7015_v30 = vpop.f32.mrf.mxu1  ;;  %7267 = vmatprep.subr.bf16.mxu0 %v15967_v37  ;;  %v15975_v32 = vld [vmem:[#allocation354_spill] sm:$0xff]  ;;  %v15978_v37 = vld [vmem:[#allocation357_spill] sm:$0xff] }
 0x743   :  { %7308 = vmatprep.subr.bf16.mxu1 %v15968_v22  ;;  %v15976_v46 = vld [vmem:[#allocation355_spill] sm:$0xff]  ;;  %v15977_v30 = vld [vmem:[#allocation356_spill] sm:$0xff]  ;;  %v15979_v22 = vld [vmem:[#allocation358_spill] sm:$0xff] }
 0x744   :  { %v16029_v5 = vld [vmem:[#allocation410_spill] sm:$0xff] }
 0x745   :  { %7268 = vmatpush1.bf16.msra.mxu0 %v15969_v4  ;;  %v15980_v4 = vld [vmem:[#allocation359_spill] sm:$0xff] }
 0x746   :  { %7309 = vmatpush1.bf16.msra.mxu1 %v15970_v63  ;;  %7269 = vmatprep.subr.bf16.mxu0 %v15971_v9  ;;  %v15981_v63 = vld [vmem:[#allocation360_spill] sm:$0xff]  ;;  %v15982_v9 = vld [vmem:[#allocation361_spill] sm:$0xff] }
 0x747   :  { %7310 = vmatprep.subr.bf16.mxu1 %v15972_v2  ;;  %v15983_v2 = vld [vmem:[#allocation362_spill] sm:$0xff] }
 0x749   :  { %7270 = vmatpush1.bf16.msra.mxu0 %v15973_v54  ;;  %v15984_v54 = vld [vmem:[#allocation363_spill] sm:$0xff] }
 0x74a   :  { %7311 = vmatpush1.bf16.msra.mxu1 %v15974_v40  ;;  %7271 = vmatprep.subr.bf16.mxu0 %v15975_v32  ;;  %v15985_v40 = vld [vmem:[#allocation364_spill] sm:$0xff]  ;;  %v15986_v32 = vld [vmem:[#allocation365_spill] sm:$0xff] }
 0x74b   :  { %7312 = vmatprep.subr.bf16.mxu1 %v15976_v46  ;;  %v15987_v46 = vld [vmem:[#allocation366_spill] sm:$0xff] }
 0x74d   :  { %7272 = vmatpush1.bf16.msra.mxu0 %v15977_v30  ;;  %v15988_v30 = vld [vmem:[#allocation367_spill] sm:$0xff] }
 0x74e   :  { %7313 = vmatpush1.bf16.msra.mxu1 %v15978_v37  ;;  %7273 = vmatprep.subr.bf16.mxu0 %v15979_v22  ;;  %v15989_v37 = vld [vmem:[#allocation368_spill] sm:$0xff]  ;;  %v15990_v22 = vld [vmem:[#allocation369_spill] sm:$0xff] }
 0x74f   :  { %7314 = vmatprep.subr.bf16.mxu1 %v15980_v4  ;;  %v15991_v4 = vld [vmem:[#allocation370_spill] sm:$0xff] }
 0x751   :  { %7274 = vmatpush1.bf16.msra.mxu0 %v15981_v63  ;;  %v15992_v63 = vld [vmem:[#allocation371_spill] sm:$0xff] }
 0x752   :  { %7315 = vmatpush1.bf16.msra.mxu1 %v15982_v9  ;;  %7275 = vmatprep.subr.bf16.mxu0 %v15983_v2  ;;  %v15993_v9 = vld [vmem:[#allocation372_spill] sm:$0xff]  ;;  %v15994_v2 = vld [vmem:[#allocation373_spill] sm:$0xff] }
 0x753   :  { %7316 = vmatprep.subr.bf16.mxu1 %v15984_v54  ;;  %v15995_v54 = vld [vmem:[#allocation374_spill] sm:$0xff] }
 0x755   :  { %7276 = vmatpush1.bf16.msra.mxu0 %v15985_v40  ;;  %v15996_v40 = vld [vmem:[#allocation375_spill] sm:$0xff] }
 0x756   :  { %7317 = vmatpush1.bf16.msra.mxu1 %v15986_v32  ;;  %7277 = vmatprep.subr.bf16.mxu0 %v15987_v46  ;;  %v15997_v32 = vld [vmem:[#allocation376_spill] sm:$0xff]  ;;  %v15998_v46 = vld [vmem:[#allocation377_spill] sm:$0xff] }
 0x757   :  { %7318 = vmatprep.subr.bf16.mxu1 %v15988_v30  ;;  %v15999_v30 = vld [vmem:[#allocation378_spill] sm:$0xff] }
 0x759   :  { %7278 = vmatpush1.bf16.msra.mxu0 %v15989_v37  ;;  %v16000_v37 = vld [vmem:[#allocation379_spill] sm:$0xff] }
 0x75a   :  { %7319 = vmatpush1.bf16.msra.mxu1 %v15990_v22  ;;  %7279 = vmatprep.subr.bf16.mxu0 %v15991_v4  ;;  %v16001_v22 = vld [vmem:[#allocation380_spill] sm:$0xff]  ;;  %v16002_v4 = vld [vmem:[#allocation381_spill] sm:$0xff] }
 0x75b   :  { %7320 = vmatprep.subr.bf16.mxu1 %v15992_v63  ;;  %v16003_v63 = vld [vmem:[#allocation382_spill] sm:$0xff] }
 0x75d   :  { %7280 = vmatpush2.bf16.msra.mxu0 %v15993_v9  ;;  %v16004_v9 = vld [vmem:[#allocation383_spill] sm:$0xff] }
 0x75e   :  { %7321 = vmatpush2.bf16.msra.mxu1 %v15994_v2  ;;  %7281 = vmatprep.subr.bf16.mxu0 %v15995_v54  ;;  %v16005_v2 = vld [vmem:[#allocation384_spill] sm:$0xff]  ;;  %v16006_v54 = vld [vmem:[#allocation385_spill] sm:$0xff] }
 0x75f   :  { %7322 = vmatprep.subr.bf16.mxu1 %v15996_v40  ;;  %v16007_v40 = vld [vmem:[#allocation386_spill] sm:$0xff] }
 0x761   :  { %7282 = vmatpush2.bf16.msra.mxu0 %v15997_v32  ;;  %v16008_v32 = vld [vmem:[#allocation387_spill] sm:$0xff] }
 0x762   :  { %7323 = vmatpush2.bf16.msra.mxu1 %v15998_v46  ;;  %7283 = vmatprep.subr.bf16.mxu0 %v15999_v30  ;;  %v16009_v46 = vld [vmem:[#allocation388_spill] sm:$0xff]  ;;  %v16010_v30 = vld [vmem:[#allocation389_spill] sm:$0xff] }
 0x763   :  { %7324 = vmatprep.subr.bf16.mxu1 %v16000_v37  ;;  %v16011_v37 = vld [vmem:[#allocation390_spill] sm:$0xff] }
 0x765   :  { %7284 = vmatpush2.bf16.msra.mxu0 %v16001_v22  ;;  %v16012_v22 = vld [vmem:[#allocation391_spill] sm:$0xff] }
 0x766   :  { %7325 = vmatpush2.bf16.msra.mxu1 %v16002_v4  ;;  %7285 = vmatprep.subr.bf16.mxu0 %v16003_v63  ;;  %v16013_v4 = vld [vmem:[#allocation392_spill] sm:$0xff]  ;;  %v16014_v63 = vld [vmem:[#allocation393_spill] sm:$0xff] }
 0x767   :  { %7326 = vmatprep.subr.bf16.mxu1 %v16004_v9  ;;  %v16015_v9 = vld [vmem:[#allocation394_spill] sm:$0xff] }
 0x769   :  { %7286 = vmatpush2.bf16.msra.mxu0 %v16005_v2  ;;  %v16016_v2 = vld [vmem:[#allocation395_spill] sm:$0xff] }
 0x76a   :  { %7327 = vmatpush2.bf16.msra.mxu1 %v16006_v54  ;;  %7287 = vmatprep.subr.bf16.mxu0 %v16007_v40  ;;  %v16017_v54 = vld [vmem:[#allocation396_spill] sm:$0xff]  ;;  %v16018_v40 = vld [vmem:[#allocation397_spill] sm:$0xff] }
 0x76b   :  { %7328 = vmatprep.subr.bf16.mxu1 %v16008_v32  ;;  %v16019_v32 = vld [vmem:[#allocation398_spill] sm:$0xff] }
 0x76d   :  { %7288 = vmatpush2.bf16.msra.mxu0 %v16009_v46  ;;  %v16020_v46 = vld [vmem:[#allocation399_spill] sm:$0xff] }
 0x76e   :  { %7329 = vmatpush2.bf16.msra.mxu1 %v16010_v30  ;;  %7289 = vmatprep.subr.bf16.mxu0 %v16011_v37  ;;  %v16021_v30 = vld [vmem:[#allocation400_spill] sm:$0xff]  ;;  %v16022_v37 = vld [vmem:[#allocation401_spill] sm:$0xff] }
 0x76f   :  { %7330 = vmatprep.subr.bf16.mxu1 %v16012_v22  ;;  %v16023_v22 = vld [vmem:[#allocation402_spill] sm:$0xff] }
 0x771   :  { %7290 = vmatpush2.bf16.msra.mxu0 %v16013_v4  ;;  %v16024_v4 = vld [vmem:[#allocation403_spill] sm:$0xff] }
 0x772   :  { %7331 = vmatpush2.bf16.msra.mxu1 %v16014_v63  ;;  %7291 = vmatprep.subr.bf16.mxu0 %v16015_v9 }
 0x773   :  { %7332 = vmatprep.subr.bf16.mxu1 %v16016_v2  ;;  %v16025_v2 = vld [vmem:[#allocation404_spill] sm:$0xff] }
 0x775   :  { %7292 = vmatpush2.bf16.msra.mxu0 %v16017_v54 }
 0x776   :  { %7333 = vmatpush2.bf16.msra.mxu1 %v16018_v40  ;;  %7293 = vmatprep.subr.bf16.mxu0 %v16019_v32  ;;  %v16026_v40 = vld [vmem:[#allocation405_spill] sm:$0xff]  ;;  %v16028_v32 = vld [vmem:[#allocation407_spill] sm:$0xff] }
 0x777   :  { %7334 = vmatprep.subr.bf16.mxu1 %v16020_v46  ;;  %v16027_v46 = vld [vmem:[#allocation406_spill] sm:$0xff] }
 0x779   :  { %7294 = vmatpush2.bf16.msra.mxu0 %v16021_v30 }
 0x77a   :  { %7335 = vmatpush2.bf16.msra.mxu1 %v16022_v37  ;;  %7345 = vmatprep.subr.bf16.mxu0 %v16023_v22 }
 0x77b   :  { %7386 = vmatprep.subr.bf16.mxu1 %v16024_v4 }
 0x77c   :  { %v7051_v63 = vpop.f32.mrf.mxu0  ;;  %7296 = vmatmul.mubr.bf16.vlgmr.msra.gmra.mxu0 %v12653_v12 }
 0x77d   :  { %v7052_v9 = vadd.f32 %v7051_v63, %v16025_v2  ;;  %v7092_v54 = vpop.f32.mrf.mxu1  ;;  %7337 = vmatmul.mubr.bf16.vlgmr.msra.gmra.mxu1 %v12655_v36  ;;  %7346 = vmatpush1.bf16.msra.mxu0 %v16026_v40 }
 0x77e   :  { %7377 = vmatprep.mubr.bf16.mxu0 %v12571_v21  ;;  %7387 = vmatpush1.bf16.msra.mxu1 %v16027_v46  ;;  %v7053_v30 = vpop.f32.mrf.mxu0 }
 0x77f   :  { %v12951_v37 = vadd.f32 %v7092_v54, %v7052_v9  ;;  %7418 = vmatprep.mubr.bf16.mxu1 %v12573_v49  ;;  %v7054_v4 = vadd.f32 %v7053_v30, %v11646_v47  ;;  %v7094_v22 = vpop.f32.mrf.mxu1  ;;  %7347 = vmatprep.subr.bf16.mxu0 %v16028_v32  ;;  %v16030_v9 = vld [vmem:[#allocation411_spill] sm:$0xff]  ;;  %v16031_v49 = vld [vmem:[#allocation412_spill] sm:$0xff]  ;;  %v16032_v30 = vld [vmem:[#allocation413_spill] sm:$0xff] }
 0x780   :  { %v7055_v63 = vpop.f32.mrf.mxu0  ;;  %7388 = vmatprep.subr.bf16.mxu1 %v11648_v48  ;;  %v16033_v47 = vld [vmem:[#allocation414_spill] sm:$0xff]  ;;  %v16035_v48 = vld [vmem:[#allocation416_spill] sm:$0xff] }
 0x781   :  { %v12957_v2 = vadd.f32 %v7094_v22, %v7054_v4  ;;  %v7096_v40 = vpop.f32.mrf.mxu1  ;;  %7348 = vmatpush1.bf16.msra.mxu0 %v16029_v5  ;;  %v16034_v63 = vld [vmem:[#allocation415_spill] sm:$0xff]  ;;  %v16036_v4 = vld [vmem:[#allocation417_spill] sm:$0xff]  ;;  %v16037_v22 = vld [vmem:[#allocation418_spill] sm:$0xff] }
 0x782   :  { %7389 = vmatpush1.bf16.msra.mxu1 %v11658_v27  ;;  %v7056_v21 = vpop.f32.mrf.mxu0  ;;  %7349 = vmatprep.subr.bf16.mxu0 %v16030_v9  ;;  %v16038_v40 = vld [vmem:[#allocation419_spill] sm:$0xff]  ;;  %v16040_v9 = vld [vmem:[#allocation421_spill] sm:$0xff] }
 0x783   :  { %v7097_v54 = vpop.f32.mrf.mxu1  ;;  %7390 = vmatprep.subr.bf16.mxu1 %v16031_v49  ;;  %v16039_v21 = vld [vmem:[#allocation420_spill] sm:$0xff]  ;;  %v16042_v49 = vld [vmem:[#allocation423_spill] sm:$0xff] }
 0x784   :  { %v16041_v54 = vld [vmem:[#allocation422_spill] sm:$0xff] }
 0x785   :  { %7350 = vmatpush1.bf16.msra.mxu0 %v16032_v30  ;;  %v16043_v30 = vld [vmem:[#allocation424_spill] sm:$0xff] }
 0x786   :  { %7391 = vmatpush1.bf16.msra.mxu1 %v16033_v47  ;;  %7351 = vmatprep.subr.bf16.mxu0 %v16034_v63  ;;  %v16044_v47 = vld [vmem:[#allocation425_spill] sm:$0xff]  ;;  %v16045_v63 = vld [vmem:[#allocation426_spill] sm:$0xff] }
 0x787   :  { %7392 = vmatprep.subr.bf16.mxu1 %v16035_v48  ;;  %v16046_v48 = vld [vmem:[#allocation427_spill] sm:$0xff] }
 0x789   :  { %7352 = vmatpush1.bf16.msra.mxu0 %v16036_v4  ;;  %v16047_v4 = vld [vmem:[#allocation428_spill] sm:$0xff] }
 0x78a   :  { %7393 = vmatpush1.bf16.msra.mxu1 %v16037_v22  ;;  %7353 = vmatprep.subr.bf16.mxu0 %v16038_v40  ;;  %v16048_v22 = vld [vmem:[#allocation429_spill] sm:$0xff]  ;;  %v16049_v40 = vld [vmem:[#allocation430_spill] sm:$0xff] }
 0x78b   :  { %7394 = vmatprep.subr.bf16.mxu1 %v16039_v21  ;;  %v16050_v21 = vld [vmem:[#allocation431_spill] sm:$0xff] }
 0x78d   :  { %7354 = vmatpush1.bf16.msra.mxu0 %v16040_v9  ;;  %v16051_v9 = vld [vmem:[#allocation432_spill] sm:$0xff] }
 0x78e   :  { %7395 = vmatpush1.bf16.msra.mxu1 %v16041_v54  ;;  %7355 = vmatprep.subr.bf16.mxu0 %v16042_v49  ;;  %v16052_v54 = vld [vmem:[#allocation433_spill] sm:$0xff]  ;;  %v16053_v49 = vld [vmem:[#allocation434_spill] sm:$0xff] }
 0x78f   :  { %7396 = vmatprep.subr.bf16.mxu1 %v16043_v30  ;;  %v16054_v30 = vld [vmem:[#allocation435_spill] sm:$0xff] }
 0x791   :  { %7356 = vmatpush1.bf16.msra.mxu0 %v16044_v47  ;;  %v16055_v47 = vld [vmem:[#allocation436_spill] sm:$0xff] }
 0x792   :  { %7397 = vmatpush1.bf16.msra.mxu1 %v16045_v63  ;;  %7357 = vmatprep.subr.bf16.mxu0 %v16046_v48  ;;  %v16056_v63 = vld [vmem:[#allocation437_spill] sm:$0xff]  ;;  %v16057_v48 = vld [vmem:[#allocation438_spill] sm:$0xff] }
 0x793   :  { %7398 = vmatprep.subr.bf16.mxu1 %v16047_v4  ;;  %v16058_v4 = vld [vmem:[#allocation439_spill] sm:$0xff] }
 0x795   :  { %7358 = vmatpush1.bf16.msra.mxu0 %v16048_v22  ;;  %v16059_v22 = vld [vmem:[#allocation440_spill] sm:$0xff] }
 0x796   :  { %7399 = vmatpush1.bf16.msra.mxu1 %v16049_v40  ;;  %7359 = vmatprep.subr.bf16.mxu0 %v16050_v21  ;;  %v16060_v40 = vld [vmem:[#allocation441_spill] sm:$0xff]  ;;  %v16061_v21 = vld [vmem:[#allocation442_spill] sm:$0xff] }
 0x797   :  { %7400 = vmatprep.subr.bf16.mxu1 %v16051_v9  ;;  %v16062_v9 = vld [vmem:[#allocation443_spill] sm:$0xff] }
 0x799   :  { %7360 = vmatpush1.bf16.msra.mxu0 %v16052_v54  ;;  %v16063_v54 = vld [vmem:[#allocation444_spill] sm:$0xff] }
 0x79a   :  { %7401 = vmatpush1.bf16.msra.mxu1 %v16053_v49  ;;  %7361 = vmatprep.subr.bf16.mxu0 %v16054_v30  ;;  %v16064_v49 = vld [vmem:[#allocation445_spill] sm:$0xff]  ;;  %v16065_v30 = vld [vmem:[#allocation446_spill] sm:$0xff] }
 0x79b   :  { %7402 = vmatprep.subr.bf16.mxu1 %v16055_v47  ;;  %v16066_v47 = vld [vmem:[#allocation447_spill] sm:$0xff] }
 0x79d   :  { %7362 = vmatpush2.bf16.msra.mxu0 %v16056_v63  ;;  %v16067_v63 = vld [vmem:[#allocation448_spill] sm:$0xff] }
 0x79e   :  { %7403 = vmatpush2.bf16.msra.mxu1 %v16057_v48  ;;  %7363 = vmatprep.subr.bf16.mxu0 %v16058_v4  ;;  %v16068_v48 = vld [vmem:[#allocation449_spill] sm:$0xff]  ;;  %v16069_v4 = vld [vmem:[#allocation450_spill] sm:$0xff] }
 0x79f   :  { %7404 = vmatprep.subr.bf16.mxu1 %v16059_v22  ;;  %v16070_v22 = vld [vmem:[#allocation451_spill] sm:$0xff] }
 0x7a1   :  { %7364 = vmatpush2.bf16.msra.mxu0 %v16060_v40  ;;  %v16071_v40 = vld [vmem:[#allocation452_spill] sm:$0xff] }
 0x7a2   :  { %7405 = vmatpush2.bf16.msra.mxu1 %v16061_v21  ;;  %7365 = vmatprep.subr.bf16.mxu0 %v16062_v9  ;;  %v16072_v21 = vld [vmem:[#allocation453_spill] sm:$0xff]  ;;  %v16073_v9 = vld [vmem:[#allocation454_spill] sm:$0xff] }
 0x7a3   :  { %7406 = vmatprep.subr.bf16.mxu1 %v16063_v54  ;;  %v16074_v54 = vld [vmem:[#allocation455_spill] sm:$0xff] }
 0x7a5   :  { %7366 = vmatpush2.bf16.msra.mxu0 %v16064_v49  ;;  %v16075_v49 = vld [vmem:[#allocation456_spill] sm:$0xff] }
 0x7a6   :  { %7407 = vmatpush2.bf16.msra.mxu1 %v16065_v30  ;;  %7367 = vmatprep.subr.bf16.mxu0 %v16066_v47  ;;  %v16076_v30 = vld [vmem:[#allocation457_spill] sm:$0xff]  ;;  %v16077_v47 = vld [vmem:[#allocation458_spill] sm:$0xff] }
 0x7a7   :  { %7408 = vmatprep.subr.bf16.mxu1 %v16067_v63  ;;  %v16078_v63 = vld [vmem:[#allocation459_spill] sm:$0xff] }
 0x7a9   :  { %7368 = vmatpush2.bf16.msra.mxu0 %v16068_v48  ;;  %v16079_v48 = vld [vmem:[#allocation460_spill] sm:$0xff] }
 0x7aa   :  { %7409 = vmatpush2.bf16.msra.mxu1 %v16069_v4  ;;  %7369 = vmatprep.subr.bf16.mxu0 %v16070_v22  ;;  %v16080_v22 = vld [vmem:[#allocation462_spill] sm:$0xff] }
 0x7ab   :  { %7410 = vmatprep.subr.bf16.mxu1 %v16071_v40  ;;  %v16081_v40 = vld [vmem:[#allocation463_spill] sm:$0xff] }
 0x7ad   :  { %7370 = vmatpush2.bf16.msra.mxu0 %v16072_v21  ;;  %v16082_v21 = vld [vmem:[#allocation464_spill] sm:$0xff] }
 0x7ae   :  { %7411 = vmatpush2.bf16.msra.mxu1 %v16073_v9  ;;  %7371 = vmatprep.subr.bf16.mxu0 %v16074_v54  ;;  %v16083_v9 = vld [vmem:[#allocation465_spill] sm:$0xff]  ;;  %v16084_v54 = vld [vmem:[#allocation466_spill] sm:$0xff] }
 0x7af   :  { %7412 = vmatprep.subr.bf16.mxu1 %v16075_v49  ;;  %v16085_v49 = vld [vmem:[#allocation467_spill] sm:$0xff] }
 0x7b1   :  { %7372 = vmatpush2.bf16.msra.mxu0 %v16076_v30  ;;  %v16086_v30 = vld [vmem:[#allocation468_spill] sm:$0xff] }
 0x7b2   :  { %7413 = vmatpush2.bf16.msra.mxu1 %v16077_v47  ;;  %7373 = vmatprep.subr.bf16.mxu0 %v16078_v63 }
 0x7b3   :  { %7414 = vmatprep.subr.bf16.mxu1 %v16079_v48 }
 0x7b5   :  { %7374 = vmatpush2.bf16.msra.mxu0 %v11817_v6 }
 0x7b6   :  { %7415 = vmatpush2.bf16.msra.mxu1 %v16080_v22  ;;  %7375 = vmatprep.subr.bf16.mxu0 %v16081_v40  ;;  %v16087_v22 = vld [vmem:[#allocation469_spill] sm:$0xff]  ;;  %v16096_v40 = vld [vmem:[#allocation478_spill] sm:$0xff] }
 0x7b7   :  { %7416 = vmatprep.subr.bf16.mxu1 %v16082_v21  ;;  %v16088_v21 = vld [vmem:[#allocation470_spill] sm:$0xff] }
 0x7b9   :  { %7376 = vmatpush2.bf16.msra.mxu0 %v16083_v9 }
 0x7ba   :  { %7417 = vmatpush2.bf16.msra.mxu1 %v16084_v54  ;;  %7427 = vmatprep.subr.bf16.mxu0 %v16085_v49  ;;  %v16089_v49 = vld [vmem:[#allocation471_spill] sm:$0xff] }
 0x7bb   :  { %7468 = vmatprep.subr.bf16.mxu1 %v16086_v30 }
 0x7bc   :  { %v7133_v47 = vpop.f32.mrf.mxu0  ;;  %7378 = vmatmul.mubr.bf16.vlgmr.msra.gmra.mxu0 %v12575_v60 }
 0x7bd   :  { %v7134_v48 = vadd.f32 %v7133_v47, %v12951_v37  ;;  %v7174_v6 = vpop.f32.mrf.mxu1  ;;  %7419 = vmatmul.mubr.bf16.vlgmr.msra.gmra.mxu1 %v12577_v19  ;;  %7428 = vmatpush1.bf16.msra.mxu0 %v16087_v22  ;;  %v16090_v47 = vld [vmem:[#allocation472_spill] sm:$0xff]  ;;  %v16091_v19 = vld [vmem:[#allocation473_spill] sm:$0xff]  ;;  %v16092_v22 = vld [vmem:[#allocation474_spill] sm:$0xff] }
 0x7be   :  { %7459 = vmatprep.mubr.bf16.mxu0 %v12647_v11  ;;  %7469 = vmatpush1.bf16.msra.mxu1 %v16088_v21  ;;  %v7135_v9 = vpop.f32.mrf.mxu0 }
 0x7bf   :  { %v13025_v54 = vadd.f32 %v7174_v6, %v7134_v48  ;;  %7500 = vmatprep.mubr.bf16.mxu1 %v12649_v24  ;;  %v13028_v30 = vpop.f32.mrf.mxu1  ;;  %7429 = vmatprep.subr.bf16.mxu0 %v16089_v49  ;;  %v16093_v48 = vld [vmem:[#allocation475_spill] sm:$0xff]  ;;  %v16094_v6 = vld [vmem:[#allocation476_spill] sm:$0xff]  ;;  %v16095_v24 = vld [vmem:[#allocation477_spill] sm:$0xff] }
 0x7c0   :  { %v7137_v60 = vpop.f32.mrf.mxu0  ;;  %7470 = vmatprep.subr.bf16.mxu1 %v16090_v47  ;;  %v16098_v47 = vld [vmem:[#allocation480_spill] sm:$0xff] }
 0x7c1   :  { %v7178_v37 = vpop.f32.mrf.mxu1  ;;  %7430 = vmatpush1.bf16.msra.mxu0 %v16091_v19  ;;  %v16097_v60 = vld [vmem:[#allocation479_spill] sm:$0xff]  ;;  %v16100_v19 = vld [vmem:[#allocation482_spill] sm:$0xff] }
 0x7c2   :  { %7471 = vmatpush1.bf16.msra.mxu1 %v11862_v35  ;;  %v7138_v11 = vpop.f32.mrf.mxu0  ;;  %7431 = vmatprep.subr.bf16.mxu0 %v16092_v22  ;;  %v16099_v37 = vld [vmem:[#allocation481_spill] sm:$0xff]  ;;  %v16102_v22 = vld [vmem:[#allocation484_spill] sm:$0xff] }
 0x7c3   :  { %v7179_v21 = vpop.f32.mrf.mxu1  ;;  %7472 = vmatprep.subr.bf16.mxu1 %v16093_v48  ;;  %v16101_v11 = vld [vmem:[#allocation483_spill] sm:$0xff]  ;;  %v16104_v48 = vld [vmem:[#allocation486_spill] sm:$0xff] }
 0x7c4   :  { %v16103_v21 = vld [vmem:[#allocation485_spill] sm:$0xff] }
 0x7c5   :  { %7432 = vmatpush1.bf16.msra.mxu0 %v16094_v6  ;;  %v16105_v6 = vld [vmem:[#allocation487_spill] sm:$0xff] }
 0x7c6   :  { %7473 = vmatpush1.bf16.msra.mxu1 %v16095_v24  ;;  %7433 = vmatprep.subr.bf16.mxu0 %v16096_v40  ;;  %v16106_v24 = vld [vmem:[#allocation488_spill] sm:$0xff]  ;;  %v16107_v40 = vld [vmem:[#allocation489_spill] sm:$0xff] }
 0x7c7   :  { %7474 = vmatprep.subr.bf16.mxu1 %v16097_v60  ;;  %v16108_v60 = vld [vmem:[#allocation490_spill] sm:$0xff] }
 0x7c9   :  { %7434 = vmatpush1.bf16.msra.mxu0 %v16098_v47  ;;  %v16109_v47 = vld [vmem:[#allocation491_spill] sm:$0xff] }
 0x7ca   :  { %7475 = vmatpush1.bf16.msra.mxu1 %v16099_v37  ;;  %7435 = vmatprep.subr.bf16.mxu0 %v16100_v19  ;;  %v16110_v37 = vld [vmem:[#allocation492_spill] sm:$0xff]  ;;  %v16111_v19 = vld [vmem:[#allocation493_spill] sm:$0xff] }
 0x7cb   :  { %7476 = vmatprep.subr.bf16.mxu1 %v16101_v11  ;;  %v16112_v11 = vld [vmem:[#allocation494_spill] sm:$0xff] }
 0x7cd   :  { %7436 = vmatpush1.bf16.msra.mxu0 %v16102_v22  ;;  %v16113_v22 = vld [vmem:[#allocation495_spill] sm:$0xff] }
 0x7ce   :  { %7477 = vmatpush1.bf16.msra.mxu1 %v16103_v21  ;;  %7437 = vmatprep.subr.bf16.mxu0 %v16104_v48  ;;  %v16114_v21 = vld [vmem:[#allocation496_spill] sm:$0xff]  ;;  %v16115_v48 = vld [vmem:[#allocation497_spill] sm:$0xff] }
 0x7cf   :  { %7478 = vmatprep.subr.bf16.mxu1 %v16105_v6  ;;  %v16116_v6 = vld [vmem:[#allocation498_spill] sm:$0xff] }
 0x7d1   :  { %7438 = vmatpush1.bf16.msra.mxu0 %v16106_v24  ;;  %v16117_v24 = vld [vmem:[#allocation499_spill] sm:$0xff] }
 0x7d2   :  { %7479 = vmatpush1.bf16.msra.mxu1 %v16107_v40  ;;  %7439 = vmatprep.subr.bf16.mxu0 %v16108_v60  ;;  %v16118_v40 = vld [vmem:[#allocation500_spill] sm:$0xff]  ;;  %v16119_v60 = vld [vmem:[#allocation501_spill] sm:$0xff] }
 0x7d3   :  { %7480 = vmatprep.subr.bf16.mxu1 %v16109_v47  ;;  %v16120_v47 = vld [vmem:[#allocation502_spill] sm:$0xff] }
 0x7d5   :  { %7440 = vmatpush1.bf16.msra.mxu0 %v16110_v37  ;;  %v16121_v37 = vld [vmem:[#allocation503_spill] sm:$0xff] }
 0x7d6   :  { %7481 = vmatpush1.bf16.msra.mxu1 %v16111_v19  ;;  %7441 = vmatprep.subr.bf16.mxu0 %v16112_v11  ;;  %v16122_v19 = vld [vmem:[#allocation504_spill] sm:$0xff]  ;;  %v16123_v11 = vld [vmem:[#allocation505_spill] sm:$0xff] }
 0x7d7   :  { %7482 = vmatprep.subr.bf16.mxu1 %v16113_v22  ;;  %v16124_v22 = vld [vmem:[#allocation506_spill] sm:$0xff] }
 0x7d9   :  { %7442 = vmatpush1.bf16.msra.mxu0 %v16114_v21  ;;  %v16125_v21 = vld [vmem:[#allocation507_spill] sm:$0xff] }
 0x7da   :  { %7483 = vmatpush1.bf16.msra.mxu1 %v16115_v48  ;;  %7443 = vmatprep.subr.bf16.mxu0 %v16116_v6  ;;  %v16126_v48 = vld [vmem:[#allocation508_spill] sm:$0xff]  ;;  %v16127_v6 = vld [vmem:[#allocation509_spill] sm:$0xff] }
 0x7db   :  { %7484 = vmatprep.subr.bf16.mxu1 %v16117_v24  ;;  %v16128_v24 = vld [vmem:[#allocation510_spill] sm:$0xff] }
 0x7dd   :  { %7444 = vmatpush2.bf16.msra.mxu0 %v16118_v40  ;;  %v16129_v40 = vld [vmem:[#allocation511_spill] sm:$0xff] }
 0x7de   :  { %7485 = vmatpush2.bf16.msra.mxu1 %v16119_v60  ;;  %7445 = vmatprep.subr.bf16.mxu0 %v16120_v47  ;;  %v16130_v60 = vld [vmem:[#allocation512_spill] sm:$0xff]  ;;  %v16131_v47 = vld [vmem:[#allocation513_spill] sm:$0xff] }
 0x7df   :  { %7486 = vmatprep.subr.bf16.mxu1 %v16121_v37  ;;  %v16132_v37 = vld [vmem:[#allocation514_spill] sm:$0xff] }
 0x7e1   :  { %7446 = vmatpush2.bf16.msra.mxu0 %v16122_v19  ;;  %v16133_v19 = vld [vmem:[#allocation515_spill] sm:$0xff] }
 0x7e2   :  { %7487 = vmatpush2.bf16.msra.mxu1 %v16123_v11  ;;  %7447 = vmatprep.subr.bf16.mxu0 %v16124_v22 }
 0x7e3   :  { %7488 = vmatprep.subr.bf16.mxu1 %v16125_v21 }
 0x7e5   :  { %7448 = vmatpush2.bf16.msra.mxu0 %v16126_v48  ;;  %v16134_v48 = vld [vmem:[#allocation519_spill] sm:$0xff] }
 0x7e6   :  { %7489 = vmatpush2.bf16.msra.mxu1 %v16127_v6  ;;  %7449 = vmatprep.subr.bf16.mxu0 %v16128_v24  ;;  %v16135_v6 = vld [vmem:[#allocation520_spill] sm:$0xff] }
 0x7e7   :  { %7490 = vmatprep.subr.bf16.mxu1 %v16129_v40  ;;  %v9906_v40 = vld [vmem:[#allocation8 + $0x354] ss:$8 sps:$4 sm:$0xff]  }
 0x7e9   :  { %7450 = vmatpush2.bf16.msra.mxu0 %v16130_v60  ;;  %v16136_v60 = vld [vmem:[#allocation523_spill] sm:$0xff] }
 0x7ea   :  { %7491 = vmatpush2.bf16.msra.mxu1 %v16131_v47  ;;  %7451 = vmatprep.subr.bf16.mxu0 %v16132_v37  ;;  %v7136_v37 = vadd.f32 %v7135_v9, %v12957_v2  ;;  %v16137_v47 = vld [vmem:[#allocation524_spill] sm:$0xff]  ;;  %v7510_v2 = vpack.c.bf16 %v12883_v59, %v12883_v59 }
 0x7eb   :  { %7492 = vmatprep.subr.bf16.mxu1 %v16133_v19  ;;  %v16138_v19 = vld [vmem:[#allocation525_spill] sm:$0xff] }
 0x7ed   :  { %7452 = vmatpush2.bf16.msra.mxu0 %v11996_v20  ;;  %v16139_v20 = vld [vmem:[#allocation526_spill] sm:$0xff] }
 0x7ee   :  { %7493 = vmatpush2.bf16.msra.mxu1 %v12000_v44  ;;  %7453 = vmatprep.subr.bf16.mxu0 %v12002_v29  ;;  %v16140_v44 = vld [vmem:[#allocation527_spill] sm:$0xff]  ;;  %v16141_v29 = vld [vmem:[#allocation528_spill] sm:$0xff] }
 0x7ef   :  { %7494 = vmatprep.subr.bf16.mxu1 %v16134_v48  ;;  %v7177_v48 = vadd.f32 %v13028_v30, %v7136_v37  ;;  %v9835_v30 = vld [vmem:[#allocation8 + $0x70] ss:$8 sps:$4 sm:$0xff]  }
 0x7f0   :  { %v9836_v37 = vld [vmem:[#allocation8 + $0x170] ss:$8 sps:$4 sm:$0xff]  }
 0x7f1   :  { %7454 = vmatpush2.bf16.msra.mxu0 %v16135_v6  ;;  %v16142_v6 = vld [vmem:[#allocation529_spill] sm:$0xff] }
 0x7f2   :  { %7495 = vmatpush2.bf16.msra.mxu1 %v12012_v17  ;;  %7455 = vmatprep.subr.bf16.mxu0 %v12014_v14  ;;  %v9833_v17 = vld [vmem:[#allocation8 + $0x74] ss:$8 sps:$4 sm:$0xff]  }
 0x7f3   :  { %7496 = vmatprep.subr.bf16.mxu1 %v16136_v60  ;;  %v9834_v14 = vld [vmem:[#allocation8 + $0x174] ss:$8 sps:$4 sm:$0xff]  }
 0x7f5   :  { %7456 = vmatpush2.bf16.msra.mxu0 %v16137_v47 }
 0x7f6   :  { %7497 = vmatpush2.bf16.msra.mxu1 %v16138_v19  ;;  %7457 = vmatprep.subr.bf16.mxu0 %v16139_v20  ;;  %v7512_v19 = vpack.c.bf16 %v7177_v48, %v7177_v48  ;;  %v16143_v20 = vld [vmem:[#allocation530_spill] sm:$0xff]  ;;  %v9838_v48 = vld [vmem:[#allocation8 + $0x164] ss:$8 sps:$4 sm:$0xff]  }
 0x7f7   :  { %7498 = vmatprep.subr.bf16.mxu1 %v16140_v44 }
 0x7f9   :  { %7458 = vmatpush2.bf16.msra.mxu0 %v16141_v29  ;;  %v9842_v29 = vld [vmem:[#allocation8 + $0x154] ss:$8 sps:$4 sm:$0xff]  }
 0x7fa   :  { %7499 = vmatpush2.bf16.msra.mxu1 %v16142_v6  ;;  %7517 = vmatprep.subr.bf16.mxu0 %v9833_v17  ;;  %v9837_v6 = vld [vmem:[#allocation8 + $0x64] ss:$8 sps:$4 sm:$0xff]  }
 0x7fb   :  { %7558 = vmatprep.subr.bf16.mxu1 %v9834_v14 }
 0x7fc   :  { %v7215_v9 = vpop.f32.mrf.mxu0  ;;  %7460 = vmatmul.mubr.bf16.vlgmr.msra.gmra.mxu0 %v12653_v12 }
 0x7fd   :  { %v7216_v47 = vadd.f32 %v7215_v9, %v16143_v20  ;;  %v7256_v44 = vpop.f32.mrf.mxu1  ;;  %7501 = vmatmul.mubr.bf16.vlgmr.msra.gmra.mxu1 %v12655_v36  ;;  %7518 = vmatpush1.bf16.msra.mxu0 %v9835_v30  ;;  %v9839_v20 = vld [vmem:[#allocation8 + $0x60] ss:$8 sps:$4 sm:$0xff]   ;;  %v9841_v30 = vld [vmem:[#allocation8 + $0x54] ss:$8 sps:$4 sm:$0xff]  }
 0x7fe   :  { %7549 = vmatprep.mubr.bf16.mxu0 %v7510_v2  ;;  %7559 = vmatpush1.bf16.msra.mxu1 %v9836_v37  ;;  %v13097_v17 = vpop.f32.mrf.mxu0  ;;  %v9840_v36 = vld [vmem:[#allocation8 + $0x160] ss:$8 sps:$4 sm:$0xff]  }
 0x7ff   :  { %v13099_v14 = vadd.f32 %v7256_v44, %v7216_v47  ;;  %7590 = vmatprep.mubr.bf16.mxu1 %v7512_v19  ;;  %v13101_v59 = vpop.f32.mrf.mxu1  ;;  %7519 = vmatprep.subr.bf16.mxu0 %v9837_v6  ;;  %v9843_v44 = vld [vmem:[#allocation8 + $0x50] ss:$8 sps:$4 sm:$0xff]   ;;  %v9845_v19 = vld [vmem:[#allocation8 + $0x44] ss:$8 sps:$4 sm:$0xff]  }
 0x800   :  { %v7219_v12 = vpop.f32.mrf.mxu0  ;;  %7560 = vmatprep.subr.bf16.mxu1 %v9838_v48  ;;  %v9844_v47 = vld [vmem:[#allocation8 + $0x150] ss:$8 sps:$4 sm:$0xff]   ;;  %v9846_v6 = vld [vmem:[#allocation8 + $0x144] ss:$8 sps:$4 sm:$0xff]   ;;  %v9848_v48 = vld [vmem:[#allocation8 + $0x140] ss:$8 sps:$4 sm:$0xff]  }
 0x801   :  { %v7260_v9 = vpop.f32.mrf.mxu1  ;;  %7520 = vmatpush1.bf16.msra.mxu0 %v9839_v20  ;;  %v9847_v12 = vld [vmem:[#allocation8 + $0x40] ss:$8 sps:$4 sm:$0xff]   ;;  %v9849_v20 = vld [vmem:[#allocation8 + $0x34] ss:$8 sps:$4 sm:$0xff]  }
 0x802   :  { %7561 = vmatpush1.bf16.msra.mxu1 %v9840_v36  ;;  %v7220_v2 = vpop.f32.mrf.mxu0  ;;  %7521 = vmatprep.subr.bf16.mxu0 %v9841_v30  ;;  %v9850_v9 = vld [vmem:[#allocation8 + $0x134] ss:$8 sps:$4 sm:$0xff]   ;;  %v9851_v36 = vld [vmem:[#allocation8 + $0x30] ss:$8 sps:$4 sm:$0xff]   ;;  %v9854_v30 = vld [vmem:[#allocation8 + $0x124] ss:$8 sps:$4 sm:$0xff]  }
 0x803   :  { %v7261_v37 = vpop.f32.mrf.mxu1  ;;  %7562 = vmatprep.subr.bf16.mxu1 %v9842_v29  ;;  %v9852_v2 = vld [vmem:[#allocation8 + $0x130] ss:$8 sps:$4 sm:$0xff]   ;;  %v9853_v29 = vld [vmem:[#allocation8 + $0x24] ss:$8 sps:$4 sm:$0xff]  }
 0x804   :  { %v9855_v37 = vld [vmem:[#allocation8 + $0x20] ss:$8 sps:$4 sm:$0xff]  }
 0x805   :  { %7522 = vmatpush1.bf16.msra.mxu0 %v9843_v44  ;;  %v9856_v44 = vld [vmem:[#allocation8 + $0x120] ss:$8 sps:$4 sm:$0xff]  }
 0x806   :  { %7563 = vmatpush1.bf16.msra.mxu1 %v9844_v47  ;;  %7523 = vmatprep.subr.bf16.mxu0 %v9845_v19  ;;  %v9857_v47 = vld [vmem:[#allocation8 + $0x14] ss:$8 sps:$4 sm:$0xff]  }
 0x807   :  { %7564 = vmatprep.subr.bf16.mxu1 %v9846_v6  ;;  %v9858_v19 = vld [vmem:[#allocation8 + $0x114] ss:$8 sps:$4 sm:$0xff]   ;;  %v9859_v6 = vld [vmem:[#allocation8 + $0x10] ss:$8 sps:$4 sm:$0xff]  }
 0x809   :  { %7524 = vmatpush1.bf16.msra.mxu0 %v9847_v12  ;;  %v9860_v12 = vld [vmem:[#allocation8 + $0x110] ss:$8 sps:$4 sm:$0xff]  }
 0x80a   :  { %7565 = vmatpush1.bf16.msra.mxu1 %v9848_v48  ;;  %7525 = vmatprep.subr.bf16.mxu0 %v9849_v20  ;;  %v9861_v48 = vld [vmem:[#allocation8 + $0x4] ss:$8 sps:$4 sm:$0xff]  }
 0x80b   :  { %7566 = vmatprep.subr.bf16.mxu1 %v9850_v9  ;;  %v9862_v20 = vld [vmem:[#allocation8 + $0x104] ss:$8 sps:$4 sm:$0xff]   ;;  %v9863_v9 = vld [vmem:[#allocation8] ss:$8 sps:$4 sm:$0xff]  }
 0x80d   :  { %7526 = vmatpush1.bf16.msra.mxu0 %v9851_v36  ;;  %v9864_v36 = vld [vmem:[#allocation8 + $0x100] ss:$8 sps:$4 sm:$0xff]  }
 0x80e   :  { %7567 = vmatpush1.bf16.msra.mxu1 %v9852_v2  ;;  %7527 = vmatprep.subr.bf16.mxu0 %v9853_v29  ;;  %v9865_v2 = vld [vmem:[#allocation8 + $0xf4] ss:$8 sps:$4 sm:$0xff]  }
 0x80f   :  { %7568 = vmatprep.subr.bf16.mxu1 %v9854_v30  ;;  %v9866_v29 = vld [vmem:[#allocation8 + $0x1f4] ss:$8 sps:$4 sm:$0xff]   ;;  %v9867_v30 = vld [vmem:[#allocation8 + $0xf0] ss:$8 sps:$4 sm:$0xff]  }
 0x811   :  { %7528 = vmatpush1.bf16.msra.mxu0 %v9855_v37  ;;  %v9868_v37 = vld [vmem:[#allocation8 + $0x1f0] ss:$8 sps:$4 sm:$0xff]  }
 0x812   :  { %7569 = vmatpush1.bf16.msra.mxu1 %v9856_v44  ;;  %7529 = vmatprep.subr.bf16.mxu0 %v9857_v47  ;;  %v9869_v44 = vld [vmem:[#allocation8 + $0xe4] ss:$8 sps:$4 sm:$0xff]  }
 0x813   :  { %7570 = vmatprep.subr.bf16.mxu1 %v9858_v19  ;;  %v9870_v47 = vld [vmem:[#allocation8 + $0x1e4] ss:$8 sps:$4 sm:$0xff]   ;;  %v9871_v19 = vld [vmem:[#allocation8 + $0xe0] ss:$8 sps:$4 sm:$0xff]  }
 0x815   :  { %7530 = vmatpush1.bf16.msra.mxu0 %v9859_v6  ;;  %v9872_v6 = vld [vmem:[#allocation8 + $0x1e0] ss:$8 sps:$4 sm:$0xff]  }
 0x816   :  { %7571 = vmatpush1.bf16.msra.mxu1 %v9860_v12  ;;  %7531 = vmatprep.subr.bf16.mxu0 %v9861_v48  ;;  %v9873_v12 = vld [vmem:[#allocation8 + $0xd4] ss:$8 sps:$4 sm:$0xff]  }
 0x817   :  { %7572 = vmatprep.subr.bf16.mxu1 %v9862_v20  ;;  %v9874_v48 = vld [vmem:[#allocation8 + $0x1d4] ss:$8 sps:$4 sm:$0xff]   ;;  %v9875_v20 = vld [vmem:[#allocation8 + $0xd0] ss:$8 sps:$4 sm:$0xff]  }
 0x819   :  { %7532 = vmatpush1.bf16.msra.mxu0 %v9863_v9  ;;  %v9876_v9 = vld [vmem:[#allocation8 + $0x1d0] ss:$8 sps:$4 sm:$0xff]  }
 0x81a   :  { %7573 = vmatpush1.bf16.msra.mxu1 %v9864_v36  ;;  %7533 = vmatprep.subr.bf16.mxu0 %v9865_v2  ;;  %v9877_v36 = vld [vmem:[#allocation8 + $0xc4] ss:$8 sps:$4 sm:$0xff]  }
 0x81b   :  { %7574 = vmatprep.subr.bf16.mxu1 %v9866_v29  ;;  %v9878_v2 = vld [vmem:[#allocation8 + $0x1c4] ss:$8 sps:$4 sm:$0xff]   ;;  %v9879_v29 = vld [vmem:[#allocation8 + $0xc0] ss:$8 sps:$4 sm:$0xff]  }
 0x81d   :  { %7534 = vmatpush2.bf16.msra.mxu0 %v9867_v30  ;;  %v9880_v30 = vld [vmem:[#allocation8 + $0x1c0] ss:$8 sps:$4 sm:$0xff]  }
 0x81e   :  { %7575 = vmatpush2.bf16.msra.mxu1 %v9868_v37  ;;  %7535 = vmatprep.subr.bf16.mxu0 %v9869_v44  ;;  %v9881_v37 = vld [vmem:[#allocation8 + $0xb4] ss:$8 sps:$4 sm:$0xff]  }
 0x81f   :  { %7576 = vmatprep.subr.bf16.mxu1 %v9870_v47  ;;  %v9882_v44 = vld [vmem:[#allocation8 + $0x1b4] ss:$8 sps:$4 sm:$0xff]   ;;  %v9883_v47 = vld [vmem:[#allocation8 + $0xb0] ss:$8 sps:$4 sm:$0xff]  }
 0x821   :  { %7536 = vmatpush2.bf16.msra.mxu0 %v9871_v19  ;;  %v9884_v19 = vld [vmem:[#allocation8 + $0x1b0] ss:$8 sps:$4 sm:$0xff]  }
 0x822   :  { %7577 = vmatpush2.bf16.msra.mxu1 %v9872_v6  ;;  %7537 = vmatprep.subr.bf16.mxu0 %v9873_v12  ;;  %v9885_v6 = vld [vmem:[#allocation8 + $0xa4] ss:$8 sps:$4 sm:$0xff]  }
 0x823   :  { %7578 = vmatprep.subr.bf16.mxu1 %v9874_v48  ;;  %v9886_v12 = vld [vmem:[#allocation8 + $0x1a4] ss:$8 sps:$4 sm:$0xff]   ;;  %v9887_v48 = vld [vmem:[#allocation8 + $0xa0] ss:$8 sps:$4 sm:$0xff]  }
 0x825   :  { %7538 = vmatpush2.bf16.msra.mxu0 %v9875_v20  ;;  %v9888_v20 = vld [vmem:[#allocation8 + $0x1a0] ss:$8 sps:$4 sm:$0xff]  }
 0x826   :  { %7579 = vmatpush2.bf16.msra.mxu1 %v9876_v9  ;;  %7539 = vmatprep.subr.bf16.mxu0 %v9877_v36  ;;  %v9889_v9 = vld [vmem:[#allocation8 + $0x94] ss:$8 sps:$4 sm:$0xff]  }
 0x827   :  { %7580 = vmatprep.subr.bf16.mxu1 %v9878_v2  ;;  %v9890_v36 = vld [vmem:[#allocation8 + $0x194] ss:$8 sps:$4 sm:$0xff]   ;;  %v9891_v2 = vld [vmem:[#allocation8 + $0x90] ss:$8 sps:$4 sm:$0xff]  }
 0x829   :  { %7540 = vmatpush2.bf16.msra.mxu0 %v9879_v29  ;;  %v9892_v29 = vld [vmem:[#allocation8 + $0x190] ss:$8 sps:$4 sm:$0xff]  }
 0x82a   :  { %7581 = vmatpush2.bf16.msra.mxu1 %v9880_v30  ;;  %7541 = vmatprep.subr.bf16.mxu0 %v9881_v37  ;;  %v9893_v30 = vld [vmem:[#allocation8 + $0x84] ss:$8 sps:$4 sm:$0xff]  }
 0x82b   :  { %7582 = vmatprep.subr.bf16.mxu1 %v9882_v44  ;;  %v9894_v37 = vld [vmem:[#allocation8 + $0x184] ss:$8 sps:$4 sm:$0xff]   ;;  %v16144_v44 = vld [vmem:[#allocation531_spill] sm:$0xff] }
 0x82d   :  { %7542 = vmatpush2.bf16.msra.mxu0 %v9883_v47  ;;  %v7218_v47 = vadd.f32 %v13097_v17, %v16144_v44 }
 0x82e   :  { %7583 = vmatpush2.bf16.msra.mxu1 %v9884_v19  ;;  %7543 = vmatprep.subr.bf16.mxu0 %v9885_v6  ;;  %v9895_v19 = vld [vmem:[#allocation8 + $0x80] ss:$8 sps:$4 sm:$0xff]   ;;  %v7509_v6 = vpack.c.bf16 %v12877_v39, %v12877_v39 }
 0x82f   :  { %7584 = vmatprep.subr.bf16.mxu1 %v9886_v12  ;;  %v9896_v12 = vld [vmem:[#allocation8 + $0x180] ss:$8 sps:$4 sm:$0xff]  }
 0x831   :  { %7544 = vmatpush2.bf16.msra.mxu0 %v9887_v48  ;;  %v9897_v48 = vld [vmem:[#allocation8 + $0x274] ss:$8 sps:$4 sm:$0xff]  }
 0x832   :  { %7585 = vmatpush2.bf16.msra.mxu1 %v9888_v20  ;;  %7545 = vmatprep.subr.bf16.mxu0 %v9889_v9  ;;  %v7511_v20 = vpack.c.bf16 %v13025_v54, %v13025_v54  ;;  %v9898_v9 = vld [vmem:[#allocation8 + $0x374] ss:$8 sps:$4 sm:$0xff]   ;;  %v9902_v54 = vld [vmem:[#allocation8 + $0x364] ss:$8 sps:$4 sm:$0xff]  }
 0x833   :  { %7586 = vmatprep.subr.bf16.mxu1 %v9890_v36 }
 0x835   :  { %7546 = vmatpush2.bf16.msra.mxu0 %v9891_v2  ;;  %v7259_v2 = vadd.f32 %v13101_v59, %v7218_v47  ;;  %v9904_v47 = vld [vmem:[#allocation8 + $0x254] ss:$8 sps:$4 sm:$0xff]  }
 0x836   :  { %7587 = vmatpush2.bf16.msra.mxu1 %v9892_v29  ;;  %7547 = vmatprep.subr.bf16.mxu0 %v9893_v30  ;;  %v9899_v29 = vld [vmem:[#allocation8 + $0x270] ss:$8 sps:$4 sm:$0xff]   ;;  %v9900_v30 = vld [vmem:[#allocation8 + $0x264] ss:$8 sps:$4 sm:$0xff]  }
 0x837   :  { %7588 = vmatprep.subr.bf16.mxu1 %v9894_v37  ;;  %v9901_v37 = vld [vmem:[#allocation8 + $0x370] ss:$8 sps:$4 sm:$0xff]  }
 0x839   :  { %7548 = vmatpush2.bf16.msra.mxu0 %v9895_v19 }
 0x83a   :  { %7589 = vmatpush2.bf16.msra.mxu1 %v9896_v12  ;;  %7599 = vmatprep.subr.bf16.mxu0 %v9897_v48 }
 0x83b   :  { %7640 = vmatprep.subr.bf16.mxu1 %v9898_v9 }
 0x83c   :  { %v13109_v36 = vpop.f32.mrf.mxu0  ;;  %7550 = vmatmul.mubr.bf16.vlgmr.msra.gmra.mxu0 %v7509_v6  ;;  %v9903_v6 = vld [vmem:[#allocation8 + $0x260] ss:$8 sps:$4 sm:$0xff]  }
 0x83d   :  { %v13112_v17 = vpop.f32.mrf.mxu1  ;;  %7591 = vmatmul.mubr.bf16.vlgmr.msra.gmra.mxu1 %v7511_v20  ;;  %7600 = vmatpush1.bf16.msra.mxu0 %v9899_v29  ;;  %v9905_v20 = vld [vmem:[#allocation8 + $0x360] ss:$8 sps:$4 sm:$0xff]  }
 0x83e   :  { %v7299_v39 = vpop.f32.mrf.mxu0  ;;  %7601 = vmatprep.subr.bf16.mxu0 %v9900_v30  ;;  %7641 = vmatpush1.bf16.msra.mxu1 %v9901_v37  ;;  %v9907_v30 = vld [vmem:[#allocation8 + $0x250] ss:$8 sps:$4 sm:$0xff]   ;;  %v9910_v37 = vld [vmem:[#allocation8 + $0x344] ss:$8 sps:$4 sm:$0xff]  }
 0x83f   :  { %v7300_v19 = vadd.f32 %v7299_v39, %v7259_v2  ;;  %v7340_v12 = vpop.f32.mrf.mxu1  ;;  %7642 = vmatprep.subr.bf16.mxu1 %v9902_v54  ;;  %v9908_v2 = vld [vmem:[#allocation8 + $0x244] ss:$8 sps:$4 sm:$0xff]   ;;  %v9909_v39 = vld [vmem:[#allocation8 + $0x350] ss:$8 sps:$4 sm:$0xff]   ;;  %v9914_v54 = vld [vmem:[#allocation8 + $0x334] ss:$8 sps:$4 sm:$0xff]  }
 0x840   :  { %v7301_v48 = vpop.f32.mrf.mxu0 }
 0x841   :  { %v7341_v9 = vadd.f32 %v7340_v12, %v7300_v19  ;;  %v7342_v44 = vpop.f32.mrf.mxu1  ;;  %7602 = vmatpush1.bf16.msra.mxu0 %v9903_v6  ;;  %v9912_v19 = vld [vmem:[#allocation8 + $0x234] ss:$8 sps:$4 sm:$0xff]   ;;  %v9913_v12 = vld [vmem:[#allocation8 + $0x340] ss:$8 sps:$4 sm:$0xff]   ;;  %v9917_v48 = vld [vmem:[#allocation8 + $0x330] ss:$8 sps:$4 sm:$0xff]  }
 0x842   :  { %v7302_v59 = vpop.f32.mrf.mxu0  ;;  %7603 = vmatprep.subr.bf16.mxu0 %v9904_v47  ;;  %7643 = vmatpush1.bf16.msra.mxu1 %v9905_v20  ;;  %v9911_v44 = vld [vmem:[#allocation8 + $0x240] ss:$8 sps:$4 sm:$0xff]   ;;  %v9922_v20 = vld [vmem:[#allocation8 + $0x314] ss:$8 sps:$4 sm:$0xff]  }
 0x843   :  { %v7514_v29 = vpack.c.bf16 %v7341_v9, %v7341_v9  ;;  %v7343_v60 = vpop.f32.mrf.mxu1  ;;  %7644 = vmatprep.subr.bf16.mxu1 %v9906_v40  ;;  %v9916_v40 = vld [vmem:[#allocation8 + $0x224] ss:$8 sps:$4 sm:$0xff]   ;;  %v9919_v6 = vld [vmem:[#allocation8 + $0x220] ss:$8 sps:$4 sm:$0xff]   ;;  %v9920_v59 = vld [vmem:[#allocation8 + $0x214] ss:$8 sps:$4 sm:$0xff]  }
 0x844   :  { %v9915_v60 = vld [vmem:[#allocation8 + $0x230] ss:$8 sps:$4 sm:$0xff]   ;;  %v9918_v9 = vld [vmem:[#allocation8 + $0x324] ss:$8 sps:$4 sm:$0xff]   ;;  %v9921_v47 = vld [vmem:[#allocation8 + $0x320] ss:$8 sps:$4 sm:$0xff]  }
 0x845   :  { %7604 = vmatpush1.bf16.msra.mxu0 %v9907_v30  ;;  %7631 = vmatprep.mubr.bf16.mxu0 %v7514_v29  ;;  %v9923_v29 = vld [vmem:[#allocation8 + $0x210] ss:$8 sps:$4 sm:$0xff]   ;;  %v9924_v30 = vld [vmem:[#allocation8 + $0x204] ss:$8 sps:$4 sm:$0xff]  }
 0x846   :  { %7605 = vmatprep.subr.bf16.mxu0 %v9908_v2  ;;  %7645 = vmatpush1.bf16.msra.mxu1 %v9909_v39  ;;  %v9925_v2 = vld [vmem:[#allocation8 + $0x310] ss:$8 sps:$4 sm:$0xff]   ;;  %v9926_v39 = vld [vmem:[#allocation8 + $0x304] ss:$8 sps:$4 sm:$0xff]  }
 0x847   :  { %7646 = vmatprep.subr.bf16.mxu1 %v9910_v37  ;;  %v9927_v37 = vld [vmem:[#allocation8 + $0x200] ss:$8 sps:$4 sm:$0xff]  }
 0x849   :  { %7606 = vmatpush1.bf16.msra.mxu0 %v9911_v44  ;;  %v9928_v44 = vld [vmem:[#allocation8 + $0x2f4] ss:$8 sps:$4 sm:$0xff]  }
 0x84a   :  { %7607 = vmatprep.subr.bf16.mxu0 %v9912_v19  ;;  %7647 = vmatpush1.bf16.msra.mxu1 %v9913_v12  ;;  %v9929_v19 = vld [vmem:[#allocation8 + $0x300] ss:$8 sps:$4 sm:$0xff]   ;;  %v9930_v12 = vld [vmem:[#allocation8 + $0x3f4] ss:$8 sps:$4 sm:$0xff]  }
 0x84b   :  { %7648 = vmatprep.subr.bf16.mxu1 %v9914_v54  ;;  %v9931_v54 = vld [vmem:[#allocation8 + $0x2f0] ss:$8 sps:$4 sm:$0xff]  }
 0x84d   :  { %7608 = vmatpush1.bf16.msra.mxu0 %v9915_v60  ;;  %v9932_v60 = vld [vmem:[#allocation8 + $0x2e4] ss:$8 sps:$4 sm:$0xff]  }
 0x84e   :  { %7609 = vmatprep.subr.bf16.mxu0 %v9916_v40  ;;  %7649 = vmatpush1.bf16.msra.mxu1 %v9917_v48  ;;  %v9933_v40 = vld [vmem:[#allocation8 + $0x3f0] ss:$8 sps:$4 sm:$0xff]   ;;  %v9934_v48 = vld [vmem:[#allocation8 + $0x3e4] ss:$8 sps:$4 sm:$0xff]  }
 0x84f   :  { %7650 = vmatprep.subr.bf16.mxu1 %v9918_v9  ;;  %v9935_v9 = vld [vmem:[#allocation8 + $0x2e0] ss:$8 sps:$4 sm:$0xff]  }
 0x851   :  { %7610 = vmatpush1.bf16.msra.mxu0 %v9919_v6  ;;  %v9936_v6 = vld [vmem:[#allocation8 + $0x2d4] ss:$8 sps:$4 sm:$0xff]  }
 0x852   :  { %7611 = vmatprep.subr.bf16.mxu0 %v9920_v59  ;;  %7651 = vmatpush1.bf16.msra.mxu1 %v9921_v47  ;;  %v9937_v59 = vld [vmem:[#allocation8 + $0x3e0] ss:$8 sps:$4 sm:$0xff]   ;;  %v9938_v47 = vld [vmem:[#allocation8 + $0x3d4] ss:$8 sps:$4 sm:$0xff]  }
 0x853   :  { %7652 = vmatprep.subr.bf16.mxu1 %v9922_v20  ;;  %v9939_v20 = vld [vmem:[#allocation8 + $0x2d0] ss:$8 sps:$4 sm:$0xff]  }
 0x855   :  { %7612 = vmatpush1.bf16.msra.mxu0 %v9923_v29  ;;  %v9940_v29 = vld [vmem:[#allocation8 + $0x2c4] ss:$8 sps:$4 sm:$0xff]  }
 0x856   :  { %7613 = vmatprep.subr.bf16.mxu0 %v9924_v30  ;;  %7653 = vmatpush1.bf16.msra.mxu1 %v9925_v2  ;;  %v9941_v30 = vld [vmem:[#allocation8 + $0x3d0] ss:$8 sps:$4 sm:$0xff]   ;;  %v9942_v2 = vld [vmem:[#allocation8 + $0x3c4] ss:$8 sps:$4 sm:$0xff]  }
 0x857   :  { %7654 = vmatprep.subr.bf16.mxu1 %v9926_v39  ;;  %v9943_v39 = vld [vmem:[#allocation8 + $0x2c0] ss:$8 sps:$4 sm:$0xff]  }
 0x859   :  { %7614 = vmatpush1.bf16.msra.mxu0 %v9927_v37  ;;  %v9944_v37 = vld [vmem:[#allocation8 + $0x2b4] ss:$8 sps:$4 sm:$0xff]  }
 0x85a   :  { %7615 = vmatprep.subr.bf16.mxu0 %v9928_v44  ;;  %7655 = vmatpush1.bf16.msra.mxu1 %v9929_v19  ;;  %v9945_v44 = vld [vmem:[#allocation8 + $0x3c0] ss:$8 sps:$4 sm:$0xff]   ;;  %v9946_v19 = vld [vmem:[#allocation8 + $0x3b4] ss:$8 sps:$4 sm:$0xff]  }
 0x85b   :  { %7656 = vmatprep.subr.bf16.mxu1 %v9930_v12  ;;  %v9947_v12 = vld [vmem:[#allocation8 + $0x2b0] ss:$8 sps:$4 sm:$0xff]  }
 0x85d   :  { %7616 = vmatpush2.bf16.msra.mxu0 %v9931_v54  ;;  %v9948_v54 = vld [vmem:[#allocation8 + $0x2a4] ss:$8 sps:$4 sm:$0xff]  }
 0x85e   :  { %7617 = vmatprep.subr.bf16.mxu0 %v9932_v60  ;;  %7657 = vmatpush2.bf16.msra.mxu1 %v9933_v40  ;;  %v9949_v60 = vld [vmem:[#allocation8 + $0x3b0] ss:$8 sps:$4 sm:$0xff]   ;;  %v9950_v40 = vld [vmem:[#allocation8 + $0x3a4] ss:$8 sps:$4 sm:$0xff]  }
 0x85f   :  { %7658 = vmatprep.subr.bf16.mxu1 %v9934_v48  ;;  %v9951_v48 = vld [vmem:[#allocation8 + $0x2a0] ss:$8 sps:$4 sm:$0xff]  }
 0x861   :  { %7618 = vmatpush2.bf16.msra.mxu0 %v9935_v9  ;;  %v7298_v9 = vadd.f32 %v13109_v36, %v13099_v14  ;;  %v9960_v14 = vld [vmem:[#allocation8 + $0x380] ss:$8 sps:$4 sm:$0xff]  }
 0x862   :  { %7619 = vmatprep.subr.bf16.mxu0 %v9936_v6  ;;  %7659 = vmatpush2.bf16.msra.mxu1 %v9937_v59  ;;  %v9952_v6 = vld [vmem:[#allocation8 + $0x294] ss:$8 sps:$4 sm:$0xff]   ;;  %v9953_v59 = vld [vmem:[#allocation8 + $0x3a0] ss:$8 sps:$4 sm:$0xff]  }
 0x863   :  { %7660 = vmatprep.subr.bf16.mxu1 %v9938_v47  ;;  %v9954_v47 = vld [vmem:[#allocation8 + $0x394] ss:$8 sps:$4 sm:$0xff]  }
 0x865   :  { %7620 = vmatpush2.bf16.msra.mxu0 %v9939_v20  ;;  %v9955_v20 = vld [vmem:[#allocation8 + $0x290] ss:$8 sps:$4 sm:$0xff]  }
 0x866   :  { %7621 = vmatprep.subr.bf16.mxu0 %v9940_v29  ;;  %7661 = vmatpush2.bf16.msra.mxu1 %v9941_v30  ;;  %v7339_v29 = vadd.f32 %v13112_v17, %v7298_v9  ;;  %v9956_v30 = vld [vmem:[#allocation8 + $0x284] ss:$8 sps:$4 sm:$0xff]  }
 0x867   :  { %7662 = vmatprep.subr.bf16.mxu1 %v9942_v2  ;;  %v9957_v2 = vld [vmem:[#allocation8 + $0x390] ss:$8 sps:$4 sm:$0xff]  }
 0x869   :  { %7622 = vmatpush2.bf16.msra.mxu0 %v9943_v39  ;;  %v9958_v39 = vld [vmem:[#allocation8 + $0x384] ss:$8 sps:$4 sm:$0xff]  }
 0x86a   :  { %7623 = vmatprep.subr.bf16.mxu0 %v9944_v37  ;;  %7663 = vmatpush2.bf16.msra.mxu1 %v9945_v44  ;;  %v9959_v37 = vld [vmem:[#allocation8 + $0x280] ss:$8 sps:$4 sm:$0xff]   ;;  %v7513_v44 = vpack.c.bf16 %v7339_v29, %v7339_v29 }
 0x86b   :  { %7664 = vmatprep.subr.bf16.mxu1 %v9946_v19  ;;  %v16155_v29 = vld [vmem:[#allocation557_spill] sm:$0xff] }
 0x86d   :  { %7624 = vmatpush2.bf16.msra.mxu0 %v9947_v12 }
 0x86e   :  { %7625 = vmatprep.subr.bf16.mxu0 %v9948_v54  ;;  %7665 = vmatpush2.bf16.msra.mxu1 %v9949_v60 }
 0x86f   :  { %7666 = vmatprep.subr.bf16.mxu1 %v9950_v40 }
 0x871   :  { %7626 = vmatpush2.bf16.msra.mxu0 %v9951_v48  ;;  %v16145_v48 = vld [vmem:[#allocation537_spill] sm:$0xff] }
 0x872   :  { %7627 = vmatprep.subr.bf16.mxu0 %v9952_v6  ;;  %7667 = vmatpush2.bf16.msra.mxu1 %v9953_v59  ;;  %v16148_v6 = vld [vmem:[#allocation543_spill] sm:$0xff]  ;;  %v16149_v59 = vld [vmem:[#allocation545_spill] sm:$0xff] }
 0x873   :  { %7668 = vmatprep.subr.bf16.mxu1 %v9954_v47  ;;  %v16152_v47 = vld [vmem:[#allocation551_spill] sm:$0xff] }
 0x875   :  { %7628 = vmatpush2.bf16.msra.mxu0 %v9955_v20  ;;  %v16153_v20 = vld [vmem:[#allocation553_spill] sm:$0xff] }
 0x876   :  { %7629 = vmatprep.subr.bf16.mxu0 %v9956_v30  ;;  %7669 = vmatpush2.bf16.msra.mxu1 %v9957_v2  ;;  %v16156_v30 = vld [vmem:[#allocation559_spill] sm:$0xff]  ;;  %v16157_v2 = vld [vmem:[#allocation561_spill] sm:$0xff] }
 0x877   :  { %7670 = vmatprep.subr.bf16.mxu1 %v9958_v39  ;;  %v16158_v39 = vld [vmem:[#allocation563_spill] sm:$0xff] }
 0x879   :  { %7630 = vmatpush2.bf16.msra.mxu0 %v9959_v37  ;;  %v16159_v37 = vld [vmem:[#allocation565_spill] sm:$0xff] }
 0x87a   :  { %7671 = vmatpush2.bf16.msra.mxu1 %v9960_v14  ;;  %7707 = vmatprep.subr.bf16.mxu0 %v12093_v13  ;;  %v16146_v13 = vld [vmem:[#allocation539_spill] sm:$0xff]  ;;  %v16161_v14 = vld [vmem:[#allocation569_spill] sm:$0xff] }
 0x87b   :  { %7748 = vmatprep.subr.bf16.mxu1 %v12097_v51  ;;  %v16147_v51 = vld [vmem:[#allocation541_spill] sm:$0xff] }
 0x87c   :  { %v7379_v36 = vpop.f32.mrf.mxu0  ;;  %7632 = vmatmul.mubr.bf16.vlgmr.msra.gmra.mxu0 %v7513_v44  ;;  %v16160_v44 = vld [vmem:[#allocation567_spill] sm:$0xff] }
 0x87d   :  { %v7420_v19 = vpop.f32.mrf.mxu1  ;;  %7708 = vmatpush1.bf16.msra.mxu0 %v12091_v7  ;;  %v16150_v7 = vld [vmem:[#allocation547_spill] sm:$0xff] }
 0x87e   :  { %v7381_v17 = vpop.f32.mrf.mxu0  ;;  %7709 = vmatprep.subr.bf16.mxu0 %v12099_v15  ;;  %v16151_v15 = vld [vmem:[#allocation549_spill] sm:$0xff] }
 0x87f   :  { %v7422_v12 = vpop.f32.mrf.mxu1 }
 0x880   :  { %v7383_v54 = vpop.f32.mrf.mxu0 }
 0x881   :  { %v7424_v60 = vpop.f32.mrf.mxu1  ;;  %7710 = vmatpush1.bf16.msra.mxu0 %v12107_v8  ;;  %v16154_v8 = vld [vmem:[#allocation555_spill] sm:$0xff] }
 0x882   :  { %v7384_v40 = vpop.f32.mrf.mxu0  ;;  %7711 = vmatprep.subr.bf16.mxu0 %v16145_v48  ;;  %v16162_v54 = vld [vmem:[#allocation571_spill] sm:$0xff]  ;;  %v16163_v60 = vld [vmem:[#allocation573_spill] sm:$0xff] }
 0x883   :  { %v7425_v9 = vpop.f32.mrf.mxu1  ;;  %v16164_v40 = vld [vmem:[#allocation575_spill] sm:$0xff]  ;;  %v16165_v48 = vld [vmem:[#allocation577_spill] sm:$0xff] }
 0x884   :  { %v16166_v9 = vld [vmem:[#allocation578_spill] sm:$0xff] }
 0x885   :  { %7712 = vmatpush1.bf16.msra.mxu0 %v16146_v13  ;;  %v16167_v13 = vld [vmem:[#allocation581_spill] sm:$0xff] }
 0x886   :  { %7713 = vmatprep.subr.bf16.mxu0 %v16147_v51  ;;  %v16168_v51 = vld [vmem:[#allocation582_spill] sm:$0xff] }
 0x889   :  { %7714 = vmatpush1.bf16.msra.mxu0 %v16148_v6  ;;  %v16169_v6 = vld [vmem:[#allocation585_spill] sm:$0xff] }
 0x88a   :  { %7715 = vmatprep.subr.bf16.mxu0 %v16149_v59  ;;  %v16170_v59 = vld [vmem:[#allocation586_spill] sm:$0xff] }
 0x88d   :  { %7716 = vmatpush1.bf16.msra.mxu0 %v16150_v7  ;;  %v16171_v7 = vld [vmem:[#allocation590_spill] sm:$0xff] }
 0x88e   :  { %7717 = vmatprep.subr.bf16.mxu0 %v16151_v15  ;;  %v16172_v15 = vld [vmem:[#allocation532_spill] sm:$0xff] }
 0x891   :  { %7718 = vmatpush1.bf16.msra.mxu0 %v16152_v47  ;;  %v7380_v47 = vadd.f32 %v7379_v36, %v16172_v15 }
 0x892   :  { %7719 = vmatprep.subr.bf16.mxu0 %v16153_v20  ;;  %v16173_v20 = vld [vmem:[#allocation533_spill] sm:$0xff] }
 0x895   :  { %7720 = vmatpush1.bf16.msra.mxu0 %v16154_v8  ;;  %v7382_v8 = vadd.f32 %v7381_v17, %v16173_v20 }
 0x896   :  { %7721 = vmatprep.subr.bf16.mxu0 %v16155_v29  ;;  %v16174_v29 = vld [vmem:[#allocation589_spill] sm:$0xff] }
 0x899   :  { %7722 = vmatpush1.bf16.msra.mxu0 %v16156_v30  ;;  %v16175_v30 = vld [vmem:[#allocation593_spill] sm:$0xff] }
 0x89a   :  { %7723 = vmatprep.subr.bf16.mxu0 %v16157_v2  ;;  %v7421_v2 = vadd.f32 %v7420_v19, %v7380_v47  ;;  %v16177_v19 = vld [vmem:[#allocation535_spill] sm:$0xff]  ;;  %v16179_v47 = vld [vmem:[#allocation538_spill] sm:$0xff] }
 0x89d   :  { %7724 = vmatpush2.bf16.msra.mxu0 %v16158_v39 }
 0x89e   :  { %7725 = vmatprep.subr.bf16.mxu0 %v16159_v37  ;;  %v7423_v37 = vadd.f32 %v7422_v12, %v7382_v8  ;;  %v16178_v12 = vld [vmem:[#allocation536_spill] sm:$0xff] }
 0x89f   :  { %v16180_v8 = vld [vmem:[#allocation540_spill] sm:$0xff] }
 0x8a1   :  { %7726 = vmatpush2.bf16.msra.mxu0 %v16160_v44 }
 0x8a2   :  { %7727 = vmatprep.subr.bf16.mxu0 %v16161_v14 }
 0x8a5   :  { %7728 = vmatpush2.bf16.msra.mxu0 %v16162_v54 }
 0x8a6   :  { %7729 = vmatprep.subr.bf16.mxu0 %v16163_v60 }
 0x8a9   :  { %7730 = vmatpush2.bf16.msra.mxu0 %v16164_v40 }
 0x8aa   :  { %7731 = vmatprep.subr.bf16.mxu0 %v16165_v48 }
 0x8ad   :  { %7732 = vmatpush2.bf16.msra.mxu0 %v16166_v9 }
 0x8ae   :  { %7733 = vmatprep.subr.bf16.mxu0 %v16167_v13 }
 0x8b1   :  { %7734 = vmatpush2.bf16.msra.mxu0 %v16168_v51 }
 0x8b2   :  { %7735 = vmatprep.subr.bf16.mxu0 %v16169_v6 }
 0x8b5   :  { %7736 = vmatpush2.bf16.msra.mxu0 %v16170_v59 }
 0x8b6   :  { %7737 = vmatprep.subr.bf16.mxu0 %v16171_v7  ;;  %v16176_v7 = vld [vmem:[#allocation534_spill] sm:$0xff] }
 0x8b9   :  { %7738 = vmatpush2.bf16.msra.mxu0 %v16174_v29  ;;  %v16181_v29 = vld [vmem:[#allocation542_spill] sm:$0xff] }
 0x8ba   :  { %7789 = vmatprep.subr.bf16.mxu0 %v16175_v30  ;;  %v16182_v30 = vld [vmem:[#allocation544_spill] sm:$0xff] }
 0x8bc   :  { %v7461_v39 = vpop.f32.mrf.mxu0 }
 0x8bd   :  { %v7462_v44 = vadd.f32 %v7461_v39, %v7421_v2  ;;  %v7502_v14 = vpop.f32.mrf.mxu1  ;;  %v16183_v2 = vld [vmem:[#allocation546_spill] sm:$0xff]  ;;  %v16184_v39 = vld [vmem:[#allocation548_spill] sm:$0xff] }
 0x8be   :  { %v7463_v54 = vpop.f32.mrf.mxu0 }
 0x8bf   :  { %v7464_v60 = vadd.f32 %v7463_v54, %v7423_v37  ;;  %v7504_v40 = vpop.f32.mrf.mxu1  ;;  %v7503_v48 = vadd.f32 %v7502_v14, %v7462_v44  ;;  %v16185_v37 = vld [vmem:[#allocation550_spill] sm:$0xff]  ;;  %v16186_v44 = vld [vmem:[#allocation552_spill] sm:$0xff] }
 0x8c0   :  { %v7465_v9 = vpop.f32.mrf.mxu0  ;;  %v16187_v14 = vld [vmem:[#allocation554_spill] sm:$0xff]  ;;  %v16188_v54 = vld [vmem:[#allocation556_spill] sm:$0xff] }
 0x8c1   :  { %v7505_v13 = vadd.f32 %v7504_v40, %v7464_v60  ;;  %v7506_v51 = vpop.f32.mrf.mxu1  ;;  %v7515_v17 = vpack.c.bf16 %v7503_v48, %v7503_v48  ;;  %v16189_v60 = vld [vmem:[#allocation558_spill] sm:$0xff]  ;;  %v16190_v40 = vld [vmem:[#allocation560_spill] sm:$0xff] }
 0x8c2   :  { %v7466_v6 = vpop.f32.mrf.mxu0  ;;  %v16191_v48 = vld [vmem:[#allocation562_spill] sm:$0xff]  ;;  %v16192_v9 = vld [vmem:[#allocation564_spill] sm:$0xff] }
 0x8c3   :  { %v7516_v36 = vpack.c.bf16 %v7505_v13, %v7505_v13  ;;  %v7507_v59 = vpop.f32.mrf.mxu1  ;;  %v16193_v13 = vld [vmem:[#allocation566_spill] sm:$0xff]  ;;  %v16194_v51 = vld [vmem:[#allocation568_spill] sm:$0xff] }
 0x8c4   :  { %v16195_v6 = vld [vmem:[#allocation570_spill] sm:$0xff] }
 0x8c5   :  { %7672 = vmatprep.mubr.bf16.mxu1 %v7516_v36  ;;  %v16196_v36 = vld [vmem:[#allocation572_spill] sm:$0xff]  ;;  %v16197_v59 = vld [vmem:[#allocation574_spill] sm:$0xff] }
 0x8c6   :  { %7673 = vmatmul.mubr.bf16.vlgmr.msra.gmra.mxu1 %v7515_v17  ;;  %v16198_v17 = vld [vmem:[#allocation576_spill] sm:$0xff] }
 0x8c7   :  { %7749 = vmatpush1.bf16.msra.mxu1 %v16176_v7  ;;  %v16199_v7 = vld [vmem:[#allocation580_spill] sm:$0xff] }
 0x8c8   :  { %7750 = vmatprep.subr.bf16.mxu1 %v16177_v19  ;;  %v16200_v19 = vld [vmem:[#allocation579_spill] sm:$0xff] }
 0x8cb   :  { %7751 = vmatpush1.bf16.msra.mxu1 %v16178_v12  ;;  %v16201_v12 = vld [vmem:[#allocation584_spill] sm:$0xff] }
 0x8cc   :  { %7752 = vmatprep.subr.bf16.mxu1 %v16179_v47  ;;  %v16202_v47 = vld [vmem:[#allocation583_spill] sm:$0xff] }
 0x8cf   :  { %7753 = vmatpush1.bf16.msra.mxu1 %v16180_v8 }
 0x8d0   :  { %7754 = vmatprep.subr.bf16.mxu1 %v16181_v29  ;;  %v16203_v29 = vld [vmem:[#allocation588_spill] sm:$0xff] }
 0x8d3   :  { %7755 = vmatpush1.bf16.msra.mxu1 %v16182_v30 }
 0x8d4   :  { %7756 = vmatprep.subr.bf16.mxu1 %v16183_v2 }
 0x8d7   :  { %7757 = vmatpush1.bf16.msra.mxu1 %v16184_v39 }
 0x8d8   :  { %7758 = vmatprep.subr.bf16.mxu1 %v16185_v37 }
 0x8db   :  { %7759 = vmatpush1.bf16.msra.mxu1 %v16186_v44  ;;  %v16204_v44 = vld [vmem:[#allocation587_spill] sm:$0xff] }
 0x8dc   :  { %7760 = vmatprep.subr.bf16.mxu1 %v16187_v14 }
 0x8df   :  { %7761 = vmatpush1.bf16.msra.mxu1 %v16188_v54 }
 0x8e0   :  { %7762 = vmatprep.subr.bf16.mxu1 %v16189_v60  ;;  %v16205_v60 = vld [vmem:[#allocation592_spill] sm:$0xff] }
 0x8e3   :  { %7763 = vmatpush1.bf16.msra.mxu1 %v16190_v40 }
 0x8e4   :  { %7764 = vmatprep.subr.bf16.mxu1 %v16191_v48 }
 0x8e7   :  { %7765 = vmatpush2.bf16.msra.mxu1 %v16192_v9 }
 0x8e8   :  { %7766 = vmatprep.subr.bf16.mxu1 %v16193_v13  ;;  %v16206_v13 = vld [vmem:[#allocation591_spill] sm:$0xff] }
 0x8eb   :  { %7767 = vmatpush2.bf16.msra.mxu1 %v16194_v51  ;;  %v16207_v51 = vld [vmem:[#allocation595_spill] sm:$0xff] }
 0x8ec   :  { %7768 = vmatprep.subr.bf16.mxu1 %v16195_v6 }
 0x8ef   :  { %7769 = vmatpush2.bf16.msra.mxu1 %v16196_v36 }
 0x8f0   :  { %7770 = vmatprep.subr.bf16.mxu1 %v16197_v59 }
 0x8f3   :  { %7771 = vmatpush2.bf16.msra.mxu1 %v16198_v17 }
 0x8f4   :  { %7772 = vmatprep.subr.bf16.mxu1 %v16199_v7 }
 0x8f7   :  { %7773 = vmatpush2.bf16.msra.mxu1 %v16200_v19 }
 0x8f8   :  { %7774 = vmatprep.subr.bf16.mxu1 %v16201_v12 }
 0x8fb   :  { %7775 = vmatpush2.bf16.msra.mxu1 %v16202_v47 }
 0x8fc   :  { %v7551_v8 = vpop.f32.mrf.mxu0  ;;  %7776 = vmatprep.subr.bf16.mxu1 %v16203_v29 }
 0x8fd   :  { %v7592_v30 = vpop.f32.mrf.mxu1 }
 0x8fe   :  { %v7593_v2 = vadd.f32 %v7592_v30, %v7551_v8  ;;  %v7553_v39 = vpop.f32.mrf.mxu0 }
 0x8ff   :  { %v7594_v37 = vpop.f32.mrf.mxu1  ;;  %7777 = vmatpush2.bf16.msra.mxu1 %v16204_v44 }
 0x900   :  { %v7595_v14 = vadd.f32 %v7594_v37, %v7553_v39  ;;  %v7555_v54 = vpop.f32.mrf.mxu0  ;;  %7778 = vmatprep.subr.bf16.mxu1 %v16205_v60 }
 0x901   :  { %v7596_v40 = vpop.f32.mrf.mxu1 }
 0x902   :  { %v7556_v48 = vpop.f32.mrf.mxu0 }
 0x903   :  { %v7597_v9 = vpop.f32.mrf.mxu1  ;;  %7779 = vmatpush2.bf16.msra.mxu1 %v16206_v13  ;;  %v16210_v13 = vld [vmem:[#allocation597_spill] sm:$0xff] }
 0x904   :  { %7830 = vmatprep.subr.bf16.mxu1 %v16207_v51  ;;  %v16208_v9 = vld [vmem:[#allocation594_spill] sm:$0xff] }
 0x905   :  { %v16211_v51 = vld [vmem:[#allocation598_spill] sm:$0xff] }
 0x93c   :  { %v7633_v6 = vpop.f32.mrf.mxu0 }
 0x93d   :  { %v7634_v36 = vadd.f32 %v7633_v6, %v7593_v2  ;;  %v16212_v6 = vld [vmem:[#allocation599_spill] sm:$0xff] }
 0x93e   :  { %v7635_v59 = vpop.f32.mrf.mxu0 }
 0x93f   :  { %v7636_v17 = vadd.f32 %v7635_v59, %v7595_v14  ;;  %v16214_v59 = vld [vmem:[#allocation601_spill] sm:$0xff] }
 0x940   :  { %v7637_v7 = vpop.f32.mrf.mxu0 }
 0x941   :  { %v16216_v7 = vld [vmem:[#allocation603_spill] sm:$0xff] }
 0x942   :  { %v7638_v19 = vpop.f32.mrf.mxu0 }
 0x943   :  { %v16218_v19 = vld [vmem:[#allocation605_spill] sm:$0xff] }
 0x986   :  { %v7674_v12 = vpop.f32.mrf.mxu1 }
 0x987   :  { %v7675_v8 = vadd.f32 %v7674_v12, %v7634_v36  ;;  %v16213_v36 = vld [vmem:[#allocation600_spill] sm:$0xff]  ;;  %v16219_v12 = vld [vmem:[#allocation606_spill] sm:$0xff] }
 0x988   :  { %v7676_v47 = vpop.f32.mrf.mxu1 }
 0x989   :  { %v7677_v29 = vadd.f32 %v7676_v47, %v7636_v17  ;;  %v16215_v17 = vld [vmem:[#allocation602_spill] sm:$0xff]  ;;  %v16220_v47 = vld [vmem:[#allocation607_spill] sm:$0xff] }
 0x98a   :  { %v7678_v30 = vpop.f32.mrf.mxu1 }
 0x98b   :  { %v7683_v39 = vcombine.low %v7675_v8, %v7677_v29  ;;  %v16221_v8 = vld [vmem:[#allocation608_spill] sm:$0xff]  ;;  %v16222_v29 = vld [vmem:[#allocation609_spill] sm:$0xff]  ;;  %v16223_v30 = vld [vmem:[#allocation610_spill] sm:$0xff] }
 0x98c   :  { %v7679_v37 = vpop.f32.mrf.mxu1 }
 0x98d   :  { %v7690_v44 = vrot.slane %v7683_v39, %v10317_v26  ;;  %v16224_v39 = vld [vmem:[#allocation611_spill] sm:$0xff]  ;;  %v16225_v37 = vld [vmem:[#allocation612_spill] sm:$0xff] }
 0x98f   :  { %v7692_v54 = vadd.f32 %v7690_v44, %v12309_v41  ;;  %v16209_v41 = vld [vmem:[#allocation596_spill] sm:$0xff]  ;;  %v16226_v44 = vld [vmem:[#allocation613_spill] sm:$0xff] }
 0x991   :  { %v13188_v60 = vadd.f32 %v7692_v54, %v12305_v0  ;;  %v16227_v54 = vld [vmem:[#allocation614_spill] sm:$0xff] }
 0x993   :  { %v7701_v2 = vrot.slane %v13188_v60, %v10317_v26 }
 0x995   :  { %v7702_v14 = vcombine.high %v7701_v2, %v7701_v2  ;;  %v13192_v48 = vpack.c.bf16 %v7701_v2, %v7701_v2  ;;  %v16228_v2 = vld [vmem:[#allocation615_spill] sm:$0xff] }
 0x997   :  { %v7706_v40 = vpack.c.bf16 %v7702_v14, %v7702_v14  ;;  %v16229_v14 = vld [vmem:[#allocation616_spill] sm:$0xff] }
 0x999   :  { %7739 = vmatprep.mubr.bf16.mxu0 %v7706_v40  ;;  %7780 = vmatprep.mubr.bf16.mxu1 %v7706_v40 }
 0x99a   :  { %7740 = vmatmul.mubr.bf16.vlgmr.msra.gmra.mxu0 %v13192_v48  ;;  %7781 = vmatmul.mubr.bf16.vlgmr.msra.gmra.mxu1 %v13192_v48 }
 0x99b   :  { %7790 = vmatpush1.bf16.msra.mxu0 %v12287_v61  ;;  %7831 = vmatpush1.bf16.msra.mxu1 %v16208_v9  ;;  %v16217_v61 = vld [vmem:[#allocation604_spill] sm:$0xff]  ;;  %v16231_v9 = vld [vmem:[#allocation618_spill] sm:$0xff] }
 0x99c   :  { %7821 = vmatprep.mubr.bf16.mxu0 %v7706_v40  ;;  %7862 = vmatprep.mubr.bf16.mxu1 %v7706_v40  ;;  %v16230_v40 = vld [vmem:[#allocation617_spill] sm:$0xff] }
 0x99d   :  { %7791 = vmatprep.subr.bf16.mxu0 %v16209_v41  ;;  %7832 = vmatprep.subr.bf16.mxu1 %v16210_v13  ;;  %v16232_v41 = vld [vmem:[#allocation619_spill] sm:$0xff]  ;;  %v16233_v13 = vld [vmem:[#allocation620_spill] sm:$0xff] }
 0x99f   :  { %7792 = vmatpush1.bf16.msra.mxu0 %v16211_v51  ;;  %7833 = vmatpush1.bf16.msra.mxu1 %v16212_v6  ;;  %v16234_v51 = vld [vmem:[#allocation621_spill] sm:$0xff]  ;;  %v16235_v6 = vld [vmem:[#allocation622_spill] sm:$0xff] }
 0x9a0   :  { %7793 = vmatprep.subr.bf16.mxu0 %v16213_v36  ;;  %7834 = vmatprep.subr.bf16.mxu1 %v16214_v59  ;;  %v16236_v36 = vld [vmem:[#allocation623_spill] sm:$0xff]  ;;  %v16237_v59 = vld [vmem:[#allocation624_spill] sm:$0xff] }
 0x9a3   :  { %7794 = vmatpush1.bf16.msra.mxu0 %v16215_v17  ;;  %7835 = vmatpush1.bf16.msra.mxu1 %v16216_v7  ;;  %v16238_v17 = vld [vmem:[#allocation625_spill] sm:$0xff]  ;;  %v16239_v7 = vld [vmem:[#allocation626_spill] sm:$0xff] }
 0x9a4   :  { %7795 = vmatprep.subr.bf16.mxu0 %v16217_v61  ;;  %7836 = vmatprep.subr.bf16.mxu1 %v16218_v19  ;;  %v16240_v61 = vld [vmem:[#allocation627_spill] sm:$0xff]  ;;  %v16241_v19 = vld [vmem:[#allocation628_spill] sm:$0xff] }
 0x9a7   :  { %7796 = vmatpush1.bf16.msra.mxu0 %v16219_v12  ;;  %7837 = vmatpush1.bf16.msra.mxu1 %v16220_v47  ;;  %v16242_v12 = vld [vmem:[#allocation629_spill] sm:$0xff]  ;;  %v16243_v47 = vld [vmem:[#allocation630_spill] sm:$0xff] }
 0x9a8   :  { %7797 = vmatprep.subr.bf16.mxu0 %v16221_v8  ;;  %7838 = vmatprep.subr.bf16.mxu1 %v16222_v29  ;;  %v16244_v8 = vld [vmem:[#allocation631_spill] sm:$0xff]  ;;  %v16245_v29 = vld [vmem:[#allocation632_spill] sm:$0xff] }
 0x9ab   :  { %7798 = vmatpush1.bf16.msra.mxu0 %v16223_v30  ;;  %7839 = vmatpush1.bf16.msra.mxu1 %v16224_v39  ;;  %v16246_v30 = vld [vmem:[#allocation633_spill] sm:$0xff]  ;;  %v16247_v39 = vld [vmem:[#allocation634_spill] sm:$0xff] }
 0x9ac   :  { %7799 = vmatprep.subr.bf16.mxu0 %v16225_v37  ;;  %7840 = vmatprep.subr.bf16.mxu1 %v16226_v44  ;;  %v16248_v37 = vld [vmem:[#allocation635_spill] sm:$0xff]  ;;  %v16249_v44 = vld [vmem:[#allocation636_spill] sm:$0xff] }
 0x9af   :  { %7800 = vmatpush1.bf16.msra.mxu0 %v16227_v54  ;;  %7841 = vmatpush1.bf16.msra.mxu1 %v16228_v2  ;;  %v16250_v54 = vld [vmem:[#allocation637_spill] sm:$0xff]  ;;  %v16251_v2 = vld [vmem:[#allocation638_spill] sm:$0xff] }
 0x9b0   :  { %7801 = vmatprep.subr.bf16.mxu0 %v16229_v14  ;;  %7842 = vmatprep.subr.bf16.mxu1 %v16230_v40  ;;  %v16252_v14 = vld [vmem:[#allocation639_spill] sm:$0xff]  ;;  %v16253_v40 = vld [vmem:[#allocation640_spill] sm:$0xff] }
 0x9b3   :  { %7802 = vmatpush1.bf16.msra.mxu0 %v16231_v9  ;;  %7843 = vmatpush1.bf16.msra.mxu1 %v16232_v41  ;;  %v16254_v9 = vld [vmem:[#allocation641_spill] sm:$0xff]  ;;  %v16255_v41 = vld [vmem:[#allocation642_spill] sm:$0xff] }
 0x9b4   :  { %7803 = vmatprep.subr.bf16.mxu0 %v16233_v13  ;;  %7844 = vmatprep.subr.bf16.mxu1 %v16234_v51  ;;  %v16256_v13 = vld [vmem:[#allocation643_spill] sm:$0xff]  ;;  %v16278_v51 = vld [vmem:[#allocation45_spill] sm:$0xff] }
 0x9b7   :  { %7804 = vmatpush1.bf16.msra.mxu0 %v16235_v6  ;;  %7845 = vmatpush1.bf16.msra.mxu1 %v16236_v36  ;;  %v16279_v6 = vld [vmem:[#allocation46_spill] sm:$0xff]  ;;  %v16280_v36 = vld [vmem:[#allocation47_spill] sm:$0xff] }
 0x9b8   :  { %7805 = vmatprep.subr.bf16.mxu0 %v16237_v59  ;;  %7846 = vmatprep.subr.bf16.mxu1 %v16238_v17  ;;  %v16281_v59 = vld [vmem:[#allocation48_spill] sm:$0xff]  ;;  %v16282_v17 = vld [vmem:[#allocation49_spill] sm:$0xff] }
 0x9bb   :  { %7806 = vmatpush2.bf16.msra.mxu0 %v16239_v7  ;;  %7847 = vmatpush2.bf16.msra.mxu1 %v16240_v61  ;;  %v16283_v7 = vld [vmem:[#allocation50_spill] sm:$0xff]  ;;  %v16284_v61 = vld [vmem:[#allocation51_spill] sm:$0xff] }
 0x9bc   :  { %7807 = vmatprep.subr.bf16.mxu0 %v16241_v19  ;;  %7848 = vmatprep.subr.bf16.mxu1 %v16242_v12  ;;  %v16285_v19 = vld [vmem:[#allocation52_spill] sm:$0xff]  ;;  %v16286_v12 = vld [vmem:[#allocation53_spill] sm:$0xff] }
 0x9bf   :  { %7808 = vmatpush2.bf16.msra.mxu0 %v16243_v47  ;;  %7849 = vmatpush2.bf16.msra.mxu1 %v16244_v8  ;;  %v16287_v47 = vld [vmem:[#allocation54_spill] sm:$0xff]  ;;  %v16288_v8 = vld [vmem:[#allocation55_spill] sm:$0xff] }
 0x9c0   :  { %7809 = vmatprep.subr.bf16.mxu0 %v16245_v29  ;;  %7850 = vmatprep.subr.bf16.mxu1 %v16246_v30  ;;  %v16289_v29 = vld [vmem:[#allocation56_spill] sm:$0xff]  ;;  %v16290_v30 = vld [vmem:[#allocation57_spill] sm:$0xff] }
 0x9c3   :  { %7810 = vmatpush2.bf16.msra.mxu0 %v16247_v39  ;;  %7851 = vmatpush2.bf16.msra.mxu1 %v16248_v37  ;;  %v16291_v39 = vld [vmem:[#allocation58_spill] sm:$0xff]  ;;  %v16292_v37 = vld [vmem:[#allocation59_spill] sm:$0xff] }
 0x9c4   :  { %7811 = vmatprep.subr.bf16.mxu0 %v16249_v44  ;;  %7852 = vmatprep.subr.bf16.mxu1 %v16250_v54  ;;  %v16293_v44 = vld [vmem:[#allocation60_spill] sm:$0xff]  ;;  %v16294_v54 = vld [vmem:[#allocation61_spill] sm:$0xff] }
 0x9c7   :  { %7812 = vmatpush2.bf16.msra.mxu0 %v16251_v2  ;;  %7853 = vmatpush2.bf16.msra.mxu1 %v16252_v14  ;;  %v16295_v2 = vld [vmem:[#allocation62_spill] sm:$0xff]  ;;  %v16296_v14 = vld [vmem:[#allocation63_spill] sm:$0xff] }
 0x9c8   :  { %7813 = vmatprep.subr.bf16.mxu0 %v16253_v40  ;;  %7854 = vmatprep.subr.bf16.mxu1 %v16254_v9  ;;  %v16297_v40 = vld [vmem:[#allocation64_spill] sm:$0xff]  ;;  %v16298_v9 = vld [vmem:[#allocation65_spill] sm:$0xff] }
 0x9cb   :  { %7814 = vmatpush2.bf16.msra.mxu0 %v12455_v45  ;;  %7855 = vmatpush2.bf16.msra.mxu1 %v12457_v3  ;;  %v16257_v45 = vld [vmem:[#allocation24_spill] sm:$0xff]  ;;  %v16260_v3 = vld [vmem:[#allocation27_spill] sm:$0xff] }
 0x9cc   :  { %7815 = vmatprep.subr.bf16.mxu0 %v12461_v58  ;;  %7856 = vmatprep.subr.bf16.mxu1 %v16255_v41  ;;  %v16261_v58 = vld [vmem:[#allocation28_spill] sm:$0xff]  ;;  %v16299_v41 = vld [vmem:[#allocation66_spill] sm:$0xff] }
 0x9cf   :  { %7816 = vmatpush2.bf16.msra.mxu0 %v16256_v13  ;;  %7857 = vmatpush2.bf16.msra.mxu1 %v12469_v57  ;;  %v16270_v57 = vld [vmem:[#allocation37_spill] sm:$0xff]  ;;  %v16300_v13 = vld [vmem:[#allocation67_spill] sm:$0xff] }
 0x9d0   :  { %7817 = vmatprep.subr.bf16.mxu0 %v12473_v62  ;;  %7858 = vmatprep.subr.bf16.mxu1 %v12475_v55  ;;  %v16271_v62 = vld [vmem:[#allocation38_spill] sm:$0xff]  ;;  %v16272_v55 = vld [vmem:[#allocation39_spill] sm:$0xff] }
 0x9d3   :  { %7818 = vmatpush2.bf16.msra.mxu0 %v12479_v56  ;;  %7859 = vmatpush2.bf16.msra.mxu1 %v12481_v1  ;;  %v16273_v56 = vld [vmem:[#allocation40_spill] sm:$0xff]  ;;  %v16274_v1 = vld [vmem:[#allocation41_spill] sm:$0xff] }
 0x9d4   :  { %7819 = vmatprep.subr.bf16.mxu0 %v12485_v23  ;;  %7860 = vmatprep.subr.bf16.mxu1 %v12487_v43  ;;  %v16275_v23 = vld [vmem:[#allocation42_spill] sm:$0xff]  ;;  %v16276_v43 = vld [vmem:[#allocation43_spill] sm:$0xff] }
 0x9d7   :  { %7820 = vmatpush2.bf16.msra.mxu0 %v12491_v16  ;;  %7861 = vmatpush2.bf16.msra.mxu1 %v12493_v52  ;;  %v16268_v16 = vld [vmem:[#allocation35_spill] sm:$0xff]  ;;  %v16269_v52 = vld [vmem:[#allocation36_spill] sm:$0xff] }
 0x9d8   :  { %7879 = vmatprep.subr.bf16.mxu0 %v10410_v25  ;;  %7920 = vmatprep.subr.bf16.mxu1 %v10414_v31  ;;  %v16258_v25 = vld [vmem:[#allocation25_spill] sm:$0xff]  ;;  %v16259_v31 = vld [vmem:[#allocation26_spill] sm:$0xff] }
 0x9da   :  { %7822 = vmatmul.mubr.bf16.vlgmr.msra.gmra.mxu0 %v13192_v48  ;;  %7863 = vmatmul.mubr.bf16.vlgmr.msra.gmra.mxu1 %v13192_v48  ;;  %v16277_v48 = vld [vmem:[#allocation44_spill] sm:$0xff] }
 0x9db   :  { %7880 = vmatpush1.bf16.msra.mxu0 %v10412_v28  ;;  %7921 = vmatpush1.bf16.msra.mxu1 %v10416_v33  ;;  %v16262_v28 = vld [vmem:[#allocation29_spill] sm:$0xff]  ;;  %v16263_v33 = vld [vmem:[#allocation30_spill] sm:$0xff] }
 0x9dc   :  { %7881 = vmatprep.subr.bf16.mxu0 %v10418_v34  ;;  %7922 = vmatprep.subr.bf16.mxu1 %v10421_v38  ;;  %v16264_v34 = vld [vmem:[#allocation31_spill] sm:$0xff]  ;;  %v16265_v38 = vld [vmem:[#allocation32_spill] sm:$0xff] }
 0x9df   :  { %7882 = vmatpush1.bf16.msra.mxu0 %v10425_v50  ;;  %7923 = vmatpush1.bf16.msra.mxu1 %v10429_v53  ;;  %v16266_v50 = vld [vmem:[#allocation33_spill] sm:$0xff]  ;;  %v16267_v53 = vld [vmem:[#allocation34_spill] sm:$0xff] }
 0x9e0   :  { %7883 = vmatprep.subr.bf16.mxu0 %v16257_v45  ;;  %7924 = vmatprep.subr.bf16.mxu1 %v16258_v25  ;;  %v16301_v45 = vld [vmem:[#allocation68_spill] sm:$0xff]  ;;  %v16302_v25 = vld [vmem:[#allocation69_spill] sm:$0xff] }
 0x9e3   :  { %7884 = vmatpush1.bf16.msra.mxu0 %v16259_v31  ;;  %7925 = vmatpush1.bf16.msra.mxu1 %v16260_v3  ;;  %v16303_v31 = vld [vmem:[#allocation70_spill] sm:$0xff]  ;;  %v16304_v3 = vld [vmem:[#allocation71_spill] sm:$0xff] }
 0x9e4   :  { %7885 = vmatprep.subr.bf16.mxu0 %v16261_v58  ;;  %7926 = vmatprep.subr.bf16.mxu1 %v16262_v28  ;;  %v16305_v58 = vld [vmem:[#allocation72_spill] sm:$0xff]  ;;  %v16306_v28 = vld [vmem:[#allocation73_spill] sm:$0xff] }
 0x9e7   :  { %7886 = vmatpush1.bf16.msra.mxu0 %v16263_v33  ;;  %7927 = vmatpush1.bf16.msra.mxu1 %v16264_v34  ;;  %v16307_v33 = vld [vmem:[#allocation74_spill] sm:$0xff]  ;;  %v16308_v34 = vld [vmem:[#allocation75_spill] sm:$0xff] }
 0x9e8   :  { %7887 = vmatprep.subr.bf16.mxu0 %v16265_v38  ;;  %7928 = vmatprep.subr.bf16.mxu1 %v16266_v50  ;;  %v16309_v38 = vld [vmem:[#allocation76_spill] sm:$0xff]  ;;  %v16310_v50 = vld [vmem:[#allocation77_spill] sm:$0xff] }
 0x9eb   :  { %7888 = vmatpush1.bf16.msra.mxu0 %v16267_v53  ;;  %7929 = vmatpush1.bf16.msra.mxu1 %v16268_v16  ;;  %v16311_v53 = vld [vmem:[#allocation78_spill] sm:$0xff]  ;;  %v16312_v16 = vld [vmem:[#allocation79_spill] sm:$0xff] }
 0x9ec   :  { %7889 = vmatprep.subr.bf16.mxu0 %v16269_v52  ;;  %7930 = vmatprep.subr.bf16.mxu1 %v16270_v57  ;;  %v16313_v52 = vld [vmem:[#allocation80_spill] sm:$0xff]  ;;  %v16314_v57 = vld [vmem:[#allocation81_spill] sm:$0xff] }
 0x9ef   :  { %7890 = vmatpush1.bf16.msra.mxu0 %v16271_v62  ;;  %7931 = vmatpush1.bf16.msra.mxu1 %v16272_v55 }
 0x9f0   :  { %7891 = vmatprep.subr.bf16.mxu0 %v16273_v56  ;;  %7932 = vmatprep.subr.bf16.mxu1 %v16274_v1  ;;  %v16315_v56 = vld [vmem:[#allocation16_spill] sm:$0xff] }
 0x9f3   :  { %7892 = vmatpush1.bf16.msra.mxu0 %v16275_v23  ;;  %7933 = vmatpush1.bf16.msra.mxu1 %v16276_v43  ;;  %v16316_v23 = vld [vmem:[#allocation17_spill] sm:$0xff] }
 0x9f4   :  { %7893 = vmatprep.subr.bf16.mxu0 %v16277_v48  ;;  %7934 = vmatprep.subr.bf16.mxu1 %v16278_v51 }
 0x9f7   :  { %7894 = vmatpush1.bf16.msra.mxu0 %v16279_v6  ;;  %7935 = vmatpush1.bf16.msra.mxu1 %v16280_v36  ;;  %v16317_v6 = vld [vmem:[#allocation18_spill] sm:$0xff] }
 0x9f8   :  { %7895 = vmatprep.subr.bf16.mxu0 %v16281_v59  ;;  %7936 = vmatprep.subr.bf16.mxu1 %v16282_v17  ;;  %v16318_v59 = vld [vmem:[#allocation19_spill] sm:$0xff] }
 0x9fb   :  { %7896 = vmatpush2.bf16.msra.mxu0 %v16283_v7  ;;  %7937 = vmatpush2.bf16.msra.mxu1 %v16284_v61 }
 0x9fc   :  { %7897 = vmatprep.subr.bf16.mxu0 %v16285_v19  ;;  %7938 = vmatprep.subr.bf16.mxu1 %v16286_v12 }
 0x9ff   :  { %7898 = vmatpush2.bf16.msra.mxu0 %v16287_v47  ;;  %7939 = vmatpush2.bf16.msra.mxu1 %v16288_v8 }
 0xa00   :  { %7899 = vmatprep.subr.bf16.mxu0 %v16289_v29  ;;  %7940 = vmatprep.subr.bf16.mxu1 %v16290_v30 }
 0xa03   :  { %7900 = vmatpush2.bf16.msra.mxu0 %v16291_v39  ;;  %7941 = vmatpush2.bf16.msra.mxu1 %v16292_v37  ;;  %v16319_v39 = vld [vmem:[#allocation82_spill] sm:$0xff]  ;;  %v16320_v37 = vld [vmem:[#allocation83_spill] sm:$0xff] }
 0xa04   :  { %7901 = vmatprep.subr.bf16.mxu0 %v16293_v44  ;;  %7942 = vmatprep.subr.bf16.mxu1 %v16294_v54  ;;  %v16321_v44 = vld [vmem:[#allocation84_spill] sm:$0xff]  ;;  %v16322_v54 = vld [vmem:[#allocation85_spill] sm:$0xff] }
 0xa07   :  { %7902 = vmatpush2.bf16.msra.mxu0 %v16295_v2  ;;  %7943 = vmatpush2.bf16.msra.mxu1 %v16296_v14  ;;  %v16323_v2 = vld [vmem:[#allocation86_spill] sm:$0xff]  ;;  %v16324_v14 = vld [vmem:[#allocation87_spill] sm:$0xff] }
 0xa08   :  { %7903 = vmatprep.subr.bf16.mxu0 %v16297_v40  ;;  %7944 = vmatprep.subr.bf16.mxu1 %v16298_v9  ;;  %v16325_v40 = vld [vmem:[#allocation88_spill] sm:$0xff]  ;;  %v16326_v9 = vld [vmem:[#allocation89_spill] sm:$0xff] }
 0xa0b   :  { %7904 = vmatpush2.bf16.msra.mxu0 %v16299_v41  ;;  %7945 = vmatpush2.bf16.msra.mxu1 %v16300_v13  ;;  %v16327_v41 = vld [vmem:[#allocation90_spill] sm:$0xff]  ;;  %v16328_v13 = vld [vmem:[#allocation91_spill] sm:$0xff] }
 0xa0c   :  { %7905 = vmatprep.subr.bf16.mxu0 %v16301_v45  ;;  %7946 = vmatprep.subr.bf16.mxu1 %v16302_v25  ;;  %v16329_v45 = vld [vmem:[#allocation92_spill] sm:$0xff]  ;;  %v16330_v25 = vld [vmem:[#allocation93_spill] sm:$0xff] }
 0xa0f   :  { %7906 = vmatpush2.bf16.msra.mxu0 %v16303_v31  ;;  %7947 = vmatpush2.bf16.msra.mxu1 %v16304_v3  ;;  %v16331_v31 = vld [vmem:[#allocation94_spill] sm:$0xff]  ;;  %v16332_v3 = vld [vmem:[#allocation95_spill] sm:$0xff] }
 0xa10   :  { %7907 = vmatprep.subr.bf16.mxu0 %v16305_v58  ;;  %7948 = vmatprep.subr.bf16.mxu1 %v16306_v28  ;;  %v16333_v58 = vld [vmem:[#allocation96_spill] sm:$0xff]  ;;  %v16334_v28 = vld [vmem:[#allocation97_spill] sm:$0xff] }
 0xa13   :  { %7908 = vmatpush2.bf16.msra.mxu0 %v16307_v33  ;;  %7949 = vmatpush2.bf16.msra.mxu1 %v16308_v34  ;;  %v16335_v33 = vld [vmem:[#allocation98_spill] sm:$0xff]  ;;  %v16336_v34 = vld [vmem:[#allocation99_spill] sm:$0xff] }
 0xa14   :  { %7909 = vmatprep.subr.bf16.mxu0 %v16309_v38  ;;  %7950 = vmatprep.subr.bf16.mxu1 %v16310_v50  ;;  %v16337_v38 = vld [vmem:[#allocation100_spill] sm:$0xff]  ;;  %v16338_v50 = vld [vmem:[#allocation101_spill] sm:$0xff] }
 0xa17   :  { %7910 = vmatpush2.bf16.msra.mxu0 %v16311_v53  ;;  %7951 = vmatpush2.bf16.msra.mxu1 %v16312_v16  ;;  %v16339_v53 = vld [vmem:[#allocation102_spill] sm:$0xff]  ;;  %v16340_v16 = vld [vmem:[#allocation103_spill] sm:$0xff] }
 0xa18   :  { %7961 = vmatprep.subr.bf16.mxu0 %v16313_v52  ;;  %8002 = vmatprep.subr.bf16.mxu1 %v16314_v57  ;;  %v16341_v52 = vld [vmem:[#allocation104_spill] sm:$0xff]  ;;  %v16342_v57 = vld [vmem:[#allocation105_spill] sm:$0xff] }
 0xa5a   :  { %v7741_v62 = vpop.f32.mrf.mxu0  ;;  %v7782_v55 = vpop.f32.mrf.mxu1 }
 0xa5b   :  { %v7742_v1 = vadd.f32 %v7741_v62, %v16315_v56  ;;  %v7783_v43 = vadd.f32 %v7782_v55, %v16316_v23  ;;  %v16343_v62 = vld [vmem:[#allocation106_spill] sm:$0xff]  ;;  %v16344_v55 = vld [vmem:[#allocation107_spill] sm:$0xff]  ;;  %v16345_v56 = vld [vmem:[#allocation108_spill] sm:$0xff] }
 0xa5c   :  { %v7743_v48 = vpop.f32.mrf.mxu0  ;;  %v7784_v51 = vpop.f32.mrf.mxu1  ;;  %v16347_v23 = vld [vmem:[#allocation110_spill] sm:$0xff] }
 0xa5d   :  { %v7744_v36 = vadd.f32 %v7743_v48, %v16317_v6  ;;  %v7785_v17 = vadd.f32 %v7784_v51, %v16318_v59  ;;  %v13334_v47 = vpack.c.bf16 %v7742_v1, %v7742_v1  ;;  %v13336_v8 = vpack.c.bf16 %v7783_v43, %v7783_v43  ;;  %v16346_v1 = vld [vmem:[#allocation109_spill] sm:$0xff]  ;;  %v16348_v43 = vld [vmem:[#allocation111_spill] sm:$0xff]  ;;  %v16349_v48 = vld [vmem:[#allocation112_spill] sm:$0xff] }
 0xa5e   :  { %v7745_v7 = vpop.f32.mrf.mxu0  ;;  %v7786_v61 = vpop.f32.mrf.mxu1  ;;  %v16350_v51 = vld [vmem:[#allocation113_spill] sm:$0xff]  ;;  %v16351_v6 = vld [vmem:[#allocation114_spill] sm:$0xff]  ;;  %v16353_v59 = vld [vmem:[#allocation116_spill] sm:$0xff] }
 0xa5f   :  { %v13330_v19 = vpack.c.bf16 %v7744_v36, %v7744_v36  ;;  %v13332_v12 = vpack.c.bf16 %v7785_v17, %v7785_v17  ;;  %v16352_v36 = vld [vmem:[#allocation115_spill] sm:$0xff]  ;;  %v16354_v17 = vld [vmem:[#allocation117_spill] sm:$0xff]  ;;  %v16355_v7 = vld [vmem:[#allocation118_spill] sm:$0xff] }
 0xa60   :  { %v7746_v29 = vpop.f32.mrf.mxu0  ;;  %v7787_v30 = vpop.f32.mrf.mxu1  ;;  %v16356_v61 = vld [vmem:[#allocation119_spill] sm:$0xff] }
 0xa61   :  { %7911 = vmatprep.mubr.bf16.mxu0 %v13330_v19  ;;  %7952 = vmatprep.mubr.bf16.mxu1 %v13332_v12  ;;  %v16357_v29 = vld [vmem:[#allocation120_spill] sm:$0xff]  ;;  %v16358_v30 = vld [vmem:[#allocation121_spill] sm:$0xff] }
 0xa62   :  { %7912 = vmatmul.mubr.bf16.vlgmr.msra.gmra.mxu0 %v13334_v47  ;;  %7953 = vmatmul.mubr.bf16.vlgmr.msra.gmra.mxu1 %v13336_v8 }
 0xa63   :  { %7962 = vmatpush1.bf16.msra.mxu0 %v16319_v39  ;;  %8003 = vmatpush1.bf16.msra.mxu1 %v16320_v37  ;;  %v16359_v39 = vld [vmem:[#allocation122_spill] sm:$0xff]  ;;  %v16360_v37 = vld [vmem:[#allocation123_spill] sm:$0xff] }
 0xa64   :  { %7963 = vmatprep.subr.bf16.mxu0 %v16321_v44  ;;  %8004 = vmatprep.subr.bf16.mxu1 %v16322_v54  ;;  %v16361_v44 = vld [vmem:[#allocation124_spill] sm:$0xff]  ;;  %v16362_v54 = vld [vmem:[#allocation125_spill] sm:$0xff] }
 0xa67   :  { %7964 = vmatpush1.bf16.msra.mxu0 %v16323_v2  ;;  %8005 = vmatpush1.bf16.msra.mxu1 %v16324_v14  ;;  %v16363_v2 = vld [vmem:[#allocation126_spill] sm:$0xff]  ;;  %v16364_v14 = vld [vmem:[#allocation127_spill] sm:$0xff] }
 0xa68   :  { %7965 = vmatprep.subr.bf16.mxu0 %v16325_v40  ;;  %8006 = vmatprep.subr.bf16.mxu1 %v16326_v9  ;;  %v16365_v40 = vld [vmem:[#allocation128_spill] sm:$0xff]  ;;  %v16366_v9 = vld [vmem:[#allocation129_spill] sm:$0xff] }
 0xa6b   :  { %7966 = vmatpush1.bf16.msra.mxu0 %v16327_v41  ;;  %8007 = vmatpush1.bf16.msra.mxu1 %v16328_v13  ;;  %v16367_v41 = vld [vmem:[#allocation130_spill] sm:$0xff]  ;;  %v16368_v13 = vld [vmem:[#allocation131_spill] sm:$0xff] }
 0xa6c   :  { %7967 = vmatprep.subr.bf16.mxu0 %v16329_v45  ;;  %8008 = vmatprep.subr.bf16.mxu1 %v16330_v25  ;;  %v16369_v45 = vld [vmem:[#allocation132_spill] sm:$0xff]  ;;  %v16370_v25 = vld [vmem:[#allocation133_spill] sm:$0xff] }
 0xa6f   :  { %7968 = vmatpush1.bf16.msra.mxu0 %v16331_v31  ;;  %8009 = vmatpush1.bf16.msra.mxu1 %v16332_v3  ;;  %v16371_v31 = vld [vmem:[#allocation134_spill] sm:$0xff]  ;;  %v16372_v3 = vld [vmem:[#allocation135_spill] sm:$0xff] }
 0xa70   :  { %7969 = vmatprep.subr.bf16.mxu0 %v16333_v58  ;;  %8010 = vmatprep.subr.bf16.mxu1 %v16334_v28  ;;  %v16373_v58 = vld [vmem:[#allocation136_spill] sm:$0xff]  ;;  %v16374_v28 = vld [vmem:[#allocation137_spill] sm:$0xff] }
 0xa73   :  { %7970 = vmatpush1.bf16.msra.mxu0 %v16335_v33  ;;  %8011 = vmatpush1.bf16.msra.mxu1 %v16336_v34 }
 0xa74   :  { %7971 = vmatprep.subr.bf16.mxu0 %v16337_v38  ;;  %8012 = vmatprep.subr.bf16.mxu1 %v16338_v50  ;;  %v16375_v38 = vld [vmem:[#allocation138_spill] sm:$0xff]  ;;  %v16376_v50 = vld [vmem:[#allocation139_spill] sm:$0xff] }
 0xa77   :  { %7972 = vmatpush1.bf16.msra.mxu0 %v16339_v53  ;;  %8013 = vmatpush1.bf16.msra.mxu1 %v16340_v16  ;;  %v16377_v53 = vld [vmem:[#allocation20_spill] sm:$0xff] }
 0xa78   :  { %7973 = vmatprep.subr.bf16.mxu0 %v16341_v52  ;;  %8014 = vmatprep.subr.bf16.mxu1 %v16342_v57  ;;  %v16378_v52 = vld [vmem:[#allocation21_spill] sm:$0xff] }
 0xa7b   :  { %7974 = vmatpush1.bf16.msra.mxu0 %v16343_v62  ;;  %8015 = vmatpush1.bf16.msra.mxu1 %v16344_v55 }
 0xa7c   :  { %7975 = vmatprep.subr.bf16.mxu0 %v16345_v56  ;;  %8016 = vmatprep.subr.bf16.mxu1 %v16346_v1  ;;  %v16379_v56 = vld [vmem:[#allocation140_spill] sm:$0xff]  ;;  %v16380_v1 = vld [vmem:[#allocation141_spill] sm:$0xff] }
 0xa7f   :  { %7976 = vmatpush1.bf16.msra.mxu0 %v16347_v23  ;;  %8017 = vmatpush1.bf16.msra.mxu1 %v16348_v43  ;;  %v16381_v23 = vld [vmem:[#allocation22_spill] sm:$0xff] }
 0xa80   :  { %7977 = vmatprep.subr.bf16.mxu0 %v16349_v48  ;;  %8018 = vmatprep.subr.bf16.mxu1 %v16350_v51  ;;  %v16382_v48 = vld [vmem:[#allocation23_spill] sm:$0xff] }
 0xa83   :  { %7978 = vmatpush2.bf16.msra.mxu0 %v16351_v6  ;;  %8019 = vmatpush2.bf16.msra.mxu1 %v16352_v36 }
 0xa84   :  { %7979 = vmatprep.subr.bf16.mxu0 %v16353_v59  ;;  %8020 = vmatprep.subr.bf16.mxu1 %v16354_v17 }
 0xa87   :  { %7980 = vmatpush2.bf16.msra.mxu0 %v16355_v7  ;;  %8021 = vmatpush2.bf16.msra.mxu1 %v16356_v61  ;;  %v16383_v7 = vld [vmem:[#allocation142_spill] sm:$0xff]  ;;  %v16384_v61 = vld [vmem:[#allocation143_spill] sm:$0xff] }
 0xa88   :  { %7981 = vmatprep.subr.bf16.mxu0 %v16357_v29  ;;  %8022 = vmatprep.subr.bf16.mxu1 %v16358_v30 }
 0xa8b   :  { %7982 = vmatpush2.bf16.msra.mxu0 %v16359_v39  ;;  %8023 = vmatpush2.bf16.msra.mxu1 %v16360_v37 }
 0xa8c   :  { %7983 = vmatprep.subr.bf16.mxu0 %v16361_v44  ;;  %8024 = vmatprep.subr.bf16.mxu1 %v16362_v54  ;;  %v16385_v44 = vld [vmem:[#allocation144_spill] sm:$0xff]  ;;  %v16386_v54 = vld [vmem:[#allocation145_spill] sm:$0xff] }
 0xa8f   :  { %7984 = vmatpush2.bf16.msra.mxu0 %v16363_v2  ;;  %8025 = vmatpush2.bf16.msra.mxu1 %v16364_v14  ;;  %v16387_v2 = vld [vmem:[#allocation146_spill] sm:$0xff]  ;;  %v16388_v14 = vld [vmem:[#allocation147_spill] sm:$0xff] }
 0xa90   :  { %7985 = vmatprep.subr.bf16.mxu0 %v16365_v40  ;;  %8026 = vmatprep.subr.bf16.mxu1 %v16366_v9  ;;  %v16389_v40 = vld [vmem:[#allocation148_spill] sm:$0xff]  ;;  %v16390_v9 = vld [vmem:[#allocation149_spill] sm:$0xff] }
 0xa93   :  { %7986 = vmatpush2.bf16.msra.mxu0 %v16367_v41  ;;  %8027 = vmatpush2.bf16.msra.mxu1 %v16368_v13  ;;  %v16391_v41 = vld [vmem:[#allocation150_spill] sm:$0xff]  ;;  %v16392_v13 = vld [vmem:[#allocation151_spill] sm:$0xff] }
 0xa94   :  { %7987 = vmatprep.subr.bf16.mxu0 %v16369_v45  ;;  %8028 = vmatprep.subr.bf16.mxu1 %v16370_v25  ;;  %v16393_v45 = vld [vmem:[#allocation152_spill] sm:$0xff]  ;;  %v16394_v25 = vld [vmem:[#allocation153_spill] sm:$0xff] }
 0xa97   :  { %7988 = vmatpush2.bf16.msra.mxu0 %v16371_v31  ;;  %8029 = vmatpush2.bf16.msra.mxu1 %v16372_v3  ;;  %v16395_v31 = vld [vmem:[#allocation154_spill] sm:$0xff]  ;;  %v16396_v3 = vld [vmem:[#allocation155_spill] sm:$0xff] }
 0xa98   :  { %7989 = vmatprep.subr.bf16.mxu0 %v16373_v58  ;;  %8030 = vmatprep.subr.bf16.mxu1 %v16374_v28  ;;  %v16397_v58 = vld [vmem:[#allocation156_spill] sm:$0xff]  ;;  %v16398_v28 = vld [vmem:[#allocation157_spill] sm:$0xff] }
 0xa9a   :  { %v7823_v33 = vpop.f32.mrf.mxu0  ;;  %v7864_v34 = vpop.f32.mrf.mxu1 }
 0xa9b   :  { %7990 = vmatpush2.bf16.msra.mxu0 %v16375_v38  ;;  %8031 = vmatpush2.bf16.msra.mxu1 %v16376_v50  ;;  %v7824_v16 = vadd.f32 %v7823_v33, %v16377_v53  ;;  %v7865_v57 = vadd.f32 %v7864_v34, %v16378_v52  ;;  %v16399_v33 = vld [vmem:[#allocation158_spill] sm:$0xff]  ;;  %v16400_v34 = vld [vmem:[#allocation159_spill] sm:$0xff]  ;;  %v16401_v38 = vld [vmem:[#allocation160_spill] sm:$0xff] }
 0xa9c   :  { %v7825_v62 = vpop.f32.mrf.mxu0  ;;  %v7866_v55 = vpop.f32.mrf.mxu1  ;;  %7991 = vmatprep.subr.bf16.mxu0 %v16379_v56  ;;  %8032 = vmatprep.subr.bf16.mxu1 %v16380_v1  ;;  %v16402_v50 = vld [vmem:[#allocation161_spill] sm:$0xff]  ;;  %v16403_v53 = vld [vmem:[#allocation162_spill] sm:$0xff]  ;;  %v16405_v52 = vld [vmem:[#allocation164_spill] sm:$0xff] }
 0xa9d   :  { %v7826_v43 = vadd.f32 %v7825_v62, %v16381_v23  ;;  %v7867_v51 = vadd.f32 %v7866_v55, %v16382_v48  ;;  %v13412_v29 = vpack.c.bf16 %v7824_v16, %v7824_v16  ;;  %v13414_v30 = vpack.c.bf16 %v7865_v57, %v7865_v57  ;;  %v16404_v16 = vld [vmem:[#allocation163_spill] sm:$0xff]  ;;  %v16406_v57 = vld [vmem:[#allocation165_spill] sm:$0xff]  ;;  %v16407_v62 = vld [vmem:[#allocation166_spill] sm:$0xff] }
 0xa9e   :  { %v7827_v6 = vpop.f32.mrf.mxu0  ;;  %v7868_v36 = vpop.f32.mrf.mxu1  ;;  %v16408_v55 = vld [vmem:[#allocation167_spill] sm:$0xff]  ;;  %v16409_v56 = vld [vmem:[#allocation168_spill] sm:$0xff]  ;;  %v16410_v1 = vld [vmem:[#allocation169_spill] sm:$0xff] }
 0xa9f   :  { %v13406_v59 = vpack.c.bf16 %v7826_v43, %v7826_v43  ;;  %v13408_v17 = vpack.c.bf16 %v7867_v51, %v7867_v51  ;;  %7992 = vmatpush2.bf16.msra.mxu0 %v16383_v7  ;;  %8033 = vmatpush2.bf16.msra.mxu1 %v16384_v61  ;;  %v16411_v23 = vld [vmem:[#allocation170_spill] sm:$0xff]  ;;  %v16412_v43 = vld [vmem:[#allocation171_spill] sm:$0xff]  ;;  %v16413_v48 = vld [vmem:[#allocation172_spill] sm:$0xff] }
 0xaa0   :  { %v7828_v39 = vpop.f32.mrf.mxu0  ;;  %v7869_v37 = vpop.f32.mrf.mxu1  ;;  %8043 = vmatprep.subr.bf16.mxu0 %v16385_v44  ;;  %8084 = vmatprep.subr.bf16.mxu1 %v16386_v54  ;;  %v16414_v51 = vld [vmem:[#allocation173_spill] sm:$0xff]  ;;  %v16415_v6 = vld [vmem:[#allocation174_spill] sm:$0xff]  ;;  %v16416_v36 = vld [vmem:[#allocation175_spill] sm:$0xff] }
 0xaa1   :  { %7993 = vmatprep.mubr.bf16.mxu0 %v13406_v59  ;;  %8034 = vmatprep.mubr.bf16.mxu1 %v13408_v17  ;;  %v16417_v7 = vld [vmem:[#allocation176_spill] sm:$0xff]  ;;  %v16418_v61 = vld [vmem:[#allocation177_spill] sm:$0xff]  ;;  %v16419_v39 = vld [vmem:[#allocation178_spill] sm:$0xff] }
 0xaa2   :  { %7994 = vmatmul.mubr.bf16.vlgmr.msra.gmra.mxu0 %v13412_v29  ;;  %8035 = vmatmul.mubr.bf16.vlgmr.msra.gmra.mxu1 %v13414_v30  ;;  %v16420_v37 = vld [vmem:[#allocation179_spill] sm:$0xff]  ;;  %v16421_v44 = vld [vmem:[#allocation180_spill] sm:$0xff]  ;;  %v16422_v54 = vld [vmem:[#allocation181_spill] sm:$0xff] }
 0xaa3   :  { %8044 = vmatpush1.bf16.msra.mxu0 %v16387_v2  ;;  %8075 = vmatprep.mubr.bf16.mxu0 %v13330_v19  ;;  %v16423_v2 = vld [vmem:[#allocation182_spill] sm:$0xff] }
 0xaa4   :  { %8085 = vmatpush1.bf16.msra.mxu1 %v16388_v14  ;;  %8116 = vmatprep.mubr.bf16.mxu1 %v13332_v12  ;;  %v16424_v14 = vld [vmem:[#allocation183_spill] sm:$0xff] }
 0xaa5   :  { %8045 = vmatprep.subr.bf16.mxu0 %v16389_v40  ;;  %8086 = vmatprep.subr.bf16.mxu1 %v16390_v9  ;;  %v16425_v40 = vld [vmem:[#allocation184_spill] sm:$0xff]  ;;  %v16426_v9 = vld [vmem:[#allocation185_spill] sm:$0xff] }
 0xaa7   :  { %8046 = vmatpush1.bf16.msra.mxu0 %v16391_v41  ;;  %v16427_v41 = vld [vmem:[#allocation186_spill] sm:$0xff] }
 0xaa8   :  { %8087 = vmatpush1.bf16.msra.mxu1 %v16392_v13  ;;  %8047 = vmatprep.subr.bf16.mxu0 %v16393_v45  ;;  %v16428_v13 = vld [vmem:[#allocation187_spill] sm:$0xff]  ;;  %v16429_v45 = vld [vmem:[#allocation188_spill] sm:$0xff] }
 0xaa9   :  { %8088 = vmatprep.subr.bf16.mxu1 %v16394_v25  ;;  %v16430_v25 = vld [vmem:[#allocation189_spill] sm:$0xff] }
 0xaab   :  { %8048 = vmatpush1.bf16.msra.mxu0 %v16395_v31  ;;  %v16431_v31 = vld [vmem:[#allocation190_spill] sm:$0xff] }
 0xaac   :  { %8089 = vmatpush1.bf16.msra.mxu1 %v16396_v3  ;;  %8049 = vmatprep.subr.bf16.mxu0 %v16397_v58  ;;  %v16432_v3 = vld [vmem:[#allocation191_spill] sm:$0xff]  ;;  %v16433_v58 = vld [vmem:[#allocation192_spill] sm:$0xff] }
 0xaad   :  { %8090 = vmatprep.subr.bf16.mxu1 %v16398_v28  ;;  %v16434_v28 = vld [vmem:[#allocation193_spill] sm:$0xff] }
 0xaaf   :  { %8050 = vmatpush1.bf16.msra.mxu0 %v16399_v33  ;;  %v16435_v33 = vld [vmem:[#allocation194_spill] sm:$0xff] }
 0xab0   :  { %8091 = vmatpush1.bf16.msra.mxu1 %v16400_v34  ;;  %8051 = vmatprep.subr.bf16.mxu0 %v16401_v38  ;;  %v16436_v34 = vld [vmem:[#allocation195_spill] sm:$0xff]  ;;  %v16437_v38 = vld [vmem:[#allocation196_spill] sm:$0xff] }
 0xab1   :  { %8092 = vmatprep.subr.bf16.mxu1 %v16402_v50  ;;  %v16438_v50 = vld [vmem:[#allocation197_spill] sm:$0xff] }
 0xab3   :  { %8052 = vmatpush1.bf16.msra.mxu0 %v16403_v53  ;;  %v16439_v53 = vld [vmem:[#allocation198_spill] sm:$0xff] }
 0xab4   :  { %8093 = vmatpush1.bf16.msra.mxu1 %v16404_v16  ;;  %8053 = vmatprep.subr.bf16.mxu0 %v16405_v52  ;;  %v16440_v16 = vld [vmem:[#allocation199_spill] sm:$0xff]  ;;  %v16441_v52 = vld [vmem:[#allocation200_spill] sm:$0xff] }
 0xab5   :  { %8094 = vmatprep.subr.bf16.mxu1 %v16406_v57  ;;  %v16442_v57 = vld [vmem:[#allocation201_spill] sm:$0xff] }
 0xab7   :  { %8054 = vmatpush1.bf16.msra.mxu0 %v16407_v62  ;;  %v16443_v62 = vld [vmem:[#allocation202_spill] sm:$0xff] }
 0xab8   :  { %8095 = vmatpush1.bf16.msra.mxu1 %v16408_v55  ;;  %8055 = vmatprep.subr.bf16.mxu0 %v16409_v56  ;;  %v16444_v55 = vld [vmem:[#allocation203_spill] sm:$0xff]  ;;  %v16445_v56 = vld [vmem:[#allocation204_spill] sm:$0xff] }
 0xab9   :  { %8096 = vmatprep.subr.bf16.mxu1 %v16410_v1  ;;  %v16446_v1 = vld [vmem:[#allocation205_spill] sm:$0xff] }
 0xabb   :  { %8056 = vmatpush1.bf16.msra.mxu0 %v16411_v23  ;;  %v16447_v23 = vld [vmem:[#allocation206_spill] sm:$0xff] }
 0xabc   :  { %8097 = vmatpush1.bf16.msra.mxu1 %v16412_v43  ;;  %8057 = vmatprep.subr.bf16.mxu0 %v16413_v48  ;;  %v16448_v43 = vld [vmem:[#allocation207_spill] sm:$0xff]  ;;  %v16449_v48 = vld [vmem:[#allocation208_spill] sm:$0xff] }
 0xabd   :  { %8098 = vmatprep.subr.bf16.mxu1 %v16414_v51  ;;  %v16450_v51 = vld [vmem:[#allocation209_spill] sm:$0xff] }
 0xabf   :  { %8058 = vmatpush1.bf16.msra.mxu0 %v16415_v6  ;;  %v16451_v6 = vld [vmem:[#allocation210_spill] sm:$0xff] }
 0xac0   :  { %8099 = vmatpush1.bf16.msra.mxu1 %v16416_v36  ;;  %8059 = vmatprep.subr.bf16.mxu0 %v16417_v7  ;;  %v16452_v36 = vld [vmem:[#allocation211_spill] sm:$0xff]  ;;  %v16453_v7 = vld [vmem:[#allocation212_spill] sm:$0xff] }
 0xac1   :  { %8100 = vmatprep.subr.bf16.mxu1 %v16418_v61  ;;  %v16454_v61 = vld [vmem:[#allocation213_spill] sm:$0xff] }
 0xac3   :  { %8060 = vmatpush2.bf16.msra.mxu0 %v16419_v39  ;;  %v16455_v39 = vld [vmem:[#allocation214_spill] sm:$0xff] }
 0xac4   :  { %8101 = vmatpush2.bf16.msra.mxu1 %v16420_v37  ;;  %8061 = vmatprep.subr.bf16.mxu0 %v16421_v44  ;;  %v16456_v37 = vld [vmem:[#allocation215_spill] sm:$0xff]  ;;  %v16457_v44 = vld [vmem:[#allocation216_spill] sm:$0xff] }
 0xac5   :  { %8102 = vmatprep.subr.bf16.mxu1 %v16422_v54  ;;  %v16458_v54 = vld [vmem:[#allocation217_spill] sm:$0xff] }
 0xac7   :  { %8062 = vmatpush2.bf16.msra.mxu0 %v16423_v2  ;;  %v16459_v2 = vld [vmem:[#allocation218_spill] sm:$0xff] }
 0xac8   :  { %8103 = vmatpush2.bf16.msra.mxu1 %v16424_v14  ;;  %8063 = vmatprep.subr.bf16.mxu0 %v16425_v40  ;;  %v16460_v14 = vld [vmem:[#allocation219_spill] sm:$0xff]  ;;  %v16461_v40 = vld [vmem:[#allocation220_spill] sm:$0xff] }
 0xac9   :  { %8104 = vmatprep.subr.bf16.mxu1 %v16426_v9  ;;  %v16462_v9 = vld [vmem:[#allocation221_spill] sm:$0xff] }
 0xacb   :  { %8064 = vmatpush2.bf16.msra.mxu0 %v16427_v41  ;;  %v16463_v41 = vld [vmem:[#allocation222_spill] sm:$0xff] }
 0xacc   :  { %8105 = vmatpush2.bf16.msra.mxu1 %v16428_v13  ;;  %8065 = vmatprep.subr.bf16.mxu0 %v16429_v45  ;;  %v16464_v13 = vld [vmem:[#allocation223_spill] sm:$0xff]  ;;  %v16465_v45 = vld [vmem:[#allocation224_spill] sm:$0xff] }
 0xacd   :  { %8106 = vmatprep.subr.bf16.mxu1 %v16430_v25  ;;  %v16466_v25 = vld [vmem:[#allocation225_spill] sm:$0xff] }
 0xacf   :  { %8066 = vmatpush2.bf16.msra.mxu0 %v16431_v31  ;;  %v16467_v31 = vld [vmem:[#allocation226_spill] sm:$0xff] }
 0xad0   :  { %8107 = vmatpush2.bf16.msra.mxu1 %v16432_v3  ;;  %8067 = vmatprep.subr.bf16.mxu0 %v16433_v58  ;;  %v16468_v3 = vld [vmem:[#allocation227_spill] sm:$0xff]  ;;  %v16469_v58 = vld [vmem:[#allocation228_spill] sm:$0xff] }
 0xad1   :  { %8108 = vmatprep.subr.bf16.mxu1 %v16434_v28  ;;  %v16470_v28 = vld [vmem:[#allocation229_spill] sm:$0xff] }
 0xad3   :  { %8068 = vmatpush2.bf16.msra.mxu0 %v16435_v33  ;;  %v16471_v33 = vld [vmem:[#allocation230_spill] sm:$0xff] }
 0xad4   :  { %8109 = vmatpush2.bf16.msra.mxu1 %v16436_v34  ;;  %8069 = vmatprep.subr.bf16.mxu0 %v16437_v38  ;;  %v16472_v34 = vld [vmem:[#allocation231_spill] sm:$0xff]  ;;  %v16473_v38 = vld [vmem:[#allocation232_spill] sm:$0xff] }
 0xad5   :  { %8110 = vmatprep.subr.bf16.mxu1 %v16438_v50  ;;  %v16474_v50 = vld [vmem:[#allocation233_spill] sm:$0xff] }
 0xad7   :  { %8070 = vmatpush2.bf16.msra.mxu0 %v16439_v53  ;;  %v16475_v53 = vld [vmem:[#allocation234_spill] sm:$0xff] }
 0xad8   :  { %8111 = vmatpush2.bf16.msra.mxu1 %v16440_v16  ;;  %8071 = vmatprep.subr.bf16.mxu0 %v16441_v52  ;;  %v16476_v16 = vld [vmem:[#allocation235_spill] sm:$0xff]  ;;  %v16477_v52 = vld [vmem:[#allocation236_spill] sm:$0xff] }
 0xad9   :  { %8112 = vmatprep.subr.bf16.mxu1 %v16442_v57  ;;  %v16478_v57 = vld [vmem:[#allocation237_spill] sm:$0xff] }
 0xadb   :  { %8072 = vmatpush2.bf16.msra.mxu0 %v16443_v62  ;;  %v16479_v62 = vld [vmem:[#allocation238_spill] sm:$0xff] }
 0xadc   :  { %8113 = vmatpush2.bf16.msra.mxu1 %v16444_v55  ;;  %8073 = vmatprep.subr.bf16.mxu0 %v16445_v56  ;;  %v16480_v55 = vld [vmem:[#allocation239_spill] sm:$0xff]  ;;  %v16481_v56 = vld [vmem:[#allocation240_spill] sm:$0xff] }
 0xadd   :  { %8114 = vmatprep.subr.bf16.mxu1 %v16446_v1  ;;  %v16482_v1 = vld [vmem:[#allocation241_spill] sm:$0xff] }
 0xadf   :  { %8074 = vmatpush2.bf16.msra.mxu0 %v16447_v23  ;;  %v16483_v23 = vld [vmem:[#allocation242_spill] sm:$0xff] }
 0xae0   :  { %8115 = vmatpush2.bf16.msra.mxu1 %v16448_v43  ;;  %8125 = vmatprep.subr.bf16.mxu0 %v16449_v48  ;;  %v16484_v43 = vld [vmem:[#allocation243_spill] sm:$0xff]  ;;  %v16485_v48 = vld [vmem:[#allocation244_spill] sm:$0xff] }
 0xae1   :  { %8166 = vmatprep.subr.bf16.mxu1 %v16450_v51  ;;  %v16486_v51 = vld [vmem:[#allocation245_spill] sm:$0xff] }
 0xae2   :  { %8076 = vmatmul.mubr.bf16.vlgmr.msra.gmra.mxu0 %v13334_v47 }
 0xae3   :  { %8117 = vmatmul.mubr.bf16.vlgmr.msra.gmra.mxu1 %v13336_v8  ;;  %8126 = vmatpush1.bf16.msra.mxu0 %v16451_v6  ;;  %v16487_v6 = vld [vmem:[#allocation246_spill] sm:$0xff] }
 0xae4   :  { %8157 = vmatprep.mubr.bf16.mxu0 %v13406_v59  ;;  %8167 = vmatpush1.bf16.msra.mxu1 %v16452_v36  ;;  %v16488_v36 = vld [vmem:[#allocation247_spill] sm:$0xff] }
 0xae5   :  { %8198 = vmatprep.mubr.bf16.mxu1 %v13408_v17  ;;  %8127 = vmatprep.subr.bf16.mxu0 %v16453_v7  ;;  %v16489_v7 = vld [vmem:[#allocation248_spill] sm:$0xff] }
 0xae6   :  { %8168 = vmatprep.subr.bf16.mxu1 %v16454_v61  ;;  %v16490_v61 = vld [vmem:[#allocation249_spill] sm:$0xff] }
 0xae7   :  { %8128 = vmatpush1.bf16.msra.mxu0 %v16455_v39  ;;  %v16491_v39 = vld [vmem:[#allocation250_spill] sm:$0xff] }
 0xae8   :  { %8169 = vmatpush1.bf16.msra.mxu1 %v16456_v37  ;;  %8129 = vmatprep.subr.bf16.mxu0 %v16457_v44  ;;  %v16492_v37 = vld [vmem:[#allocation251_spill] sm:$0xff]  ;;  %v16493_v44 = vld [vmem:[#allocation252_spill] sm:$0xff] }
 0xae9   :  { %8170 = vmatprep.subr.bf16.mxu1 %v16458_v54  ;;  %v16494_v54 = vld [vmem:[#allocation253_spill] sm:$0xff] }
 0xaeb   :  { %8130 = vmatpush1.bf16.msra.mxu0 %v16459_v2  ;;  %v16495_v2 = vld [vmem:[#allocation254_spill] sm:$0xff] }
 0xaec   :  { %8171 = vmatpush1.bf16.msra.mxu1 %v16460_v14  ;;  %8131 = vmatprep.subr.bf16.mxu0 %v16461_v40  ;;  %v16496_v14 = vld [vmem:[#allocation255_spill] sm:$0xff]  ;;  %v16497_v40 = vld [vmem:[#allocation256_spill] sm:$0xff] }
 0xaed   :  { %8172 = vmatprep.subr.bf16.mxu1 %v16462_v9  ;;  %v16498_v9 = vld [vmem:[#allocation257_spill] sm:$0xff] }
 0xaef   :  { %8132 = vmatpush1.bf16.msra.mxu0 %v16463_v41  ;;  %v16499_v41 = vld [vmem:[#allocation258_spill] sm:$0xff] }
 0xaf0   :  { %8173 = vmatpush1.bf16.msra.mxu1 %v16464_v13  ;;  %8133 = vmatprep.subr.bf16.mxu0 %v16465_v45  ;;  %v16500_v13 = vld [vmem:[#allocation259_spill] sm:$0xff]  ;;  %v16501_v45 = vld [vmem:[#allocation260_spill] sm:$0xff] }
 0xaf1   :  { %8174 = vmatprep.subr.bf16.mxu1 %v16466_v25  ;;  %v16502_v25 = vld [vmem:[#allocation261_spill] sm:$0xff] }
 0xaf3   :  { %8134 = vmatpush1.bf16.msra.mxu0 %v16467_v31  ;;  %v16503_v31 = vld [vmem:[#allocation262_spill] sm:$0xff] }
 0xaf4   :  { %8175 = vmatpush1.bf16.msra.mxu1 %v16468_v3  ;;  %8135 = vmatprep.subr.bf16.mxu0 %v16469_v58  ;;  %v16504_v3 = vld [vmem:[#allocation263_spill] sm:$0xff]  ;;  %v16505_v58 = vld [vmem:[#allocation264_spill] sm:$0xff] }
 0xaf5   :  { %8176 = vmatprep.subr.bf16.mxu1 %v16470_v28  ;;  %v16506_v28 = vld [vmem:[#allocation265_spill] sm:$0xff] }
 0xaf7   :  { %8136 = vmatpush1.bf16.msra.mxu0 %v16471_v33  ;;  %v16507_v33 = vld [vmem:[#allocation266_spill] sm:$0xff] }
 0xaf8   :  { %8177 = vmatpush1.bf16.msra.mxu1 %v16472_v34  ;;  %8137 = vmatprep.subr.bf16.mxu0 %v16473_v38  ;;  %v16508_v34 = vld [vmem:[#allocation267_spill] sm:$0xff]  ;;  %v16509_v38 = vld [vmem:[#allocation268_spill] sm:$0xff] }
 0xaf9   :  { %8178 = vmatprep.subr.bf16.mxu1 %v16474_v50  ;;  %v16510_v50 = vld [vmem:[#allocation269_spill] sm:$0xff] }
 0xafb   :  { %8138 = vmatpush1.bf16.msra.mxu0 %v16475_v53  ;;  %v16511_v53 = vld [vmem:[#allocation270_spill] sm:$0xff] }
 0xafc   :  { %8179 = vmatpush1.bf16.msra.mxu1 %v16476_v16  ;;  %8139 = vmatprep.subr.bf16.mxu0 %v16477_v52  ;;  %v16512_v16 = vld [vmem:[#allocation271_spill] sm:$0xff]  ;;  %v16513_v52 = vld [vmem:[#allocation272_spill] sm:$0xff] }
 0xafd   :  { %8180 = vmatprep.subr.bf16.mxu1 %v16478_v57  ;;  %v16514_v57 = vld [vmem:[#allocation273_spill] sm:$0xff] }
 0xaff   :  { %8140 = vmatpush1.bf16.msra.mxu0 %v16479_v62 }
 0xb00   :  { %8181 = vmatpush1.bf16.msra.mxu1 %v16480_v55  ;;  %8141 = vmatprep.subr.bf16.mxu0 %v16481_v56  ;;  %v16515_v56 = vld [vmem:[#allocation274_spill] sm:$0xff] }
 0xb01   :  { %8182 = vmatprep.subr.bf16.mxu1 %v16482_v1 }
 0xb03   :  { %8142 = vmatpush2.bf16.msra.mxu0 %v16483_v23  ;;  %v16516_v23 = vld [vmem:[#allocation275_spill] sm:$0xff] }
 0xb04   :  { %8183 = vmatpush2.bf16.msra.mxu1 %v16484_v43  ;;  %8143 = vmatprep.subr.bf16.mxu0 %v16485_v48  ;;  %v16517_v43 = vld [vmem:[#allocation276_spill] sm:$0xff] }
 0xb05   :  { %8184 = vmatprep.subr.bf16.mxu1 %v16486_v51 }
 0xb07   :  { %8144 = vmatpush2.bf16.msra.mxu0 %v16487_v6 }
 0xb08   :  { %8185 = vmatpush2.bf16.msra.mxu1 %v16488_v36  ;;  %8145 = vmatprep.subr.bf16.mxu0 %v16489_v7  ;;  %v16518_v36 = vld [vmem:[#allocation278_spill] sm:$0xff] }
 0xb09   :  { %8186 = vmatprep.subr.bf16.mxu1 %v16490_v61  ;;  %v16519_v61 = vld [vmem:[#allocation277_spill] sm:$0xff] }
 0xb0b   :  { %8146 = vmatpush2.bf16.msra.mxu0 %v16491_v39  ;;  %v16520_v39 = vld [vmem:[#allocation279_spill] sm:$0xff] }
 0xb0c   :  { %8187 = vmatpush2.bf16.msra.mxu1 %v16492_v37  ;;  %8147 = vmatprep.subr.bf16.mxu0 %v16493_v44 }
 0xb0d   :  { %8188 = vmatprep.subr.bf16.mxu1 %v16494_v54 }
 0xb0f   :  { %8148 = vmatpush2.bf16.msra.mxu0 %v16495_v2  ;;  %v16521_v2 = vld [vmem:[#allocation280_spill] sm:$0xff] }
 0xb10   :  { %8189 = vmatpush2.bf16.msra.mxu1 %v16496_v14  ;;  %8149 = vmatprep.subr.bf16.mxu0 %v16497_v40  ;;  %v16522_v14 = vld [vmem:[#allocation281_spill] sm:$0xff] }
 0xb11   :  { %8190 = vmatprep.subr.bf16.mxu1 %v16498_v9 }
 0xb13   :  { %8150 = vmatpush2.bf16.msra.mxu0 %v16499_v41  ;;  %v16523_v41 = vld [vmem:[#allocation282_spill] sm:$0xff] }
 0xb14   :  { %8191 = vmatpush2.bf16.msra.mxu1 %v16500_v13  ;;  %8151 = vmatprep.subr.bf16.mxu0 %v16501_v45  ;;  %v16524_v13 = vld [vmem:[#allocation283_spill] sm:$0xff]  ;;  %v16525_v45 = vld [vmem:[#allocation284_spill] sm:$0xff] }
 0xb15   :  { %8192 = vmatprep.subr.bf16.mxu1 %v16502_v25  ;;  %v16526_v25 = vld [vmem:[#allocation285_spill] sm:$0xff] }
 0xb17   :  { %8152 = vmatpush2.bf16.msra.mxu0 %v16503_v31  ;;  %v16527_v31 = vld [vmem:[#allocation286_spill] sm:$0xff] }
 0xb18   :  { %8193 = vmatpush2.bf16.msra.mxu1 %v16504_v3  ;;  %8153 = vmatprep.subr.bf16.mxu0 %v16505_v58  ;;  %v16528_v3 = vld [vmem:[#allocation287_spill] sm:$0xff]  ;;  %v16529_v58 = vld [vmem:[#allocation288_spill] sm:$0xff] }
 0xb19   :  { %8194 = vmatprep.subr.bf16.mxu1 %v16506_v28  ;;  %v16530_v28 = vld [vmem:[#allocation289_spill] sm:$0xff] }
 0xb1b   :  { %8154 = vmatpush2.bf16.msra.mxu0 %v16507_v33  ;;  %v16531_v33 = vld [vmem:[#allocation290_spill] sm:$0xff] }
 0xb1c   :  { %8195 = vmatpush2.bf16.msra.mxu1 %v16508_v34  ;;  %8155 = vmatprep.subr.bf16.mxu0 %v16509_v38  ;;  %v16532_v34 = vld [vmem:[#allocation291_spill] sm:$0xff]  ;;  %v16533_v38 = vld [vmem:[#allocation292_spill] sm:$0xff] }
 0xb1d   :  { %8196 = vmatprep.subr.bf16.mxu1 %v16510_v50  ;;  %v16534_v50 = vld [vmem:[#allocation293_spill] sm:$0xff] }
 0xb1f   :  { %8156 = vmatpush2.bf16.msra.mxu0 %v16511_v53  ;;  %v16535_v53 = vld [vmem:[#allocation294_spill] sm:$0xff] }
 0xb20   :  { %8197 = vmatpush2.bf16.msra.mxu1 %v16512_v16  ;;  %8207 = vmatprep.subr.bf16.mxu0 %v16513_v52  ;;  %v16536_v16 = vld [vmem:[#allocation295_spill] sm:$0xff]  ;;  %v16537_v52 = vld [vmem:[#allocation296_spill] sm:$0xff] }
 0xb21   :  { %8248 = vmatprep.subr.bf16.mxu1 %v16514_v57  ;;  %v16538_v57 = vld [vmem:[#allocation297_spill] sm:$0xff] }
 0xb22   :  { %8158 = vmatmul.mubr.bf16.vlgmr.msra.gmra.mxu0 %v13412_v29  ;;  %v7913_v62 = vpop.f32.mrf.mxu0  ;;  %v7954_v55 = vpop.f32.mrf.mxu1 }
 0xb23   :  { %8199 = vmatmul.mubr.bf16.vlgmr.msra.gmra.mxu1 %v13414_v30  ;;  %v7914_v1 = vadd.f32 %v7913_v62, %v16515_v56  ;;  %8208 = vmatpush1.bf16.msra.mxu0 %v16516_v23  ;;  %v16539_v62 = vld [vmem:[#allocation298_spill] sm:$0xff]  ;;  %v16541_v56 = vld [vmem:[#allocation300_spill] sm:$0xff] }
 0xb24   :  { %8239 = vmatprep.mubr.bf16.mxu0 %v13330_v19  ;;  %8249 = vmatpush1.bf16.msra.mxu1 %v16517_v43  ;;  %v7915_v48 = vpop.f32.mrf.mxu0  ;;  %v7956_v51 = vpop.f32.mrf.mxu1  ;;  %v16543_v23 = vld [vmem:[#allocation302_spill] sm:$0xff]  ;;  %v16544_v43 = vld [vmem:[#allocation303_spill] sm:$0xff] }
 0xb25   :  { %v13562_v6 = vadd.f32 %v7954_v55, %v7914_v1  ;;  %8280 = vmatprep.mubr.bf16.mxu1 %v13332_v12  ;;  %v7916_v7 = vadd.f32 %v7915_v48, %v16518_v36  ;;  %8209 = vmatprep.subr.bf16.mxu0 %v16519_v61  ;;  %v16540_v55 = vld [vmem:[#allocation299_spill] sm:$0xff]  ;;  %v16542_v1 = vld [vmem:[#allocation301_spill] sm:$0xff]  ;;  %v16545_v48 = vld [vmem:[#allocation304_spill] sm:$0xff] }
 0xb26   :  { %8250 = vmatprep.subr.bf16.mxu1 %v16520_v39  ;;  %v7917_v37 = vpop.f32.mrf.mxu0  ;;  %v7958_v44 = vpop.f32.mrf.mxu1  ;;  %v16547_v36 = vld [vmem:[#allocation306_spill] sm:$0xff]  ;;  %v16549_v61 = vld [vmem:[#allocation308_spill] sm:$0xff]  ;;  %v16550_v39 = vld [vmem:[#allocation309_spill] sm:$0xff] }
 0xb27   :  { %v13568_v54 = vadd.f32 %v7956_v51, %v7916_v7  ;;  %8210 = vmatpush1.bf16.msra.mxu0 %v16521_v2  ;;  %v16546_v51 = vld [vmem:[#allocation305_spill] sm:$0xff]  ;;  %v16548_v7 = vld [vmem:[#allocation307_spill] sm:$0xff]  ;;  %v16551_v37 = vld [vmem:[#allocation310_spill] sm:$0xff] }
 0xb28   :  { %8251 = vmatpush1.bf16.msra.mxu1 %v16522_v14  ;;  %v7918_v40 = vpop.f32.mrf.mxu0  ;;  %v7959_v9 = vpop.f32.mrf.mxu1  ;;  %8211 = vmatprep.subr.bf16.mxu0 %v16523_v41  ;;  %v16552_v44 = vld [vmem:[#allocation311_spill] sm:$0xff]  ;;  %v16553_v2 = vld [vmem:[#allocation312_spill] sm:$0xff]  ;;  %v16554_v14 = vld [vmem:[#allocation313_spill] sm:$0xff] }
 0xb29   :  { %8252 = vmatprep.subr.bf16.mxu1 %v16524_v13  ;;  %v16555_v40 = vld [vmem:[#allocation314_spill] sm:$0xff]  ;;  %v16556_v9 = vld [vmem:[#allocation315_spill] sm:$0xff]  ;;  %v16557_v41 = vld [vmem:[#allocation316_spill] sm:$0xff] }
 0xb2a   :  { %v16558_v13 = vld [vmem:[#allocation317_spill] sm:$0xff] }
 0xb2b   :  { %8212 = vmatpush1.bf16.msra.mxu0 %v16525_v45  ;;  %v16559_v45 = vld [vmem:[#allocation318_spill] sm:$0xff] }
 0xb2c   :  { %8253 = vmatpush1.bf16.msra.mxu1 %v16526_v25  ;;  %8213 = vmatprep.subr.bf16.mxu0 %v16527_v31  ;;  %v16560_v25 = vld [vmem:[#allocation319_spill] sm:$0xff]  ;;  %v16561_v31 = vld [vmem:[#allocation320_spill] sm:$0xff] }
 0xb2d   :  { %8254 = vmatprep.subr.bf16.mxu1 %v16528_v3  ;;  %v16562_v3 = vld [vmem:[#allocation321_spill] sm:$0xff] }
 0xb2f   :  { %8214 = vmatpush1.bf16.msra.mxu0 %v16529_v58  ;;  %v16563_v58 = vld [vmem:[#allocation322_spill] sm:$0xff] }
 0xb30   :  { %8255 = vmatpush1.bf16.msra.mxu1 %v16530_v28  ;;  %8215 = vmatprep.subr.bf16.mxu0 %v16531_v33  ;;  %v16564_v28 = vld [vmem:[#allocation323_spill] sm:$0xff]  ;;  %v16565_v33 = vld [vmem:[#allocation324_spill] sm:$0xff] }
 0xb31   :  { %8256 = vmatprep.subr.bf16.mxu1 %v16532_v34  ;;  %v16566_v34 = vld [vmem:[#allocation325_spill] sm:$0xff] }
 0xb33   :  { %8216 = vmatpush1.bf16.msra.mxu0 %v16533_v38  ;;  %v16567_v38 = vld [vmem:[#allocation326_spill] sm:$0xff] }
 0xb34   :  { %8257 = vmatpush1.bf16.msra.mxu1 %v16534_v50  ;;  %8217 = vmatprep.subr.bf16.mxu0 %v16535_v53  ;;  %v16568_v50 = vld [vmem:[#allocation327_spill] sm:$0xff]  ;;  %v16569_v53 = vld [vmem:[#allocation328_spill] sm:$0xff] }
 0xb35   :  { %8258 = vmatprep.subr.bf16.mxu1 %v16536_v16  ;;  %v16570_v16 = vld [vmem:[#allocation329_spill] sm:$0xff] }
 0xb37   :  { %8218 = vmatpush1.bf16.msra.mxu0 %v16537_v52  ;;  %v16571_v52 = vld [vmem:[#allocation330_spill] sm:$0xff] }
 0xb38   :  { %8259 = vmatpush1.bf16.msra.mxu1 %v16538_v57  ;;  %8219 = vmatprep.subr.bf16.mxu0 %v16539_v62  ;;  %v16572_v57 = vld [vmem:[#allocation331_spill] sm:$0xff]  ;;  %v16573_v62 = vld [vmem:[#allocation332_spill] sm:$0xff] }
 0xb39   :  { %8260 = vmatprep.subr.bf16.mxu1 %v16540_v55  ;;  %v16574_v55 = vld [vmem:[#allocation333_spill] sm:$0xff] }
 0xb3b   :  { %8220 = vmatpush1.bf16.msra.mxu0 %v16541_v56  ;;  %v16575_v56 = vld [vmem:[#allocation334_spill] sm:$0xff] }
 0xb3c   :  { %8261 = vmatpush1.bf16.msra.mxu1 %v16542_v1  ;;  %8221 = vmatprep.subr.bf16.mxu0 %v16543_v23  ;;  %v16576_v1 = vld [vmem:[#allocation335_spill] sm:$0xff]  ;;  %v16577_v23 = vld [vmem:[#allocation336_spill] sm:$0xff] }
 0xb3d   :  { %8262 = vmatprep.subr.bf16.mxu1 %v16544_v43  ;;  %v16578_v43 = vld [vmem:[#allocation337_spill] sm:$0xff] }
 0xb3f   :  { %8222 = vmatpush1.bf16.msra.mxu0 %v16545_v48  ;;  %v16579_v48 = vld [vmem:[#allocation338_spill] sm:$0xff] }
 0xb40   :  { %8263 = vmatpush1.bf16.msra.mxu1 %v16546_v51  ;;  %8223 = vmatprep.subr.bf16.mxu0 %v16547_v36  ;;  %v16580_v51 = vld [vmem:[#allocation339_spill] sm:$0xff] }
 0xb41   :  { %8264 = vmatprep.subr.bf16.mxu1 %v16548_v7 }
 0xb43   :  { %8224 = vmatpush2.bf16.msra.mxu0 %v16549_v61 }
 0xb44   :  { %8265 = vmatpush2.bf16.msra.mxu1 %v16550_v39  ;;  %8225 = vmatprep.subr.bf16.mxu0 %v16551_v37  ;;  %v16581_v39 = vld [vmem:[#allocation340_spill] sm:$0xff]  ;;  %v16582_v37 = vld [vmem:[#allocation341_spill] sm:$0xff] }
 0xb45   :  { %8266 = vmatprep.subr.bf16.mxu1 %v16552_v44 }
 0xb47   :  { %8226 = vmatpush2.bf16.msra.mxu0 %v16553_v2 }
 0xb48   :  { %8267 = vmatpush2.bf16.msra.mxu1 %v16554_v14  ;;  %8227 = vmatprep.subr.bf16.mxu0 %v16555_v40 }
 0xb49   :  { %8268 = vmatprep.subr.bf16.mxu1 %v16556_v9 }
 0xb4b   :  { %8228 = vmatpush2.bf16.msra.mxu0 %v16557_v41 }
 0xb4c   :  { %8269 = vmatpush2.bf16.msra.mxu1 %v16558_v13  ;;  %8229 = vmatprep.subr.bf16.mxu0 %v16559_v45  ;;  %v16583_v13 = vld [vmem:[#allocation345_spill] sm:$0xff] }
 0xb4d   :  { %8270 = vmatprep.subr.bf16.mxu1 %v16560_v25 }
 0xb4f   :  { %8230 = vmatpush2.bf16.msra.mxu0 %v16561_v31  ;;  %v16584_v31 = vld [vmem:[#allocation346_spill] sm:$0xff] }
 0xb50   :  { %8271 = vmatpush2.bf16.msra.mxu1 %v16562_v3  ;;  %8231 = vmatprep.subr.bf16.mxu0 %v16563_v58  ;;  %v16585_v3 = vld [vmem:[#allocation347_spill] sm:$0xff]  ;;  %v16586_v58 = vld [vmem:[#allocation348_spill] sm:$0xff] }
 0xb51   :  { %8272 = vmatprep.subr.bf16.mxu1 %v16564_v28  ;;  %v16589_v28 = vld [vmem:[#allocation351_spill] sm:$0xff] }
 0xb53   :  { %8232 = vmatpush2.bf16.msra.mxu0 %v16565_v33  ;;  %v16591_v33 = vld [vmem:[#allocation353_spill] sm:$0xff] }
 0xb54   :  { %8273 = vmatpush2.bf16.msra.mxu1 %v16566_v34  ;;  %8233 = vmatprep.subr.bf16.mxu0 %v16567_v38  ;;  %v16593_v34 = vld [vmem:[#allocation355_spill] sm:$0xff]  ;;  %v16594_v38 = vld [vmem:[#allocation356_spill] sm:$0xff] }
 0xb55   :  { %8274 = vmatprep.subr.bf16.mxu1 %v16568_v50  ;;  %v16595_v50 = vld [vmem:[#allocation357_spill] sm:$0xff] }
 0xb57   :  { %8234 = vmatpush2.bf16.msra.mxu0 %v16569_v53  ;;  %v16596_v53 = vld [vmem:[#allocation358_spill] sm:$0xff] }
 0xb58   :  { %8275 = vmatpush2.bf16.msra.mxu1 %v16570_v16  ;;  %8235 = vmatprep.subr.bf16.mxu0 %v16571_v52  ;;  %v16597_v16 = vld [vmem:[#allocation359_spill] sm:$0xff]  ;;  %v16598_v52 = vld [vmem:[#allocation360_spill] sm:$0xff] }
 0xb59   :  { %8276 = vmatprep.subr.bf16.mxu1 %v16572_v57  ;;  %v16599_v57 = vld [vmem:[#allocation361_spill] sm:$0xff] }
 0xb5b   :  { %8236 = vmatpush2.bf16.msra.mxu0 %v16573_v62  ;;  %v16600_v62 = vld [vmem:[#allocation362_spill] sm:$0xff] }
 0xb5c   :  { %8277 = vmatpush2.bf16.msra.mxu1 %v16574_v55  ;;  %8237 = vmatprep.subr.bf16.mxu0 %v16575_v56  ;;  %v16601_v55 = vld [vmem:[#allocation363_spill] sm:$0xff]  ;;  %v16602_v56 = vld [vmem:[#allocation364_spill] sm:$0xff] }
 0xb5d   :  { %8278 = vmatprep.subr.bf16.mxu1 %v16576_v1  ;;  %v16603_v1 = vld [vmem:[#allocation365_spill] sm:$0xff] }
 0xb5f   :  { %8238 = vmatpush2.bf16.msra.mxu0 %v16577_v23  ;;  %v16604_v23 = vld [vmem:[#allocation366_spill] sm:$0xff] }
 0xb60   :  { %8279 = vmatpush2.bf16.msra.mxu1 %v16578_v43  ;;  %8289 = vmatprep.subr.bf16.mxu0 %v16579_v48  ;;  %v16605_v43 = vld [vmem:[#allocation367_spill] sm:$0xff]  ;;  %v16606_v48 = vld [vmem:[#allocation368_spill] sm:$0xff] }
 0xb61   :  { %8330 = vmatprep.subr.bf16.mxu1 %v16580_v51  ;;  %v16607_v51 = vld [vmem:[#allocation369_spill] sm:$0xff] }
 0xb62   :  { %v7995_v36 = vpop.f32.mrf.mxu0  ;;  %v8036_v7 = vpop.f32.mrf.mxu1  ;;  %8240 = vmatmul.mubr.bf16.vlgmr.msra.gmra.mxu0 %v13334_v47 }
 0xb63   :  { %v7996_v61 = vadd.f32 %v7995_v36, %v13562_v6  ;;  %8281 = vmatmul.mubr.bf16.vlgmr.msra.gmra.mxu1 %v13336_v8  ;;  %8290 = vmatpush1.bf16.msra.mxu0 %v16581_v39  ;;  %v16608_v36 = vld [vmem:[#allocation370_spill] sm:$0xff]  ;;  %v16611_v39 = vld [vmem:[#allocation373_spill] sm:$0xff] }
 0xb64   :  { %8321 = vmatprep.mubr.bf16.mxu0 %v13406_v59  ;;  %8331 = vmatpush1.bf16.msra.mxu1 %v16582_v37  ;;  %v7997_v44 = vpop.f32.mrf.mxu0  ;;  %v8038_v2 = vpop.f32.mrf.mxu1  ;;  %v16612_v37 = vld [vmem:[#allocation374_spill] sm:$0xff] }
 0xb65   :  { %v13636_v14 = vadd.f32 %v8036_v7, %v7996_v61  ;;  %8362 = vmatprep.mubr.bf16.mxu1 %v13408_v17  ;;  %v7998_v40 = vadd.f32 %v7997_v44, %v13568_v54  ;;  %8291 = vmatprep.subr.bf16.mxu0 %v15963_v18  ;;  %v16587_v54 = vld [vmem:[#allocation349_spill] sm:$0xff]  ;;  %v16588_v18 = vld [vmem:[#allocation350_spill] sm:$0xff]  ;;  %v16609_v7 = vld [vmem:[#allocation371_spill] sm:$0xff] }
 0xb66   :  { %v7999_v9 = vpop.f32.mrf.mxu0  ;;  %v8040_v6 = vpop.f32.mrf.mxu1  ;;  %8332 = vmatprep.subr.bf16.mxu1 %v15964_v42  ;;  %v16590_v42 = vld [vmem:[#allocation352_spill] sm:$0xff]  ;;  %v16613_v44 = vld [vmem:[#allocation375_spill] sm:$0xff] }
 0xb67   :  { %v13642_v41 = vadd.f32 %v8038_v2, %v7998_v40  ;;  %8292 = vmatpush1.bf16.msra.mxu0 %v15965_v10  ;;  %v16592_v10 = vld [vmem:[#allocation354_spill] sm:$0xff]  ;;  %v16610_v61 = vld [vmem:[#allocation372_spill] sm:$0xff]  ;;  %v16615_v40 = vld [vmem:[#allocation377_spill] sm:$0xff] }
 0xb68   :  { %8333 = vmatpush1.bf16.msra.mxu1 %v16583_v13  ;;  %v8000_v45 = vpop.f32.mrf.mxu0  ;;  %v8041_v25 = vpop.f32.mrf.mxu1  ;;  %8293 = vmatprep.subr.bf16.mxu0 %v16584_v31  ;;  %v16614_v2 = vld [vmem:[#allocation376_spill] sm:$0xff]  ;;  %v16616_v9 = vld [vmem:[#allocation378_spill] sm:$0xff]  ;;  %v16617_v6 = vld [vmem:[#allocation379_spill] sm:$0xff] }
 0xb69   :  { %8334 = vmatprep.subr.bf16.mxu1 %v16585_v3  ;;  %v16618_v13 = vld [vmem:[#allocation380_spill] sm:$0xff]  ;;  %v16619_v45 = vld [vmem:[#allocation381_spill] sm:$0xff]  ;;  %v16620_v25 = vld [vmem:[#allocation382_spill] sm:$0xff] }
 0xb6a   :  { %v16621_v31 = vld [vmem:[#allocation383_spill] sm:$0xff]  ;;  %v16622_v3 = vld [vmem:[#allocation384_spill] sm:$0xff] }
 0xb6b   :  { %8294 = vmatpush1.bf16.msra.mxu0 %v16586_v58  ;;  %v16623_v58 = vld [vmem:[#allocation385_spill] sm:$0xff] }
 0xb6c   :  { %8335 = vmatpush1.bf16.msra.mxu1 %v16587_v54  ;;  %8295 = vmatprep.subr.bf16.mxu0 %v16588_v18  ;;  %v16624_v54 = vld [vmem:[#allocation386_spill] sm:$0xff]  ;;  %v16625_v18 = vld [vmem:[#allocation387_spill] sm:$0xff] }
 0xb6d   :  { %8336 = vmatprep.subr.bf16.mxu1 %v16589_v28  ;;  %v16626_v28 = vld [vmem:[#allocation388_spill] sm:$0xff] }
 0xb6f   :  { %8296 = vmatpush1.bf16.msra.mxu0 %v16590_v42  ;;  %v16627_v42 = vld [vmem:[#allocation389_spill] sm:$0xff] }
 0xb70   :  { %8337 = vmatpush1.bf16.msra.mxu1 %v16591_v33  ;;  %8297 = vmatprep.subr.bf16.mxu0 %v16592_v10  ;;  %v16628_v33 = vld [vmem:[#allocation390_spill] sm:$0xff]  ;;  %v16629_v10 = vld [vmem:[#allocation391_spill] sm:$0xff] }
 0xb71   :  { %8338 = vmatprep.subr.bf16.mxu1 %v16593_v34  ;;  %v16630_v34 = vld [vmem:[#allocation392_spill] sm:$0xff] }
 0xb73   :  { %8298 = vmatpush1.bf16.msra.mxu0 %v16594_v38  ;;  %v16631_v38 = vld [vmem:[#allocation393_spill] sm:$0xff] }
 0xb74   :  { %8339 = vmatpush1.bf16.msra.mxu1 %v16595_v50  ;;  %8299 = vmatprep.subr.bf16.mxu0 %v16596_v53  ;;  %v16632_v50 = vld [vmem:[#allocation394_spill] sm:$0xff]  ;;  %v16633_v53 = vld [vmem:[#allocation395_spill] sm:$0xff] }
 0xb75   :  { %8340 = vmatprep.subr.bf16.mxu1 %v16597_v16  ;;  %v16634_v16 = vld [vmem:[#allocation396_spill] sm:$0xff] }
 0xb77   :  { %8300 = vmatpush1.bf16.msra.mxu0 %v16598_v52  ;;  %v16635_v52 = vld [vmem:[#allocation397_spill] sm:$0xff] }
 0xb78   :  { %8341 = vmatpush1.bf16.msra.mxu1 %v16599_v57  ;;  %8301 = vmatprep.subr.bf16.mxu0 %v16600_v62  ;;  %v16636_v57 = vld [vmem:[#allocation398_spill] sm:$0xff]  ;;  %v16637_v62 = vld [vmem:[#allocation399_spill] sm:$0xff] }
 0xb79   :  { %8342 = vmatprep.subr.bf16.mxu1 %v16601_v55  ;;  %v16638_v55 = vld [vmem:[#allocation400_spill] sm:$0xff] }
 0xb7b   :  { %8302 = vmatpush1.bf16.msra.mxu0 %v16602_v56  ;;  %v16639_v56 = vld [vmem:[#allocation401_spill] sm:$0xff] }
 0xb7c   :  { %8343 = vmatpush1.bf16.msra.mxu1 %v16603_v1  ;;  %8303 = vmatprep.subr.bf16.mxu0 %v16604_v23  ;;  %v16640_v1 = vld [vmem:[#allocation402_spill] sm:$0xff]  ;;  %v16641_v23 = vld [vmem:[#allocation403_spill] sm:$0xff] }
 0xb7d   :  { %8344 = vmatprep.subr.bf16.mxu1 %v16605_v43 }
 0xb7f   :  { %8304 = vmatpush1.bf16.msra.mxu0 %v16606_v48  ;;  %v16642_v48 = vld [vmem:[#allocation404_spill] sm:$0xff] }
 0xb80   :  { %8345 = vmatpush1.bf16.msra.mxu1 %v16607_v51  ;;  %8305 = vmatprep.subr.bf16.mxu0 %v16608_v36 }
 0xb81   :  { %8346 = vmatprep.subr.bf16.mxu1 %v16609_v7  ;;  %v16643_v7 = vld [vmem:[#allocation405_spill] sm:$0xff] }
 0xb83   :  { %8306 = vmatpush2.bf16.msra.mxu0 %v16610_v61 }
 0xb84   :  { %8347 = vmatpush2.bf16.msra.mxu1 %v16611_v39  ;;  %8307 = vmatprep.subr.bf16.mxu0 %v16612_v37  ;;  %v16644_v37 = vld [vmem:[#allocation408_spill] sm:$0xff] }
 0xb85   :  { %8348 = vmatprep.subr.bf16.mxu1 %v16613_v44 }
 0xb87   :  { %8308 = vmatpush2.bf16.msra.mxu0 %v16614_v2 }
 0xb88   :  { %8349 = vmatpush2.bf16.msra.mxu1 %v16615_v40  ;;  %8309 = vmatprep.subr.bf16.mxu0 %v16616_v9  ;;  %v16645_v9 = vld [vmem:[#allocation409_spill] sm:$0xff] }
 0xb89   :  { %8350 = vmatprep.subr.bf16.mxu1 %v16617_v6 }
 0xb8b   :  { %8310 = vmatpush2.bf16.msra.mxu0 %v16618_v13 }
 0xb8c   :  { %8351 = vmatpush2.bf16.msra.mxu1 %v16619_v45  ;;  %8311 = vmatprep.subr.bf16.mxu0 %v16620_v25  ;;  %v16648_v25 = vld [vmem:[#allocation413_spill] sm:$0xff] }
 0xb8d   :  { %8352 = vmatprep.subr.bf16.mxu1 %v16621_v31  ;;  %v16649_v31 = vld [vmem:[#allocation414_spill] sm:$0xff] }
 0xb8f   :  { %8312 = vmatpush2.bf16.msra.mxu0 %v16622_v3  ;;  %v16651_v3 = vld [vmem:[#allocation416_spill] sm:$0xff] }
 0xb90   :  { %8353 = vmatpush2.bf16.msra.mxu1 %v16623_v58  ;;  %8313 = vmatprep.subr.bf16.mxu0 %v16624_v54  ;;  %v16652_v58 = vld [vmem:[#allocation417_spill] sm:$0xff]  ;;  %v16653_v54 = vld [vmem:[#allocation418_spill] sm:$0xff] }
 0xb91   :  { %8354 = vmatprep.subr.bf16.mxu1 %v16625_v18  ;;  %v16656_v18 = vld [vmem:[#allocation421_spill] sm:$0xff] }
 0xb93   :  { %8314 = vmatpush2.bf16.msra.mxu0 %v16626_v28  ;;  %v16657_v28 = vld [vmem:[#allocation422_spill] sm:$0xff] }
 0xb94   :  { %8355 = vmatpush2.bf16.msra.mxu1 %v16627_v42  ;;  %8315 = vmatprep.subr.bf16.mxu0 %v16628_v33  ;;  %v16658_v42 = vld [vmem:[#allocation423_spill] sm:$0xff]  ;;  %v16659_v33 = vld [vmem:[#allocation424_spill] sm:$0xff] }
 0xb95   :  { %8356 = vmatprep.subr.bf16.mxu1 %v16629_v10  ;;  %v16660_v10 = vld [vmem:[#allocation425_spill] sm:$0xff] }
 0xb97   :  { %8316 = vmatpush2.bf16.msra.mxu0 %v16630_v34  ;;  %v16661_v34 = vld [vmem:[#allocation426_spill] sm:$0xff] }
 0xb98   :  { %8357 = vmatpush2.bf16.msra.mxu1 %v16631_v38  ;;  %8317 = vmatprep.subr.bf16.mxu0 %v16632_v50  ;;  %v16662_v38 = vld [vmem:[#allocation427_spill] sm:$0xff]  ;;  %v16663_v50 = vld [vmem:[#allocation428_spill] sm:$0xff] }
 0xb99   :  { %8358 = vmatprep.subr.bf16.mxu1 %v16633_v53  ;;  %v16664_v53 = vld [vmem:[#allocation429_spill] sm:$0xff] }
 0xb9b   :  { %8318 = vmatpush2.bf16.msra.mxu0 %v16634_v16  ;;  %v16665_v16 = vld [vmem:[#allocation430_spill] sm:$0xff] }
 0xb9c   :  { %8359 = vmatpush2.bf16.msra.mxu1 %v16635_v52  ;;  %8319 = vmatprep.subr.bf16.mxu0 %v16636_v57  ;;  %v16666_v52 = vld [vmem:[#allocation431_spill] sm:$0xff]  ;;  %v16667_v57 = vld [vmem:[#allocation432_spill] sm:$0xff] }
 0xb9d   :  { %8360 = vmatprep.subr.bf16.mxu1 %v16637_v62  ;;  %v16668_v62 = vld [vmem:[#allocation433_spill] sm:$0xff] }
 0xb9f   :  { %8320 = vmatpush2.bf16.msra.mxu0 %v16638_v55  ;;  %v16669_v55 = vld [vmem:[#allocation434_spill] sm:$0xff] }
 0xba0   :  { %8361 = vmatpush2.bf16.msra.mxu1 %v16639_v56  ;;  %8371 = vmatprep.subr.bf16.mxu0 %v16640_v1  ;;  %v16670_v56 = vld [vmem:[#allocation435_spill] sm:$0xff]  ;;  %v16671_v1 = vld [vmem:[#allocation436_spill] sm:$0xff] }
 0xba1   :  { %8412 = vmatprep.subr.bf16.mxu1 %v16641_v23  ;;  %v16672_v23 = vld [vmem:[#allocation437_spill] sm:$0xff] }
 0xba2   :  { %v8077_v43 = vpop.f32.mrf.mxu0  ;;  %8322 = vmatmul.mubr.bf16.vlgmr.msra.gmra.mxu0 %v13412_v29 }
 0xba3   :  { %v8078_v51 = vadd.f32 %v8077_v43, %v16642_v48  ;;  %v8118_v36 = vpop.f32.mrf.mxu1  ;;  %8363 = vmatmul.mubr.bf16.vlgmr.msra.gmra.mxu1 %v13414_v30  ;;  %8372 = vmatpush1.bf16.msra.mxu0 %v16643_v7  ;;  %v16673_v43 = vld [vmem:[#allocation438_spill] sm:$0xff]  ;;  %v16674_v48 = vld [vmem:[#allocation439_spill] sm:$0xff] }
 0xba4   :  { %8403 = vmatprep.mubr.bf16.mxu0 %v13330_v19  ;;  %8413 = vmatpush1.bf16.msra.mxu1 %v16027_v46  ;;  %v8079_v61 = vpop.f32.mrf.mxu0  ;;  %v16646_v19 = vld [vmem:[#allocation411_spill] sm:$0xff]  ;;  %v16677_v7 = vld [vmem:[#allocation442_spill] sm:$0xff] }
 0xba5   :  { %v13710_v39 = vadd.f32 %v8118_v36, %v8078_v51  ;;  %8444 = vmatprep.mubr.bf16.mxu1 %v13332_v12  ;;  %v8080_v44 = vadd.f32 %v8079_v61, %v16644_v37  ;;  %v8120_v2 = vpop.f32.mrf.mxu1  ;;  %8373 = vmatprep.subr.bf16.mxu0 %v16028_v32  ;;  %v16647_v12 = vld [vmem:[#allocation412_spill] sm:$0xff]  ;;  %v16650_v32 = vld [vmem:[#allocation415_spill] sm:$0xff]  ;;  %v16676_v36 = vld [vmem:[#allocation441_spill] sm:$0xff] }
 0xba6   :  { %v8081_v40 = vpop.f32.mrf.mxu0  ;;  %8414 = vmatprep.subr.bf16.mxu1 %v16645_v9  ;;  %v16675_v51 = vld [vmem:[#allocation440_spill] sm:$0xff]  ;;  %v16678_v61 = vld [vmem:[#allocation443_spill] sm:$0xff] }
 0xba7   :  { %v13716_v6 = vadd.f32 %v8120_v2, %v8080_v44  ;;  %v8122_v13 = vpop.f32.mrf.mxu1  ;;  %8374 = vmatpush1.bf16.msra.mxu0 %v16029_v5  ;;  %v16654_v5 = vld [vmem:[#allocation419_spill] sm:$0xff]  ;;  %v16679_v37 = vld [vmem:[#allocation444_spill] sm:$0xff]  ;;  %v16680_v44 = vld [vmem:[#allocation445_spill] sm:$0xff] }
 0xba8   :  { %8415 = vmatpush1.bf16.msra.mxu1 %v11658_v27  ;;  %v8082_v46 = vpop.f32.mrf.mxu0  ;;  %8375 = vmatprep.subr.bf16.mxu0 %v16646_v19  ;;  %v16655_v27 = vld [vmem:[#allocation420_spill] sm:$0xff]  ;;  %v16681_v2 = vld [vmem:[#allocation446_spill] sm:$0xff]  ;;  %v16682_v40 = vld [vmem:[#allocation447_spill] sm:$0xff] }
 0xba9   :  { %v8123_v45 = vpop.f32.mrf.mxu1  ;;  %8416 = vmatprep.subr.bf16.mxu1 %v16647_v12  ;;  %v16683_v9 = vld [vmem:[#allocation448_spill] sm:$0xff]  ;;  %v16684_v13 = vld [vmem:[#allocation449_spill] sm:$0xff]  ;;  %v16685_v46 = vld [vmem:[#allocation451_spill] sm:$0xff] }
 0xbaa   :  { %v16686_v19 = vld [vmem:[#allocation452_spill] sm:$0xff]  ;;  %v16687_v45 = vld [vmem:[#allocation453_spill] sm:$0xff]  ;;  %v16688_v12 = vld [vmem:[#allocation454_spill] sm:$0xff] }
 0xbab   :  { %8376 = vmatpush1.bf16.msra.mxu0 %v16648_v25  ;;  %v16689_v25 = vld [vmem:[#allocation455_spill] sm:$0xff] }
 0xbac   :  { %8417 = vmatpush1.bf16.msra.mxu1 %v16649_v31  ;;  %8377 = vmatprep.subr.bf16.mxu0 %v16650_v32  ;;  %v16690_v31 = vld [vmem:[#allocation456_spill] sm:$0xff]  ;;  %v16691_v32 = vld [vmem:[#allocation457_spill] sm:$0xff] }
 0xbad   :  { %8418 = vmatprep.subr.bf16.mxu1 %v16651_v3  ;;  %v16692_v3 = vld [vmem:[#allocation458_spill] sm:$0xff] }
 0xbaf   :  { %8378 = vmatpush1.bf16.msra.mxu0 %v16652_v58  ;;  %v16693_v58 = vld [vmem:[#allocation460_spill] sm:$0xff] }
 0xbb0   :  { %8419 = vmatpush1.bf16.msra.mxu1 %v16653_v54  ;;  %8379 = vmatprep.subr.bf16.mxu0 %v16654_v5  ;;  %v16695_v54 = vld [vmem:[#allocation462_spill] sm:$0xff]  ;;  %v16696_v5 = vld [vmem:[#allocation463_spill] sm:$0xff] }
 0xbb1   :  { %8420 = vmatprep.subr.bf16.mxu1 %v16655_v27  ;;  %v16697_v27 = vld [vmem:[#allocation464_spill] sm:$0xff] }
 0xbb3   :  { %8380 = vmatpush1.bf16.msra.mxu0 %v16656_v18  ;;  %v16698_v18 = vld [vmem:[#allocation465_spill] sm:$0xff] }
 0xbb4   :  { %8421 = vmatpush1.bf16.msra.mxu1 %v16657_v28  ;;  %8381 = vmatprep.subr.bf16.mxu0 %v16658_v42  ;;  %v16699_v28 = vld [vmem:[#allocation466_spill] sm:$0xff]  ;;  %v16700_v42 = vld [vmem:[#allocation467_spill] sm:$0xff] }
 0xbb5   :  { %8422 = vmatprep.subr.bf16.mxu1 %v16659_v33  ;;  %v16701_v33 = vld [vmem:[#allocation468_spill] sm:$0xff] }
 0xbb7   :  { %8382 = vmatpush1.bf16.msra.mxu0 %v16660_v10 }
 0xbb8   :  { %8423 = vmatpush1.bf16.msra.mxu1 %v16661_v34  ;;  %8383 = vmatprep.subr.bf16.mxu0 %v16662_v38  ;;  %v16702_v38 = vld [vmem:[#allocation469_spill] sm:$0xff] }
 0xbb9   :  { %8424 = vmatprep.subr.bf16.mxu1 %v16663_v50  ;;  %v16703_v50 = vld [vmem:[#allocation470_spill] sm:$0xff] }
 0xbbb   :  { %8384 = vmatpush1.bf16.msra.mxu0 %v16664_v53 }
 0xbbc   :  { %8425 = vmatpush1.bf16.msra.mxu1 %v16665_v16  ;;  %8385 = vmatprep.subr.bf16.mxu0 %v16666_v52 }
 0xbbd   :  { %8426 = vmatprep.subr.bf16.mxu1 %v16667_v57 }
 0xbbf   :  { %8386 = vmatpush1.bf16.msra.mxu0 %v16668_v62  ;;  %v16706_v62 = vld [vmem:[#allocation474_spill] sm:$0xff] }
 0xbc0   :  { %8427 = vmatpush1.bf16.msra.mxu1 %v16669_v55  ;;  %8387 = vmatprep.subr.bf16.mxu0 %v16670_v56  ;;  %v16707_v56 = vld [vmem:[#allocation475_spill] sm:$0xff] }
 0xbc1   :  { %8428 = vmatprep.subr.bf16.mxu1 %v16671_v1  ;;  %v16708_v1 = vld [vmem:[#allocation476_spill] sm:$0xff] }
 0xbc3   :  { %8388 = vmatpush2.bf16.msra.mxu0 %v16672_v23  ;;  %v16710_v23 = vld [vmem:[#allocation478_spill] sm:$0xff] }
 0xbc4   :  { %8429 = vmatpush2.bf16.msra.mxu1 %v16673_v43  ;;  %8389 = vmatprep.subr.bf16.mxu0 %v16674_v48  ;;  %v16712_v43 = vld [vmem:[#allocation480_spill] sm:$0xff]  ;;  %v16713_v48 = vld [vmem:[#allocation481_spill] sm:$0xff] }
 0xbc5   :  { %8430 = vmatprep.subr.bf16.mxu1 %v16675_v51  ;;  %v16714_v51 = vld [vmem:[#allocation482_spill] sm:$0xff] }
 0xbc7   :  { %8390 = vmatpush2.bf16.msra.mxu0 %v16676_v36  ;;  %v16716_v36 = vld [vmem:[#allocation484_spill] sm:$0xff] }
 0xbc8   :  { %8431 = vmatpush2.bf16.msra.mxu1 %v16677_v7  ;;  %8391 = vmatprep.subr.bf16.mxu0 %v16678_v61  ;;  %v16717_v7 = vld [vmem:[#allocation485_spill] sm:$0xff]  ;;  %v16718_v61 = vld [vmem:[#allocation486_spill] sm:$0xff] }
 0xbc9   :  { %8432 = vmatprep.subr.bf16.mxu1 %v16679_v37  ;;  %v16719_v37 = vld [vmem:[#allocation487_spill] sm:$0xff] }
 0xbcb   :  { %8392 = vmatpush2.bf16.msra.mxu0 %v16680_v44  ;;  %v16720_v44 = vld [vmem:[#allocation488_spill] sm:$0xff] }
 0xbcc   :  { %8433 = vmatpush2.bf16.msra.mxu1 %v16681_v2  ;;  %8393 = vmatprep.subr.bf16.mxu0 %v16682_v40  ;;  %v16721_v2 = vld [vmem:[#allocation489_spill] sm:$0xff]  ;;  %v16722_v40 = vld [vmem:[#allocation490_spill] sm:$0xff] }
 0xbcd   :  { %8434 = vmatprep.subr.bf16.mxu1 %v16683_v9  ;;  %v16723_v9 = vld [vmem:[#allocation491_spill] sm:$0xff] }
 0xbcf   :  { %8394 = vmatpush2.bf16.msra.mxu0 %v16684_v13  ;;  %v16724_v13 = vld [vmem:[#allocation492_spill] sm:$0xff] }
 0xbd0   :  { %8435 = vmatpush2.bf16.msra.mxu1 %v16069_v4  ;;  %8395 = vmatprep.subr.bf16.mxu0 %v16685_v46  ;;  %v16694_v4 = vld [vmem:[#allocation461_spill] sm:$0xff] }
 0xbd1   :  { %8436 = vmatprep.subr.bf16.mxu1 %v16686_v19  ;;  %v16725_v46 = vld [vmem:[#allocation493_spill] sm:$0xff]  ;;  %v16726_v19 = vld [vmem:[#allocation494_spill] sm:$0xff] }
 0xbd3   :  { %8396 = vmatpush2.bf16.msra.mxu0 %v16687_v45  ;;  %v16727_v45 = vld [vmem:[#allocation495_spill] sm:$0xff] }
 0xbd4   :  { %8437 = vmatpush2.bf16.msra.mxu1 %v16688_v12  ;;  %8397 = vmatprep.subr.bf16.mxu0 %v16689_v25  ;;  %v16728_v12 = vld [vmem:[#allocation496_spill] sm:$0xff]  ;;  %v16729_v25 = vld [vmem:[#allocation497_spill] sm:$0xff] }
 0xbd5   :  { %8438 = vmatprep.subr.bf16.mxu1 %v16690_v31  ;;  %v16730_v31 = vld [vmem:[#allocation498_spill] sm:$0xff] }
 0xbd7   :  { %8398 = vmatpush2.bf16.msra.mxu0 %v16691_v32  ;;  %v16731_v32 = vld [vmem:[#allocation499_spill] sm:$0xff] }
 0xbd8   :  { %8439 = vmatpush2.bf16.msra.mxu1 %v16692_v3  ;;  %8399 = vmatprep.subr.bf16.mxu0 %v16078_v63  ;;  %v16732_v3 = vld [vmem:[#allocation500_spill] sm:$0xff] }
 0xbd9   :  { %8440 = vmatprep.subr.bf16.mxu1 %v16693_v58  ;;  %v16733_v58 = vld [vmem:[#allocation501_spill] sm:$0xff] }
 0xbdb   :  { %8400 = vmatpush2.bf16.msra.mxu0 %v16694_v4  ;;  %v16734_v4 = vld [vmem:[#allocation502_spill] sm:$0xff] }
 0xbdc   :  { %8441 = vmatpush2.bf16.msra.mxu1 %v16695_v54  ;;  %8401 = vmatprep.subr.bf16.mxu0 %v16696_v5  ;;  %v16735_v54 = vld [vmem:[#allocation503_spill] sm:$0xff]  ;;  %v16736_v5 = vld [vmem:[#allocation504_spill] sm:$0xff] }
 0xbdd   :  { %8442 = vmatprep.subr.bf16.mxu1 %v16697_v27  ;;  %v16737_v27 = vld [vmem:[#allocation508_spill] sm:$0xff] }
 0xbdf   :  { %8402 = vmatpush2.bf16.msra.mxu0 %v16698_v18  ;;  %v16738_v18 = vld [vmem:[#allocation509_spill] sm:$0xff] }
 0xbe0   :  { %8443 = vmatpush2.bf16.msra.mxu1 %v16699_v28  ;;  %8453 = vmatprep.subr.bf16.mxu0 %v16700_v42  ;;  %v16739_v28 = vld [vmem:[#allocation511_spill] sm:$0xff]  ;;  %v16740_v42 = vld [vmem:[#allocation512_spill] sm:$0xff] }
 0xbe1   :  { %8494 = vmatprep.subr.bf16.mxu1 %v16701_v33  ;;  %v16741_v33 = vld [vmem:[#allocation513_spill] sm:$0xff] }
 0xbe2   :  { %v8159_v10 = vpop.f32.mrf.mxu0  ;;  %8404 = vmatmul.mubr.bf16.vlgmr.msra.gmra.mxu0 %v13334_v47 }
 0xbe3   :  { %v8160_v63 = vadd.f32 %v8159_v10, %v13710_v39  ;;  %v8200_v34 = vpop.f32.mrf.mxu1  ;;  %8445 = vmatmul.mubr.bf16.vlgmr.msra.gmra.mxu1 %v13336_v8  ;;  %8454 = vmatpush1.bf16.msra.mxu0 %v16702_v38  ;;  %v16704_v39 = vld [vmem:[#allocation472_spill] sm:$0xff]  ;;  %v16705_v8 = vld [vmem:[#allocation473_spill] sm:$0xff]  ;;  %v16742_v10 = vld [vmem:[#allocation514_spill] sm:$0xff] }
 0xbe4   :  { %8485 = vmatprep.mubr.bf16.mxu0 %v13406_v59  ;;  %8495 = vmatpush1.bf16.msra.mxu1 %v16703_v50  ;;  %v8161_v53 = vpop.f32.mrf.mxu0  ;;  %v16748_v38 = vld [vmem:[#allocation520_spill] sm:$0xff]  ;;  %v16750_v50 = vld [vmem:[#allocation522_spill] sm:$0xff] }
 0xbe5   :  { %v13784_v16 = vadd.f32 %v8200_v34, %v8160_v63  ;;  %8526 = vmatprep.mubr.bf16.mxu1 %v13408_v17  ;;  %v13787_v52 = vpop.f32.mrf.mxu1  ;;  %8455 = vmatprep.subr.bf16.mxu0 %v16089_v49  ;;  %v16709_v17 = vld [vmem:[#allocation477_spill] sm:$0xff]  ;;  %v16711_v49 = vld [vmem:[#allocation479_spill] sm:$0xff] }
 0xbe6   :  { %v8163_v47 = vpop.f32.mrf.mxu0  ;;  %8496 = vmatprep.subr.bf16.mxu1 %v16704_v39  ;;  %v16743_v63 = vld [vmem:[#allocation515_spill] sm:$0xff]  ;;  %v8162_v39 = vadd.f32 %v8161_v53, %v13716_v6  ;;  %v8536_v6 = vpack.c.bf16 %v13642_v41, %v13642_v41 }
 0xbe7   :  { %v8204_v57 = vpop.f32.mrf.mxu1  ;;  %8456 = vmatpush1.bf16.msra.mxu0 %v16705_v8  ;;  %v16747_v34 = vld [vmem:[#allocation519_spill] sm:$0xff]  ;;  %v16753_v8 = vld [vmem:[#allocation525_spill] sm:$0xff] }
 0xbe8   :  { %8497 = vmatpush1.bf16.msra.mxu1 %v11862_v35  ;;  %v8164_v59 = vpop.f32.mrf.mxu0  ;;  %8457 = vmatprep.subr.bf16.mxu0 %v16706_v62  ;;  %v16715_v35 = vld [vmem:[#allocation483_spill] sm:$0xff]  ;;  %v16752_v57 = vld [vmem:[#allocation524_spill] sm:$0xff] }
 0xbe9   :  { %v8205_v55 = vpop.f32.mrf.mxu1  ;;  %8498 = vmatprep.subr.bf16.mxu1 %v16707_v56  ;;  %v16751_v47 = vld [vmem:[#allocation523_spill] sm:$0xff]  ;;  %v16754_v59 = vld [vmem:[#allocation526_spill] sm:$0xff]  ;;  %v16756_v56 = vld [vmem:[#allocation528_spill] sm:$0xff] }
 0xbea   :  { %v16755_v62 = vld [vmem:[#allocation527_spill] sm:$0xff]  ;;  %v8203_v55 = vadd.f32 %v13787_v52, %v8162_v39  ;;  %v9997_v39 = vld [vmem:[#allocation8 + $0xe4] ss:$8 sps:$4 sm:$0xff]  }
 0xbeb   :  { %8458 = vmatpush1.bf16.msra.mxu0 %v16708_v1  ;;  %v16757_v1 = vld [vmem:[#allocation529_spill] sm:$0xff]  ;;  %v9963_v52 = vld [vmem:[#allocation8 + $0x70] ss:$8 sps:$4 sm:$0xff]  }
 0xbec   :  { %8499 = vmatpush1.bf16.msra.mxu1 %v16709_v17  ;;  %8459 = vmatprep.subr.bf16.mxu0 %v16710_v23  ;;  %v9961_v17 = vld [vmem:[#allocation8 + $0x74] ss:$8 sps:$4 sm:$0xff]  }
 0xbed   :  { %8500 = vmatprep.subr.bf16.mxu1 %v16711_v49  ;;  %v9962_v23 = vld [vmem:[#allocation8 + $0x174] ss:$8 sps:$4 sm:$0xff]   ;;  %v8538_v49 = vpack.c.bf16 %v8203_v55, %v8203_v55 }
 0xbee   :  { %v10002_v55 = vld [vmem:[#allocation8 + $0x1d4] ss:$8 sps:$4 sm:$0xff]  }
 0xbef   :  { %8460 = vmatpush1.bf16.msra.mxu0 %v16712_v43  ;;  %v16758_v43 = vld [vmem:[#allocation530_spill] sm:$0xff] }
 0xbf0   :  { %8501 = vmatpush1.bf16.msra.mxu1 %v16713_v48  ;;  %8461 = vmatprep.subr.bf16.mxu0 %v16714_v51 }
 0xbf1   :  { %8502 = vmatprep.subr.bf16.mxu1 %v16715_v35  ;;  %v9964_v35 = vld [vmem:[#allocation8 + $0x170] ss:$8 sps:$4 sm:$0xff]  }
 0xbf3   :  { %8462 = vmatpush1.bf16.msra.mxu0 %v16716_v36 }
 0xbf4   :  { %8503 = vmatpush1.bf16.msra.mxu1 %v16717_v7  ;;  %8463 = vmatprep.subr.bf16.mxu0 %v16718_v61  ;;  %v9965_v61 = vld [vmem:[#allocation8 + $0x64] ss:$8 sps:$4 sm:$0xff]  }
 0xbf5   :  { %8504 = vmatprep.subr.bf16.mxu1 %v16719_v37  ;;  %v9966_v37 = vld [vmem:[#allocation8 + $0x164] ss:$8 sps:$4 sm:$0xff]  }
 0xbf7   :  { %8464 = vmatpush1.bf16.msra.mxu0 %v16720_v44 }
 0xbf8   :  { %8505 = vmatpush1.bf16.msra.mxu1 %v16721_v2  ;;  %8465 = vmatprep.subr.bf16.mxu0 %v16722_v40  ;;  %v9967_v2 = vld [vmem:[#allocation8 + $0x60] ss:$8 sps:$4 sm:$0xff]  }
 0xbf9   :  { %8506 = vmatprep.subr.bf16.mxu1 %v16723_v9  ;;  %v9969_v9 = vld [vmem:[#allocation8 + $0x54] ss:$8 sps:$4 sm:$0xff]  }
 0xbfb   :  { %8466 = vmatpush1.bf16.msra.mxu0 %v16724_v13 }
 0xbfc   :  { %8507 = vmatpush1.bf16.msra.mxu1 %v16725_v46  ;;  %8467 = vmatprep.subr.bf16.mxu0 %v16726_v19  ;;  %v9970_v46 = vld [vmem:[#allocation8 + $0x154] ss:$8 sps:$4 sm:$0xff]   ;;  %v9971_v19 = vld [vmem:[#allocation8 + $0x50] ss:$8 sps:$4 sm:$0xff]  }
 0xbfd   :  { %8508 = vmatprep.subr.bf16.mxu1 %v16727_v45  ;;  %v9972_v45 = vld [vmem:[#allocation8 + $0x150] ss:$8 sps:$4 sm:$0xff]  }
 0xbff   :  { %8468 = vmatpush1.bf16.msra.mxu0 %v16728_v12  ;;  %v9973_v12 = vld [vmem:[#allocation8 + $0x44] ss:$8 sps:$4 sm:$0xff]  }
 0xc00   :  { %8509 = vmatpush1.bf16.msra.mxu1 %v16729_v25  ;;  %8469 = vmatprep.subr.bf16.mxu0 %v16730_v31  ;;  %v9974_v25 = vld [vmem:[#allocation8 + $0x144] ss:$8 sps:$4 sm:$0xff]   ;;  %v9975_v31 = vld [vmem:[#allocation8 + $0x40] ss:$8 sps:$4 sm:$0xff]  }
 0xc01   :  { %8510 = vmatprep.subr.bf16.mxu1 %v16731_v32  ;;  %v9976_v32 = vld [vmem:[#allocation8 + $0x140] ss:$8 sps:$4 sm:$0xff]  }
 0xc03   :  { %8470 = vmatpush2.bf16.msra.mxu0 %v16732_v3  ;;  %v9977_v3 = vld [vmem:[#allocation8 + $0x34] ss:$8 sps:$4 sm:$0xff]  }
 0xc04   :  { %8511 = vmatpush2.bf16.msra.mxu1 %v16733_v58  ;;  %8471 = vmatprep.subr.bf16.mxu0 %v16734_v4  ;;  %v9978_v58 = vld [vmem:[#allocation8 + $0x134] ss:$8 sps:$4 sm:$0xff]   ;;  %v9979_v4 = vld [vmem:[#allocation8 + $0x30] ss:$8 sps:$4 sm:$0xff]  }
 0xc05   :  { %8512 = vmatprep.subr.bf16.mxu1 %v16735_v54  ;;  %v9980_v54 = vld [vmem:[#allocation8 + $0x130] ss:$8 sps:$4 sm:$0xff]  }
 0xc07   :  { %8472 = vmatpush2.bf16.msra.mxu0 %v16736_v5  ;;  %v9981_v5 = vld [vmem:[#allocation8 + $0x24] ss:$8 sps:$4 sm:$0xff]  }
 0xc08   :  { %8513 = vmatpush2.bf16.msra.mxu1 %v16123_v11  ;;  %8473 = vmatprep.subr.bf16.mxu0 %v16124_v22  ;;  %v16744_v11 = vld [vmem:[#allocation516_spill] sm:$0xff]  ;;  %v16745_v22 = vld [vmem:[#allocation517_spill] sm:$0xff] }
 0xc09   :  { %8514 = vmatprep.subr.bf16.mxu1 %v16125_v21  ;;  %v16746_v21 = vld [vmem:[#allocation518_spill] sm:$0xff] }
 0xc0b   :  { %8474 = vmatpush2.bf16.msra.mxu0 %v16737_v27  ;;  %v9982_v27 = vld [vmem:[#allocation8 + $0x124] ss:$8 sps:$4 sm:$0xff]  }
 0xc0c   :  { %8515 = vmatpush2.bf16.msra.mxu1 %v16738_v18  ;;  %8475 = vmatprep.subr.bf16.mxu0 %v16128_v24  ;;  %v16749_v24 = vld [vmem:[#allocation521_spill] sm:$0xff] }
 0xc0d   :  { %8516 = vmatprep.subr.bf16.mxu1 %v16739_v28  ;;  %v9983_v18 = vld [vmem:[#allocation8 + $0x20] ss:$8 sps:$4 sm:$0xff]  }
 0xc0e   :  { %v9984_v28 = vld [vmem:[#allocation8 + $0x120] ss:$8 sps:$4 sm:$0xff]  }
 0xc0f   :  { %8476 = vmatpush2.bf16.msra.mxu0 %v16740_v42  ;;  %v9985_v42 = vld [vmem:[#allocation8 + $0x14] ss:$8 sps:$4 sm:$0xff]  }
 0xc10   :  { %8517 = vmatpush2.bf16.msra.mxu1 %v16741_v33  ;;  %8477 = vmatprep.subr.bf16.mxu0 %v16742_v10  ;;  %v9986_v33 = vld [vmem:[#allocation8 + $0x114] ss:$8 sps:$4 sm:$0xff]   ;;  %v9987_v10 = vld [vmem:[#allocation8 + $0x10] ss:$8 sps:$4 sm:$0xff]  }
 0xc11   :  { %8518 = vmatprep.subr.bf16.mxu1 %v16743_v63  ;;  %v9988_v63 = vld [vmem:[#allocation8 + $0x110] ss:$8 sps:$4 sm:$0xff]  }
 0xc13   :  { %8478 = vmatpush2.bf16.msra.mxu0 %v16744_v11  ;;  %v9989_v11 = vld [vmem:[#allocation8 + $0x4] ss:$8 sps:$4 sm:$0xff]  }
 0xc14   :  { %8519 = vmatpush2.bf16.msra.mxu1 %v16745_v22  ;;  %8479 = vmatprep.subr.bf16.mxu0 %v16746_v21  ;;  %v9990_v22 = vld [vmem:[#allocation8 + $0x104] ss:$8 sps:$4 sm:$0xff]   ;;  %v9991_v21 = vld [vmem:[#allocation8] ss:$8 sps:$4 sm:$0xff]  }
 0xc15   :  { %8520 = vmatprep.subr.bf16.mxu1 %v16747_v34  ;;  %v9992_v34 = vld [vmem:[#allocation8 + $0x100] ss:$8 sps:$4 sm:$0xff]  }
 0xc17   :  { %8480 = vmatpush2.bf16.msra.mxu0 %v16748_v38  ;;  %v9993_v38 = vld [vmem:[#allocation8 + $0xf4] ss:$8 sps:$4 sm:$0xff]  }
 0xc18   :  { %8521 = vmatpush2.bf16.msra.mxu1 %v16749_v24  ;;  %8481 = vmatprep.subr.bf16.mxu0 %v16750_v50  ;;  %v9994_v24 = vld [vmem:[#allocation8 + $0x1f4] ss:$8 sps:$4 sm:$0xff]   ;;  %v9995_v50 = vld [vmem:[#allocation8 + $0xf0] ss:$8 sps:$4 sm:$0xff]  }
 0xc19   :  { %8522 = vmatprep.subr.bf16.mxu1 %v16751_v47  ;;  %v9996_v47 = vld [vmem:[#allocation8 + $0x1f0] ss:$8 sps:$4 sm:$0xff]  }
 0xc1b   :  { %8482 = vmatpush2.bf16.msra.mxu0 %v16752_v57  ;;  %v9998_v57 = vld [vmem:[#allocation8 + $0x1e4] ss:$8 sps:$4 sm:$0xff]  }
 0xc1c   :  { %8523 = vmatpush2.bf16.msra.mxu1 %v16753_v8  ;;  %8483 = vmatprep.subr.bf16.mxu0 %v16754_v59  ;;  %v9999_v8 = vld [vmem:[#allocation8 + $0xe0] ss:$8 sps:$4 sm:$0xff]  }
 0xc1d   :  { %8524 = vmatprep.subr.bf16.mxu1 %v16755_v62  ;;  %v10000_v59 = vld [vmem:[#allocation8 + $0x1e0] ss:$8 sps:$4 sm:$0xff]   ;;  %v10001_v62 = vld [vmem:[#allocation8 + $0xd4] ss:$8 sps:$4 sm:$0xff]  }
 0xc1f   :  { %8484 = vmatpush2.bf16.msra.mxu0 %v16756_v56  ;;  %v10003_v56 = vld [vmem:[#allocation8 + $0xd0] ss:$8 sps:$4 sm:$0xff]  }
 0xc20   :  { %8525 = vmatpush2.bf16.msra.mxu1 %v16757_v1  ;;  %8543 = vmatprep.subr.bf16.mxu0 %v9961_v17  ;;  %v10004_v1 = vld [vmem:[#allocation8 + $0x1d0] ss:$8 sps:$4 sm:$0xff]   ;;  %v10005_v17 = vld [vmem:[#allocation8 + $0xc4] ss:$8 sps:$4 sm:$0xff]  }
 0xc21   :  { %8584 = vmatprep.subr.bf16.mxu1 %v9962_v23  ;;  %v10006_v23 = vld [vmem:[#allocation8 + $0x1c4] ss:$8 sps:$4 sm:$0xff]  }
 0xc22   :  { %v8241_v53 = vpop.f32.mrf.mxu0  ;;  %8486 = vmatmul.mubr.bf16.vlgmr.msra.gmra.mxu0 %v13412_v29 }
 0xc23   :  { %v8242_v48 = vadd.f32 %v8241_v53, %v16758_v43  ;;  %v8282_v51 = vpop.f32.mrf.mxu1  ;;  %8527 = vmatmul.mubr.bf16.vlgmr.msra.gmra.mxu1 %v13414_v30  ;;  %8544 = vmatpush1.bf16.msra.mxu0 %v9963_v52  ;;  %v9968_v30 = vld [vmem:[#allocation8 + $0x160] ss:$8 sps:$4 sm:$0xff]   ;;  %v10010_v43 = vld [vmem:[#allocation8 + $0x1b4] ss:$8 sps:$4 sm:$0xff]   ;;  %v10013_v52 = vld [vmem:[#allocation8 + $0xa4] ss:$8 sps:$4 sm:$0xff]  }
 0xc24   :  { %8575 = vmatprep.mubr.bf16.mxu0 %v8536_v6  ;;  %8585 = vmatpush1.bf16.msra.mxu1 %v9964_v35  ;;  %v13856_v36 = vpop.f32.mrf.mxu0  ;;  %v10007_v6 = vld [vmem:[#allocation8 + $0xc0] ss:$8 sps:$4 sm:$0xff]   ;;  %v10014_v35 = vld [vmem:[#allocation8 + $0x1a4] ss:$8 sps:$4 sm:$0xff]  }
 0xc25   :  { %v13858_v7 = vadd.f32 %v8282_v51, %v8242_v48  ;;  %8616 = vmatprep.mubr.bf16.mxu1 %v8538_v49  ;;  %v13860_v41 = vpop.f32.mrf.mxu1  ;;  %8545 = vmatprep.subr.bf16.mxu0 %v9965_v61  ;;  %v10008_v53 = vld [vmem:[#allocation8 + $0x1c0] ss:$8 sps:$4 sm:$0xff]   ;;  %v10009_v49 = vld [vmem:[#allocation8 + $0xb4] ss:$8 sps:$4 sm:$0xff]   ;;  %v10011_v48 = vld [vmem:[#allocation8 + $0xb0] ss:$8 sps:$4 sm:$0xff]  }
 0xc26   :  { %v8245_v29 = vpop.f32.mrf.mxu0  ;;  %8586 = vmatprep.subr.bf16.mxu1 %v9966_v37  ;;  %v10012_v51 = vld [vmem:[#allocation8 + $0x1b0] ss:$8 sps:$4 sm:$0xff]   ;;  %v10015_v61 = vld [vmem:[#allocation8 + $0xa0] ss:$8 sps:$4 sm:$0xff]   ;;  %v10017_v37 = vld [vmem:[#allocation8 + $0x94] ss:$8 sps:$4 sm:$0xff]  }
 0xc27   :  { %v8286_v44 = vpop.f32.mrf.mxu1  ;;  %8546 = vmatpush1.bf16.msra.mxu0 %v9967_v2  ;;  %v10016_v29 = vld [vmem:[#allocation8 + $0x1a0] ss:$8 sps:$4 sm:$0xff]   ;;  %v10019_v2 = vld [vmem:[#allocation8 + $0x90] ss:$8 sps:$4 sm:$0xff]  }
 0xc28   :  { %8587 = vmatpush1.bf16.msra.mxu1 %v9968_v30  ;;  %v8246_v40 = vpop.f32.mrf.mxu0  ;;  %8547 = vmatprep.subr.bf16.mxu0 %v9969_v9  ;;  %v10018_v44 = vld [vmem:[#allocation8 + $0x194] ss:$8 sps:$4 sm:$0xff]   ;;  %v10020_v30 = vld [vmem:[#allocation8 + $0x190] ss:$8 sps:$4 sm:$0xff]   ;;  %v10022_v9 = vld [vmem:[#allocation8 + $0x184] ss:$8 sps:$4 sm:$0xff]  }
 0xc29   :  { %v8287_v13 = vpop.f32.mrf.mxu1  ;;  %8588 = vmatprep.subr.bf16.mxu1 %v9970_v46  ;;  %v10021_v40 = vld [vmem:[#allocation8 + $0x84] ss:$8 sps:$4 sm:$0xff]  }
 0xc2a   :  { %v16759_v13 = vld [vmem:[#allocation531_spill] sm:$0xff] }
 0xc2b   :  { %8548 = vmatpush1.bf16.msra.mxu0 %v9971_v19  ;;  %v8244_v46 = vadd.f32 %v13856_v36, %v16759_v13  ;;  %v10023_v19 = vld [vmem:[#allocation8 + $0x80] ss:$8 sps:$4 sm:$0xff]  }
 0xc2c   :  { %8589 = vmatpush1.bf16.msra.mxu1 %v9972_v45  ;;  %8549 = vmatprep.subr.bf16.mxu0 %v9973_v12  ;;  %v8535_v45 = vpack.c.bf16 %v13636_v14, %v13636_v14  ;;  %v10024_v12 = vld [vmem:[#allocation8 + $0x180] ss:$8 sps:$4 sm:$0xff]  }
 0xc2d   :  { %8590 = vmatprep.subr.bf16.mxu1 %v9974_v25  ;;  %v10025_v25 = vld [vmem:[#allocation8 + $0x274] ss:$8 sps:$4 sm:$0xff]   ;;  %v10065_v13 = vld [vmem:[#allocation8 + $0x3e0] ss:$8 sps:$4 sm:$0xff]  }
 0xc2f   :  { %8550 = vmatpush1.bf16.msra.mxu0 %v9975_v31  ;;  %v8537_v31 = vpack.c.bf16 %v13784_v16, %v13784_v16  ;;  %v10030_v16 = vld [vmem:[#allocation8 + $0x364] ss:$8 sps:$4 sm:$0xff]  }
 0xc30   :  { %8591 = vmatpush1.bf16.msra.mxu1 %v9976_v32  ;;  %8551 = vmatprep.subr.bf16.mxu0 %v9977_v3  ;;  %v10026_v32 = vld [vmem:[#allocation8 + $0x374] ss:$8 sps:$4 sm:$0xff]  }
 0xc31   :  { %8592 = vmatprep.subr.bf16.mxu1 %v9978_v58  ;;  %v8285_v58 = vadd.f32 %v13860_v41, %v8244_v46  ;;  %v10066_v46 = vld [vmem:[#allocation8 + $0x3d4] ss:$8 sps:$4 sm:$0xff]  }
 0xc33   :  { %8552 = vmatpush1.bf16.msra.mxu0 %v9979_v4  ;;  %v10027_v4 = vld [vmem:[#allocation8 + $0x270] ss:$8 sps:$4 sm:$0xff]  }
 0xc34   :  { %8593 = vmatpush1.bf16.msra.mxu1 %v9980_v54  ;;  %8553 = vmatprep.subr.bf16.mxu0 %v9981_v5  ;;  %v10028_v54 = vld [vmem:[#allocation8 + $0x264] ss:$8 sps:$4 sm:$0xff]   ;;  %v10029_v5 = vld [vmem:[#allocation8 + $0x370] ss:$8 sps:$4 sm:$0xff]  }
 0xc35   :  { %8594 = vmatprep.subr.bf16.mxu1 %v9982_v27 }
 0xc37   :  { %8554 = vmatpush1.bf16.msra.mxu0 %v9983_v18 }
 0xc38   :  { %8595 = vmatpush1.bf16.msra.mxu1 %v9984_v28  ;;  %8555 = vmatprep.subr.bf16.mxu0 %v9985_v42 }
 0xc39   :  { %8596 = vmatprep.subr.bf16.mxu1 %v9986_v33 }
 0xc3b   :  { %8556 = vmatpush1.bf16.msra.mxu0 %v9987_v10  ;;  %v10031_v10 = vld [vmem:[#allocation8 + $0x260] ss:$8 sps:$4 sm:$0xff]  }
 0xc3c   :  { %8597 = vmatpush1.bf16.msra.mxu1 %v9988_v63  ;;  %8557 = vmatprep.subr.bf16.mxu0 %v9989_v11  ;;  %v10032_v63 = vld [vmem:[#allocation8 + $0x254] ss:$8 sps:$4 sm:$0xff]   ;;  %v10033_v11 = vld [vmem:[#allocation8 + $0x360] ss:$8 sps:$4 sm:$0xff]  }
 0xc3d   :  { %8598 = vmatprep.subr.bf16.mxu1 %v9990_v22 }
 0xc3f   :  { %8558 = vmatpush1.bf16.msra.mxu0 %v9991_v21 }
 0xc40   :  { %8599 = vmatpush1.bf16.msra.mxu1 %v9992_v34  ;;  %8559 = vmatprep.subr.bf16.mxu0 %v9993_v38  ;;  %v10034_v34 = vld [vmem:[#allocation8 + $0x354] ss:$8 sps:$4 sm:$0xff]   ;;  %v10035_v38 = vld [vmem:[#allocation8 + $0x250] ss:$8 sps:$4 sm:$0xff]  }
 0xc41   :  { %8600 = vmatprep.subr.bf16.mxu1 %v9994_v24  ;;  %v10036_v24 = vld [vmem:[#allocation8 + $0x244] ss:$8 sps:$4 sm:$0xff]  }
 0xc43   :  { %8560 = vmatpush2.bf16.msra.mxu0 %v9995_v50  ;;  %v10037_v50 = vld [vmem:[#allocation8 + $0x350] ss:$8 sps:$4 sm:$0xff]  }
 0xc44   :  { %8601 = vmatpush2.bf16.msra.mxu1 %v9996_v47  ;;  %8561 = vmatprep.subr.bf16.mxu0 %v9997_v39  ;;  %v10038_v47 = vld [vmem:[#allocation8 + $0x344] ss:$8 sps:$4 sm:$0xff]   ;;  %v10039_v39 = vld [vmem:[#allocation8 + $0x240] ss:$8 sps:$4 sm:$0xff]  }
 0xc45   :  { %8602 = vmatprep.subr.bf16.mxu1 %v9998_v57  ;;  %v10040_v57 = vld [vmem:[#allocation8 + $0x234] ss:$8 sps:$4 sm:$0xff]  }
 0xc47   :  { %8562 = vmatpush2.bf16.msra.mxu0 %v9999_v8  ;;  %v10041_v8 = vld [vmem:[#allocation8 + $0x340] ss:$8 sps:$4 sm:$0xff]  }
 0xc48   :  { %8603 = vmatpush2.bf16.msra.mxu1 %v10000_v59  ;;  %8563 = vmatprep.subr.bf16.mxu0 %v10001_v62  ;;  %v10042_v59 = vld [vmem:[#allocation8 + $0x334] ss:$8 sps:$4 sm:$0xff]   ;;  %v10043_v62 = vld [vmem:[#allocation8 + $0x230] ss:$8 sps:$4 sm:$0xff]  }
 0xc49   :  { %8604 = vmatprep.subr.bf16.mxu1 %v10002_v55  ;;  %v10044_v55 = vld [vmem:[#allocation8 + $0x224] ss:$8 sps:$4 sm:$0xff]  }
 0xc4b   :  { %8564 = vmatpush2.bf16.msra.mxu0 %v10003_v56  ;;  %v10045_v56 = vld [vmem:[#allocation8 + $0x330] ss:$8 sps:$4 sm:$0xff]  }
 0xc4c   :  { %8605 = vmatpush2.bf16.msra.mxu1 %v10004_v1  ;;  %8565 = vmatprep.subr.bf16.mxu0 %v10005_v17  ;;  %v10046_v1 = vld [vmem:[#allocation8 + $0x324] ss:$8 sps:$4 sm:$0xff]   ;;  %v10047_v17 = vld [vmem:[#allocation8 + $0x220] ss:$8 sps:$4 sm:$0xff]  }
 0xc4d   :  { %8606 = vmatprep.subr.bf16.mxu1 %v10006_v23  ;;  %v10048_v23 = vld [vmem:[#allocation8 + $0x214] ss:$8 sps:$4 sm:$0xff]  }
 0xc4f   :  { %8566 = vmatpush2.bf16.msra.mxu0 %v10007_v6  ;;  %v10049_v6 = vld [vmem:[#allocation8 + $0x320] ss:$8 sps:$4 sm:$0xff]  }
 0xc50   :  { %8607 = vmatpush2.bf16.msra.mxu1 %v10008_v53  ;;  %8567 = vmatprep.subr.bf16.mxu0 %v10009_v49  ;;  %v10050_v53 = vld [vmem:[#allocation8 + $0x314] ss:$8 sps:$4 sm:$0xff]   ;;  %v10051_v49 = vld [vmem:[#allocation8 + $0x210] ss:$8 sps:$4 sm:$0xff]  }
 0xc51   :  { %8608 = vmatprep.subr.bf16.mxu1 %v10010_v43  ;;  %v10052_v43 = vld [vmem:[#allocation8 + $0x204] ss:$8 sps:$4 sm:$0xff]  }
 0xc53   :  { %8568 = vmatpush2.bf16.msra.mxu0 %v10011_v48  ;;  %v10053_v48 = vld [vmem:[#allocation8 + $0x310] ss:$8 sps:$4 sm:$0xff]  }
 0xc54   :  { %8609 = vmatpush2.bf16.msra.mxu1 %v10012_v51  ;;  %8569 = vmatprep.subr.bf16.mxu0 %v10013_v52  ;;  %v10054_v51 = vld [vmem:[#allocation8 + $0x304] ss:$8 sps:$4 sm:$0xff]   ;;  %v10055_v52 = vld [vmem:[#allocation8 + $0x200] ss:$8 sps:$4 sm:$0xff]  }
 0xc55   :  { %8610 = vmatprep.subr.bf16.mxu1 %v10014_v35  ;;  %v10056_v35 = vld [vmem:[#allocation8 + $0x2f4] ss:$8 sps:$4 sm:$0xff]  }
 0xc57   :  { %8570 = vmatpush2.bf16.msra.mxu0 %v10015_v61  ;;  %v10057_v61 = vld [vmem:[#allocation8 + $0x300] ss:$8 sps:$4 sm:$0xff]  }
 0xc58   :  { %8611 = vmatpush2.bf16.msra.mxu1 %v10016_v29  ;;  %8571 = vmatprep.subr.bf16.mxu0 %v10017_v37  ;;  %v10058_v29 = vld [vmem:[#allocation8 + $0x3f4] ss:$8 sps:$4 sm:$0xff]   ;;  %v10059_v37 = vld [vmem:[#allocation8 + $0x2f0] ss:$8 sps:$4 sm:$0xff]  }
 0xc59   :  { %8612 = vmatprep.subr.bf16.mxu1 %v10018_v44  ;;  %v10060_v44 = vld [vmem:[#allocation8 + $0x2e4] ss:$8 sps:$4 sm:$0xff]  }
 0xc5b   :  { %8572 = vmatpush2.bf16.msra.mxu0 %v10019_v2  ;;  %v10061_v2 = vld [vmem:[#allocation8 + $0x3f0] ss:$8 sps:$4 sm:$0xff]  }
 0xc5c   :  { %8613 = vmatpush2.bf16.msra.mxu1 %v10020_v30  ;;  %8573 = vmatprep.subr.bf16.mxu0 %v10021_v40  ;;  %v10062_v30 = vld [vmem:[#allocation8 + $0x3e4] ss:$8 sps:$4 sm:$0xff]   ;;  %v10063_v40 = vld [vmem:[#allocation8 + $0x2e0] ss:$8 sps:$4 sm:$0xff]  }
 0xc5d   :  { %8614 = vmatprep.subr.bf16.mxu1 %v10022_v9  ;;  %v10064_v9 = vld [vmem:[#allocation8 + $0x2d4] ss:$8 sps:$4 sm:$0xff]  }
 0xc5f   :  { %8574 = vmatpush2.bf16.msra.mxu0 %v10023_v19  ;;  %v10067_v19 = vld [vmem:[#allocation8 + $0x2d0] ss:$8 sps:$4 sm:$0xff]  }
 0xc60   :  { %8615 = vmatpush2.bf16.msra.mxu1 %v10024_v12  ;;  %8625 = vmatprep.subr.bf16.mxu0 %v10025_v25  ;;  %v10069_v12 = vld [vmem:[#allocation8 + $0x3d0] ss:$8 sps:$4 sm:$0xff]   ;;  %v10070_v25 = vld [vmem:[#allocation8 + $0x3c4] ss:$8 sps:$4 sm:$0xff]  }
 0xc61   :  { %8666 = vmatprep.subr.bf16.mxu1 %v10026_v32  ;;  %v10072_v32 = vld [vmem:[#allocation8 + $0x2b4] ss:$8 sps:$4 sm:$0xff]  }
 0xc62   :  { %v13868_v3 = vpop.f32.mrf.mxu0  ;;  %8576 = vmatmul.mubr.bf16.vlgmr.msra.gmra.mxu0 %v8535_v45  ;;  %v10068_v45 = vld [vmem:[#allocation8 + $0x2c4] ss:$8 sps:$4 sm:$0xff]  }
 0xc63   :  { %v13871_v36 = vpop.f32.mrf.mxu1  ;;  %8617 = vmatmul.mubr.bf16.vlgmr.msra.gmra.mxu1 %v8537_v31  ;;  %8626 = vmatpush1.bf16.msra.mxu0 %v10027_v4  ;;  %v10071_v31 = vld [vmem:[#allocation8 + $0x2c0] ss:$8 sps:$4 sm:$0xff]   ;;  %v10074_v4 = vld [vmem:[#allocation8 + $0x3b4] ss:$8 sps:$4 sm:$0xff]  }
 0xc64   :  { %v8325_v14 = vpop.f32.mrf.mxu0  ;;  %8627 = vmatprep.subr.bf16.mxu0 %v10028_v54  ;;  %8667 = vmatpush1.bf16.msra.mxu1 %v10029_v5  ;;  %v10076_v54 = vld [vmem:[#allocation8 + $0x2a4] ss:$8 sps:$4 sm:$0xff]   ;;  %v10077_v5 = vld [vmem:[#allocation8 + $0x3b0] ss:$8 sps:$4 sm:$0xff]  }
 0xc65   :  { %v8326_v27 = vadd.f32 %v8325_v14, %v8285_v58  ;;  %v8366_v18 = vpop.f32.mrf.mxu1  ;;  %8668 = vmatprep.subr.bf16.mxu1 %v10030_v16  ;;  %v10073_v58 = vld [vmem:[#allocation8 + $0x3c0] ss:$8 sps:$4 sm:$0xff]   ;;  %v10075_v14 = vld [vmem:[#allocation8 + $0x2b0] ss:$8 sps:$4 sm:$0xff]   ;;  %v8324_v16 = vadd.f32 %v13868_v3, %v13858_v7 }
 0xc66   :  { %v8327_v28 = vpop.f32.mrf.mxu0  ;;  %v10088_v7 = vld [vmem:[#allocation8 + $0x380] ss:$8 sps:$4 sm:$0xff]  }
 0xc67   :  { %v8367_v42 = vadd.f32 %v8366_v18, %v8326_v27  ;;  %v8368_v33 = vpop.f32.mrf.mxu1  ;;  %8628 = vmatpush1.bf16.msra.mxu0 %v10031_v10  ;;  %v10078_v27 = vld [vmem:[#allocation8 + $0x3a4] ss:$8 sps:$4 sm:$0xff]   ;;  %v10079_v18 = vld [vmem:[#allocation8 + $0x2a0] ss:$8 sps:$4 sm:$0xff]   ;;  %v10080_v28 = vld [vmem:[#allocation8 + $0x294] ss:$8 sps:$4 sm:$0xff]  }
 0xc68   :  { %v8328_v41 = vpop.f32.mrf.mxu0  ;;  %8629 = vmatprep.subr.bf16.mxu0 %v10032_v63  ;;  %8669 = vmatpush1.bf16.msra.mxu1 %v10033_v11  ;;  %v10082_v33 = vld [vmem:[#allocation8 + $0x394] ss:$8 sps:$4 sm:$0xff]   ;;  %v10083_v10 = vld [vmem:[#allocation8 + $0x290] ss:$8 sps:$4 sm:$0xff]   ;;  %v10084_v63 = vld [vmem:[#allocation8 + $0x284] ss:$8 sps:$4 sm:$0xff]  }
 0xc69   :  { %v8540_v22 = vpack.c.bf16 %v8367_v42, %v8367_v42  ;;  %v8369_v21 = vpop.f32.mrf.mxu1  ;;  %8670 = vmatprep.subr.bf16.mxu1 %v10034_v34  ;;  %v10081_v42 = vld [vmem:[#allocation8 + $0x3a0] ss:$8 sps:$4 sm:$0xff]   ;;  %v8365_v41 = vadd.f32 %v13871_v36, %v8324_v16  ;;  %v10085_v11 = vld [vmem:[#allocation8 + $0x390] ss:$8 sps:$4 sm:$0xff]  }
 0xc6a   :  { %v10087_v21 = vld [vmem:[#allocation8 + $0x280] ss:$8 sps:$4 sm:$0xff]  }
 0xc6b   :  { %8630 = vmatpush1.bf16.msra.mxu0 %v10035_v38  ;;  %8657 = vmatprep.mubr.bf16.mxu0 %v8540_v22  ;;  %v10086_v22 = vld [vmem:[#allocation8 + $0x384] ss:$8 sps:$4 sm:$0xff]   ;;  %v8539_v34 = vpack.c.bf16 %v8365_v41, %v8365_v41 }
 0xc6c   :  { %8631 = vmatprep.subr.bf16.mxu0 %v10036_v24  ;;  %8671 = vmatpush1.bf16.msra.mxu1 %v10037_v50 }
 0xc6d   :  { %8672 = vmatprep.subr.bf16.mxu1 %v10038_v47 }
 0xc6f   :  { %8632 = vmatpush1.bf16.msra.mxu0 %v10039_v39 }
 0xc70   :  { %8633 = vmatprep.subr.bf16.mxu0 %v10040_v57  ;;  %8673 = vmatpush1.bf16.msra.mxu1 %v10041_v8 }
 0xc71   :  { %8674 = vmatprep.subr.bf16.mxu1 %v10042_v59 }
 0xc73   :  { %8634 = vmatpush1.bf16.msra.mxu0 %v10043_v62 }
 0xc74   :  { %8635 = vmatprep.subr.bf16.mxu0 %v10044_v55  ;;  %8675 = vmatpush1.bf16.msra.mxu1 %v10045_v56 }
 0xc75   :  { %8676 = vmatprep.subr.bf16.mxu1 %v10046_v1 }
 0xc77   :  { %8636 = vmatpush1.bf16.msra.mxu0 %v10047_v17 }
 0xc78   :  { %8637 = vmatprep.subr.bf16.mxu0 %v10048_v23  ;;  %8677 = vmatpush1.bf16.msra.mxu1 %v10049_v6 }
 0xc79   :  { %8678 = vmatprep.subr.bf16.mxu1 %v10050_v53 }
 0xc7b   :  { %8638 = vmatpush1.bf16.msra.mxu0 %v10051_v49 }
 0xc7c   :  { %8639 = vmatprep.subr.bf16.mxu0 %v10052_v43  ;;  %8679 = vmatpush1.bf16.msra.mxu1 %v10053_v48 }
 0xc7d   :  { %8680 = vmatprep.subr.bf16.mxu1 %v10054_v51 }
 0xc7f   :  { %8640 = vmatpush1.bf16.msra.mxu0 %v10055_v52 }
 0xc80   :  { %8641 = vmatprep.subr.bf16.mxu0 %v10056_v35  ;;  %8681 = vmatpush1.bf16.msra.mxu1 %v10057_v61 }
 0xc81   :  { %8682 = vmatprep.subr.bf16.mxu1 %v10058_v29 }
 0xc83   :  { %8642 = vmatpush2.bf16.msra.mxu0 %v10059_v37 }
 0xc84   :  { %8643 = vmatprep.subr.bf16.mxu0 %v10060_v44  ;;  %8683 = vmatpush2.bf16.msra.mxu1 %v10061_v2 }
 0xc85   :  { %8684 = vmatprep.subr.bf16.mxu1 %v10062_v30 }
 0xc87   :  { %8644 = vmatpush2.bf16.msra.mxu0 %v10063_v40 }
 0xc88   :  { %8645 = vmatprep.subr.bf16.mxu0 %v10064_v9  ;;  %8685 = vmatpush2.bf16.msra.mxu1 %v10065_v13 }
 0xc89   :  { %8686 = vmatprep.subr.bf16.mxu1 %v10066_v46 }
 0xc8b   :  { %8646 = vmatpush2.bf16.msra.mxu0 %v10067_v19 }
 0xc8c   :  { %8647 = vmatprep.subr.bf16.mxu0 %v10068_v45  ;;  %8687 = vmatpush2.bf16.msra.mxu1 %v10069_v12 }
 0xc8d   :  { %8688 = vmatprep.subr.bf16.mxu1 %v10070_v25 }
 0xc8f   :  { %8648 = vmatpush2.bf16.msra.mxu0 %v10071_v31 }
 0xc90   :  { %8649 = vmatprep.subr.bf16.mxu0 %v10072_v32  ;;  %8689 = vmatpush2.bf16.msra.mxu1 %v10073_v58 }
 0xc91   :  { %8690 = vmatprep.subr.bf16.mxu1 %v10074_v4 }
 0xc93   :  { %8650 = vmatpush2.bf16.msra.mxu0 %v10075_v14 }
 0xc94   :  { %8651 = vmatprep.subr.bf16.mxu0 %v10076_v54  ;;  %8691 = vmatpush2.bf16.msra.mxu1 %v10077_v5 }
 0xc95   :  { %8692 = vmatprep.subr.bf16.mxu1 %v10078_v27 }
 0xc97   :  { %8652 = vmatpush2.bf16.msra.mxu0 %v10079_v18 }
 0xc98   :  { %8653 = vmatprep.subr.bf16.mxu0 %v10080_v28  ;;  %8693 = vmatpush2.bf16.msra.mxu1 %v10081_v42 }
 0xc99   :  { %8694 = vmatprep.subr.bf16.mxu1 %v10082_v33 }
 0xc9b   :  { %8654 = vmatpush2.bf16.msra.mxu0 %v10083_v10 }
 0xc9c   :  { %8655 = vmatprep.subr.bf16.mxu0 %v10084_v63  ;;  %8695 = vmatpush2.bf16.msra.mxu1 %v10085_v11 }
 0xc9d   :  { %8696 = vmatprep.subr.bf16.mxu1 %v10086_v22 }
 0xc9f   :  { %8656 = vmatpush2.bf16.msra.mxu0 %v10087_v21 }
 0xca0   :  { %8697 = vmatpush2.bf16.msra.mxu1 %v10088_v7 }
 0xca2   :  { %v8405_v3 = vpop.f32.mrf.mxu0  ;;  %8658 = vmatmul.mubr.bf16.vlgmr.msra.gmra.mxu0 %v8539_v34 }
 0xca3   :  { %v8446_v38 = vpop.f32.mrf.mxu1  ;;  %v8406_v8 = vadd.f32 %v8405_v3, %v16172_v15 }
 0xca4   :  { %v8407_v24 = vpop.f32.mrf.mxu0 }
 0xca5   :  { %v8448_v50 = vpop.f32.mrf.mxu1  ;;  %v8408_v59 = vadd.f32 %v8407_v24, %v16173_v20  ;;  %v8447_v62 = vadd.f32 %v8446_v38, %v8406_v8 }
 0xca6   :  { %v8409_v47 = vpop.f32.mrf.mxu0 }
 0xca7   :  { %v8450_v39 = vpop.f32.mrf.mxu1  ;;  %v8449_v56 = vadd.f32 %v8448_v50, %v8408_v59 }
 0xca8   :  { %v8410_v57 = vpop.f32.mrf.mxu0 }
 0xca9   :  { %v8451_v36 = vpop.f32.mrf.mxu1 }
 0xce2   :  { %v8487_v55 = vpop.f32.mrf.mxu0 }
 0xce3   :  { %v8488_v1 = vadd.f32 %v8487_v55, %v8447_v62  ;;  %v8528_v17 = vpop.f32.mrf.mxu1 }
 0xce4   :  { %v8489_v23 = vpop.f32.mrf.mxu0 }
 0xce5   :  { %v8490_v6 = vadd.f32 %v8489_v23, %v8449_v56  ;;  %v8530_v53 = vpop.f32.mrf.mxu1  ;;  %v8529_v49 = vadd.f32 %v8528_v17, %v8488_v1 }
 0xce6   :  { %v8491_v43 = vpop.f32.mrf.mxu0 }
 0xce7   :  { %v8531_v48 = vadd.f32 %v8530_v53, %v8490_v6  ;;  %v8532_v51 = vpop.f32.mrf.mxu1  ;;  %v8541_v29 = vpack.c.bf16 %v8529_v49, %v8529_v49 }
 0xce8   :  { %v8492_v52 = vpop.f32.mrf.mxu0 }
 0xce9   :  { %v8542_v35 = vpack.c.bf16 %v8531_v48, %v8531_v48  ;;  %v8533_v61 = vpop.f32.mrf.mxu1 }
 0xceb   :  { %8698 = vmatprep.mubr.bf16.mxu1 %v8542_v35 }
 0xcec   :  { %8699 = vmatmul.mubr.bf16.vlgmr.msra.gmra.mxu1 %v8541_v29 }
 0xd22   :  { %v8577_v15 = vpop.f32.mrf.mxu0 }
 0xd23   :  { %v8618_v20 = vpop.f32.mrf.mxu1 }
 0xd24   :  { %v8619_v37 = vadd.f32 %v8618_v20, %v8577_v15  ;;  %v8579_v44 = vpop.f32.mrf.mxu0 }
 0xd25   :  { %v8620_v2 = vpop.f32.mrf.mxu1 }
 0xd26   :  { %v8621_v30 = vadd.f32 %v8620_v2, %v8579_v44  ;;  %v8581_v40 = vpop.f32.mrf.mxu0 }
 0xd27   :  { %v8622_v9 = vpop.f32.mrf.mxu1 }
 0xd28   :  { %v8582_v13 = vpop.f32.mrf.mxu0 }
 0xd29   :  { %v8623_v46 = vpop.f32.mrf.mxu1 }
 0xd62   :  { %v8659_v19 = vpop.f32.mrf.mxu0 }
 0xd63   :  { %v8660_v45 = vadd.f32 %v8659_v19, %v8619_v37 }
 0xd64   :  { %v8661_v12 = vpop.f32.mrf.mxu0 }
 0xd65   :  { %v8662_v25 = vadd.f32 %v8661_v12, %v8621_v30 }
 0xd66   :  { %v8663_v31 = vpop.f32.mrf.mxu0 }
 0xd68   :  { %v8664_v32 = vpop.f32.mrf.mxu0 }
 0xdac   :  { %v8700_v58 = vpop.f32.mrf.mxu1 }
 0xdad   :  { %v8701_v14 = vadd.f32 %v8700_v58, %v8660_v45 }
 0xdae   :  { %v8702_v4 = vpop.f32.mrf.mxu1 }
 0xdaf   :  { %v8703_v54 = vadd.f32 %v8702_v4, %v8662_v25 }
 0xdb0   :  { %v8704_v5 = vpop.f32.mrf.mxu1 }
 0xdb1   :  { %v8709_v27 = vcombine.low %v8701_v14, %v8703_v54 }
 0xdb2   :  { %v8705_v18 = vpop.f32.mrf.mxu1 }
 0xdb3   :  { %v8716_v16 = vrot.slane %v8709_v27, %v10317_v26 }
 0xdb5   :  { %v8718_v28 = vadd.f32 %v8716_v16, %v13188_v60 }
 0xdb7   :  { %v8719_v42 = vadd.f32 %v8718_v28, %v12305_v0 }
 0xdb9   :  { %8720 = vst [vmem:[%s13890_s6] sm:$0xf] %v8719_v42 }
 0xdba   :  { %8725 = vsyncpa [#allocation5], 1 }
 0xdbb   :  { %8726 = vsyncpa [#allocation7], 1 }
 0xdbc   :  { %8727 = vsyncmov [#allocation3] }
 0xdbf   :  { %s8728_s25 = vpop.sfrf %8727 }
 0xdc0   :  { %p9629_p6 = scmp.ne.s32.totalorder %s8728_s25, 0 }
 0xdc2   :  { %8732 = shalt.err (%p9629_p6)  }

</bundles_post_ra>
